<compile_context>
chip_gen: v5e
topology: v5e:2x2
jax: 0.10.0
libtpu: 0.0.40
codegen_flags: <defaults>
</compile_context>

<pallas_src>
import jax
import jax.numpy as jnp
import numpy as np
from jax.experimental import pallas as pl
from jax.experimental.pallas import tpu as pltpu

# ----- small synthetic shapes -----
B = 2            # batch
CIN = 4          # channels per input branch
H = W = 16       # spatial
CF = 512         # trunk output channels per branch (512 + 512 = 1024 -> classifier)

KTAP = 9 * CIN               # im2col contraction width per branch (36)
KCAT = 2 * KTAP              # fused contraction width (72) — NOT padded to 128
OUT_PAD = 128                # lane-padded fused-heads output width

HEAD_CLASSES = {
    "wealth": 5, "water_src": 7, "toilet_type": 6, "roof": 4,
    "cooking_fuel": 5, "drought": 3, "pop_density": 8,
    "livestock_bin": 2, "agriculture_land_bin": 2,
}
TOTAL_CLASSES = sum(HEAD_CLASSES.values())


# ---------------------------------------------------------------------------
# Single fused kernel: conv-as-im2col-matmul (both branches) + ReLU
#                      + avg-pool (f32 sublane reduce) + MLP + 9 fused heads
# ---------------------------------------------------------------------------
def fused_forward_kernel(patches_ref, wcat_ref, bcat_ref,
                         w1_ref, b1_ref, w2_ref, b2_ref, wh_ref, bh_ref,
                         o_ref):
    # patches_ref: (B*H*W, 72) bf16  im2col patches, cols [0:36)=rgb, [36:72)=nir
    # wcat_ref   : (72, 1024)  bf16  block-diagonal conv weights
    #                                (rgb taps -> cols 0:512, nir taps -> 512:1024)
    # bcat_ref   : (1, 1024)   f32   conv biases [rgb | nir]
    # w1/b1, w2/b2             bf16/f32  classifier Linear(1024,512), Linear(512,256)
    # wh/bh                    bf16/f32  9 heads fused + zero-padded to 128 columns
    # o_ref      : (B, 128)    f32   lane-dense padded logits

    # --- both trunks: one im2col matmul (bf16 operands, f32 accumulation) ---
    conv = jnp.dot(patches_ref[...], wcat_ref[...],
                   preferred_element_type=jnp.float32)            # (B*H*W, 1024)
    conv = jnp.maximum(conv + bcat_ref[...], 0.0)                 # bias + ReLU (f32)

    # --- AdaptiveAvgPool2d(1): per-sample f32 mean over the H*W sublane axis ---
    feats = jnp.mean(conv.reshape(B, H * W, 2 * CF), axis=1)      # (B, 1024) f32

    # --- classifier MLP (Dropout layers are identity at inference) ---
    h1 = jnp.dot(feats.astype(jnp.bfloat16), w1_ref[...],
                 preferred_element_type=jnp.float32) + b1_ref[...]
    h1 = jnp.maximum(h1, 0.0)                                     # (B, 512)
    h2 = jnp.dot(h1.astype(jnp.bfloat16), w2_ref[...],
                 preferred_element_type=jnp.float32) + b2_ref[...]
    h2 = jnp.maximum(h2, 0.0)                                     # (B, 256)

    # --- 9 heads fused into one lane-dense (B, 128) store ---
    o_ref[...] = (jnp.dot(h2.astype(jnp.bfloat16), wh_ref[...],
                          preferred_element_type=jnp.float32)
                  + bh_ref[...])                                  # (B, OUT_PAD)


_COST = pl.CostEstimate(
    flops=(2 * (B * H * W * KCAT * 2 * CF        # conv im2col matmul
                + B * 2 * CF * 512               # Linear(1024,512)
                + B * 512 * 256                  # Linear(512,256)
                + B * 256 * OUT_PAD)             # fused heads
           + B * H * W * 2 * CF),                # avg-pool reduce
    transcendentals=0,
    bytes_accessed=(2 * (B * H * W * KCAT        # bf16 operands
                         + KCAT * 2 * CF
                         + 2 * CF * 512
                         + 512 * 256
                         + 256 * OUT_PAD)
                    + 4 * (2 * CF + 512 + 256 + OUT_PAD   # f32 biases
                           + B * OUT_PAD)),               # f32 output
)


def _im2col(x):
    """x: (B, H, W, CIN) -> (B*H*W, 9*CIN) patch matrix (layout plumbing, XLA)."""
    xp = jnp.pad(x, ((0, 0), (1, 1), (1, 1), (0, 0)))
    cols = [xp[:, dy:dy + H, dx:dx + W, :] for dy in range(3) for dx in range(3)]
    return jnp.concatenate(cols, axis=-1).reshape(B * H * W, KTAP)


def prepare_params(params):
    """One-time prep (per param load, NOT per forward): bf16 weights,
    block-diagonal conv weight, fused + lane-padded heads. Biases stay f32."""
    wr = params["wc_rgb"].reshape(KTAP, CF)
    wn = params["wc_nir"].reshape(KTAP, CF)
    zc = jnp.zeros((KTAP, CF), jnp.float32)
    # rgb taps -> output cols [0:512), nir taps -> output cols [512:1024)
    wcat = jnp.concatenate(
        [jnp.concatenate([wr, zc], axis=1),
         jnp.concatenate([zc, wn], axis=1)], axis=0)                     # (72, 1024)
    bcat = jnp.concatenate([params["bc_rgb"], params["bc_nir"]], axis=1)  # (1, 1024)
    wh_pad = jnp.pad(params["wh"], ((0, 0), (0, OUT_PAD - TOTAL_CLASSES)))
    bh_pad = jnp.pad(params["bh"], ((0, 0), (0, OUT_PAD - TOTAL_CLASSES)))
    return {
        "wcat": wcat.astype(jnp.bfloat16),
        "bcat": bcat,
        "w1": params["w1"].astype(jnp.bfloat16), "b1": params["b1"],
        "w2": params["w2"].astype(jnp.bfloat16), "b2": params["b2"],
        "wh": wh_pad.astype(jnp.bfloat16), "bh": bh_pad,
    }


# ---------------------------------------------------------------------------
# Full forward: one pallas_call; wrapper does only layout plumbing
# ---------------------------------------------------------------------------
@jax.jit
def sentinel_resnet_forward(prep, x_rgb, x_nir):
    # im2col both branches in bf16, concat along K (no explicit 128 pad)
    # TODO(synk): fold im2col into the kernel once the real trunk lands; at
    # these sizes the bf16 patches are <5% of kernel traffic.
    patches = jnp.concatenate([_im2col(x_rgb.astype(jnp.bfloat16)),
                               _im2col(x_nir.astype(jnp.bfloat16))],
                              axis=1)                                    # (B*H*W, 72)

    logits_pad = pl.pallas_call(
        fused_forward_kernel,
        out_shape=jax.ShapeDtypeStruct((B, OUT_PAD), jnp.float32),
        in_specs=[pl.BlockSpec(memory_space=pltpu.MemorySpace.VMEM)] * 9,
        out_specs=pl.BlockSpec(memory_space=pltpu.MemorySpace.VMEM),
        cost_estimate=_COST,
    )(patches, prep["wcat"], prep["bcat"],
      prep["w1"], prep["b1"], prep["w2"], prep["b2"], prep["wh"], prep["bh"])

    logits = logits_pad[:, :TOTAL_CLASSES]
    outs, off = [], 0
    for _, n in HEAD_CLASSES.items():
        outs.append(logits[:, off:off + n])
        off += n
    return tuple(outs)   # (wealth, water_src, toilet_type, roof, cooking_fuel,
                         #  drought, pop_density, livestock_bin, agriculture_land_bin)


# ---------------------------------------------------------------------------
# Pure-JAX f32 reference for correctness checking
# ---------------------------------------------------------------------------
def ref_forward(params, x_rgb, x_nir):
    def branch(x, w, b):
        y = jax.lax.conv_general_dilated(
            x, w, window_strides=(1, 1), padding="SAME",
            dimension_numbers=("NHWC", "HWIO", "NHWC"))
        y = jnp.maximum(y + b.reshape(1, 1, 1, CF), 0.0)
        return jnp.mean(y, axis=(1, 2))
    rgb = branch(x_rgb, params["wc_rgb"], params["bc_rgb"])
    nir = branch(x_nir, params["wc_nir"], params["bc_nir"])
    f = jnp.concatenate([rgb, nir], axis=1)
    h1 = jnp.maximum(f @ params["w1"] + params["b1"], 0.0)
    h2 = jnp.maximum(h1 @ params["w2"] + params["b2"], 0.0)
    logits = h2 @ params["wh"] + params["bh"]
    outs, off = [], 0
    for _, n in HEAD_CLASSES.items():
        outs.append(logits[:, off:off + n])
        off += n
    return tuple(outs)


if __name__ == "__main__":
    key = jax.random.PRNGKey(0)
    ks = jax.random.split(key, 12)
    params = {
        "wc_rgb": jax.random.normal(ks[0], (3, 3, CIN, CF), jnp.float32) * 0.05,
        "bc_rgb": jax.random.normal(ks[1], (1, CF), jnp.float32) * 0.05,
        "wc_nir": jax.random.normal(ks[2], (3, 3, CIN, CF), jnp.float32) * 0.05,
        "bc_nir": jax.random.normal(ks[3], (1, CF), jnp.float32) * 0.05,
        "w1": jax.random.normal(ks[4], (2 * CF, 512), jnp.float32) * 0.03,   # Linear(1024,512)
        "b1": jax.random.normal(ks[5], (1, 512), jnp.float32) * 0.03,
        "w2": jax.random.normal(ks[6], (512, 256), jnp.float32) * 0.03,      # Linear(512,256)
        "b2": jax.random.normal(ks[7], (1, 256), jnp.float32) * 0.03,
        "wh": jax.random.normal(ks[8], (256, TOTAL_CLASSES), jnp.float32) * 0.03,  # 9 heads fused
        "bh": jax.random.normal(ks[9], (1, TOTAL_CLASSES), jnp.float32) * 0.03,
    }
    x_rgb = jax.random.normal(ks[10], (B, H, W, CIN), jnp.float32)
    x_nir = jax.random.normal(ks[11], (B, H, W, CIN), jnp.float32)

    # one-time param prep (bf16 weights, fused/padded layouts) — NOT per call
    prep = jax.block_until_ready(prepare_params(params))

    outs = sentinel_resnet_forward(prep, x_rgb, x_nir)
    outs = jax.block_until_ready(outs)

    refs = ref_forward(params, x_rgb, x_nir)
    # bf16 MXU operands (f32 accumulation) vs f32 reference -> slightly looser tol
    for o, r in zip(outs, refs):
        np.testing.assert_allclose(np.asarray(o), np.asarray(r), rtol=2e-2, atol=3e-3)

    print("KERNEL_OK")
</pallas_src>

<mosaic_0001>
module attributes {stable_mosaic.version = 11 : i64} {
  func.func @fused_forward_kernel(%arg0: memref<512x72xbf16, #tpu.memory_space<vmem>>, %arg1: memref<72x1024xbf16, #tpu.memory_space<vmem>>, %arg2: memref<1x1024xf32, #tpu.memory_space<vmem>>, %arg3: memref<1024x512xbf16, #tpu.memory_space<vmem>>, %arg4: memref<1x512xf32, #tpu.memory_space<vmem>>, %arg5: memref<512x256xbf16, #tpu.memory_space<vmem>>, %arg6: memref<1x256xf32, #tpu.memory_space<vmem>>, %arg7: memref<256x128xbf16, #tpu.memory_space<vmem>>, %arg8: memref<1x128xf32, #tpu.memory_space<vmem>>, %arg9: memref<2x128xf32, #tpu.memory_space<vmem>>) attributes {dimension_semantics = [], scalar_prefetch = 0 : i64, scratch_operands = 0 : i64, tpu.core_type = #tpu.core_type<tc>} {
    %c0 = arith.constant 0 : index
    %c0_0 = arith.constant 0 : index
    %0 = vector.load %arg0[%c0, %c0_0] : memref<512x72xbf16, #tpu.memory_space<vmem>>, vector<512x72xbf16>
    %c0_1 = arith.constant 0 : index
    %c0_2 = arith.constant 0 : index
    %1 = vector.load %arg1[%c0_1, %c0_2] : memref<72x1024xbf16, #tpu.memory_space<vmem>>, vector<72x1024xbf16>
    %cst = arith.constant dense<0.000000e+00> : vector<512x1024xf32>
    %2 = tpu.matmul %0, %1, %cst {dimension_numbers = #tpu.dot_dimension_numbers<[1], [0], [0], [1], [0, 0, 1, 1], [], []>} : vector<512x72xbf16>, vector<72x1024xbf16>, vector<512x1024xf32> -> vector<512x1024xf32>
    %c0_3 = arith.constant 0 : index
    %c0_4 = arith.constant 0 : index
    %3 = vector.load %arg2[%c0_3, %c0_4] : memref<1x1024xf32, #tpu.memory_space<vmem>>, vector<1x1024xf32>
    %4 = vector.broadcast %3 : vector<1x1024xf32> to vector<512x1024xf32>
    %5 = arith.addf %2, %4 : vector<512x1024xf32>
    %cst_5 = arith.constant 0.000000e+00 : f32
    %6 = vector.broadcast %cst_5 : f32 to vector<512x1024xf32>
    %7 = arith.maximumf %5, %6 : vector<512x1024xf32>
    %8 = vector.shape_cast %7 : vector<512x1024xf32> to vector<2x256x1024xf32>
    %cst_6 = arith.constant dense<0.000000e+00> : vector<2x1024xf32>
    %9 = vector.multi_reduction <add>, %8, %cst_6 [1] : vector<2x256x1024xf32> to vector<2x1024xf32>
    %cst_7 = arith.constant 2.560000e+02 : f32
    %10 = vector.broadcast %cst_7 : f32 to vector<2x1024xf32>
    %11 = arith.divf %9, %10 : vector<2x1024xf32>
    %12 = arith.truncf %11 : vector<2x1024xf32> to vector<2x1024xbf16>
    %c0_8 = arith.constant 0 : index
    %c0_9 = arith.constant 0 : index
    %13 = vector.load %arg3[%c0_8, %c0_9] : memref<1024x512xbf16, #tpu.memory_space<vmem>>, vector<1024x512xbf16>
    %cst_10 = arith.constant dense<0.000000e+00> : vector<2x512xf32>
    %14 = tpu.matmul %12, %13, %cst_10 {dimension_numbers = #tpu.dot_dimension_numbers<[1], [0], [0], [1], [0, 0, 1, 1], [], []>} : vector<2x1024xbf16>, vector<1024x512xbf16>, vector<2x512xf32> -> vector<2x512xf32>
    %c0_11 = arith.constant 0 : index
    %c0_12 = arith.constant 0 : index
    %15 = vector.load %arg4[%c0_11, %c0_12] : memref<1x512xf32, #tpu.memory_space<vmem>>, vector<1x512xf32>
    %16 = vector.broadcast %15 : vector<1x512xf32> to vector<2x512xf32>
    %17 = arith.addf %14, %16 : vector<2x512xf32>
    %cst_13 = arith.constant 0.000000e+00 : f32
    %18 = vector.broadcast %cst_13 : f32 to vector<2x512xf32>
    %19 = arith.maximumf %17, %18 : vector<2x512xf32>
    %20 = arith.truncf %19 : vector<2x512xf32> to vector<2x512xbf16>
    %c0_14 = arith.constant 0 : index
    %c0_15 = arith.constant 0 : index
    %21 = vector.load %arg5[%c0_14, %c0_15] : memref<512x256xbf16, #tpu.memory_space<vmem>>, vector<512x256xbf16>
    %cst_16 = arith.constant dense<0.000000e+00> : vector<2x256xf32>
    %22 = tpu.matmul %20, %21, %cst_16 {dimension_numbers = #tpu.dot_dimension_numbers<[1], [0], [0], [1], [0, 0, 1, 1], [], []>} : vector<2x512xbf16>, vector<512x256xbf16>, vector<2x256xf32> -> vector<2x256xf32>
    %c0_17 = arith.constant 0 : index
    %c0_18 = arith.constant 0 : index
    %23 = vector.load %arg6[%c0_17, %c0_18] : memref<1x256xf32, #tpu.memory_space<vmem>>, vector<1x256xf32>
    %24 = vector.broadcast %23 : vector<1x256xf32> to vector<2x256xf32>
    %25 = arith.addf %22, %24 : vector<2x256xf32>
    %cst_19 = arith.constant 0.000000e+00 : f32
    %26 = vector.broadcast %cst_19 : f32 to vector<2x256xf32>
    %27 = arith.maximumf %25, %26 : vector<2x256xf32>
    %28 = arith.truncf %27 : vector<2x256xf32> to vector<2x256xbf16>
    %c0_20 = arith.constant 0 : index
    %c0_21 = arith.constant 0 : index
    %29 = vector.load %arg7[%c0_20, %c0_21] : memref<256x128xbf16, #tpu.memory_space<vmem>>, vector<256x128xbf16>
    %cst_22 = arith.constant dense<0.000000e+00> : vector<2x128xf32>
    %30 = tpu.matmul %28, %29, %cst_22 {dimension_numbers = #tpu.dot_dimension_numbers<[1], [0], [0], [1], [0, 0, 1, 1], [], []>} : vector<2x256xbf16>, vector<256x128xbf16>, vector<2x128xf32> -> vector<2x128xf32>
    %c0_23 = arith.constant 0 : index
    %c0_24 = arith.constant 0 : index
    %31 = vector.load %arg8[%c0_23, %c0_24] : memref<1x128xf32, #tpu.memory_space<vmem>>, vector<1x128xf32>
    %32 = vector.broadcast %31 : vector<1x128xf32> to vector<2x128xf32>
    %33 = arith.addf %30, %32 : vector<2x128xf32>
    %c0_25 = arith.constant 0 : index
    %c0_26 = arith.constant 0 : index
    %34 = vector.load %arg9[%c0_25, %c0_26] : memref<2x128xf32, #tpu.memory_space<vmem>>, vector<2x128xf32>
    tpu.vector_store %arg9[%c0_25, %c0_26], %33 {strides = array<i32>} : memref<2x128xf32, #tpu.memory_space<vmem>>, vector<2x128xf32>,
    return
  }
}

</mosaic_0001>

<bundles_post_ra>
// kernel: sentinel_resnet_forward.1
= control target key start
LH: loop header
LB: loop body
LE: loop exit
PB: predicated region body
PF: predicated region fallthrough
CT: control target
= control target key end

     0   :  { %vm588_vm0 = vcmask 1043456   ;;  %vm491_vm1 = vcmask 588800   ;;  %vm3406_vm3 = vcmask 1041409   ;;  %s11687_s1 = inlined_call_operand.vmem [shape: bf16[72,1024], index: 1, kind: input, shape index: {}]   ;;  %s11688_s0 = inlined_call_operand.vmem [shape: bf16[512,72], index: 0, kind: input, shape index: {}]   ;;  %s11689_s2 = inlined_call_operand.vmem [shape: f32[1,1024], index: 2, kind: input, shape index: {}]   ;;  %s11690_s3 = inlined_call_operand.vmem [shape: bf16[1024,512], index: 3, kind: input, shape index: {}]   ;;  %s11691_s4 = inlined_call_operand.vmem [shape: f32[1,512], index: 4, kind: input, shape index: {}]   ;;  %s11692_s5 = inlined_call_operand.vmem [shape: bf16[512,256], index: 5, kind: input, shape index: {}]   ;;  %s11693_s6 = inlined_call_operand.vmem [shape: f32[1,256], index: 6, kind: input, shape index: {}]   ;;  %s11694_s8 = inlined_call_operand.vmem [shape: f32[1,128], index: 8, kind: input, shape index: {}]   ;;  %s11695_s7 = inlined_call_operand.vmem [shape: bf16[256,128], index: 7, kind: input, shape index: {}]   ;;  %s11696_s9 = inlined_call_operand.vmem [shape: f32[2,128], index: 9, kind: output, shape index: {}]  }
   0x1   :  { %v129_v0 = vld [vmem:[%s11687_s1 + $0x100] sm:$0xff]  ;;  %v130_v1 = vld [vmem:[%s11687_s1 + $0x108] sm:$0xff] }
   0x2   :  { %v411_v2 = vunpack.c.l.b16 %v129_v0  ;;  %v412_v3 = vunpack.c.h.b16 %v129_v0  ;;  %v413_v4 = vunpack.c.l.b16 %v130_v1  ;;  %v414_v5 = vunpack.c.h.b16 %v130_v1  ;;  %v6022_v6 = vld [vmem:[%s11687_s1 + $0xc0] sm:$0xf]  ;;  %v7708_v12 = vld [vmem:[%s11687_s1 + $0xc4] sm:$0xf]  ;;  %v6030_v14 = vld [vmem:[%s11687_s1 + $0xc8] sm:$0xf] }
   0x3   :  { %v7712_v7 = vld [vmem:[%s11687_s1 + $0xdc] sm:$0xf0]  ;;  %v6024_v13 = vld [vmem:[%s11687_s1 + $0xe0] sm:$0xf0]  ;;  %v7713_v15 = vld [vmem:[%s11687_s1 + $0xe4] sm:$0xf0] }
   0x4   :  { %v451_v8 = vpack.c.b16 %v411_v2, %v411_v2  ;;  %v452_v9 = vpack.c.b16 %v412_v3, %v412_v3  ;;  %v453_v10 = vpack.c.b16 %v413_v4, %v413_v4  ;;  %v454_v11 = vpack.c.b16 %v414_v5, %v414_v5  ;;  %v7709_v16 = vld [vmem:[%s11687_s1 + $0xcc] sm:$0xf]  ;;  %v5990_v24 = vld [vmem:[%s11687_s1 + $0x80] sm:$0xf]  ;;  %v7700_v28 = vld [vmem:[%s11687_s1 + $0x84] sm:$0xf] }
   0x5   :  { %v6032_v17 = vld [vmem:[%s11687_s1 + $0xe8] sm:$0xf0]  ;;  %v6023_v22 = vor.u32 %v7712_v7, %v6022_v6  ;;  %v6027_v23 = vor.u32 %v7708_v12, %v6024_v13  ;;  %v7704_v25 = vld [vmem:[%s11687_s1 + $0x9c] sm:$0xf0]  ;;  %v6031_v26 = vor.u32 %v7713_v15, %v6030_v14  ;;  %v5992_v29 = vld [vmem:[%s11687_s1 + $0xa0] sm:$0xf0] }
   0x6   :  { %v590_v18 = vsel %vm588_vm0, %v451_v8, 0  ;;  %v593_v19 = vsel %vm588_vm0, %v452_v9, 0  ;;  %v596_v20 = vsel %vm588_vm0, %v453_v10, 0  ;;  %v599_v21 = vsel %vm588_vm0, %v454_v11, 0  ;;  %v5998_v30 = vld [vmem:[%s11687_s1 + $0x88] sm:$0xf] }
   0x7   :  { %616 = vmatpush.bf16.msra.mxu0 %v590_v18  ;;  %785 = vmatpush.bf16.msra.mxu1 %v593_v19  ;;  %v6035_v27 = vor.u32 %v7709_v16, %v6032_v17  ;;  %v7705_v31 = vld [vmem:[%s11687_s1 + $0xa4] sm:$0xf0]  ;;  %v7701_v32 = vld [vmem:[%s11687_s1 + $0x8c] sm:$0xf]  ;;  %v5991_v34 = vor.u32 %v7704_v25, %v5990_v24  ;;  %v5995_v35 = vor.u32 %v7700_v28, %v5992_v29  ;;  %v5958_v36 = vld [vmem:[%s11687_s1 + $0x40] sm:$0xf] }
   0x8   :  { %954 = vmatpush.bf16.msra.mxu2 %v596_v20  ;;  %1123 = vmatpush.bf16.msra.mxu3 %v599_v21  ;;  %v6000_v33 = vld [vmem:[%s11687_s1 + $0xa8] sm:$0xf0]  ;;  %v7696_v37 = vld [vmem:[%s11687_s1 + $0x5c] sm:$0xf0]  ;;  %v5999_v38 = vor.u32 %v7705_v31, %v5998_v30  ;;  %v7692_v40 = vld [vmem:[%s11687_s1 + $0x44] sm:$0xf] }
   0x9   :  { %v6003_v39 = vor.u32 %v7701_v32, %v6000_v33  ;;  %v5960_v41 = vld [vmem:[%s11687_s1 + $0x60] sm:$0xf0]  ;;  %v5966_v42 = vld [vmem:[%s11687_s1 + $0x48] sm:$0xf]  ;;  %v7693_v44 = vld [vmem:[%s11687_s1 + $0x4c] sm:$0xf]  ;;  %v5959_v46 = vor.u32 %v7696_v37, %v5958_v36 }
   0xa   :  { %v7697_v43 = vld [vmem:[%s11687_s1 + $0x64] sm:$0xf0]  ;;  %v5968_v45 = vld [vmem:[%s11687_s1 + $0x68] sm:$0xf0]  ;;  %v5963_v47 = vor.u32 %v7692_v40, %v5960_v41  ;;  %v5926_v48 = vld [vmem:[%s11687_s1] sm:$0xf] }
   0xb   :  { %617 = vmatpush.bf16.msra.mxu0 %v6023_v22  ;;  %786 = vmatpush.bf16.msra.mxu1 %v6027_v23  ;;  %v7688_v49 = vld [vmem:[%s11687_s1 + $0x1c] sm:$0xf0]  ;;  %v5967_v50 = vor.u32 %v7697_v43, %v5966_v42  ;;  %v5971_v51 = vor.u32 %v7693_v44, %v5968_v45  ;;  %v7684_v52 = vld [vmem:[%s11687_s1 + $0x4] sm:$0xf]  ;;  %v5934_v54 = vld [vmem:[%s11687_s1 + $0x8] sm:$0xf] }
   0xc   :  { %955 = vmatpush.bf16.msra.mxu2 %v6031_v26  ;;  %1124 = vmatpush.bf16.msra.mxu3 %v6035_v27  ;;  %v5928_v53 = vld [vmem:[%s11687_s1 + $0x20] sm:$0xf0]  ;;  %v7689_v55 = vld [vmem:[%s11687_s1 + $0x24] sm:$0xf0]  ;;  %v7685_v56 = vld [vmem:[%s11687_s1 + $0xc] sm:$0xf]  ;;  %v5927_v58 = vor.u32 %v7688_v49, %v5926_v48 }
   0xd   :  { %v5936_v57 = vld [vmem:[%s11687_s1 + $0x28] sm:$0xf0]  ;;  %v5931_v59 = vor.u32 %v7684_v52, %v5928_v53  ;;  %v5935_v60 = vor.u32 %v7689_v55, %v5934_v54  ;;  %v7652_v62 = vld [vmem:[%s11688_s0] sm:$0xff]  ;;  %v132_v0 = vld [vmem:[%s11687_s1 + $0x118] sm:$0xff] }
   0xe   :  { %v5939_v61 = vor.u32 %v7685_v56, %v5936_v57  ;;  %v7653_v63 = vld [vmem:[%s11688_s0 + $0x8] sm:$0xff]  ;;  %v131_v1 = vld [vmem:[%s11687_s1 + $0x110] sm:$0xff]  ;;  %v417_v2 = vunpack.c.l.b16 %v132_v0  ;;  %v418_v3 = vunpack.c.h.b16 %v132_v0  ;;  %v7655_v15 = vld [vmem:[%s11688_s0 + $0x18] sm:$0xff] }
   0xf   :  { %618 = vmatpush.bf16.msra.mxu0 %v5991_v34  ;;  %787 = vmatpush.bf16.msra.mxu1 %v5995_v35  ;;  %v415_v4 = vunpack.c.l.b16 %v131_v1  ;;  %v416_v5 = vunpack.c.h.b16 %v131_v1  ;;  %v7654_v14 = vld [vmem:[%s11688_s0 + $0x10] sm:$0xff]  ;;  %v7656_v16 = vld [vmem:[%s11688_s0 + $0x20] sm:$0xff]  ;;  %v7657_v17 = vld [vmem:[%s11688_s0 + $0x28] sm:$0xff] }
  0x10   :  { %956 = vmatpush.bf16.msra.mxu2 %v5999_v38  ;;  %1125 = vmatpush.bf16.msra.mxu3 %v6003_v39  ;;  %v457_v6 = vpack.c.b16 %v417_v2, %v417_v2  ;;  %v458_v7 = vpack.c.b16 %v418_v3, %v418_v3  ;;  %v7658_v18 = vld [vmem:[%s11688_s0 + $0x30] sm:$0xff]  ;;  %v7659_v19 = vld [vmem:[%s11688_s0 + $0x38] sm:$0xff]  ;;  %v7660_v23 = vld [vmem:[%s11688_s0 + $0x40] sm:$0xff] }
  0x11   :  { %v455_v8 = vpack.c.b16 %v415_v4, %v415_v4  ;;  %v456_v9 = vpack.c.b16 %v416_v5, %v416_v5  ;;  %v6046_v20 = vld [vmem:[%s11687_s1 + $0xd8] sm:$0xf]  ;;  %v133_v24 = vld [vmem:[%s11689_s2] sm:$0xff]  ;;  %v7711_v29 = vld [vmem:[%s11687_s1 + $0xdc] sm:$0xf] }
  0x12   :  { %v608_v10 = vsel %vm588_vm0, %v457_v6, 0  ;;  %v611_v11 = vsel %vm588_vm0, %v458_v7, 0  ;;  %v7715_v21 = vld [vmem:[%s11687_s1 + $0xf4] sm:$0xf0]  ;;  %v8325_v27 = vperm.slane %v133_v24, 0  ;;  %v8327_v28 = vperm.slane %v133_v24, 1 }
  0x13   :  { %619 = vmatpush.bf16.msra.mxu0 %v5959_v46  ;;  %788 = vmatpush.bf16.msra.mxu1 %v5963_v47  ;;  %v602_v12 = vsel %vm588_vm0, %v455_v8, 0  ;;  %v605_v13 = vsel %vm588_vm0, %v456_v9, 0  ;;  %v6047_v22 = vor.u32 %v7715_v21, %v6046_v20  ;;  %v6048_v30 = vld [vmem:[%s11687_s1 + $0xf8] sm:$0xf0]  ;;  %v6038_v34 = vld [vmem:[%s11687_s1 + $0xd0] sm:$0xf] }
  0x14   :  { %957 = vmatpush.bf16.msra.mxu2 %v5967_v50  ;;  %1126 = vmatpush.bf16.msra.mxu3 %v5971_v51  ;;  %v6051_v33 = vor.u32 %v7711_v29, %v6048_v30  ;;  %v7714_v35 = vld [vmem:[%s11687_s1 + $0xec] sm:$0xf0]  ;;  %v8349_v45 = vperm.slane %v133_v24, 2  ;;  %v8351_v46 = vperm.slane %v133_v24, 3  ;;  %v7710_v49 = vld [vmem:[%s11687_s1 + $0xd4] sm:$0xf] }
  0x15   :  { %v6039_v36 = vor.u32 %v7714_v35, %v6038_v34  ;;  %v6040_v50 = vld [vmem:[%s11687_s1 + $0xf0] sm:$0xf0] }
  0x16   :  { %v6043_v53 = vor.u32 %v7710_v49, %v6040_v50 }
  0x17   :  { %620 = vmatpush.bf16.msra.mxu0 %v5927_v58  ;;  %789 = vmatpush.bf16.msra.mxu1 %v5931_v59  ;;  %v7661_v58 = vld [vmem:[%s11688_s0 + $0x48] sm:$0xff] }
  0x18   :  { %958 = vmatpush.bf16.msra.mxu2 %v5935_v60  ;;  %1127 = vmatpush.bf16.msra.mxu3 %v5939_v61 }
  0x1a   :  { %6052 = vmatmul.msk.bf16.vlgmr.msra.gmra.mxu0 %vm491_vm1, %v7652_v62  ;;  %6084 = vmatmul.msk.bf16.vlgmr.msra.gmra.mxu1 %vm491_vm1, %v7652_v62 }
  0x1b   :  { %6116 = vmatmul.msk.bf16.vlgmr.msra.gmra.mxu2 %vm491_vm1, %v7652_v62  ;;  %6148 = vmatmul.msk.bf16.vlgmr.msra.gmra.mxu3 %vm491_vm1, %v7652_v62 }
  0x1c   :  { %1630 = vmatpush.bf16.msrb.mxu2 %v608_v10  ;;  %1799 = vmatpush.bf16.msrb.mxu3 %v611_v11 }
  0x1d   :  { %1292 = vmatpush.bf16.msrb.mxu0 %v602_v12  ;;  %1461 = vmatpush.bf16.msrb.mxu1 %v605_v13 }
  0x20   :  { %1631 = vmatpush.bf16.msrb.mxu2 %v6047_v22  ;;  %1800 = vmatpush.bf16.msrb.mxu3 %v6051_v33 }
  0x21   :  { %1293 = vmatpush.bf16.msrb.mxu0 %v6039_v36  ;;  %1462 = vmatpush.bf16.msrb.mxu1 %v6043_v53 }
  0x2a   :  { %6053 = vmatmul.msk.bf16.gmra.mxu0 %vm491_vm1, %v7653_v63  ;;  %6085 = vmatmul.msk.bf16.gmra.mxu1 %vm491_vm1, %v7653_v63 }
  0x2b   :  { %6117 = vmatmul.msk.bf16.gmra.mxu2 %vm491_vm1, %v7653_v63  ;;  %6149 = vmatmul.msk.bf16.gmra.mxu3 %vm491_vm1, %v7653_v63 }
  0x3a   :  { %6054 = vmatmul.msk.bf16.gmra.mxu0 %vm491_vm1, %v7654_v14  ;;  %6086 = vmatmul.msk.bf16.gmra.mxu1 %vm491_vm1, %v7654_v14 }
  0x3b   :  { %6118 = vmatmul.msk.bf16.gmra.mxu2 %vm491_vm1, %v7654_v14  ;;  %6150 = vmatmul.msk.bf16.gmra.mxu3 %vm491_vm1, %v7654_v14 }
  0x4a   :  { %6055 = vmatmul.msk.bf16.gmra.mxu0 %vm491_vm1, %v7655_v15  ;;  %6087 = vmatmul.msk.bf16.gmra.mxu1 %vm491_vm1, %v7655_v15 }
  0x4b   :  { %6119 = vmatmul.msk.bf16.gmra.mxu2 %vm491_vm1, %v7655_v15  ;;  %6151 = vmatmul.msk.bf16.gmra.mxu3 %vm491_vm1, %v7655_v15 }
  0x5a   :  { %6056 = vmatmul.msk.bf16.gmra.mxu0 %vm491_vm1, %v7656_v16  ;;  %6088 = vmatmul.msk.bf16.gmra.mxu1 %vm491_vm1, %v7656_v16 }
  0x5b   :  { %6120 = vmatmul.msk.bf16.gmra.mxu2 %vm491_vm1, %v7656_v16  ;;  %6152 = vmatmul.msk.bf16.gmra.mxu3 %vm491_vm1, %v7656_v16 }
  0x6a   :  { %6057 = vmatmul.msk.bf16.gmra.mxu0 %vm491_vm1, %v7657_v17  ;;  %6089 = vmatmul.msk.bf16.gmra.mxu1 %vm491_vm1, %v7657_v17 }
  0x6b   :  { %6121 = vmatmul.msk.bf16.gmra.mxu2 %vm491_vm1, %v7657_v17  ;;  %6153 = vmatmul.msk.bf16.gmra.mxu3 %vm491_vm1, %v7657_v17 }
  0x7a   :  { %6058 = vmatmul.msk.bf16.gmra.mxu0 %vm491_vm1, %v7658_v18  ;;  %6090 = vmatmul.msk.bf16.gmra.mxu1 %vm491_vm1, %v7658_v18 }
  0x7b   :  { %6122 = vmatmul.msk.bf16.gmra.mxu2 %vm491_vm1, %v7658_v18  ;;  %6154 = vmatmul.msk.bf16.gmra.mxu3 %vm491_vm1, %v7658_v18 }
  0x8a   :  { %6059 = vmatmul.msk.bf16.gmra.mxu0 %vm491_vm1, %v7659_v19  ;;  %6091 = vmatmul.msk.bf16.gmra.mxu1 %vm491_vm1, %v7659_v19 }
  0x8b   :  { %6123 = vmatmul.msk.bf16.gmra.mxu2 %vm491_vm1, %v7659_v19  ;;  %6155 = vmatmul.msk.bf16.gmra.mxu3 %vm491_vm1, %v7659_v19 }
  0x97   :  { %v622_v25 = vpop.f32.mrf.mxu0  ;;  %v791_v26 = vpop.f32.mrf.mxu1 }
  0x98   :  { %v623_v31 = vadd.f32 %v622_v25, %v8325_v27  ;;  %v792_v32 = vadd.f32 %v791_v26, %v8327_v28 }
  0x9a   :  { %6060 = vmatmul.msk.bf16.gmra.mxu0 %vm491_vm1, %v7660_v23  ;;  %6092 = vmatmul.msk.bf16.gmra.mxu1 %vm491_vm1, %v7660_v23  ;;  %v1965_v41 = vmax.f32 %v623_v31, 0.0  ;;  %v1966_v42 = vmax.f32 %v792_v32, 0.0  ;;  %v7662_v31 = vld [vmem:[%s11688_s0 + $0x50] sm:$0xff] }
  0x9b   :  { %6124 = vmatmul.msk.bf16.gmra.mxu2 %vm491_vm1, %v7660_v23  ;;  %6156 = vmatmul.msk.bf16.gmra.mxu3 %vm491_vm1, %v7660_v23 }
  0x9e   :  { %v960_v37 = vpop.f32.mrf.mxu2  ;;  %v1129_v38 = vpop.f32.mrf.mxu3 }
  0x9f   :  { %v624_v39 = vpop.f32.mrf.mxu0  ;;  %v793_v40 = vpop.f32.mrf.mxu1  ;;  %v961_v54 = vadd.f32 %v960_v37, %v8349_v45  ;;  %v1130_v55 = vadd.f32 %v1129_v38, %v8351_v46 }
  0xa0   :  { %v625_v43 = vadd.f32 %v624_v39, %v8325_v27  ;;  %v794_v44 = vadd.f32 %v793_v40, %v8327_v28 }
  0xa1   :  { %v1967_v1 = vmax.f32 %v961_v54, 0.0  ;;  %v1968_v2 = vmax.f32 %v1130_v55, 0.0 }
  0xa2   :  { %v1973_v47 = vmax.f32 %v625_v43, 0.0  ;;  %v1974_v48 = vmax.f32 %v794_v44, 0.0 }
  0xa4   :  { %v2477_v51 = vadd.f32 %v1973_v47, %v1965_v41  ;;  %v2514_v52 = vadd.f32 %v1974_v48, %v1966_v42 }
  0xa6   :  { %v962_v56 = vpop.f32.mrf.mxu2  ;;  %v1131_v57 = vpop.f32.mrf.mxu3 }
  0xa7   :  { %v963_v59 = vadd.f32 %v962_v56, %v8349_v45  ;;  %v1132_v60 = vadd.f32 %v1131_v57, %v8351_v46  ;;  %v627_v61 = vpop.f32.mrf.mxu0  ;;  %v796_v62 = vpop.f32.mrf.mxu1 }
  0xa8   :  { %v628_v63 = vadd.f32 %v627_v61, %v8325_v27  ;;  %v797_v0 = vadd.f32 %v796_v62, %v8327_v28 }
  0xa9   :  { %v1975_v3 = vmax.f32 %v963_v59, 0.0  ;;  %v1976_v4 = vmax.f32 %v1132_v60, 0.0 }
  0xaa   :  { %v1981_v5 = vmax.f32 %v628_v63, 0.0  ;;  %v1982_v6 = vmax.f32 %v797_v0, 0.0  ;;  %6061 = vmatmul.msk.bf16.gmra.mxu0 %vm491_vm1, %v7661_v58  ;;  %6093 = vmatmul.msk.bf16.gmra.mxu1 %vm491_vm1, %v7661_v58 }
  0xab   :  { %v2551_v7 = vadd.f32 %v1975_v3, %v1967_v1  ;;  %v2588_v8 = vadd.f32 %v1976_v4, %v1968_v2  ;;  %6125 = vmatmul.msk.bf16.gmra.mxu2 %vm491_vm1, %v7661_v58  ;;  %6157 = vmatmul.msk.bf16.gmra.mxu3 %vm491_vm1, %v7661_v58  ;;  %v7663_v2 = vld [vmem:[%s11688_s0 + $0x58] sm:$0xff] }
  0xac   :  { %v2478_v9 = vadd.f32 %v2477_v51, %v1981_v5  ;;  %v2515_v10 = vadd.f32 %v2514_v52, %v1982_v6 }
  0xae   :  { %v965_v11 = vpop.f32.mrf.mxu2  ;;  %v1134_v12 = vpop.f32.mrf.mxu3 }
  0xaf   :  { %v966_v13 = vadd.f32 %v965_v11, %v8349_v45  ;;  %v1135_v14 = vadd.f32 %v1134_v12, %v8351_v46  ;;  %v629_v15 = vpop.f32.mrf.mxu0  ;;  %v798_v16 = vpop.f32.mrf.mxu1 }
  0xb0   :  { %v630_v17 = vadd.f32 %v629_v15, %v8325_v27  ;;  %v799_v18 = vadd.f32 %v798_v16, %v8327_v28 }
  0xb1   :  { %v1983_v19 = vmax.f32 %v966_v13, 0.0  ;;  %v1984_v20 = vmax.f32 %v1135_v14, 0.0 }
  0xb2   :  { %v1989_v21 = vmax.f32 %v630_v17, 0.0  ;;  %v1990_v22 = vmax.f32 %v799_v18, 0.0 }
  0xb3   :  { %v2552_v23 = vadd.f32 %v2551_v7, %v1983_v19  ;;  %v2589_v24 = vadd.f32 %v2588_v8, %v1984_v20 }
  0xb4   :  { %v2479_v25 = vadd.f32 %v2478_v9, %v1989_v21  ;;  %v2516_v26 = vadd.f32 %v2515_v10, %v1990_v22 }
  0xb6   :  { %v967_v29 = vpop.f32.mrf.mxu2  ;;  %v1136_v30 = vpop.f32.mrf.mxu3 }
  0xb7   :  { %v968_v32 = vadd.f32 %v967_v29, %v8349_v45  ;;  %v1137_v33 = vadd.f32 %v1136_v30, %v8351_v46  ;;  %v632_v34 = vpop.f32.mrf.mxu0  ;;  %v801_v35 = vpop.f32.mrf.mxu1 }
  0xb8   :  { %v633_v36 = vadd.f32 %v632_v34, %v8325_v27  ;;  %v802_v37 = vadd.f32 %v801_v35, %v8327_v28 }
  0xb9   :  { %v1991_v38 = vmax.f32 %v968_v32, 0.0  ;;  %v1992_v39 = vmax.f32 %v1137_v33, 0.0 }
  0xba   :  { %v1997_v40 = vmax.f32 %v633_v36, 0.0  ;;  %v1998_v41 = vmax.f32 %v802_v37, 0.0  ;;  %6062 = vmatmul.msk.bf16.gmra.mxu0 %vm491_vm1, %v7662_v31  ;;  %6094 = vmatmul.msk.bf16.gmra.mxu1 %vm491_vm1, %v7662_v31  ;;  %v7664_v37 = vld [vmem:[%s11688_s0 + $0x60] sm:$0xff] }
  0xbb   :  { %v2553_v42 = vadd.f32 %v2552_v23, %v1991_v38  ;;  %v2590_v43 = vadd.f32 %v2589_v24, %v1992_v39  ;;  %6126 = vmatmul.msk.bf16.gmra.mxu2 %vm491_vm1, %v7662_v31  ;;  %6158 = vmatmul.msk.bf16.gmra.mxu3 %vm491_vm1, %v7662_v31 }
  0xbc   :  { %v2480_v44 = vadd.f32 %v2479_v25, %v1997_v40  ;;  %v2517_v47 = vadd.f32 %v2516_v26, %v1998_v41 }
  0xbe   :  { %v970_v48 = vpop.f32.mrf.mxu2  ;;  %v1139_v49 = vpop.f32.mrf.mxu3 }
  0xbf   :  { %v971_v50 = vadd.f32 %v970_v48, %v8349_v45  ;;  %v1140_v51 = vadd.f32 %v1139_v49, %v8351_v46  ;;  %v634_v52 = vpop.f32.mrf.mxu0  ;;  %v803_v53 = vpop.f32.mrf.mxu1 }
  0xc0   :  { %v635_v54 = vadd.f32 %v634_v52, %v8325_v27  ;;  %v804_v55 = vadd.f32 %v803_v53, %v8327_v28 }
  0xc1   :  { %v1999_v56 = vmax.f32 %v971_v50, 0.0  ;;  %v2000_v57 = vmax.f32 %v1140_v51, 0.0 }
  0xc2   :  { %v2005_v58 = vmax.f32 %v635_v54, 0.0  ;;  %v2006_v59 = vmax.f32 %v804_v55, 0.0 }
  0xc3   :  { %v2554_v60 = vadd.f32 %v2553_v42, %v1999_v56  ;;  %v2591_v61 = vadd.f32 %v2590_v43, %v2000_v57 }
  0xc4   :  { %v2481_v62 = vadd.f32 %v2480_v44, %v2005_v58  ;;  %v2518_v63 = vadd.f32 %v2517_v47, %v2006_v59 }
  0xc6   :  { %v972_v0 = vpop.f32.mrf.mxu2  ;;  %v1141_v1 = vpop.f32.mrf.mxu3 }
  0xc7   :  { %v973_v3 = vadd.f32 %v972_v0, %v8349_v45  ;;  %v1142_v4 = vadd.f32 %v1141_v1, %v8351_v46  ;;  %v637_v5 = vpop.f32.mrf.mxu0  ;;  %v806_v6 = vpop.f32.mrf.mxu1 }
  0xc8   :  { %v638_v7 = vadd.f32 %v637_v5, %v8325_v27  ;;  %v807_v8 = vadd.f32 %v806_v6, %v8327_v28 }
  0xc9   :  { %v2007_v9 = vmax.f32 %v973_v3, 0.0  ;;  %v2008_v10 = vmax.f32 %v1142_v4, 0.0 }
  0xca   :  { %v2013_v11 = vmax.f32 %v638_v7, 0.0  ;;  %v2014_v12 = vmax.f32 %v807_v8, 0.0  ;;  %6063 = vmatmul.msk.bf16.gmra.mxu0 %vm491_vm1, %v7663_v2  ;;  %6095 = vmatmul.msk.bf16.gmra.mxu1 %vm491_vm1, %v7663_v2  ;;  %v7665_v8 = vld [vmem:[%s11688_s0 + $0x68] sm:$0xff] }
  0xcb   :  { %v2555_v13 = vadd.f32 %v2554_v60, %v2007_v9  ;;  %v2592_v14 = vadd.f32 %v2591_v61, %v2008_v10  ;;  %6127 = vmatmul.msk.bf16.gmra.mxu2 %vm491_vm1, %v7663_v2  ;;  %6159 = vmatmul.msk.bf16.gmra.mxu3 %vm491_vm1, %v7663_v2 }
  0xcc   :  { %v2482_v15 = vadd.f32 %v2481_v62, %v2013_v11  ;;  %v2519_v16 = vadd.f32 %v2518_v63, %v2014_v12 }
  0xce   :  { %v975_v17 = vpop.f32.mrf.mxu2  ;;  %v1144_v18 = vpop.f32.mrf.mxu3 }
  0xcf   :  { %v976_v19 = vadd.f32 %v975_v17, %v8349_v45  ;;  %v1145_v20 = vadd.f32 %v1144_v18, %v8351_v46  ;;  %v639_v21 = vpop.f32.mrf.mxu0  ;;  %v808_v22 = vpop.f32.mrf.mxu1 }
  0xd0   :  { %v640_v23 = vadd.f32 %v639_v21, %v8325_v27  ;;  %v809_v24 = vadd.f32 %v808_v22, %v8327_v28 }
  0xd1   :  { %v2015_v25 = vmax.f32 %v976_v19, 0.0  ;;  %v2016_v26 = vmax.f32 %v1145_v20, 0.0 }
  0xd2   :  { %v2021_v29 = vmax.f32 %v640_v23, 0.0  ;;  %v2022_v30 = vmax.f32 %v809_v24, 0.0 }
  0xd3   :  { %v2556_v31 = vadd.f32 %v2555_v13, %v2015_v25  ;;  %v2593_v32 = vadd.f32 %v2592_v14, %v2016_v26 }
  0xd4   :  { %v2483_v33 = vadd.f32 %v2482_v15, %v2021_v29  ;;  %v2520_v34 = vadd.f32 %v2519_v16, %v2022_v30 }
  0xd6   :  { %v977_v35 = vpop.f32.mrf.mxu2  ;;  %v1146_v36 = vpop.f32.mrf.mxu3 }
  0xd7   :  { %v978_v38 = vadd.f32 %v977_v35, %v8349_v45  ;;  %v1147_v39 = vadd.f32 %v1146_v36, %v8351_v46  ;;  %v642_v40 = vpop.f32.mrf.mxu0  ;;  %v811_v41 = vpop.f32.mrf.mxu1 }
  0xd8   :  { %v643_v42 = vadd.f32 %v642_v40, %v8325_v27  ;;  %v812_v43 = vadd.f32 %v811_v41, %v8327_v28 }
  0xd9   :  { %v2023_v44 = vmax.f32 %v978_v38, 0.0  ;;  %v2024_v47 = vmax.f32 %v1147_v39, 0.0 }
  0xda   :  { %v2029_v48 = vmax.f32 %v643_v42, 0.0  ;;  %v2030_v49 = vmax.f32 %v812_v43, 0.0  ;;  %6064 = vmatmul.msk.bf16.gmra.mxu0 %vm491_vm1, %v7664_v37  ;;  %6096 = vmatmul.msk.bf16.gmra.mxu1 %vm491_vm1, %v7664_v37  ;;  %v7666_v43 = vld [vmem:[%s11688_s0 + $0x70] sm:$0xff] }
  0xdb   :  { %v2557_v50 = vadd.f32 %v2556_v31, %v2023_v44  ;;  %v2594_v51 = vadd.f32 %v2593_v32, %v2024_v47  ;;  %6128 = vmatmul.msk.bf16.gmra.mxu2 %vm491_vm1, %v7664_v37  ;;  %6160 = vmatmul.msk.bf16.gmra.mxu3 %vm491_vm1, %v7664_v37 }
  0xdc   :  { %v2484_v52 = vadd.f32 %v2483_v33, %v2029_v48  ;;  %v2521_v53 = vadd.f32 %v2520_v34, %v2030_v49 }
  0xde   :  { %v980_v54 = vpop.f32.mrf.mxu2  ;;  %v1149_v55 = vpop.f32.mrf.mxu3 }
  0xdf   :  { %v981_v56 = vadd.f32 %v980_v54, %v8349_v45  ;;  %v1150_v57 = vadd.f32 %v1149_v55, %v8351_v46  ;;  %v644_v58 = vpop.f32.mrf.mxu0  ;;  %v813_v59 = vpop.f32.mrf.mxu1 }
  0xe0   :  { %v645_v60 = vadd.f32 %v644_v58, %v8325_v27  ;;  %v814_v61 = vadd.f32 %v813_v59, %v8327_v28 }
  0xe1   :  { %v2031_v62 = vmax.f32 %v981_v56, 0.0  ;;  %v2032_v63 = vmax.f32 %v1150_v57, 0.0 }
  0xe2   :  { %v2037_v0 = vmax.f32 %v645_v60, 0.0  ;;  %v2038_v1 = vmax.f32 %v814_v61, 0.0  ;;  %v6014_v60 = vld [vmem:[%s11687_s1 + $0x98] sm:$0xf] }
  0xe3   :  { %v2558_v2 = vadd.f32 %v2557_v50, %v2031_v62  ;;  %v2595_v3 = vadd.f32 %v2594_v51, %v2032_v63  ;;  %v7707_v61 = vld [vmem:[%s11687_s1 + $0xb4] sm:$0xf0]  ;;  %v7703_v62 = vld [vmem:[%s11687_s1 + $0x9c] sm:$0xf] }
  0xe4   :  { %v2485_v4 = vadd.f32 %v2484_v52, %v2037_v0  ;;  %v2522_v5 = vadd.f32 %v2521_v53, %v2038_v1  ;;  %v6015_v63 = vor.u32 %v7707_v61, %v6014_v60  ;;  %v6016_v0 = vld [vmem:[%s11687_s1 + $0xb8] sm:$0xf0] }
  0xe6   :  { %v982_v6 = vpop.f32.mrf.mxu2  ;;  %v1151_v7 = vpop.f32.mrf.mxu3  ;;  %1632 = vmatpush.bf16.msrb.mxu2 %v6015_v63  ;;  %v7668_v63 = vld [vmem:[%s11688_s0 + $0x80] sm:$0xff] }
  0xe7   :  { %v983_v9 = vadd.f32 %v982_v6, %v8349_v45  ;;  %v1152_v10 = vadd.f32 %v1151_v7, %v8351_v46  ;;  %v647_v11 = vpop.f32.mrf.mxu0  ;;  %v816_v12 = vpop.f32.mrf.mxu1 }
  0xe8   :  { %v648_v13 = vadd.f32 %v647_v11, %v8325_v27  ;;  %v817_v14 = vadd.f32 %v816_v12, %v8327_v28 }
  0xe9   :  { %v2039_v15 = vmax.f32 %v983_v9, 0.0  ;;  %v2040_v16 = vmax.f32 %v1152_v10, 0.0 }
  0xea   :  { %v2045_v17 = vmax.f32 %v648_v13, 0.0  ;;  %v2046_v18 = vmax.f32 %v817_v14, 0.0  ;;  %6065 = vmatmul.msk.bf16.gmra.mxu0 %vm491_vm1, %v7665_v8  ;;  %6097 = vmatmul.msk.bf16.gmra.mxu1 %vm491_vm1, %v7665_v8 }
  0xeb   :  { %v2559_v19 = vadd.f32 %v2558_v2, %v2039_v15  ;;  %v2596_v20 = vadd.f32 %v2595_v3, %v2040_v16  ;;  %6129 = vmatmul.msk.bf16.gmra.mxu2 %vm491_vm1, %v7665_v8  ;;  %6161 = vmatmul.msk.bf16.gmra.mxu3 %vm491_vm1, %v7665_v8  ;;  %v6019_v3 = vor.u32 %v7703_v62, %v6016_v0 }
  0xec   :  { %v2486_v21 = vadd.f32 %v2485_v4, %v2045_v17  ;;  %v2523_v22 = vadd.f32 %v2522_v5, %v2046_v18  ;;  %v6006_v18 = vld [vmem:[%s11687_s1 + $0x90] sm:$0xf] }
  0xed   :  { %1801 = vmatpush.bf16.msrb.mxu3 %v6019_v3 }
  0xee   :  { %v985_v23 = vpop.f32.mrf.mxu2  ;;  %v1154_v24 = vpop.f32.mrf.mxu3 }
  0xef   :  { %v986_v25 = vadd.f32 %v985_v23, %v8349_v45  ;;  %v1155_v26 = vadd.f32 %v1154_v24, %v8351_v46  ;;  %v649_v29 = vpop.f32.mrf.mxu0  ;;  %v818_v30 = vpop.f32.mrf.mxu1 }
  0xf0   :  { %v650_v31 = vadd.f32 %v649_v29, %v8325_v27  ;;  %v819_v32 = vadd.f32 %v818_v30, %v8327_v28 }
  0xf1   :  { %v2047_v33 = vmax.f32 %v986_v25, 0.0  ;;  %v2048_v34 = vmax.f32 %v1155_v26, 0.0  ;;  %v7667_v25 = vld [vmem:[%s11688_s0 + $0x78] sm:$0xff] }
  0xf2   :  { %v2053_v35 = vmax.f32 %v650_v31, 0.0  ;;  %v2054_v36 = vmax.f32 %v819_v32, 0.0 }
  0xf3   :  { %v2560_v37 = vadd.f32 %v2559_v19, %v2047_v33  ;;  %v2597_v38 = vadd.f32 %v2596_v20, %v2048_v34  ;;  %v7706_v19 = vld [vmem:[%s11687_s1 + $0xac] sm:$0xf0]  ;;  %v7702_v20 = vld [vmem:[%s11687_s1 + $0x94] sm:$0xf] }
  0xf4   :  { %v2487_v39 = vadd.f32 %v2486_v21, %v2053_v35  ;;  %v2524_v40 = vadd.f32 %v2523_v22, %v2054_v36  ;;  %v6007_v21 = vor.u32 %v7706_v19, %v6006_v18  ;;  %v6008_v22 = vld [vmem:[%s11687_s1 + $0xb0] sm:$0xf0] }
  0xf5   :  { %v6011_v26 = vor.u32 %v7702_v20, %v6008_v22 }
  0xf6   :  { %v987_v41 = vpop.f32.mrf.mxu2  ;;  %v1156_v42 = vpop.f32.mrf.mxu3  ;;  %1294 = vmatpush.bf16.msrb.mxu0 %v6007_v21 }
  0xf7   :  { %v988_v44 = vadd.f32 %v987_v41, %v8349_v45  ;;  %v1157_v47 = vadd.f32 %v1156_v42, %v8351_v46  ;;  %v652_v48 = vpop.f32.mrf.mxu0  ;;  %v821_v49 = vpop.f32.mrf.mxu1  ;;  %1463 = vmatpush.bf16.msrb.mxu1 %v6011_v26 }
  0xf8   :  { %v653_v50 = vadd.f32 %v652_v48, %v8325_v27  ;;  %v822_v51 = vadd.f32 %v821_v49, %v8327_v28 }
  0xf9   :  { %v2055_v52 = vmax.f32 %v988_v44, 0.0  ;;  %v2056_v53 = vmax.f32 %v1157_v47, 0.0 }
  0xfa   :  { %v2061_v54 = vmax.f32 %v653_v50, 0.0  ;;  %v2062_v55 = vmax.f32 %v822_v51, 0.0  ;;  %6066 = vmatmul.msk.bf16.gmra.mxu0 %vm491_vm1, %v7666_v43  ;;  %6098 = vmatmul.msk.bf16.gmra.mxu1 %vm491_vm1, %v7666_v43 }
  0xfb   :  { %v2561_v56 = vadd.f32 %v2560_v37, %v2055_v52  ;;  %v2598_v57 = vadd.f32 %v2597_v38, %v2056_v53  ;;  %6130 = vmatmul.msk.bf16.gmra.mxu2 %vm491_vm1, %v7666_v43  ;;  %6162 = vmatmul.msk.bf16.gmra.mxu3 %vm491_vm1, %v7666_v43 }
  0xfc   :  { %v2488_v58 = vadd.f32 %v2487_v39, %v2061_v54  ;;  %v2525_v59 = vadd.f32 %v2524_v40, %v2062_v55 }
  0xfe   :  { %v990_v1 = vpop.f32.mrf.mxu2  ;;  %v1159_v2 = vpop.f32.mrf.mxu3 }
  0xff   :  { %v991_v4 = vadd.f32 %v990_v1, %v8349_v45  ;;  %v1160_v5 = vadd.f32 %v1159_v2, %v8351_v46  ;;  %v654_v6 = vpop.f32.mrf.mxu0  ;;  %v823_v7 = vpop.f32.mrf.mxu1 }
 0x100   :  { %v655_v8 = vadd.f32 %v654_v6, %v8325_v27  ;;  %v824_v9 = vadd.f32 %v823_v7, %v8327_v28 }
 0x101   :  { %v2063_v10 = vmax.f32 %v991_v4, 0.0  ;;  %v2064_v11 = vmax.f32 %v1160_v5, 0.0 }
 0x102   :  { %v2069_v12 = vmax.f32 %v655_v8, 0.0  ;;  %v2070_v13 = vmax.f32 %v824_v9, 0.0 }
 0x103   :  { %v2562_v14 = vadd.f32 %v2561_v56, %v2063_v10  ;;  %v2599_v15 = vadd.f32 %v2598_v57, %v2064_v11 }
 0x104   :  { %v2489_v16 = vadd.f32 %v2488_v58, %v2069_v12  ;;  %v2526_v17 = vadd.f32 %v2525_v59, %v2070_v13 }
 0x106   :  { %v992_v23 = vpop.f32.mrf.mxu2  ;;  %v1161_v24 = vpop.f32.mrf.mxu3 }
 0x107   :  { %v993_v29 = vadd.f32 %v992_v23, %v8349_v45  ;;  %v1162_v30 = vadd.f32 %v1161_v24, %v8351_v46  ;;  %v657_v31 = vpop.f32.mrf.mxu0  ;;  %v826_v32 = vpop.f32.mrf.mxu1 }
 0x108   :  { %v658_v33 = vadd.f32 %v657_v31, %v8325_v27  ;;  %v827_v34 = vadd.f32 %v826_v32, %v8327_v28 }
 0x109   :  { %v2071_v35 = vmax.f32 %v993_v29, 0.0  ;;  %v2072_v36 = vmax.f32 %v1162_v30, 0.0 }
 0x10a   :  { %v2077_v37 = vmax.f32 %v658_v33, 0.0  ;;  %v2078_v38 = vmax.f32 %v827_v34, 0.0  ;;  %6067 = vmatmul.msk.bf16.gmra.mxu0 %vm491_vm1, %v7667_v25  ;;  %6099 = vmatmul.msk.bf16.gmra.mxu1 %vm491_vm1, %v7667_v25  ;;  %v7669_v34 = vld [vmem:[%s11688_s0 + $0x88] sm:$0xff] }
 0x10b   :  { %v2563_v39 = vadd.f32 %v2562_v14, %v2071_v35  ;;  %v2600_v40 = vadd.f32 %v2599_v15, %v2072_v36  ;;  %6131 = vmatmul.msk.bf16.gmra.mxu2 %vm491_vm1, %v7667_v25  ;;  %6163 = vmatmul.msk.bf16.gmra.mxu3 %vm491_vm1, %v7667_v25 }
 0x10c   :  { %v2490_v41 = vadd.f32 %v2489_v16, %v2077_v37  ;;  %v2527_v42 = vadd.f32 %v2526_v17, %v2078_v38 }
 0x10e   :  { %v995_v43 = vpop.f32.mrf.mxu2  ;;  %v1164_v44 = vpop.f32.mrf.mxu3 }
 0x10f   :  { %v996_v47 = vadd.f32 %v995_v43, %v8349_v45  ;;  %v1165_v48 = vadd.f32 %v1164_v44, %v8351_v46  ;;  %v659_v49 = vpop.f32.mrf.mxu0  ;;  %v828_v50 = vpop.f32.mrf.mxu1 }
 0x110   :  { %v660_v51 = vadd.f32 %v659_v49, %v8325_v27  ;;  %v829_v52 = vadd.f32 %v828_v50, %v8327_v28 }
 0x111   :  { %v2079_v53 = vmax.f32 %v996_v47, 0.0  ;;  %v2080_v54 = vmax.f32 %v1165_v48, 0.0 }
 0x112   :  { %v2085_v55 = vmax.f32 %v660_v51, 0.0  ;;  %v2086_v56 = vmax.f32 %v829_v52, 0.0 }
 0x113   :  { %v2564_v57 = vadd.f32 %v2563_v39, %v2079_v53  ;;  %v2601_v58 = vadd.f32 %v2600_v40, %v2080_v54 }
 0x114   :  { %v2491_v59 = vadd.f32 %v2490_v41, %v2085_v55  ;;  %v2528_v60 = vadd.f32 %v2527_v42, %v2086_v56 }
 0x116   :  { %v997_v61 = vpop.f32.mrf.mxu2  ;;  %v1166_v62 = vpop.f32.mrf.mxu3 }
 0x117   :  { %v998_v0 = vadd.f32 %v997_v61, %v8349_v45  ;;  %v1167_v1 = vadd.f32 %v1166_v62, %v8351_v46  ;;  %v662_v2 = vpop.f32.mrf.mxu0  ;;  %v831_v3 = vpop.f32.mrf.mxu1 }
 0x118   :  { %v663_v4 = vadd.f32 %v662_v2, %v8325_v27  ;;  %v832_v5 = vadd.f32 %v831_v3, %v8327_v28 }
 0x119   :  { %v2087_v6 = vmax.f32 %v998_v0, 0.0  ;;  %v2088_v7 = vmax.f32 %v1167_v1, 0.0 }
 0x11a   :  { %v2093_v8 = vmax.f32 %v663_v4, 0.0  ;;  %v2094_v9 = vmax.f32 %v832_v5, 0.0  ;;  %6068 = vmatmul.msk.bf16.gmra.mxu0 %vm491_vm1, %v7668_v63  ;;  %6100 = vmatmul.msk.bf16.gmra.mxu1 %vm491_vm1, %v7668_v63  ;;  %v7670_v5 = vld [vmem:[%s11688_s0 + $0x90] sm:$0xff] }
 0x11b   :  { %v2565_v10 = vadd.f32 %v2564_v57, %v2087_v6  ;;  %v2602_v11 = vadd.f32 %v2601_v58, %v2088_v7  ;;  %6132 = vmatmul.msk.bf16.gmra.mxu2 %vm491_vm1, %v7668_v63  ;;  %6164 = vmatmul.msk.bf16.gmra.mxu3 %vm491_vm1, %v7668_v63 }
 0x11c   :  { %v2492_v12 = vadd.f32 %v2491_v59, %v2093_v8  ;;  %v2529_v13 = vadd.f32 %v2528_v60, %v2094_v9 }
 0x11e   :  { %v1000_v14 = vpop.f32.mrf.mxu2  ;;  %v1169_v15 = vpop.f32.mrf.mxu3 }
 0x11f   :  { %v1001_v16 = vadd.f32 %v1000_v14, %v8349_v45  ;;  %v1170_v17 = vadd.f32 %v1169_v15, %v8351_v46  ;;  %v664_v18 = vpop.f32.mrf.mxu0  ;;  %v833_v19 = vpop.f32.mrf.mxu1 }
 0x120   :  { %v665_v20 = vadd.f32 %v664_v18, %v8325_v27  ;;  %v834_v21 = vadd.f32 %v833_v19, %v8327_v28 }
 0x121   :  { %v2095_v22 = vmax.f32 %v1001_v16, 0.0  ;;  %v2096_v23 = vmax.f32 %v1170_v17, 0.0 }
 0x122   :  { %v2101_v24 = vmax.f32 %v665_v20, 0.0  ;;  %v2102_v25 = vmax.f32 %v834_v21, 0.0 }
 0x123   :  { %v2566_v26 = vadd.f32 %v2565_v10, %v2095_v22  ;;  %v2603_v29 = vadd.f32 %v2602_v11, %v2096_v23 }
 0x124   :  { %v2493_v30 = vadd.f32 %v2492_v12, %v2101_v24  ;;  %v2530_v31 = vadd.f32 %v2529_v13, %v2102_v25 }
 0x126   :  { %v1002_v32 = vpop.f32.mrf.mxu2  ;;  %v1171_v33 = vpop.f32.mrf.mxu3 }
 0x127   :  { %v1003_v35 = vadd.f32 %v1002_v32, %v8349_v45  ;;  %v1172_v36 = vadd.f32 %v1171_v33, %v8351_v46  ;;  %v667_v37 = vpop.f32.mrf.mxu0  ;;  %v836_v38 = vpop.f32.mrf.mxu1 }
 0x128   :  { %v668_v39 = vadd.f32 %v667_v37, %v8325_v27  ;;  %v837_v40 = vadd.f32 %v836_v38, %v8327_v28 }
 0x129   :  { %v2103_v41 = vmax.f32 %v1003_v35, 0.0  ;;  %v2104_v42 = vmax.f32 %v1172_v36, 0.0 }
 0x12a   :  { %v2109_v43 = vmax.f32 %v668_v39, 0.0  ;;  %v2110_v44 = vmax.f32 %v837_v40, 0.0  ;;  %6069 = vmatmul.msk.bf16.gmra.mxu0 %vm491_vm1, %v7669_v34  ;;  %6101 = vmatmul.msk.bf16.gmra.mxu1 %vm491_vm1, %v7669_v34  ;;  %v7671_v40 = vld [vmem:[%s11688_s0 + $0x98] sm:$0xff] }
 0x12b   :  { %v2567_v47 = vadd.f32 %v2566_v26, %v2103_v41  ;;  %v2604_v48 = vadd.f32 %v2603_v29, %v2104_v42  ;;  %6133 = vmatmul.msk.bf16.gmra.mxu2 %vm491_vm1, %v7669_v34  ;;  %6165 = vmatmul.msk.bf16.gmra.mxu3 %vm491_vm1, %v7669_v34 }
 0x12c   :  { %v2494_v49 = vadd.f32 %v2493_v30, %v2109_v43  ;;  %v2531_v50 = vadd.f32 %v2530_v31, %v2110_v44 }
 0x12e   :  { %v1005_v51 = vpop.f32.mrf.mxu2  ;;  %v1174_v52 = vpop.f32.mrf.mxu3 }
 0x12f   :  { %v1006_v53 = vadd.f32 %v1005_v51, %v8349_v45  ;;  %v1175_v54 = vadd.f32 %v1174_v52, %v8351_v46  ;;  %v669_v55 = vpop.f32.mrf.mxu0  ;;  %v838_v56 = vpop.f32.mrf.mxu1 }
 0x130   :  { %v670_v57 = vadd.f32 %v669_v55, %v8325_v27  ;;  %v839_v58 = vadd.f32 %v838_v56, %v8327_v28 }
 0x131   :  { %v2111_v59 = vmax.f32 %v1006_v53, 0.0  ;;  %v2112_v60 = vmax.f32 %v1175_v54, 0.0 }
 0x132   :  { %v2117_v61 = vmax.f32 %v670_v57, 0.0  ;;  %v2118_v62 = vmax.f32 %v839_v58, 0.0 }
 0x133   :  { %v2568_v63 = vadd.f32 %v2567_v47, %v2111_v59  ;;  %v2605_v0 = vadd.f32 %v2604_v48, %v2112_v60 }
 0x134   :  { %v2495_v1 = vadd.f32 %v2494_v49, %v2117_v61  ;;  %v2532_v2 = vadd.f32 %v2531_v50, %v2118_v62 }
 0x136   :  { %v1007_v3 = vpop.f32.mrf.mxu2  ;;  %v1176_v4 = vpop.f32.mrf.mxu3 }
 0x137   :  { %v1008_v6 = vadd.f32 %v1007_v3, %v8349_v45  ;;  %v1177_v7 = vadd.f32 %v1176_v4, %v8351_v46  ;;  %v672_v8 = vpop.f32.mrf.mxu0  ;;  %v841_v9 = vpop.f32.mrf.mxu1 }
 0x138   :  { %v673_v10 = vadd.f32 %v672_v8, %v8325_v27  ;;  %v842_v11 = vadd.f32 %v841_v9, %v8327_v28 }
 0x139   :  { %v2119_v12 = vmax.f32 %v1008_v6, 0.0  ;;  %v2120_v13 = vmax.f32 %v1177_v7, 0.0 }
 0x13a   :  { %v2125_v14 = vmax.f32 %v673_v10, 0.0  ;;  %v2126_v15 = vmax.f32 %v842_v11, 0.0  ;;  %6070 = vmatmul.msk.bf16.gmra.mxu0 %vm491_vm1, %v7670_v5  ;;  %6102 = vmatmul.msk.bf16.gmra.mxu1 %vm491_vm1, %v7670_v5  ;;  %v7672_v11 = vld [vmem:[%s11688_s0 + $0xa0] sm:$0xff] }
 0x13b   :  { %v2569_v16 = vadd.f32 %v2568_v63, %v2119_v12  ;;  %v2606_v17 = vadd.f32 %v2605_v0, %v2120_v13  ;;  %6134 = vmatmul.msk.bf16.gmra.mxu2 %vm491_vm1, %v7670_v5  ;;  %6166 = vmatmul.msk.bf16.gmra.mxu3 %vm491_vm1, %v7670_v5 }
 0x13c   :  { %v2496_v18 = vadd.f32 %v2495_v1, %v2125_v14  ;;  %v2533_v19 = vadd.f32 %v2532_v2, %v2126_v15 }
 0x13e   :  { %v1010_v20 = vpop.f32.mrf.mxu2  ;;  %v1179_v21 = vpop.f32.mrf.mxu3 }
 0x13f   :  { %v1011_v22 = vadd.f32 %v1010_v20, %v8349_v45  ;;  %v1180_v23 = vadd.f32 %v1179_v21, %v8351_v46  ;;  %v674_v24 = vpop.f32.mrf.mxu0  ;;  %v843_v25 = vpop.f32.mrf.mxu1 }
 0x140   :  { %v675_v26 = vadd.f32 %v674_v24, %v8325_v27  ;;  %v844_v29 = vadd.f32 %v843_v25, %v8327_v28 }
 0x141   :  { %v2127_v30 = vmax.f32 %v1011_v22, 0.0  ;;  %v2128_v31 = vmax.f32 %v1180_v23, 0.0 }
 0x142   :  { %v2133_v32 = vmax.f32 %v675_v26, 0.0  ;;  %v2134_v33 = vmax.f32 %v844_v29, 0.0 }
 0x143   :  { %v2570_v34 = vadd.f32 %v2569_v16, %v2127_v30  ;;  %v2607_v35 = vadd.f32 %v2606_v17, %v2128_v31 }
 0x144   :  { %v2497_v36 = vadd.f32 %v2496_v18, %v2133_v32  ;;  %v2534_v37 = vadd.f32 %v2533_v19, %v2134_v33 }
 0x146   :  { %v1012_v38 = vpop.f32.mrf.mxu2  ;;  %v1181_v39 = vpop.f32.mrf.mxu3 }
 0x147   :  { %v1013_v41 = vadd.f32 %v1012_v38, %v8349_v45  ;;  %v1182_v42 = vadd.f32 %v1181_v39, %v8351_v46  ;;  %v677_v43 = vpop.f32.mrf.mxu0  ;;  %v846_v44 = vpop.f32.mrf.mxu1 }
 0x148   :  { %v678_v47 = vadd.f32 %v677_v43, %v8325_v27  ;;  %v847_v48 = vadd.f32 %v846_v44, %v8327_v28  ;;  %v5982_v44 = vld [vmem:[%s11687_s1 + $0x58] sm:$0xf] }
 0x149   :  { %v2135_v49 = vmax.f32 %v1013_v41, 0.0  ;;  %v2136_v50 = vmax.f32 %v1182_v42, 0.0 }
 0x14a   :  { %v2141_v51 = vmax.f32 %v678_v47, 0.0  ;;  %v2142_v52 = vmax.f32 %v847_v48, 0.0  ;;  %6071 = vmatmul.msk.bf16.gmra.mxu0 %vm491_vm1, %v7671_v40  ;;  %6103 = vmatmul.msk.bf16.gmra.mxu1 %vm491_vm1, %v7671_v40  ;;  %v7699_v47 = vld [vmem:[%s11687_s1 + $0x74] sm:$0xf0]  ;;  %v7695_v48 = vld [vmem:[%s11687_s1 + $0x5c] sm:$0xf] }
 0x14b   :  { %v2571_v53 = vadd.f32 %v2570_v34, %v2135_v49  ;;  %v2608_v54 = vadd.f32 %v2607_v35, %v2136_v50  ;;  %6135 = vmatmul.msk.bf16.gmra.mxu2 %vm491_vm1, %v7671_v40  ;;  %6167 = vmatmul.msk.bf16.gmra.mxu3 %vm491_vm1, %v7671_v40  ;;  %v5983_v49 = vor.u32 %v7699_v47, %v5982_v44  ;;  %v5984_v50 = vld [vmem:[%s11687_s1 + $0x78] sm:$0xf0] }
 0x14c   :  { %v2498_v55 = vadd.f32 %v2497_v36, %v2141_v51  ;;  %v2535_v56 = vadd.f32 %v2534_v37, %v2142_v52 }
 0x14d   :  { %1633 = vmatpush.bf16.msrb.mxu2 %v5983_v49 }
 0x14e   :  { %v1015_v57 = vpop.f32.mrf.mxu2  ;;  %v1184_v58 = vpop.f32.mrf.mxu3 }
 0x14f   :  { %v1016_v59 = vadd.f32 %v1015_v57, %v8349_v45  ;;  %v1185_v60 = vadd.f32 %v1184_v58, %v8351_v46  ;;  %v679_v61 = vpop.f32.mrf.mxu0  ;;  %v848_v62 = vpop.f32.mrf.mxu1 }
 0x150   :  { %v680_v63 = vadd.f32 %v679_v61, %v8325_v27  ;;  %v849_v0 = vadd.f32 %v848_v62, %v8327_v28 }
 0x151   :  { %v2143_v1 = vmax.f32 %v1016_v59, 0.0  ;;  %v2144_v2 = vmax.f32 %v1185_v60, 0.0 }
 0x152   :  { %v2149_v3 = vmax.f32 %v680_v63, 0.0  ;;  %v2150_v4 = vmax.f32 %v849_v0, 0.0 }
 0x153   :  { %v2572_v5 = vadd.f32 %v2571_v53, %v2143_v1  ;;  %v2609_v6 = vadd.f32 %v2608_v54, %v2144_v2  ;;  %v7673_v53 = vld [vmem:[%s11688_s0 + $0xa8] sm:$0xff]  ;;  %v5987_v54 = vor.u32 %v7695_v48, %v5984_v50 }
 0x154   :  { %v2499_v7 = vadd.f32 %v2498_v55, %v2149_v3  ;;  %v2536_v8 = vadd.f32 %v2535_v56, %v2150_v4 }
 0x155   :  { %1802 = vmatpush.bf16.msrb.mxu3 %v5987_v54 }
 0x156   :  { %v1017_v9 = vpop.f32.mrf.mxu2  ;;  %v1186_v10 = vpop.f32.mrf.mxu3 }
 0x157   :  { %v1018_v12 = vadd.f32 %v1017_v9, %v8349_v45  ;;  %v1187_v13 = vadd.f32 %v1186_v10, %v8351_v46  ;;  %v682_v14 = vpop.f32.mrf.mxu0  ;;  %v851_v15 = vpop.f32.mrf.mxu1  ;;  %v5976_v9 = vld [vmem:[%s11687_s1 + $0x70] sm:$0xf0] }
 0x158   :  { %v683_v16 = vadd.f32 %v682_v14, %v8325_v27  ;;  %v852_v17 = vadd.f32 %v851_v15, %v8327_v28 }
 0x159   :  { %v2151_v18 = vmax.f32 %v1018_v12, 0.0  ;;  %v2152_v19 = vmax.f32 %v1187_v13, 0.0 }
 0x15a   :  { %v2157_v20 = vmax.f32 %v683_v16, 0.0  ;;  %v2158_v21 = vmax.f32 %v852_v17, 0.0  ;;  %6072 = vmatmul.msk.bf16.gmra.mxu0 %vm491_vm1, %v7672_v11  ;;  %6104 = vmatmul.msk.bf16.gmra.mxu1 %vm491_vm1, %v7672_v11 }
 0x15b   :  { %v2573_v22 = vadd.f32 %v2572_v5, %v2151_v18  ;;  %v2610_v23 = vadd.f32 %v2609_v6, %v2152_v19  ;;  %6136 = vmatmul.msk.bf16.gmra.mxu2 %vm491_vm1, %v7672_v11  ;;  %6168 = vmatmul.msk.bf16.gmra.mxu3 %vm491_vm1, %v7672_v11  ;;  %v5974_v5 = vld [vmem:[%s11687_s1 + $0x50] sm:$0xf] }
 0x15c   :  { %v2500_v24 = vadd.f32 %v2499_v7, %v2157_v20  ;;  %v2537_v25 = vadd.f32 %v2536_v8, %v2158_v21  ;;  %v7698_v6 = vld [vmem:[%s11687_s1 + $0x6c] sm:$0xf0]  ;;  %v7694_v7 = vld [vmem:[%s11687_s1 + $0x54] sm:$0xf] }
 0x15d   :  { %v5975_v8 = vor.u32 %v7698_v6, %v5974_v5  ;;  %v5979_v12 = vor.u32 %v7694_v7, %v5976_v9 }
 0x15e   :  { %v1020_v26 = vpop.f32.mrf.mxu2  ;;  %v1189_v29 = vpop.f32.mrf.mxu3 }
 0x15f   :  { %v1021_v30 = vadd.f32 %v1020_v26, %v8349_v45  ;;  %v1190_v31 = vadd.f32 %v1189_v29, %v8351_v46  ;;  %v684_v32 = vpop.f32.mrf.mxu0  ;;  %v853_v33 = vpop.f32.mrf.mxu1  ;;  %1295 = vmatpush.bf16.msrb.mxu0 %v5975_v8  ;;  %1464 = vmatpush.bf16.msrb.mxu1 %v5979_v12 }
 0x160   :  { %v685_v34 = vadd.f32 %v684_v32, %v8325_v27  ;;  %v854_v35 = vadd.f32 %v853_v33, %v8327_v28 }
 0x161   :  { %v2159_v36 = vmax.f32 %v1021_v30, 0.0  ;;  %v2160_v37 = vmax.f32 %v1190_v31, 0.0  ;;  %v7674_v31 = vld [vmem:[%s11688_s0 + $0xb0] sm:$0xff] }
 0x162   :  { %v2165_v38 = vmax.f32 %v685_v34, 0.0  ;;  %v2166_v39 = vmax.f32 %v854_v35, 0.0 }
 0x163   :  { %v2574_v40 = vadd.f32 %v2573_v22, %v2159_v36  ;;  %v2611_v41 = vadd.f32 %v2610_v23, %v2160_v37 }
 0x164   :  { %v2501_v42 = vadd.f32 %v2500_v24, %v2165_v38  ;;  %v2538_v43 = vadd.f32 %v2537_v25, %v2166_v39 }
 0x166   :  { %v1022_v51 = vpop.f32.mrf.mxu2  ;;  %v1191_v52 = vpop.f32.mrf.mxu3 }
 0x167   :  { %v1023_v55 = vadd.f32 %v1022_v51, %v8349_v45  ;;  %v1192_v56 = vadd.f32 %v1191_v52, %v8351_v46  ;;  %v687_v57 = vpop.f32.mrf.mxu0  ;;  %v856_v58 = vpop.f32.mrf.mxu1 }
 0x168   :  { %v688_v59 = vadd.f32 %v687_v57, %v8325_v27  ;;  %v857_v60 = vadd.f32 %v856_v58, %v8327_v28 }
 0x169   :  { %v2167_v61 = vmax.f32 %v1023_v55, 0.0  ;;  %v2168_v62 = vmax.f32 %v1192_v56, 0.0 }
 0x16a   :  { %v2173_v63 = vmax.f32 %v688_v59, 0.0  ;;  %v2174_v0 = vmax.f32 %v857_v60, 0.0  ;;  %6073 = vmatmul.msk.bf16.gmra.mxu0 %vm491_vm1, %v7673_v53  ;;  %6105 = vmatmul.msk.bf16.gmra.mxu1 %vm491_vm1, %v7673_v53 }
 0x16b   :  { %v2575_v1 = vadd.f32 %v2574_v40, %v2167_v61  ;;  %v2612_v2 = vadd.f32 %v2611_v41, %v2168_v62  ;;  %6137 = vmatmul.msk.bf16.gmra.mxu2 %vm491_vm1, %v7673_v53  ;;  %6169 = vmatmul.msk.bf16.gmra.mxu3 %vm491_vm1, %v7673_v53 }
 0x16c   :  { %v2502_v3 = vadd.f32 %v2501_v42, %v2173_v63  ;;  %v2539_v4 = vadd.f32 %v2538_v43, %v2174_v0 }
 0x16e   :  { %v1025_v10 = vpop.f32.mrf.mxu2  ;;  %v1194_v11 = vpop.f32.mrf.mxu3 }
 0x16f   :  { %v1026_v13 = vadd.f32 %v1025_v10, %v8349_v45  ;;  %v1195_v14 = vadd.f32 %v1194_v11, %v8351_v46  ;;  %v689_v15 = vpop.f32.mrf.mxu0  ;;  %v858_v16 = vpop.f32.mrf.mxu1 }
 0x170   :  { %v690_v17 = vadd.f32 %v689_v15, %v8325_v27  ;;  %v859_v18 = vadd.f32 %v858_v16, %v8327_v28 }
 0x171   :  { %v2175_v19 = vmax.f32 %v1026_v13, 0.0  ;;  %v2176_v20 = vmax.f32 %v1195_v14, 0.0 }
 0x172   :  { %v2181_v21 = vmax.f32 %v690_v17, 0.0  ;;  %v2182_v22 = vmax.f32 %v859_v18, 0.0 }
 0x173   :  { %v2576_v23 = vadd.f32 %v2575_v1, %v2175_v19  ;;  %v2613_v24 = vadd.f32 %v2612_v2, %v2176_v20  ;;  %v7675_v2 = vld [vmem:[%s11688_s0 + $0xb8] sm:$0xff] }
 0x174   :  { %v2503_v25 = vadd.f32 %v2502_v3, %v2181_v21  ;;  %v2540_v26 = vadd.f32 %v2539_v4, %v2182_v22 }
 0x176   :  { %v1027_v29 = vpop.f32.mrf.mxu2  ;;  %v1196_v30 = vpop.f32.mrf.mxu3 }
 0x177   :  { %v1028_v32 = vadd.f32 %v1027_v29, %v8349_v45  ;;  %v1197_v33 = vadd.f32 %v1196_v30, %v8351_v46  ;;  %v692_v34 = vpop.f32.mrf.mxu0  ;;  %v861_v35 = vpop.f32.mrf.mxu1 }
 0x178   :  { %v693_v36 = vadd.f32 %v692_v34, %v8325_v27  ;;  %v862_v37 = vadd.f32 %v861_v35, %v8327_v28 }
 0x179   :  { %v2183_v38 = vmax.f32 %v1028_v32, 0.0  ;;  %v2184_v39 = vmax.f32 %v1197_v33, 0.0 }
 0x17a   :  { %v2189_v40 = vmax.f32 %v693_v36, 0.0  ;;  %v2190_v41 = vmax.f32 %v862_v37, 0.0  ;;  %6074 = vmatmul.msk.bf16.gmra.mxu0 %vm491_vm1, %v7674_v31  ;;  %6106 = vmatmul.msk.bf16.gmra.mxu1 %vm491_vm1, %v7674_v31  ;;  %v7676_v37 = vld [vmem:[%s11688_s0 + $0xc0] sm:$0xff] }
 0x17b   :  { %v2577_v42 = vadd.f32 %v2576_v23, %v2183_v38  ;;  %v2614_v43 = vadd.f32 %v2613_v24, %v2184_v39  ;;  %6138 = vmatmul.msk.bf16.gmra.mxu2 %vm491_vm1, %v7674_v31  ;;  %6170 = vmatmul.msk.bf16.gmra.mxu3 %vm491_vm1, %v7674_v31 }
 0x17c   :  { %v2504_v44 = vadd.f32 %v2503_v25, %v2189_v40  ;;  %v2541_v47 = vadd.f32 %v2540_v26, %v2190_v41 }
 0x17e   :  { %v1030_v48 = vpop.f32.mrf.mxu2  ;;  %v1199_v49 = vpop.f32.mrf.mxu3 }
 0x17f   :  { %v1031_v50 = vadd.f32 %v1030_v48, %v8349_v45  ;;  %v1200_v51 = vadd.f32 %v1199_v49, %v8351_v46  ;;  %v694_v52 = vpop.f32.mrf.mxu0  ;;  %v863_v53 = vpop.f32.mrf.mxu1 }
 0x180   :  { %v695_v54 = vadd.f32 %v694_v52, %v8325_v27  ;;  %v864_v55 = vadd.f32 %v863_v53, %v8327_v28 }
 0x181   :  { %v2191_v56 = vmax.f32 %v1031_v50, 0.0  ;;  %v2192_v57 = vmax.f32 %v1200_v51, 0.0 }
 0x182   :  { %v2197_v58 = vmax.f32 %v695_v54, 0.0  ;;  %v2198_v59 = vmax.f32 %v864_v55, 0.0 }
 0x183   :  { %v2578_v60 = vadd.f32 %v2577_v42, %v2191_v56  ;;  %v2615_v61 = vadd.f32 %v2614_v43, %v2192_v57 }
 0x184   :  { %v2505_v62 = vadd.f32 %v2504_v44, %v2197_v58  ;;  %v2542_v63 = vadd.f32 %v2541_v47, %v2198_v59 }
 0x186   :  { %v1032_v0 = vpop.f32.mrf.mxu2  ;;  %v1201_v1 = vpop.f32.mrf.mxu3 }
 0x187   :  { %v1033_v3 = vadd.f32 %v1032_v0, %v8349_v45  ;;  %v1202_v4 = vadd.f32 %v1201_v1, %v8351_v46  ;;  %v697_v5 = vpop.f32.mrf.mxu0  ;;  %v866_v6 = vpop.f32.mrf.mxu1 }
 0x188   :  { %v698_v7 = vadd.f32 %v697_v5, %v8325_v27  ;;  %v867_v8 = vadd.f32 %v866_v6, %v8327_v28 }
 0x189   :  { %v2199_v9 = vmax.f32 %v1033_v3, 0.0  ;;  %v2200_v10 = vmax.f32 %v1202_v4, 0.0 }
 0x18a   :  { %v2205_v11 = vmax.f32 %v698_v7, 0.0  ;;  %v2206_v12 = vmax.f32 %v867_v8, 0.0  ;;  %6075 = vmatmul.msk.bf16.gmra.mxu0 %vm491_vm1, %v7675_v2  ;;  %6107 = vmatmul.msk.bf16.gmra.mxu1 %vm491_vm1, %v7675_v2 }
 0x18b   :  { %v2579_v13 = vadd.f32 %v2578_v60, %v2199_v9  ;;  %v2616_v14 = vadd.f32 %v2615_v61, %v2200_v10  ;;  %6139 = vmatmul.msk.bf16.gmra.mxu2 %vm491_vm1, %v7675_v2  ;;  %6171 = vmatmul.msk.bf16.gmra.mxu3 %vm491_vm1, %v7675_v2  ;;  %v7677_v2 = vld [vmem:[%s11688_s0 + $0xc8] sm:$0xff] }
 0x18c   :  { %v2506_v15 = vadd.f32 %v2505_v62, %v2205_v11  ;;  %v2543_v16 = vadd.f32 %v2542_v63, %v2206_v12 }
 0x18e   :  { %v1035_v17 = vpop.f32.mrf.mxu2  ;;  %v1204_v18 = vpop.f32.mrf.mxu3 }
 0x18f   :  { %v1036_v19 = vadd.f32 %v1035_v17, %v8349_v45  ;;  %v1205_v20 = vadd.f32 %v1204_v18, %v8351_v46  ;;  %v699_v21 = vpop.f32.mrf.mxu0  ;;  %v868_v22 = vpop.f32.mrf.mxu1 }
 0x190   :  { %v700_v23 = vadd.f32 %v699_v21, %v8325_v27  ;;  %v869_v24 = vadd.f32 %v868_v22, %v8327_v28 }
 0x191   :  { %v2207_v25 = vmax.f32 %v1036_v19, 0.0  ;;  %v2208_v26 = vmax.f32 %v1205_v20, 0.0 }
 0x192   :  { %v2213_v29 = vmax.f32 %v700_v23, 0.0  ;;  %v2214_v30 = vmax.f32 %v869_v24, 0.0 }
 0x193   :  { %v2580_v31 = vadd.f32 %v2579_v13, %v2207_v25  ;;  %v2617_v32 = vadd.f32 %v2616_v14, %v2208_v26 }
 0x194   :  { %v8634_v33 = vadd.f32 %v2506_v15, %v2213_v29  ;;  %v8636_v34 = vadd.f32 %v2543_v16, %v2214_v30 }
 0x196   :  { %v1037_v35 = vpop.f32.mrf.mxu2  ;;  %v1206_v36 = vpop.f32.mrf.mxu3 }
 0x197   :  { %v1038_v38 = vadd.f32 %v1037_v35, %v8349_v45  ;;  %v1207_v39 = vadd.f32 %v1206_v36, %v8351_v46  ;;  %v702_v40 = vpop.f32.mrf.mxu0  ;;  %v871_v41 = vpop.f32.mrf.mxu1 }
 0x198   :  { %v703_v48 = vadd.f32 %v702_v40, %v8325_v27  ;;  %v872_v49 = vadd.f32 %v871_v41, %v8327_v28  ;;  %v7678_v41 = vld [vmem:[%s11688_s0 + $0xd0] sm:$0xff] }
 0x199   :  { %v2215_v42 = vmax.f32 %v1038_v38, 0.0  ;;  %v2216_v43 = vmax.f32 %v1207_v39, 0.0 }
 0x19a   :  { %6076 = vmatmul.msk.bf16.gmra.mxu0 %vm491_vm1, %v7676_v37  ;;  %6108 = vmatmul.msk.bf16.gmra.mxu1 %vm491_vm1, %v7676_v37  ;;  %v2221_v54 = vmax.f32 %v703_v48, 0.0  ;;  %v2222_v55 = vmax.f32 %v872_v49, 0.0 }
 0x19b   :  { %v8645_v44 = vadd.f32 %v2580_v31, %v2215_v42  ;;  %v8647_v47 = vadd.f32 %v2617_v32, %v2216_v43  ;;  %6140 = vmatmul.msk.bf16.gmra.mxu2 %vm491_vm1, %v7676_v37  ;;  %6172 = vmatmul.msk.bf16.gmra.mxu3 %vm491_vm1, %v7676_v37 }
 0x19e   :  { %v1040_v50 = vpop.f32.mrf.mxu2  ;;  %v1209_v51 = vpop.f32.mrf.mxu3 }
 0x19f   :  { %v704_v52 = vpop.f32.mrf.mxu0  ;;  %v873_v53 = vpop.f32.mrf.mxu1  ;;  %v1041_v62 = vadd.f32 %v1040_v50, %v8349_v45  ;;  %v1210_v63 = vadd.f32 %v1209_v51, %v8351_v46 }
 0x1a0   :  { %v705_v56 = vadd.f32 %v704_v52, %v8325_v27  ;;  %v874_v57 = vadd.f32 %v873_v53, %v8327_v28 }
 0x1a1   :  { %v2223_v9 = vmax.f32 %v1041_v62, 0.0  ;;  %v2224_v10 = vmax.f32 %v1210_v63, 0.0 }
 0x1a2   :  { %v2229_v58 = vmax.f32 %v705_v56, 0.0  ;;  %v2230_v59 = vmax.f32 %v874_v57, 0.0 }
 0x1a4   :  { %v2773_v60 = vadd.f32 %v2229_v58, %v2221_v54  ;;  %v2810_v61 = vadd.f32 %v2230_v59, %v2222_v55 }
 0x1a6   :  { %v1042_v0 = vpop.f32.mrf.mxu2  ;;  %v1211_v1 = vpop.f32.mrf.mxu3 }
 0x1a7   :  { %v1043_v3 = vadd.f32 %v1042_v0, %v8349_v45  ;;  %v1212_v4 = vadd.f32 %v1211_v1, %v8351_v46  ;;  %v707_v5 = vpop.f32.mrf.mxu0  ;;  %v876_v6 = vpop.f32.mrf.mxu1 }
 0x1a8   :  { %v708_v7 = vadd.f32 %v707_v5, %v8325_v27  ;;  %v877_v8 = vadd.f32 %v876_v6, %v8327_v28 }
 0x1a9   :  { %v2231_v11 = vmax.f32 %v1043_v3, 0.0  ;;  %v2232_v12 = vmax.f32 %v1212_v4, 0.0 }
 0x1aa   :  { %v2237_v13 = vmax.f32 %v708_v7, 0.0  ;;  %v2238_v14 = vmax.f32 %v877_v8, 0.0  ;;  %6077 = vmatmul.msk.bf16.gmra.mxu0 %vm491_vm1, %v7677_v2  ;;  %6109 = vmatmul.msk.bf16.gmra.mxu1 %vm491_vm1, %v7677_v2 }
 0x1ab   :  { %v2847_v15 = vadd.f32 %v2231_v11, %v2223_v9  ;;  %v2884_v16 = vadd.f32 %v2232_v12, %v2224_v10  ;;  %6141 = vmatmul.msk.bf16.gmra.mxu2 %vm491_vm1, %v7677_v2  ;;  %6173 = vmatmul.msk.bf16.gmra.mxu3 %vm491_vm1, %v7677_v2 }
 0x1ac   :  { %v2774_v17 = vadd.f32 %v2773_v60, %v2237_v13  ;;  %v2811_v18 = vadd.f32 %v2810_v61, %v2238_v14  ;;  %v7679_v14 = vld [vmem:[%s11688_s0 + $0xd8] sm:$0xff] }
 0x1ae   :  { %v1045_v19 = vpop.f32.mrf.mxu2  ;;  %v1214_v20 = vpop.f32.mrf.mxu3 }
 0x1af   :  { %v1046_v21 = vadd.f32 %v1045_v19, %v8349_v45  ;;  %v1215_v22 = vadd.f32 %v1214_v20, %v8351_v46  ;;  %v709_v23 = vpop.f32.mrf.mxu0  ;;  %v878_v24 = vpop.f32.mrf.mxu1 }
 0x1b0   :  { %v710_v25 = vadd.f32 %v709_v23, %v8325_v27  ;;  %v879_v26 = vadd.f32 %v878_v24, %v8327_v28 }
 0x1b1   :  { %v2239_v29 = vmax.f32 %v1046_v21, 0.0  ;;  %v2240_v30 = vmax.f32 %v1215_v22, 0.0 }
 0x1b2   :  { %v2245_v31 = vmax.f32 %v710_v25, 0.0  ;;  %v2246_v32 = vmax.f32 %v879_v26, 0.0 }
 0x1b3   :  { %v2848_v35 = vadd.f32 %v2847_v15, %v2239_v29  ;;  %v2885_v36 = vadd.f32 %v2884_v16, %v2240_v30 }
 0x1b4   :  { %v2775_v37 = vadd.f32 %v2774_v17, %v2245_v31  ;;  %v2812_v38 = vadd.f32 %v2811_v18, %v2246_v32  ;;  %v5950_v31 = vld [vmem:[%s11687_s1 + $0x18] sm:$0xf] }
 0x1b5   :  { %v7691_v32 = vld [vmem:[%s11687_s1 + $0x34] sm:$0xf0] }
 0x1b6   :  { %v1047_v39 = vpop.f32.mrf.mxu2  ;;  %v1216_v40 = vpop.f32.mrf.mxu3 }
 0x1b7   :  { %v1048_v42 = vadd.f32 %v1047_v39, %v8349_v45  ;;  %v1217_v43 = vadd.f32 %v1216_v40, %v8351_v46  ;;  %v712_v48 = vpop.f32.mrf.mxu0  ;;  %v881_v49 = vpop.f32.mrf.mxu1 }
 0x1b8   :  { %v713_v50 = vadd.f32 %v712_v48, %v8325_v27  ;;  %v882_v51 = vadd.f32 %v881_v49, %v8327_v28 }
 0x1b9   :  { %v2247_v52 = vmax.f32 %v1048_v42, 0.0  ;;  %v2248_v53 = vmax.f32 %v1217_v43, 0.0 }
 0x1ba   :  { %v2253_v54 = vmax.f32 %v713_v50, 0.0  ;;  %v2254_v55 = vmax.f32 %v882_v51, 0.0  ;;  %6078 = vmatmul.msk.bf16.gmra.mxu0 %vm491_vm1, %v7678_v41  ;;  %6110 = vmatmul.msk.bf16.gmra.mxu1 %vm491_vm1, %v7678_v41 }
 0x1bb   :  { %v2849_v56 = vadd.f32 %v2848_v35, %v2247_v52  ;;  %v2886_v57 = vadd.f32 %v2885_v36, %v2248_v53  ;;  %6142 = vmatmul.msk.bf16.gmra.mxu2 %vm491_vm1, %v7678_v41  ;;  %6174 = vmatmul.msk.bf16.gmra.mxu3 %vm491_vm1, %v7678_v41  ;;  %v7687_v35 = vld [vmem:[%s11687_s1 + $0x1c] sm:$0xf]  ;;  %v5951_v36 = vor.u32 %v7691_v32, %v5950_v31 }
 0x1bc   :  { %v2776_v58 = vadd.f32 %v2775_v37, %v2253_v54  ;;  %v2813_v59 = vadd.f32 %v2812_v38, %v2254_v55  ;;  %v5952_v37 = vld [vmem:[%s11687_s1 + $0x38] sm:$0xf0] }
 0x1bd   :  { %v5955_v40 = vor.u32 %v7687_v35, %v5952_v37  ;;  %1634 = vmatpush.bf16.msrb.mxu2 %v5951_v36 }
 0x1be   :  { %v1050_v60 = vpop.f32.mrf.mxu2  ;;  %v1219_v61 = vpop.f32.mrf.mxu3 }
 0x1bf   :  { %v1051_v62 = vadd.f32 %v1050_v60, %v8349_v45  ;;  %v1220_v63 = vadd.f32 %v1219_v61, %v8351_v46  ;;  %v714_v0 = vpop.f32.mrf.mxu0  ;;  %v883_v1 = vpop.f32.mrf.mxu1  ;;  %1803 = vmatpush.bf16.msrb.mxu3 %v5955_v40  ;;  %v7690_v60 = vld [vmem:[%s11687_s1 + $0x2c] sm:$0xf0]  ;;  %v7686_v61 = vld [vmem:[%s11687_s1 + $0x14] sm:$0xf]  ;;  %v7681_v40 = vld [vmem:[%s11688_s0 + $0xe8] sm:$0xff] }
 0x1c0   :  { %v715_v2 = vadd.f32 %v714_v0, %v8325_v27  ;;  %v884_v3 = vadd.f32 %v883_v1, %v8327_v28 }
 0x1c1   :  { %v2255_v4 = vmax.f32 %v1051_v62, 0.0  ;;  %v2256_v5 = vmax.f32 %v1220_v63, 0.0  ;;  %v5944_v63 = vld [vmem:[%s11687_s1 + $0x30] sm:$0xf0] }
 0x1c2   :  { %v2261_v6 = vmax.f32 %v715_v2, 0.0  ;;  %v2262_v7 = vmax.f32 %v884_v3, 0.0  ;;  %v7680_v2 = vld [vmem:[%s11688_s0 + $0xe0] sm:$0xff]  ;;  %v5947_v3 = vor.u32 %v7686_v61, %v5944_v63 }
 0x1c3   :  { %v2850_v8 = vadd.f32 %v2849_v56, %v2255_v4  ;;  %v2887_v9 = vadd.f32 %v2886_v57, %v2256_v5 }
 0x1c4   :  { %v2777_v10 = vadd.f32 %v2776_v58, %v2261_v6  ;;  %v2814_v11 = vadd.f32 %v2813_v59, %v2262_v7  ;;  %v5942_v59 = vld [vmem:[%s11687_s1 + $0x10] sm:$0xf]  ;;  %1465 = vmatpush.bf16.msrb.mxu1 %v5947_v3 }
 0x1c5   :  { %v5943_v62 = vor.u32 %v7690_v60, %v5942_v59 }
 0x1c6   :  { %v1052_v12 = vpop.f32.mrf.mxu2  ;;  %v1221_v13 = vpop.f32.mrf.mxu3 }
 0x1c7   :  { %v1053_v15 = vadd.f32 %v1052_v12, %v8349_v45  ;;  %v1222_v16 = vadd.f32 %v1221_v13, %v8351_v46  ;;  %v717_v17 = vpop.f32.mrf.mxu0  ;;  %v886_v18 = vpop.f32.mrf.mxu1  ;;  %1296 = vmatpush.bf16.msrb.mxu0 %v5943_v62 }
 0x1c8   :  { %v718_v19 = vadd.f32 %v717_v17, %v8325_v27  ;;  %v887_v20 = vadd.f32 %v886_v18, %v8327_v28 }
 0x1c9   :  { %v2263_v21 = vmax.f32 %v1053_v15, 0.0  ;;  %v2264_v22 = vmax.f32 %v1222_v16, 0.0 }
 0x1ca   :  { %v2269_v23 = vmax.f32 %v718_v19, 0.0  ;;  %v2270_v24 = vmax.f32 %v887_v20, 0.0  ;;  %6079 = vmatmul.msk.bf16.gmra.mxu0 %vm491_vm1, %v7679_v14  ;;  %6111 = vmatmul.msk.bf16.gmra.mxu1 %vm491_vm1, %v7679_v14 }
 0x1cb   :  { %v2851_v25 = vadd.f32 %v2850_v8, %v2263_v21  ;;  %v2888_v26 = vadd.f32 %v2887_v9, %v2264_v22  ;;  %6143 = vmatmul.msk.bf16.gmra.mxu2 %vm491_vm1, %v7679_v14  ;;  %6175 = vmatmul.msk.bf16.gmra.mxu3 %vm491_vm1, %v7679_v14 }
 0x1cc   :  { %v2778_v29 = vadd.f32 %v2777_v10, %v2269_v23  ;;  %v2815_v30 = vadd.f32 %v2814_v11, %v2270_v24 }
 0x1ce   :  { %v1055_v38 = vpop.f32.mrf.mxu2  ;;  %v1224_v39 = vpop.f32.mrf.mxu3 }
 0x1cf   :  { %v1056_v41 = vadd.f32 %v1055_v38, %v8349_v45  ;;  %v1225_v42 = vadd.f32 %v1224_v39, %v8351_v46  ;;  %v719_v43 = vpop.f32.mrf.mxu0  ;;  %v888_v48 = vpop.f32.mrf.mxu1 }
 0x1d0   :  { %v720_v49 = vadd.f32 %v719_v43, %v8325_v27  ;;  %v889_v50 = vadd.f32 %v888_v48, %v8327_v28 }
 0x1d1   :  { %v2271_v51 = vmax.f32 %v1056_v41, 0.0  ;;  %v2272_v52 = vmax.f32 %v1225_v42, 0.0 }
 0x1d2   :  { %v2277_v53 = vmax.f32 %v720_v49, 0.0  ;;  %v2278_v54 = vmax.f32 %v889_v50, 0.0 }
 0x1d3   :  { %v2852_v55 = vadd.f32 %v2851_v25, %v2271_v51  ;;  %v2889_v56 = vadd.f32 %v2888_v26, %v2272_v52 }
 0x1d4   :  { %v2779_v57 = vadd.f32 %v2778_v29, %v2277_v53  ;;  %v2816_v58 = vadd.f32 %v2815_v30, %v2278_v54 }
 0x1d6   :  { %v1057_v0 = vpop.f32.mrf.mxu2  ;;  %v1226_v1 = vpop.f32.mrf.mxu3 }
 0x1d7   :  { %v1058_v4 = vadd.f32 %v1057_v0, %v8349_v45  ;;  %v1227_v5 = vadd.f32 %v1226_v1, %v8351_v46  ;;  %v722_v6 = vpop.f32.mrf.mxu0  ;;  %v891_v7 = vpop.f32.mrf.mxu1 }
 0x1d8   :  { %v723_v8 = vadd.f32 %v722_v6, %v8325_v27  ;;  %v892_v9 = vadd.f32 %v891_v7, %v8327_v28 }
 0x1d9   :  { %v2279_v10 = vmax.f32 %v1058_v4, 0.0  ;;  %v2280_v11 = vmax.f32 %v1227_v5, 0.0 }
 0x1da   :  { %v2285_v12 = vmax.f32 %v723_v8, 0.0  ;;  %v2286_v13 = vmax.f32 %v892_v9, 0.0  ;;  %6080 = vmatmul.msk.bf16.gmra.mxu0 %vm491_vm1, %v7680_v2  ;;  %6112 = vmatmul.msk.bf16.gmra.mxu1 %vm491_vm1, %v7680_v2 }
 0x1db   :  { %v2853_v14 = vadd.f32 %v2852_v55, %v2279_v10  ;;  %v2890_v15 = vadd.f32 %v2889_v56, %v2280_v11  ;;  %6144 = vmatmul.msk.bf16.gmra.mxu2 %vm491_vm1, %v7680_v2  ;;  %6176 = vmatmul.msk.bf16.gmra.mxu3 %vm491_vm1, %v7680_v2 }
 0x1dc   :  { %v2780_v16 = vadd.f32 %v2779_v57, %v2285_v12  ;;  %v2817_v17 = vadd.f32 %v2816_v58, %v2286_v13  ;;  %v7682_v13 = vld [vmem:[%s11688_s0 + $0xf0] sm:$0xff] }
 0x1de   :  { %v1060_v18 = vpop.f32.mrf.mxu2  ;;  %v1229_v19 = vpop.f32.mrf.mxu3 }
 0x1df   :  { %v1061_v20 = vadd.f32 %v1060_v18, %v8349_v45  ;;  %v1230_v21 = vadd.f32 %v1229_v19, %v8351_v46  ;;  %v724_v22 = vpop.f32.mrf.mxu0  ;;  %v893_v23 = vpop.f32.mrf.mxu1 }
 0x1e0   :  { %v725_v24 = vadd.f32 %v724_v22, %v8325_v27  ;;  %v894_v25 = vadd.f32 %v893_v23, %v8327_v28 }
 0x1e1   :  { %v2287_v26 = vmax.f32 %v1061_v20, 0.0  ;;  %v2288_v29 = vmax.f32 %v1230_v21, 0.0 }
 0x1e2   :  { %v2293_v30 = vmax.f32 %v725_v24, 0.0  ;;  %v2294_v31 = vmax.f32 %v894_v25, 0.0 }
 0x1e3   :  { %v2854_v32 = vadd.f32 %v2853_v14, %v2287_v26  ;;  %v2891_v35 = vadd.f32 %v2890_v15, %v2288_v29 }
 0x1e4   :  { %v2781_v36 = vadd.f32 %v2780_v16, %v2293_v30  ;;  %v2818_v37 = vadd.f32 %v2817_v17, %v2294_v31 }
 0x1e6   :  { %v1062_v38 = vpop.f32.mrf.mxu2  ;;  %v1231_v39 = vpop.f32.mrf.mxu3 }
 0x1e7   :  { %v1063_v41 = vadd.f32 %v1062_v38, %v8349_v45  ;;  %v1232_v42 = vadd.f32 %v1231_v39, %v8351_v46  ;;  %v727_v43 = vpop.f32.mrf.mxu0  ;;  %v896_v48 = vpop.f32.mrf.mxu1 }
 0x1e8   :  { %v728_v49 = vadd.f32 %v727_v43, %v8325_v27  ;;  %v897_v50 = vadd.f32 %v896_v48, %v8327_v28 }
 0x1e9   :  { %v2295_v51 = vmax.f32 %v1063_v41, 0.0  ;;  %v2296_v52 = vmax.f32 %v1232_v42, 0.0 }
 0x1ea   :  { %v2301_v53 = vmax.f32 %v728_v49, 0.0  ;;  %v2302_v54 = vmax.f32 %v897_v50, 0.0  ;;  %6081 = vmatmul.msk.bf16.gmra.mxu0 %vm491_vm1, %v7681_v40  ;;  %6113 = vmatmul.msk.bf16.gmra.mxu1 %vm491_vm1, %v7681_v40 }
 0x1eb   :  { %v2855_v55 = vadd.f32 %v2854_v32, %v2295_v51  ;;  %v2892_v56 = vadd.f32 %v2891_v35, %v2296_v52  ;;  %6145 = vmatmul.msk.bf16.gmra.mxu2 %vm491_vm1, %v7681_v40  ;;  %6177 = vmatmul.msk.bf16.gmra.mxu3 %vm491_vm1, %v7681_v40 }
 0x1ec   :  { %v2782_v57 = vadd.f32 %v2781_v36, %v2301_v53  ;;  %v2819_v58 = vadd.f32 %v2818_v37, %v2302_v54  ;;  %v7683_v54 = vld [vmem:[%s11688_s0 + $0xf8] sm:$0xff] }
 0x1ee   :  { %v1065_v59 = vpop.f32.mrf.mxu2  ;;  %v1234_v60 = vpop.f32.mrf.mxu3 }
 0x1ef   :  { %v1066_v61 = vadd.f32 %v1065_v59, %v8349_v45  ;;  %v1235_v62 = vadd.f32 %v1234_v60, %v8351_v46  ;;  %v729_v63 = vpop.f32.mrf.mxu0  ;;  %v898_v0 = vpop.f32.mrf.mxu1 }
 0x1f0   :  { %v730_v1 = vadd.f32 %v729_v63, %v8325_v27  ;;  %v899_v2 = vadd.f32 %v898_v0, %v8327_v28 }
 0x1f1   :  { %v2303_v3 = vmax.f32 %v1066_v61, 0.0  ;;  %v2304_v4 = vmax.f32 %v1235_v62, 0.0 }
 0x1f2   :  { %v2309_v5 = vmax.f32 %v730_v1, 0.0  ;;  %v2310_v6 = vmax.f32 %v899_v2, 0.0 }
 0x1f3   :  { %v2856_v7 = vadd.f32 %v2855_v55, %v2303_v3  ;;  %v2893_v8 = vadd.f32 %v2892_v56, %v2304_v4 }
 0x1f4   :  { %v2783_v9 = vadd.f32 %v2782_v57, %v2309_v5  ;;  %v2820_v10 = vadd.f32 %v2819_v58, %v2310_v6 }
 0x1f6   :  { %v1067_v11 = vpop.f32.mrf.mxu2  ;;  %v1236_v12 = vpop.f32.mrf.mxu3 }
 0x1f7   :  { %v1068_v14 = vadd.f32 %v1067_v11, %v8349_v45  ;;  %v1237_v15 = vadd.f32 %v1236_v12, %v8351_v46  ;;  %v732_v16 = vpop.f32.mrf.mxu0  ;;  %v901_v17 = vpop.f32.mrf.mxu1 }
 0x1f8   :  { %v733_v18 = vadd.f32 %v732_v16, %v8325_v27  ;;  %v902_v19 = vadd.f32 %v901_v17, %v8327_v28 }
 0x1f9   :  { %v2311_v20 = vmax.f32 %v1068_v14, 0.0  ;;  %v2312_v21 = vmax.f32 %v1237_v15, 0.0 }
 0x1fa   :  { %v2317_v22 = vmax.f32 %v733_v18, 0.0  ;;  %v2318_v23 = vmax.f32 %v902_v19, 0.0  ;;  %6082 = vmatmul.msk.bf16.gmra.mxu0 %vm491_vm1, %v7682_v13  ;;  %6114 = vmatmul.msk.bf16.gmra.mxu1 %vm491_vm1, %v7682_v13 }
 0x1fb   :  { %v2857_v24 = vadd.f32 %v2856_v7, %v2311_v20  ;;  %v2894_v25 = vadd.f32 %v2893_v8, %v2312_v21  ;;  %6146 = vmatmul.msk.bf16.gmra.mxu2 %vm491_vm1, %v7682_v13  ;;  %6178 = vmatmul.msk.bf16.gmra.mxu3 %vm491_vm1, %v7682_v13 }
 0x1fc   :  { %v2784_v26 = vadd.f32 %v2783_v9, %v2317_v22  ;;  %v2821_v29 = vadd.f32 %v2820_v10, %v2318_v23 }
 0x1fe   :  { %v1070_v30 = vpop.f32.mrf.mxu2  ;;  %v1239_v31 = vpop.f32.mrf.mxu3 }
 0x1ff   :  { %v1071_v32 = vadd.f32 %v1070_v30, %v8349_v45  ;;  %v1240_v35 = vadd.f32 %v1239_v31, %v8351_v46  ;;  %v734_v36 = vpop.f32.mrf.mxu0  ;;  %v903_v37 = vpop.f32.mrf.mxu1 }
 0x200   :  { %v735_v38 = vadd.f32 %v734_v36, %v8325_v27  ;;  %v904_v39 = vadd.f32 %v903_v37, %v8327_v28  ;;  %v8056_v37 = vld [vmem:[%s11688_s0] sm:$0xff] }
 0x201   :  { %v2319_v40 = vmax.f32 %v1071_v32, 0.0  ;;  %v2320_v41 = vmax.f32 %v1240_v35, 0.0 }
 0x202   :  { %v2325_v42 = vmax.f32 %v735_v38, 0.0  ;;  %v2326_v43 = vmax.f32 %v904_v39, 0.0 }
 0x203   :  { %v2858_v48 = vadd.f32 %v2857_v24, %v2319_v40  ;;  %v2895_v49 = vadd.f32 %v2894_v25, %v2320_v41 }
 0x204   :  { %v2785_v50 = vadd.f32 %v2784_v26, %v2325_v42  ;;  %v2822_v51 = vadd.f32 %v2821_v29, %v2326_v43 }
 0x206   :  { %v1072_v52 = vpop.f32.mrf.mxu2  ;;  %v1241_v53 = vpop.f32.mrf.mxu3 }
 0x207   :  { %v1073_v55 = vadd.f32 %v1072_v52, %v8349_v45  ;;  %v1242_v56 = vadd.f32 %v1241_v53, %v8351_v46  ;;  %v737_v57 = vpop.f32.mrf.mxu0  ;;  %v906_v58 = vpop.f32.mrf.mxu1 }
 0x208   :  { %v738_v59 = vadd.f32 %v737_v57, %v8325_v27  ;;  %v907_v60 = vadd.f32 %v906_v58, %v8327_v28 }
 0x209   :  { %v2327_v61 = vmax.f32 %v1073_v55, 0.0  ;;  %v2328_v62 = vmax.f32 %v1242_v56, 0.0 }
 0x20a   :  { %v2333_v63 = vmax.f32 %v738_v59, 0.0  ;;  %v2334_v0 = vmax.f32 %v907_v60, 0.0  ;;  %6083 = vmatmul.msk.bf16.gmra.mxu0 %vm491_vm1, %v7683_v54  ;;  %6115 = vmatmul.msk.bf16.gmra.mxu1 %vm491_vm1, %v7683_v54 }
 0x20b   :  { %v2859_v1 = vadd.f32 %v2858_v48, %v2327_v61  ;;  %v2896_v2 = vadd.f32 %v2895_v49, %v2328_v62  ;;  %6147 = vmatmul.msk.bf16.gmra.mxu2 %vm491_vm1, %v7683_v54  ;;  %6179 = vmatmul.msk.bf16.gmra.mxu3 %vm491_vm1, %v7683_v54 }
 0x20c   :  { %v2786_v3 = vadd.f32 %v2785_v50, %v2333_v63  ;;  %v2823_v4 = vadd.f32 %v2822_v51, %v2334_v0 }
 0x20e   :  { %v1075_v5 = vpop.f32.mrf.mxu2  ;;  %v1244_v6 = vpop.f32.mrf.mxu3 }
 0x20f   :  { %v1076_v7 = vadd.f32 %v1075_v5, %v8349_v45  ;;  %v1245_v8 = vadd.f32 %v1244_v6, %v8351_v46  ;;  %v739_v9 = vpop.f32.mrf.mxu0  ;;  %v908_v10 = vpop.f32.mrf.mxu1 }
 0x210   :  { %v740_v11 = vadd.f32 %v739_v9, %v8325_v27  ;;  %v909_v12 = vadd.f32 %v908_v10, %v8327_v28  ;;  %v8057_v10 = vld [vmem:[%s11688_s0 + $0x8] sm:$0xff] }
 0x211   :  { %v2335_v13 = vmax.f32 %v1076_v7, 0.0  ;;  %v2336_v14 = vmax.f32 %v1245_v8, 0.0 }
 0x212   :  { %v2341_v15 = vmax.f32 %v740_v11, 0.0  ;;  %v2342_v16 = vmax.f32 %v909_v12, 0.0 }
 0x213   :  { %v2860_v17 = vadd.f32 %v2859_v1, %v2335_v13  ;;  %v2897_v18 = vadd.f32 %v2896_v2, %v2336_v14 }
 0x214   :  { %v2787_v19 = vadd.f32 %v2786_v3, %v2341_v15  ;;  %v2824_v20 = vadd.f32 %v2823_v4, %v2342_v16 }
 0x216   :  { %v1077_v21 = vpop.f32.mrf.mxu2  ;;  %v1246_v22 = vpop.f32.mrf.mxu3 }
 0x217   :  { %v1078_v23 = vadd.f32 %v1077_v21, %v8349_v45  ;;  %v1247_v24 = vadd.f32 %v1246_v22, %v8351_v46  ;;  %v742_v25 = vpop.f32.mrf.mxu0  ;;  %v911_v26 = vpop.f32.mrf.mxu1 }
 0x218   :  { %v743_v29 = vadd.f32 %v742_v25, %v8325_v27  ;;  %v912_v30 = vadd.f32 %v911_v26, %v8327_v28 }
 0x219   :  { %v2343_v31 = vmax.f32 %v1078_v23, 0.0  ;;  %v2344_v32 = vmax.f32 %v1247_v24, 0.0 }
 0x21a   :  { %v2349_v35 = vmax.f32 %v743_v29, 0.0  ;;  %v2350_v36 = vmax.f32 %v912_v30, 0.0  ;;  %6180 = vmatmul.msk.bf16.vlgmr.msrb.gmra.mxu0 %vm491_vm1, %v8056_v37  ;;  %6212 = vmatmul.msk.bf16.vlgmr.msrb.gmra.mxu1 %vm491_vm1, %v8056_v37 }
 0x21b   :  { %v2861_v38 = vadd.f32 %v2860_v17, %v2343_v31  ;;  %v2898_v39 = vadd.f32 %v2897_v18, %v2344_v32  ;;  %6244 = vmatmul.msk.bf16.vlgmr.msrb.gmra.mxu2 %vm491_vm1, %v8056_v37  ;;  %6276 = vmatmul.msk.bf16.vlgmr.msrb.gmra.mxu3 %vm491_vm1, %v8056_v37 }
 0x21c   :  { %v2788_v40 = vadd.f32 %v2787_v19, %v2349_v35  ;;  %v2825_v41 = vadd.f32 %v2824_v20, %v2350_v36 }
 0x21e   :  { %v1080_v42 = vpop.f32.mrf.mxu2  ;;  %v1249_v43 = vpop.f32.mrf.mxu3 }
 0x21f   :  { %v1081_v48 = vadd.f32 %v1080_v42, %v8349_v45  ;;  %v1250_v49 = vadd.f32 %v1249_v43, %v8351_v46  ;;  %v744_v50 = vpop.f32.mrf.mxu0  ;;  %v913_v51 = vpop.f32.mrf.mxu1 }
 0x220   :  { %v745_v52 = vadd.f32 %v744_v50, %v8325_v27  ;;  %v914_v53 = vadd.f32 %v913_v51, %v8327_v28  ;;  %v8058_v50 = vld [vmem:[%s11688_s0 + $0x10] sm:$0xff] }
 0x221   :  { %v2351_v54 = vmax.f32 %v1081_v48, 0.0  ;;  %v2352_v55 = vmax.f32 %v1250_v49, 0.0 }
 0x222   :  { %v2357_v56 = vmax.f32 %v745_v52, 0.0  ;;  %v2358_v57 = vmax.f32 %v914_v53, 0.0 }
 0x223   :  { %v2862_v58 = vadd.f32 %v2861_v38, %v2351_v54  ;;  %v2899_v59 = vadd.f32 %v2898_v39, %v2352_v55 }
 0x224   :  { %v2789_v60 = vadd.f32 %v2788_v40, %v2357_v56  ;;  %v2826_v61 = vadd.f32 %v2825_v41, %v2358_v57 }
 0x226   :  { %v1082_v62 = vpop.f32.mrf.mxu2  ;;  %v1251_v63 = vpop.f32.mrf.mxu3 }
 0x227   :  { %v1083_v0 = vadd.f32 %v1082_v62, %v8349_v45  ;;  %v1252_v1 = vadd.f32 %v1251_v63, %v8351_v46  ;;  %v747_v2 = vpop.f32.mrf.mxu0  ;;  %v916_v3 = vpop.f32.mrf.mxu1 }
 0x228   :  { %v748_v4 = vadd.f32 %v747_v2, %v8325_v27  ;;  %v917_v5 = vadd.f32 %v916_v3, %v8327_v28 }
 0x229   :  { %v2359_v6 = vmax.f32 %v1083_v0, 0.0  ;;  %v2360_v7 = vmax.f32 %v1252_v1, 0.0 }
 0x22a   :  { %v2365_v8 = vmax.f32 %v748_v4, 0.0  ;;  %v2366_v9 = vmax.f32 %v917_v5, 0.0  ;;  %6181 = vmatmul.msk.bf16.gmra.mxu0 %vm491_vm1, %v8057_v10  ;;  %6213 = vmatmul.msk.bf16.gmra.mxu1 %vm491_vm1, %v8057_v10 }
 0x22b   :  { %v2863_v11 = vadd.f32 %v2862_v58, %v2359_v6  ;;  %v2900_v12 = vadd.f32 %v2899_v59, %v2360_v7  ;;  %6245 = vmatmul.msk.bf16.gmra.mxu2 %vm491_vm1, %v8057_v10  ;;  %6277 = vmatmul.msk.bf16.gmra.mxu3 %vm491_vm1, %v8057_v10 }
 0x22c   :  { %v2790_v13 = vadd.f32 %v2789_v60, %v2365_v8  ;;  %v2827_v14 = vadd.f32 %v2826_v61, %v2366_v9 }
 0x22e   :  { %v1085_v15 = vpop.f32.mrf.mxu2  ;;  %v1254_v17 = vpop.f32.mrf.mxu3 }
 0x22f   :  { %v1086_v16 = vadd.f32 %v1085_v15, %v8349_v45  ;;  %v749_v18 = vpop.f32.mrf.mxu0  ;;  %v1255_v19 = vadd.f32 %v1254_v17, %v8351_v46  ;;  %v918_v21 = vpop.f32.mrf.mxu1 }
 0x230   :  { %v750_v20 = vadd.f32 %v749_v18, %v8325_v27  ;;  %v919_v23 = vadd.f32 %v918_v21, %v8327_v28 }
 0x231   :  { %v2367_v22 = vmax.f32 %v1086_v16, 0.0  ;;  %v2368_v24 = vmax.f32 %v1255_v19, 0.0  ;;  %v8059_v19 = vld [vmem:[%s11688_s0 + $0x18] sm:$0xff] }
 0x232   :  { %v2373_v25 = vmax.f32 %v750_v20, 0.0  ;;  %v2374_v29 = vmax.f32 %v919_v23, 0.0 }
 0x233   :  { %v2864_v26 = vadd.f32 %v2863_v11, %v2367_v22  ;;  %v2901_v30 = vadd.f32 %v2900_v12, %v2368_v24 }
 0x234   :  { %v2791_v31 = vadd.f32 %v2790_v13, %v2373_v25  ;;  %v2828_v32 = vadd.f32 %v2827_v14, %v2374_v29 }
 0x236   :  { %v1087_v35 = vpop.f32.mrf.mxu2  ;;  %v1256_v37 = vpop.f32.mrf.mxu3 }
 0x237   :  { %v1088_v36 = vadd.f32 %v1087_v35, %v8349_v45  ;;  %v752_v38 = vpop.f32.mrf.mxu0  ;;  %v1257_v39 = vadd.f32 %v1256_v37, %v8351_v46  ;;  %v921_v41 = vpop.f32.mrf.mxu1 }
 0x238   :  { %v753_v40 = vadd.f32 %v752_v38, %v8325_v27  ;;  %v922_v43 = vadd.f32 %v921_v41, %v8327_v28 }
 0x239   :  { %v2375_v42 = vmax.f32 %v1088_v36, 0.0  ;;  %v2376_v48 = vmax.f32 %v1257_v39, 0.0 }
 0x23a   :  { %v2381_v49 = vmax.f32 %v753_v40, 0.0  ;;  %6182 = vmatmul.msk.bf16.gmra.mxu0 %vm491_vm1, %v8058_v50  ;;  %6214 = vmatmul.msk.bf16.gmra.mxu1 %vm491_vm1, %v8058_v50  ;;  %v2382_v52 = vmax.f32 %v922_v43, 0.0 }
 0x23b   :  { %v2865_v51 = vadd.f32 %v2864_v26, %v2375_v42  ;;  %6246 = vmatmul.msk.bf16.gmra.mxu2 %vm491_vm1, %v8058_v50  ;;  %v2902_v53 = vadd.f32 %v2901_v30, %v2376_v48  ;;  %6278 = vmatmul.msk.bf16.gmra.mxu3 %vm491_vm1, %v8058_v50 }
 0x23c   :  { %v2792_v54 = vadd.f32 %v2791_v31, %v2381_v49  ;;  %v2829_v55 = vadd.f32 %v2828_v32, %v2382_v52 }
 0x23e   :  { %v1090_v56 = vpop.f32.mrf.mxu2  ;;  %v1259_v58 = vpop.f32.mrf.mxu3 }
 0x23f   :  { %v1091_v57 = vadd.f32 %v1090_v56, %v8349_v45  ;;  %v754_v59 = vpop.f32.mrf.mxu0  ;;  %v1260_v60 = vadd.f32 %v1259_v58, %v8351_v46  ;;  %v923_v62 = vpop.f32.mrf.mxu1 }
 0x240   :  { %v755_v61 = vadd.f32 %v754_v59, %v8325_v27  ;;  %v924_v0 = vadd.f32 %v923_v62, %v8327_v28 }
 0x241   :  { %v2383_v63 = vmax.f32 %v1091_v57, 0.0  ;;  %v2384_v1 = vmax.f32 %v1260_v60, 0.0  ;;  %v8060_v60 = vld [vmem:[%s11688_s0 + $0x20] sm:$0xff] }
 0x242   :  { %v2389_v2 = vmax.f32 %v755_v61, 0.0  ;;  %v2390_v4 = vmax.f32 %v924_v0, 0.0 }
 0x243   :  { %v2866_v3 = vadd.f32 %v2865_v51, %v2383_v63  ;;  %v2903_v5 = vadd.f32 %v2902_v53, %v2384_v1 }
 0x244   :  { %v2793_v6 = vadd.f32 %v2792_v54, %v2389_v2  ;;  %v2830_v7 = vadd.f32 %v2829_v55, %v2390_v4 }
 0x246   :  { %v1092_v8 = vpop.f32.mrf.mxu2  ;;  %v1261_v10 = vpop.f32.mrf.mxu3 }
 0x247   :  { %v1093_v9 = vadd.f32 %v1092_v8, %v8349_v45  ;;  %v757_v11 = vpop.f32.mrf.mxu0  ;;  %v1262_v12 = vadd.f32 %v1261_v10, %v8351_v46  ;;  %v926_v14 = vpop.f32.mrf.mxu1 }
 0x248   :  { %v758_v13 = vadd.f32 %v757_v11, %v8325_v27  ;;  %v927_v16 = vadd.f32 %v926_v14, %v8327_v28 }
 0x249   :  { %v2391_v15 = vmax.f32 %v1093_v9, 0.0  ;;  %v2392_v17 = vmax.f32 %v1262_v12, 0.0 }
 0x24a   :  { %v2397_v18 = vmax.f32 %v758_v13, 0.0  ;;  %6183 = vmatmul.msk.bf16.gmra.mxu0 %vm491_vm1, %v8059_v19  ;;  %6215 = vmatmul.msk.bf16.gmra.mxu1 %vm491_vm1, %v8059_v19  ;;  %v2398_v21 = vmax.f32 %v927_v16, 0.0 }
 0x24b   :  { %v2867_v20 = vadd.f32 %v2866_v3, %v2391_v15  ;;  %6247 = vmatmul.msk.bf16.gmra.mxu2 %vm491_vm1, %v8059_v19  ;;  %v2904_v22 = vadd.f32 %v2903_v5, %v2392_v17  ;;  %6279 = vmatmul.msk.bf16.gmra.mxu3 %vm491_vm1, %v8059_v19 }
 0x24c   :  { %v2794_v23 = vadd.f32 %v2793_v6, %v2397_v18  ;;  %v2831_v24 = vadd.f32 %v2830_v7, %v2398_v21 }
 0x24e   :  { %v1095_v25 = vpop.f32.mrf.mxu2  ;;  %v1264_v29 = vpop.f32.mrf.mxu3 }
 0x24f   :  { %v1096_v26 = vadd.f32 %v1095_v25, %v8349_v45  ;;  %v759_v30 = vpop.f32.mrf.mxu0  ;;  %v1265_v31 = vadd.f32 %v1264_v29, %v8351_v46  ;;  %v928_v35 = vpop.f32.mrf.mxu1 }
 0x250   :  { %v760_v32 = vadd.f32 %v759_v30, %v8325_v27  ;;  %v929_v37 = vadd.f32 %v928_v35, %v8327_v28 }
 0x251   :  { %v2399_v36 = vmax.f32 %v1096_v26, 0.0  ;;  %v2400_v38 = vmax.f32 %v1265_v31, 0.0  ;;  %v8061_v31 = vld [vmem:[%s11688_s0 + $0x28] sm:$0xff] }
 0x252   :  { %v2405_v39 = vmax.f32 %v760_v32, 0.0  ;;  %v2406_v41 = vmax.f32 %v929_v37, 0.0 }
 0x253   :  { %v2868_v40 = vadd.f32 %v2867_v20, %v2399_v36  ;;  %v2905_v42 = vadd.f32 %v2904_v22, %v2400_v38 }
 0x254   :  { %v2795_v43 = vadd.f32 %v2794_v23, %v2405_v39  ;;  %v2832_v48 = vadd.f32 %v2831_v24, %v2406_v41 }
 0x256   :  { %v1097_v49 = vpop.f32.mrf.mxu2  ;;  %v1266_v51 = vpop.f32.mrf.mxu3 }
 0x257   :  { %v1098_v50 = vadd.f32 %v1097_v49, %v8349_v45  ;;  %v762_v52 = vpop.f32.mrf.mxu0  ;;  %v1267_v53 = vadd.f32 %v1266_v51, %v8351_v46  ;;  %v931_v55 = vpop.f32.mrf.mxu1 }
 0x258   :  { %v763_v54 = vadd.f32 %v762_v52, %v8325_v27  ;;  %v932_v57 = vadd.f32 %v931_v55, %v8327_v28 }
 0x259   :  { %v2407_v56 = vmax.f32 %v1098_v50, 0.0  ;;  %v2408_v58 = vmax.f32 %v1267_v53, 0.0 }
 0x25a   :  { %v2413_v59 = vmax.f32 %v763_v54, 0.0  ;;  %6184 = vmatmul.msk.bf16.gmra.mxu0 %vm491_vm1, %v8060_v60  ;;  %6216 = vmatmul.msk.bf16.gmra.mxu1 %vm491_vm1, %v8060_v60  ;;  %v2414_v62 = vmax.f32 %v932_v57, 0.0 }
 0x25b   :  { %v2869_v61 = vadd.f32 %v2868_v40, %v2407_v56  ;;  %6248 = vmatmul.msk.bf16.gmra.mxu2 %vm491_vm1, %v8060_v60  ;;  %v2906_v63 = vadd.f32 %v2905_v42, %v2408_v58  ;;  %6280 = vmatmul.msk.bf16.gmra.mxu3 %vm491_vm1, %v8060_v60 }
 0x25c   :  { %v2796_v0 = vadd.f32 %v2795_v43, %v2413_v59  ;;  %v2833_v1 = vadd.f32 %v2832_v48, %v2414_v62 }
 0x25e   :  { %v1100_v2 = vpop.f32.mrf.mxu2  ;;  %v1269_v4 = vpop.f32.mrf.mxu3 }
 0x25f   :  { %v1101_v3 = vadd.f32 %v1100_v2, %v8349_v45  ;;  %v764_v5 = vpop.f32.mrf.mxu0  ;;  %v1270_v6 = vadd.f32 %v1269_v4, %v8351_v46  ;;  %v933_v8 = vpop.f32.mrf.mxu1 }
 0x260   :  { %v765_v7 = vadd.f32 %v764_v5, %v8325_v27  ;;  %v934_v10 = vadd.f32 %v933_v8, %v8327_v28 }
 0x261   :  { %v2415_v9 = vmax.f32 %v1101_v3, 0.0  ;;  %v2416_v11 = vmax.f32 %v1270_v6, 0.0 }
 0x262   :  { %v2421_v12 = vmax.f32 %v765_v7, 0.0  ;;  %v2422_v14 = vmax.f32 %v934_v10, 0.0  ;;  %v8062_v7 = vld [vmem:[%s11688_s0 + $0x30] sm:$0xff]  ;;  %v2508_v10 = vrot.slane %v8634_v33, 4 }
 0x263   :  { %v2870_v13 = vadd.f32 %v2869_v61, %v2415_v9  ;;  %v2907_v15 = vadd.f32 %v2906_v63, %v2416_v11  ;;  %v8090_v63 = vmov 256.0  }
 0x264   :  { %v2797_v16 = vadd.f32 %v2796_v0, %v2421_v12  ;;  %v2834_v17 = vadd.f32 %v2833_v1, %v2422_v14  ;;  %8054 = vrcp.f32 %v8090_v63 }
 0x266   :  { %v1102_v18 = vpop.f32.mrf.mxu2  ;;  %v1271_v20 = vpop.f32.mrf.mxu3 }
 0x267   :  { %v1103_v19 = vadd.f32 %v1102_v18, %v8349_v45  ;;  %v767_v21 = vpop.f32.mrf.mxu0  ;;  %v1272_v22 = vadd.f32 %v1271_v20, %v8351_v46  ;;  %v936_v24 = vpop.f32.mrf.mxu1  ;;  %v2509_v20 = vadd.f32 %v2508_v10, %v8634_v33 }
 0x268   :  { %v768_v23 = vadd.f32 %v767_v21, %v8325_v27  ;;  %v937_v26 = vadd.f32 %v936_v24, %v8327_v28 }
 0x269   :  { %v2423_v25 = vmax.f32 %v1103_v19, 0.0  ;;  %v2424_v29 = vmax.f32 %v1272_v22, 0.0 }
 0x26a   :  { %v2429_v30 = vmax.f32 %v768_v23, 0.0  ;;  %6185 = vmatmul.msk.bf16.gmra.mxu0 %vm491_vm1, %v8061_v31  ;;  %6217 = vmatmul.msk.bf16.gmra.mxu1 %vm491_vm1, %v8061_v31  ;;  %v2430_v35 = vmax.f32 %v937_v26, 0.0 }
 0x26b   :  { %v2871_v32 = vadd.f32 %v2870_v13, %v2423_v25  ;;  %6249 = vmatmul.msk.bf16.gmra.mxu2 %vm491_vm1, %v8061_v31  ;;  %v2908_v36 = vadd.f32 %v2907_v15, %v2424_v29  ;;  %6281 = vmatmul.msk.bf16.gmra.mxu3 %vm491_vm1, %v8061_v31  ;;  %v2545_v13 = vrot.slane %v8636_v34, 4  ;;  %v8889_v15 = vpop.eup %8054 }
 0x26c   :  { %v2798_v37 = vadd.f32 %v2797_v16, %v2429_v30  ;;  %v2835_v38 = vadd.f32 %v2834_v17, %v2430_v35  ;;  %v3070_v24 = vmul.f32 256.0, %v8889_v15  ;;  %vm3074_vm2 = vweird.f32 %v8889_v15 }
 0x26d   :  { %v2546_v25 = vadd.f32 %v2545_v13, %v8636_v34 }
 0x26e   :  { %v1105_v39 = vpop.f32.mrf.mxu2  ;;  %v1274_v41 = vpop.f32.mrf.mxu3  ;;  %v3071_v33 = vsub.f32 1.0, %v3070_v24 }
 0x26f   :  { %v1106_v40 = vadd.f32 %v1105_v39, %v8349_v45  ;;  %v769_v42 = vpop.f32.mrf.mxu0  ;;  %v1275_v43 = vadd.f32 %v1274_v41, %v8351_v46  ;;  %v938_v49 = vpop.f32.mrf.mxu1  ;;  %v2547_v39 = vrot.slane %v2546_v25, 2  ;;  %v2582_v41 = vrot.slane %v8645_v44, 4 }
 0x270   :  { %v770_v48 = vadd.f32 %v769_v42, %v8325_v27  ;;  %v939_v51 = vadd.f32 %v938_v49, %v8327_v28 }
 0x271   :  { %v2431_v50 = vmax.f32 %v1106_v40, 0.0  ;;  %v2432_v52 = vmax.f32 %v1275_v43, 0.0 }
 0x272   :  { %v2437_v53 = vmax.f32 %v770_v48, 0.0  ;;  %v2438_v55 = vmax.f32 %v939_v51, 0.0 }
 0x273   :  { %v2872_v54 = vadd.f32 %v2871_v32, %v2431_v50  ;;  %v2909_v56 = vadd.f32 %v2908_v36, %v2432_v52  ;;  %v2510_v36 = vrot.slane %v2509_v20, 2 }
 0x274   :  { %v2799_v57 = vadd.f32 %v2798_v37, %v2437_v53  ;;  %v2836_v58 = vadd.f32 %v2835_v38, %v2438_v55  ;;  %v3072_v53 = vmul.f32 %v8889_v15, %v3071_v33 }
 0x275   :  { %v2511_v49 = vadd.f32 %v2510_v36, %v2509_v20 }
 0x276   :  { %v1107_v59 = vpop.f32.mrf.mxu2  ;;  %v1276_v61 = vpop.f32.mrf.mxu3 }
 0x277   :  { %v1108_v60 = vadd.f32 %v1107_v59, %v8349_v45  ;;  %v772_v62 = vpop.f32.mrf.mxu0  ;;  %v1277_v0 = vadd.f32 %v1276_v61, %v8351_v46  ;;  %v941_v2 = vpop.f32.mrf.mxu1  ;;  %v8063_v61 = vld [vmem:[%s11688_s0 + $0x38] sm:$0xff] }
 0x278   :  { %v773_v1 = vadd.f32 %v772_v62, %v8325_v27  ;;  %v942_v4 = vadd.f32 %v941_v2, %v8327_v28 }
 0x279   :  { %v2439_v3 = vmax.f32 %v1108_v60, 0.0  ;;  %v2440_v5 = vmax.f32 %v1277_v0, 0.0  ;;  %v2512_v0 = vrot.slane %v2511_v49, 1 }
 0x27a   :  { %v2445_v6 = vmax.f32 %v773_v1, 0.0  ;;  %6186 = vmatmul.msk.bf16.gmra.mxu0 %vm491_vm1, %v8062_v7  ;;  %6218 = vmatmul.msk.bf16.gmra.mxu1 %vm491_vm1, %v8062_v7  ;;  %v2446_v9 = vmax.f32 %v942_v4, 0.0 }
 0x27b   :  { %v2873_v8 = vadd.f32 %v2872_v54, %v2439_v3  ;;  %6250 = vmatmul.msk.bf16.gmra.mxu2 %vm491_vm1, %v8062_v7  ;;  %v2910_v11 = vadd.f32 %v2909_v56, %v2440_v5  ;;  %6282 = vmatmul.msk.bf16.gmra.mxu3 %vm491_vm1, %v8062_v7  ;;  %v2548_v54 = vadd.f32 %v2547_v39, %v2546_v25 }
 0x27c   :  { %v2800_v12 = vadd.f32 %v2799_v57, %v2445_v6  ;;  %v2837_v14 = vadd.f32 %v2836_v58, %v2446_v9  ;;  %v2583_v57 = vadd.f32 %v2582_v41, %v8645_v44  ;;  %v2619_v58 = vrot.slane %v8647_v47, 4  ;;  %v8064_v41 = vld [vmem:[%s11689_s2] sm:$0xff] }
 0x27d   :  { %v3073_v44 = vadd.f32 %v8889_v15, %v3072_v53  ;;  %v2549_v3 = vrot.slane %v2548_v54, 1 }
 0x27e   :  { %v1110_v16 = vpop.f32.mrf.mxu2  ;;  %v1279_v18 = vpop.f32.mrf.mxu3  ;;  %v2584_v5 = vrot.slane %v2583_v57, 2  ;;  %v2620_v6 = vadd.f32 %v2619_v58, %v8647_v47 }
 0x27f   :  { %v1111_v17 = vadd.f32 %v1110_v16, %v8349_v45  ;;  %v774_v19 = vpop.f32.mrf.mxu0  ;;  %v1280_v21 = vadd.f32 %v1279_v18, %v8351_v46  ;;  %v943_v23 = vpop.f32.mrf.mxu1  ;;  %v8920_v16 = vsel %vm3074_vm2, %v8889_v15, %v3073_v44 }
 0x280   :  { %v775_v22 = vadd.f32 %v774_v19, %v8325_v27  ;;  %v944_v29 = vadd.f32 %v943_v23, %v8327_v28  ;;  %v2585_v20 = vadd.f32 %v2584_v5, %v2583_v57  ;;  %v2621_v47 = vrot.slane %v2620_v6, 2 }
 0x281   :  { %v2447_v26 = vmax.f32 %v1111_v17, 0.0  ;;  %v2448_v30 = vmax.f32 %v1280_v21, 0.0  ;;  %v2550_v17 = vadd.f32 %v2549_v3, %v2548_v54 }
 0x282   :  { %v2453_v31 = vmax.f32 %v775_v22, 0.0  ;;  %v2454_v35 = vmax.f32 %v944_v29, 0.0  ;;  %v2622_v15 = vadd.f32 %v2621_v47, %v2620_v6  ;;  %v8948_v6 = vperm.slane %v8064_v41, 6 }
 0x283   :  { %v2874_v32 = vadd.f32 %v2873_v8, %v2447_v26  ;;  %v2911_v37 = vadd.f32 %v2910_v11, %v2448_v30  ;;  %v2513_v11 = vadd.f32 %v2512_v0, %v2511_v49 }
 0x284   :  { %v2801_v38 = vadd.f32 %v2800_v12, %v2453_v31  ;;  %v2838_v40 = vadd.f32 %v2837_v14, %v2454_v35  ;;  %v2586_v31 = vrot.slane %v2585_v20, 1 }
 0x285   :  { %v3076_v25 = vmul.f32 %v8920_v16, %v2513_v11 }
 0x286   :  { %v1112_v42 = vpop.f32.mrf.mxu2  ;;  %v1281_v48 = vpop.f32.mrf.mxu3 }
 0x287   :  { %v1113_v43 = vadd.f32 %v1112_v42, %v8349_v45  ;;  %v777_v34 = vpop.f32.mrf.mxu0  ;;  %v1282_v50 = vadd.f32 %v1281_v48, %v8351_v46  ;;  %v946_v52 = vpop.f32.mrf.mxu1  ;;  %v3092_v33 = vpack.c.bf16 %v3076_v25, %v3076_v25  ;;  %v8930_v42 = vperm.slane %v8064_v41, 4 }
 0x288   :  { %v778_v51 = vadd.f32 %v777_v34, %v8325_v27  ;;  %v947_v56 = vadd.f32 %v946_v52, %v8327_v28 }
 0x289   :  { %v2455_v55 = vmax.f32 %v1113_v43, 0.0  ;;  %v2456_v59 = vmax.f32 %v1282_v50, 0.0  ;;  %v8932_v50 = vperm.slane %v8064_v41, 5 }
 0x28a   :  { %v2461_v60 = vmax.f32 %v778_v51, 0.0  ;;  %6187 = vmatmul.msk.bf16.gmra.mxu0 %vm491_vm1, %v8063_v61  ;;  %6219 = vmatmul.msk.bf16.gmra.mxu1 %vm491_vm1, %v8063_v61  ;;  %v2462_v63 = vmax.f32 %v947_v56, 0.0  ;;  %v2587_v51 = vadd.f32 %v2586_v31, %v2585_v20  ;;  %v3390_v56 = vunpack.c.l.b16 %v3092_v33 }
 0x28b   :  { %v2875_v62 = vadd.f32 %v2874_v32, %v2455_v55  ;;  %6251 = vmatmul.msk.bf16.gmra.mxu2 %vm491_vm1, %v8063_v61  ;;  %v2912_v1 = vadd.f32 %v2911_v37, %v2456_v59  ;;  %6283 = vmatmul.msk.bf16.gmra.mxu3 %vm491_vm1, %v8063_v61 }
 0x28c   :  { %v2802_v2 = vadd.f32 %v2801_v38, %v2461_v60  ;;  %v2839_v4 = vadd.f32 %v2838_v40, %v2462_v63  ;;  %v8946_v0 = vmul.f32 %v8920_v16, %v2587_v51 }
 0x28e   :  { %v1115_v7 = vpop.f32.mrf.mxu2  ;;  %v1284_v9 = vpop.f32.mrf.mxu3 }
 0x28f   :  { %v1116_v8 = vadd.f32 %v1115_v7, %v8349_v45  ;;  %v779_v10 = vpop.f32.mrf.mxu0  ;;  %v1285_v12 = vadd.f32 %v1284_v9, %v8351_v46  ;;  %v948_v14 = vpop.f32.mrf.mxu1  ;;  %v8950_v7 = vperm.slane %v8064_v41, 7 }
 0x290   :  { %v780_v13 = vadd.f32 %v779_v10, %v8325_v27  ;;  %v949_v19 = vadd.f32 %v948_v14, %v8327_v28  ;;  %v3077_v27 = vmul.f32 %v8920_v16, %v2550_v17 }
 0x291   :  { %v2463_v18 = vmax.f32 %v1116_v8, 0.0  ;;  %v2464_v21 = vmax.f32 %v1285_v12, 0.0 }
 0x292   :  { %v2469_v22 = vmax.f32 %v780_v13, 0.0  ;;  %v2470_v24 = vmax.f32 %v949_v19, 0.0  ;;  %v3093_v48 = vpack.c.bf16 %v3077_v27, %v3077_v27 }
 0x293   :  { %v2876_v23 = vadd.f32 %v2875_v62, %v2463_v18  ;;  %v2913_v26 = vadd.f32 %v2912_v1, %v2464_v21 }
 0x294   :  { %v2803_v29 = vadd.f32 %v2802_v2, %v2469_v22  ;;  %v2840_v30 = vadd.f32 %v2839_v4, %v2470_v24  ;;  %v8942_v60 = vunpack.c.l.b16 %v3093_v48 }
 0x296   :  { %v2804_v32 = vrot.slane %v2803_v29, 4  ;;  %v1117_v35 = vpop.f32.mrf.mxu2  ;;  %v2841_v36 = vrot.slane %v2840_v30, 4  ;;  %v1286_v37 = vpop.f32.mrf.mxu3 }
 0x297   :  { %v1118_v28 = vadd.f32 %v1117_v35, %v8349_v45  ;;  %v1298_v38 = vpop.f32.mrf.mxu0  ;;  %v1287_v40 = vadd.f32 %v1286_v37, %v8351_v46  ;;  %v1467_v43 = vpop.f32.mrf.mxu1  ;;  %v2623_v45 = vrot.slane %v2622_v15, 1  ;;  %v8065_v46 = vld [vmem:[%s11688_s0 + $0x40] sm:$0xff] }
 0x298   :  { %v2805_v39 = vadd.f32 %v2804_v32, %v2803_v29  ;;  %v2842_v34 = vadd.f32 %v2841_v36, %v2840_v30  ;;  %v1299_v59 = vadd.f32 %v1298_v38, %v8930_v42  ;;  %v1468_v63 = vadd.f32 %v1467_v43, %v8932_v50 }
 0x299   :  { %v2471_v49 = vmax.f32 %v1118_v28, 0.0  ;;  %v2472_v53 = vmax.f32 %v1287_v40, 0.0  ;;  %v2624_v1 = vadd.f32 %v2623_v45, %v2622_v15  ;;  %v3094_v28 = vpack.c.bf16 %v8946_v0, %v8946_v0 }
 0x29a   :  { %v2806_v52 = vrot.slane %v2805_v39, 2  ;;  %6188 = vmatmul.msk.bf16.gmra.mxu0 %vm491_vm1, %v8065_v46  ;;  %6220 = vmatmul.msk.bf16.gmra.mxu1 %vm491_vm1, %v8065_v46  ;;  %v2843_v54 = vrot.slane %v2842_v34, 2  ;;  %v1969_v12 = vmax.f32 %v1299_v59, 0.0  ;;  %v1970_v19 = vmax.f32 %v1468_v63, 0.0  ;;  %v8066_v63 = vld [vmem:[%s11688_s0 + $0x48] sm:$0xff] }
 0x29b   :  { %v2877_v55 = vadd.f32 %v2876_v23, %v2471_v49  ;;  %6252 = vmatmul.msk.bf16.gmra.mxu2 %vm491_vm1, %v8065_v46  ;;  %v2914_v58 = vadd.f32 %v2913_v26, %v2472_v53  ;;  %6284 = vmatmul.msk.bf16.gmra.mxu3 %vm491_vm1, %v8065_v46  ;;  %v3079_v47 = vmul.f32 %v8920_v16, %v2624_v1 }
 0x29c   :  { %v2807_v57 = vadd.f32 %v2806_v52, %v2805_v39  ;;  %v2844_v61 = vadd.f32 %v2843_v54, %v2842_v34 }
 0x29d   :  { %v2878_v62 = vrot.slane %v2877_v55, 4  ;;  %v2915_v44 = vrot.slane %v2914_v58, 4  ;;  %v3095_v37 = vpack.c.bf16 %v3079_v47, %v3079_v47 }
 0x29e   :  { %v2808_v2 = vrot.slane %v2807_v57, 1  ;;  %v1636_v3 = vpop.f32.mrf.mxu2  ;;  %v2845_v4 = vrot.slane %v2844_v61, 1  ;;  %v1805_v8 = vpop.f32.mrf.mxu3 }
 0x29f   :  { %v2879_v5 = vadd.f32 %v2878_v62, %v2877_v55  ;;  %v1300_v9 = vpop.f32.mrf.mxu0  ;;  %v2916_v11 = vadd.f32 %v2915_v44, %v2914_v58  ;;  %v1469_v14 = vpop.f32.mrf.mxu1  ;;  %v1637_v26 = vadd.f32 %v1636_v3, %v8948_v6  ;;  %v1806_v35 = vadd.f32 %v1805_v8, %v8950_v7 }
 0x2a0   :  { %v2809_v10 = vadd.f32 %v2808_v2, %v2807_v57  ;;  %v1301_v13 = vadd.f32 %v1300_v9, %v8930_v42  ;;  %v2846_v17 = vadd.f32 %v2845_v4, %v2844_v61  ;;  %v1470_v20 = vadd.f32 %v1469_v14, %v8932_v50 }
 0x2a1   :  { %v2880_v18 = vrot.slane %v2879_v5, 2  ;;  %v2917_v22 = vrot.slane %v2916_v11, 2  ;;  %v1971_v43 = vmax.f32 %v1637_v26, 0.0  ;;  %v1972_v55 = vmax.f32 %v1806_v35, 0.0 }
 0x2a2   :  { %v3084_v21 = vmul.f32 %v8920_v16, %v2809_v10  ;;  %v1977_v23 = vmax.f32 %v1301_v13, 0.0  ;;  %v3085_v24 = vmul.f32 %v8920_v16, %v2846_v17  ;;  %v1978_v29 = vmax.f32 %v1470_v20, 0.0 }
 0x2a3   :  { %v2881_v25 = vadd.f32 %v2880_v18, %v2879_v5  ;;  %v2918_v30 = vadd.f32 %v2917_v22, %v2916_v11  ;;  %v3392_v5 = vunpack.c.l.b16 %v3094_v28  ;;  %v3393_v10 = vunpack.c.l.b16 %v3095_v37 }
 0x2a4   :  { %v3100_v27 = vpack.c.bf16 %v3084_v21, %v3084_v21  ;;  %v2625_v31 = vadd.f32 %v1977_v23, %v1969_v12  ;;  %v3101_v15 = vpack.c.bf16 %v3085_v24, %v3085_v24  ;;  %v2662_v36 = vadd.f32 %v1978_v29, %v1970_v19 }
 0x2a5   :  { %v2882_v32 = vrot.slane %v2881_v25, 1  ;;  %v2919_v33 = vrot.slane %v2918_v30, 1 }
 0x2a6   :  { %v3398_v38 = vunpack.c.l.b16 %v3100_v27  ;;  %v1638_v39 = vpop.f32.mrf.mxu2  ;;  %v3399_v40 = vunpack.c.l.b16 %v3101_v15  ;;  %v1807_v34 = vpop.f32.mrf.mxu3  ;;  %v7810_v15 = vld [vmem:[%s11690_s3 + $0x2ec] sm:$0xf0] }
 0x2a7   :  { %v2883_v41 = vadd.f32 %v2882_v32, %v2881_v25  ;;  %v1639_v48 = vadd.f32 %v1638_v39, %v8948_v6  ;;  %v1303_v49 = vpop.f32.mrf.mxu0  ;;  %v2920_v51 = vadd.f32 %v2919_v33, %v2918_v30  ;;  %v1808_v45 = vadd.f32 %v1807_v34, %v8950_v7  ;;  %v1472_v53 = vpop.f32.mrf.mxu1  ;;  %v8067_v34 = vld [vmem:[%s11688_s0 + $0x50] sm:$0xff] }
 0x2a8   :  { %v1304_v52 = vadd.f32 %v1303_v49, %v8930_v42  ;;  %v8965_v46 = vsel %vm3406_vm3, %v3398_v38, %v3390_v56  ;;  %v1473_v58 = vadd.f32 %v1472_v53, %v8932_v50  ;;  %v8977_v56 = vsel %vm3406_vm3, %v3399_v40, %v8942_v60  ;;  %v6422_v53 = vld [vmem:[%s11690_s3 + $0xe0] sm:$0xf] }
 0x2a9   :  { %v3086_v54 = vmul.f32 %v8920_v16, %v2883_v41  ;;  %v1979_v57 = vmax.f32 %v1639_v48, 0.0  ;;  %v3087_v59 = vmul.f32 %v8920_v16, %v2920_v51  ;;  %v1980_v61 = vmax.f32 %v1808_v45, 0.0 }
 0x2aa   :  { %v1985_v62 = vmax.f32 %v1304_v52, 0.0  ;;  %6189 = vmatmul.msk.bf16.gmra.mxu0 %vm491_vm1, %v8066_v63  ;;  %6221 = vmatmul.msk.bf16.gmra.mxu1 %vm491_vm1, %v8066_v63  ;;  %v1986_v2 = vmax.f32 %v1473_v58, 0.0 }
 0x2ab   :  { %v3102_v0 = vpack.c.bf16 %v3086_v54, %v3086_v54  ;;  %v2699_v1 = vadd.f32 %v1979_v57, %v1971_v43  ;;  %6253 = vmatmul.msk.bf16.gmra.mxu2 %vm491_vm1, %v8066_v63  ;;  %v3103_v44 = vpack.c.bf16 %v3087_v59, %v3087_v59  ;;  %v2736_v3 = vadd.f32 %v1980_v61, %v1972_v55  ;;  %v7746_v54 = vld [vmem:[%s11690_s3 + $0xec] sm:$0xf0]  ;;  %v6806_v55 = vld [vmem:[%s11690_s3 + $0x3e0] sm:$0xf] }
 0x2ac   :  { %v2626_v4 = vadd.f32 %v2625_v31, %v1985_v62  ;;  %6285 = vmatmul.msk.bf16.gmra.mxu3 %vm491_vm1, %v8066_v63  ;;  %v2663_v9 = vadd.f32 %v2662_v36, %v1986_v2  ;;  %v6678_v31 = vld [vmem:[%s11690_s3 + $0x2e0] sm:$0xf]  ;;  %v6423_v58 = vor.u32 %v7746_v54, %v6422_v53  ;;  %v7842_v59 = vld [vmem:[%s11690_s3 + $0x3ec] sm:$0xf0] }
 0x2ad   :  { %v3400_v8 = vunpack.c.l.b16 %v3102_v0  ;;  %v3401_v11 = vunpack.c.l.b16 %v3103_v44  ;;  %v6679_v35 = vor.u32 %v7810_v15, %v6678_v31  ;;  %v6550_v61 = vld [vmem:[%s11690_s3 + $0x1e0] sm:$0xf]  ;;  %v7778_v62 = vld [vmem:[%s11690_s3 + $0x1ec] sm:$0xf0]  ;;  %v6807_v0 = vor.u32 %v7842_v59, %v6806_v55  ;;  %v8068_v15 = vld [vmem:[%s11688_s0 + $0x58] sm:$0xff] }
 0x2ae   :  { %v1641_v12 = vpop.f32.mrf.mxu2  ;;  %v1810_v60 = vpop.f32.mrf.mxu3  ;;  %4711 = vmatpush.bf16.msra.mxu0 %v6423_v58 }
 0x2af   :  { %v1642_v13 = vadd.f32 %v1641_v12, %v8948_v6  ;;  %v1305_v14 = vpop.f32.mrf.mxu0  ;;  %v8983_v17 = vsel %vm3406_vm3, %v3400_v8, %v3392_v5  ;;  %v1811_v18 = vadd.f32 %v1810_v60, %v8950_v7  ;;  %v1474_v20 = vpop.f32.mrf.mxu1  ;;  %v8988_v47 = vsel %vm3406_vm3, %v3401_v11, %v3393_v10  ;;  %4737 = vmatpush.bf16.msra.mxu2 %v6679_v35 }
 0x2b0   :  { %v1306_v19 = vadd.f32 %v1305_v14, %v8930_v42  ;;  %v1475_v22 = vadd.f32 %v1474_v20, %v8932_v50  ;;  %4750 = vmatpush.bf16.msra.mxu3 %v6807_v0 }
 0x2b1   :  { %v1987_v21 = vmax.f32 %v1642_v13, 0.0  ;;  %v1988_v23 = vmax.f32 %v1811_v18, 0.0 }
 0x2b2   :  { %v1993_v24 = vmax.f32 %v1306_v19, 0.0  ;;  %v1994_v26 = vmax.f32 %v1475_v22, 0.0 }
 0x2b3   :  { %v2700_v25 = vadd.f32 %v2699_v1, %v1987_v21  ;;  %v2737_v29 = vadd.f32 %v2736_v3, %v1988_v23  ;;  %v6551_v1 = vor.u32 %v7778_v62, %v6550_v61 }
 0x2b4   :  { %v2627_v27 = vadd.f32 %v2626_v4, %v1993_v24  ;;  %v2664_v30 = vadd.f32 %v2663_v9, %v1994_v26 }
 0x2b5   :  { %4724 = vmatpush.bf16.msra.mxu1 %v6551_v1 }
 0x2b6   :  { %v1643_v32 = vpop.f32.mrf.mxu2  ;;  %v1812_v28 = vpop.f32.mrf.mxu3 }
 0x2b7   :  { %v1644_v36 = vadd.f32 %v1643_v32, %v8948_v6  ;;  %v1308_v37 = vpop.f32.mrf.mxu0  ;;  %v1813_v38 = vadd.f32 %v1812_v28, %v8950_v7  ;;  %v1477_v39 = vpop.f32.mrf.mxu1 }
 0x2b8   :  { %v1309_v33 = vadd.f32 %v1308_v37, %v8930_v42  ;;  %v1478_v41 = vadd.f32 %v1477_v39, %v8932_v50 }
 0x2b9   :  { %v1995_v40 = vmax.f32 %v1644_v36, 0.0  ;;  %v1996_v43 = vmax.f32 %v1813_v38, 0.0 }
 0x2ba   :  { %v2001_v48 = vmax.f32 %v1309_v33, 0.0  ;;  %6190 = vmatmul.msk.bf16.gmra.mxu0 %vm491_vm1, %v8067_v34  ;;  %6222 = vmatmul.msk.bf16.gmra.mxu1 %vm491_vm1, %v8067_v34  ;;  %v2002_v51 = vmax.f32 %v1478_v41, 0.0 }
 0x2bb   :  { %v2701_v49 = vadd.f32 %v2700_v25, %v1995_v40  ;;  %6254 = vmatmul.msk.bf16.gmra.mxu2 %vm491_vm1, %v8067_v34  ;;  %v2738_v45 = vadd.f32 %v2737_v29, %v1996_v43 }
 0x2bc   :  { %v2628_v52 = vadd.f32 %v2627_v27, %v2001_v48  ;;  %6286 = vmatmul.msk.bf16.gmra.mxu3 %vm491_vm1, %v8067_v34  ;;  %v2665_v57 = vadd.f32 %v2664_v30, %v2002_v51 }
 0x2be   :  { %v1646_v63 = vpop.f32.mrf.mxu2  ;;  %v1815_v44 = vpop.f32.mrf.mxu3 }
 0x2bf   :  { %v1647_v2 = vadd.f32 %v1646_v63, %v8948_v6  ;;  %v1310_v3 = vpop.f32.mrf.mxu0  ;;  %v1816_v4 = vadd.f32 %v1815_v44, %v8950_v7  ;;  %v1479_v8 = vpop.f32.mrf.mxu1 }
 0x2c0   :  { %v1311_v5 = vadd.f32 %v1310_v3, %v8930_v42  ;;  %v1480_v10 = vadd.f32 %v1479_v8, %v8932_v50 }
 0x2c1   :  { %v2003_v9 = vmax.f32 %v1647_v2, 0.0  ;;  %v2004_v11 = vmax.f32 %v1816_v4, 0.0 }
 0x2c2   :  { %v2009_v12 = vmax.f32 %v1311_v5, 0.0  ;;  %v2010_v60 = vmax.f32 %v1480_v10, 0.0  ;;  %v8069_v5 = vld [vmem:[%s11688_s0 + $0x60] sm:$0xff] }
 0x2c3   :  { %v2702_v13 = vadd.f32 %v2701_v49, %v2003_v9  ;;  %v2739_v14 = vadd.f32 %v2738_v45, %v2004_v11 }
 0x2c4   :  { %v2629_v18 = vadd.f32 %v2628_v52, %v2009_v12  ;;  %v2666_v19 = vadd.f32 %v2665_v57, %v2010_v60 }
 0x2c6   :  { %v1648_v20 = vpop.f32.mrf.mxu2  ;;  %v1817_v22 = vpop.f32.mrf.mxu3 }
 0x2c7   :  { %v1649_v21 = vadd.f32 %v1648_v20, %v8948_v6  ;;  %v1313_v23 = vpop.f32.mrf.mxu0  ;;  %v1818_v24 = vadd.f32 %v1817_v22, %v8950_v7  ;;  %v1482_v26 = vpop.f32.mrf.mxu1 }
 0x2c8   :  { %v1314_v25 = vadd.f32 %v1313_v23, %v8930_v42  ;;  %v1483_v27 = vadd.f32 %v1482_v26, %v8932_v50 }
 0x2c9   :  { %v2011_v29 = vmax.f32 %v1649_v21, 0.0  ;;  %v2012_v30 = vmax.f32 %v1818_v24, 0.0 }
 0x2ca   :  { %v2017_v31 = vmax.f32 %v1314_v25, 0.0  ;;  %6191 = vmatmul.msk.bf16.gmra.mxu0 %vm491_vm1, %v8068_v15  ;;  %6223 = vmatmul.msk.bf16.gmra.mxu1 %vm491_vm1, %v8068_v15  ;;  %v2018_v35 = vmax.f32 %v1483_v27, 0.0 }
 0x2cb   :  { %v2703_v32 = vadd.f32 %v2702_v13, %v2011_v29  ;;  %6255 = vmatmul.msk.bf16.gmra.mxu2 %vm491_vm1, %v8068_v15  ;;  %v2740_v36 = vadd.f32 %v2739_v14, %v2012_v30 }
 0x2cc   :  { %v2630_v28 = vadd.f32 %v2629_v18, %v2017_v31  ;;  %6287 = vmatmul.msk.bf16.gmra.mxu3 %vm491_vm1, %v8068_v15  ;;  %v2667_v37 = vadd.f32 %v2666_v19, %v2018_v35 }
 0x2ce   :  { %v1651_v38 = vpop.f32.mrf.mxu2  ;;  %v1820_v39 = vpop.f32.mrf.mxu3 }
 0x2cf   :  { %v1652_v33 = vadd.f32 %v1651_v38, %v8948_v6  ;;  %v1315_v40 = vpop.f32.mrf.mxu0  ;;  %v1821_v41 = vadd.f32 %v1820_v39, %v8950_v7  ;;  %v1484_v48 = vpop.f32.mrf.mxu1 }
 0x2d0   :  { %v1316_v43 = vadd.f32 %v1315_v40, %v8930_v42  ;;  %v1485_v49 = vadd.f32 %v1484_v48, %v8932_v50 }
 0x2d1   :  { %v2019_v34 = vmax.f32 %v1652_v33, 0.0  ;;  %v2020_v51 = vmax.f32 %v1821_v41, 0.0 }
 0x2d2   :  { %v2025_v45 = vmax.f32 %v1316_v43, 0.0  ;;  %v2026_v53 = vmax.f32 %v1485_v49, 0.0  ;;  %v8070_v43 = vld [vmem:[%s11688_s0 + $0x68] sm:$0xff] }
 0x2d3   :  { %v2704_v52 = vadd.f32 %v2703_v32, %v2019_v34  ;;  %v2741_v54 = vadd.f32 %v2740_v36, %v2020_v51 }
 0x2d4   :  { %v2631_v55 = vadd.f32 %v2630_v28, %v2025_v45  ;;  %v2668_v57 = vadd.f32 %v2667_v37, %v2026_v53 }
 0x2d6   :  { %v1653_v58 = vpop.f32.mrf.mxu2  ;;  %v1822_v61 = vpop.f32.mrf.mxu3 }
 0x2d7   :  { %v1654_v59 = vadd.f32 %v1653_v58, %v8948_v6  ;;  %v1318_v62 = vpop.f32.mrf.mxu0  ;;  %v1823_v63 = vadd.f32 %v1822_v61, %v8950_v7  ;;  %v1487_v1 = vpop.f32.mrf.mxu1 }
 0x2d8   :  { %v1319_v0 = vadd.f32 %v1318_v62, %v8930_v42  ;;  %v1488_v44 = vadd.f32 %v1487_v1, %v8932_v50 }
 0x2d9   :  { %v2027_v2 = vmax.f32 %v1654_v59, 0.0  ;;  %v2028_v3 = vmax.f32 %v1823_v63, 0.0 }
 0x2da   :  { %v2033_v4 = vmax.f32 %v1319_v0, 0.0  ;;  %6192 = vmatmul.msk.bf16.gmra.mxu0 %vm491_vm1, %v8069_v5  ;;  %6224 = vmatmul.msk.bf16.gmra.mxu1 %vm491_vm1, %v8069_v5  ;;  %v2034_v9 = vmax.f32 %v1488_v44, 0.0 }
 0x2db   :  { %v2705_v8 = vadd.f32 %v2704_v52, %v2027_v2  ;;  %6256 = vmatmul.msk.bf16.gmra.mxu2 %vm491_vm1, %v8069_v5  ;;  %v2742_v10 = vadd.f32 %v2741_v54, %v2028_v3 }
 0x2dc   :  { %v2632_v11 = vadd.f32 %v2631_v55, %v2033_v4  ;;  %6288 = vmatmul.msk.bf16.gmra.mxu3 %vm491_vm1, %v8069_v5  ;;  %v2669_v12 = vadd.f32 %v2668_v57, %v2034_v9  ;;  %v6662_v5 = vld [vmem:[%s11690_s3 + $0x2c0] sm:$0xf] }
 0x2de   :  { %v1656_v13 = vpop.f32.mrf.mxu2  ;;  %v1825_v14 = vpop.f32.mrf.mxu3 }
 0x2df   :  { %v1657_v60 = vadd.f32 %v1656_v13, %v8948_v6  ;;  %v1320_v18 = vpop.f32.mrf.mxu0  ;;  %v1826_v19 = vadd.f32 %v1825_v14, %v8950_v7  ;;  %v1489_v21 = vpop.f32.mrf.mxu1 }
 0x2e0   :  { %v1321_v20 = vadd.f32 %v1320_v18, %v8930_v42  ;;  %v1490_v23 = vadd.f32 %v1489_v21, %v8932_v50 }
 0x2e1   :  { %v2035_v22 = vmax.f32 %v1657_v60, 0.0  ;;  %v2036_v24 = vmax.f32 %v1826_v19, 0.0 }
 0x2e2   :  { %v2041_v25 = vmax.f32 %v1321_v20, 0.0  ;;  %v2042_v29 = vmax.f32 %v1490_v23, 0.0  ;;  %v8071_v23 = vld [vmem:[%s11688_s0 + $0x70] sm:$0xff] }
 0x2e3   :  { %v2706_v26 = vadd.f32 %v2705_v8, %v2035_v22  ;;  %v2743_v27 = vadd.f32 %v2742_v10, %v2036_v24  ;;  %v7806_v8 = vld [vmem:[%s11690_s3 + $0x2cc] sm:$0xf0] }
 0x2e4   :  { %v2633_v30 = vadd.f32 %v2632_v11, %v2041_v25  ;;  %v2670_v31 = vadd.f32 %v2669_v12, %v2042_v29  ;;  %v6663_v10 = vor.u32 %v7806_v8, %v6662_v5  ;;  %v8072_v8 = vld [vmem:[%s11688_s0 + $0x78] sm:$0xff] }
 0x2e6   :  { %v1658_v15 = vpop.f32.mrf.mxu2  ;;  %v1827_v35 = vpop.f32.mrf.mxu3  ;;  %4738 = vmatpush.bf16.msra.mxu2 %v6663_v10 }
 0x2e7   :  { %v1659_v32 = vadd.f32 %v1658_v15, %v8948_v6  ;;  %v1323_v36 = vpop.f32.mrf.mxu0  ;;  %v1828_v28 = vadd.f32 %v1827_v35, %v8950_v7  ;;  %v1492_v38 = vpop.f32.mrf.mxu1  ;;  %v7838_v35 = vld [vmem:[%s11690_s3 + $0x3cc] sm:$0xf0] }
 0x2e8   :  { %v1324_v37 = vadd.f32 %v1323_v36, %v8930_v42  ;;  %v1493_v39 = vadd.f32 %v1492_v38, %v8932_v50  ;;  %v6534_v36 = vld [vmem:[%s11690_s3 + $0x1c0] sm:$0xf] }
 0x2e9   :  { %v2043_v33 = vmax.f32 %v1659_v32, 0.0  ;;  %v2044_v40 = vmax.f32 %v1828_v28, 0.0  ;;  %v7774_v28 = vld [vmem:[%s11690_s3 + $0x1cc] sm:$0xf0] }
 0x2ea   :  { %v2049_v41 = vmax.f32 %v1324_v37, 0.0  ;;  %6193 = vmatmul.msk.bf16.gmra.mxu0 %vm491_vm1, %v8070_v43  ;;  %6225 = vmatmul.msk.bf16.gmra.mxu1 %vm491_vm1, %v8070_v43  ;;  %v2050_v34 = vmax.f32 %v1493_v39, 0.0 }
 0x2eb   :  { %v2707_v48 = vadd.f32 %v2706_v26, %v2043_v33  ;;  %6257 = vmatmul.msk.bf16.gmra.mxu2 %vm491_vm1, %v8070_v43  ;;  %v2744_v49 = vadd.f32 %v2743_v27, %v2044_v40  ;;  %v6406_v27 = vld [vmem:[%s11690_s3 + $0xc0] sm:$0xf]  ;;  %v6535_v33 = vor.u32 %v7774_v28, %v6534_v36 }
 0x2ec   :  { %v2634_v51 = vadd.f32 %v2633_v30, %v2049_v41  ;;  %6289 = vmatmul.msk.bf16.gmra.mxu3 %vm491_vm1, %v8070_v43  ;;  %v2671_v45 = vadd.f32 %v2670_v31, %v2050_v34  ;;  %v7742_v30 = vld [vmem:[%s11690_s3 + $0xcc] sm:$0xf0]  ;;  %v6790_v31 = vld [vmem:[%s11690_s3 + $0x3c0] sm:$0xf] }
 0x2ed   :  { %v6407_v32 = vor.u32 %v7742_v30, %v6406_v27  ;;  %v6791_v38 = vor.u32 %v7838_v35, %v6790_v31  ;;  %4725 = vmatpush.bf16.msra.mxu1 %v6535_v33 }
 0x2ee   :  { %v1661_v52 = vpop.f32.mrf.mxu2  ;;  %v1830_v54 = vpop.f32.mrf.mxu3 }
 0x2ef   :  { %v1662_v53 = vadd.f32 %v1661_v52, %v8948_v6  ;;  %v1325_v55 = vpop.f32.mrf.mxu0  ;;  %v1831_v57 = vadd.f32 %v1830_v54, %v8950_v7  ;;  %v1494_v59 = vpop.f32.mrf.mxu1  ;;  %4712 = vmatpush.bf16.msra.mxu0 %v6407_v32  ;;  %4751 = vmatpush.bf16.msra.mxu3 %v6791_v38 }
 0x2f0   :  { %v1326_v58 = vadd.f32 %v1325_v55, %v8930_v42  ;;  %v1495_v62 = vadd.f32 %v1494_v59, %v8932_v50 }
 0x2f1   :  { %v2051_v61 = vmax.f32 %v1662_v53, 0.0  ;;  %v2052_v63 = vmax.f32 %v1831_v57, 0.0 }
 0x2f2   :  { %v2057_v0 = vmax.f32 %v1326_v58, 0.0  ;;  %v2058_v2 = vmax.f32 %v1495_v62, 0.0 }
 0x2f3   :  { %v2708_v1 = vadd.f32 %v2707_v48, %v2051_v61  ;;  %v2745_v44 = vadd.f32 %v2744_v49, %v2052_v63 }
 0x2f4   :  { %v2635_v3 = vadd.f32 %v2634_v51, %v2057_v0  ;;  %v2672_v4 = vadd.f32 %v2671_v45, %v2058_v2 }
 0x2f6   :  { %v1663_v9 = vpop.f32.mrf.mxu2  ;;  %v1832_v12 = vpop.f32.mrf.mxu3 }
 0x2f7   :  { %v1664_v11 = vadd.f32 %v1663_v9, %v8948_v6  ;;  %v1328_v13 = vpop.f32.mrf.mxu0  ;;  %v1833_v60 = vadd.f32 %v1832_v12, %v8950_v7  ;;  %v1497_v18 = vpop.f32.mrf.mxu1 }
 0x2f8   :  { %v1329_v14 = vadd.f32 %v1328_v13, %v8930_v42  ;;  %v1498_v20 = vadd.f32 %v1497_v18, %v8932_v50 }
 0x2f9   :  { %v2059_v19 = vmax.f32 %v1664_v11, 0.0  ;;  %v2060_v21 = vmax.f32 %v1833_v60, 0.0 }
 0x2fa   :  { %v2065_v22 = vmax.f32 %v1329_v14, 0.0  ;;  %6194 = vmatmul.msk.bf16.gmra.mxu0 %vm491_vm1, %v8071_v23  ;;  %6226 = vmatmul.msk.bf16.gmra.mxu1 %vm491_vm1, %v8071_v23  ;;  %v2066_v25 = vmax.f32 %v1498_v20, 0.0 }
 0x2fb   :  { %v2709_v24 = vadd.f32 %v2708_v1, %v2059_v19  ;;  %6258 = vmatmul.msk.bf16.gmra.mxu2 %vm491_vm1, %v8071_v23  ;;  %v2746_v26 = vadd.f32 %v2745_v44, %v2060_v21 }
 0x2fc   :  { %v2636_v29 = vadd.f32 %v2635_v3, %v2065_v22  ;;  %6290 = vmatmul.msk.bf16.gmra.mxu3 %vm491_vm1, %v8071_v23  ;;  %v2673_v15 = vadd.f32 %v2672_v4, %v2066_v25 }
 0x2fe   :  { %v1666_v37 = vpop.f32.mrf.mxu2  ;;  %v1835_v40 = vpop.f32.mrf.mxu3 }
 0x2ff   :  { %v1667_v39 = vadd.f32 %v1666_v37, %v8948_v6  ;;  %v1330_v41 = vpop.f32.mrf.mxu0  ;;  %v1836_v43 = vadd.f32 %v1835_v40, %v8950_v7  ;;  %v1499_v34 = vpop.f32.mrf.mxu1 }
 0x300   :  { %v1331_v48 = vadd.f32 %v1330_v41, %v8930_v42  ;;  %v1500_v51 = vadd.f32 %v1499_v34, %v8932_v50 }
 0x301   :  { %v2067_v49 = vmax.f32 %v1667_v39, 0.0  ;;  %v2068_v45 = vmax.f32 %v1836_v43, 0.0 }
 0x302   :  { %v2073_v52 = vmax.f32 %v1331_v48, 0.0  ;;  %v2074_v54 = vmax.f32 %v1500_v51, 0.0  ;;  %v8073_v48 = vld [vmem:[%s11688_s0 + $0x80] sm:$0xff] }
 0x303   :  { %v2710_v53 = vadd.f32 %v2709_v24, %v2067_v49  ;;  %v2747_v55 = vadd.f32 %v2746_v26, %v2068_v45 }
 0x304   :  { %v2637_v57 = vadd.f32 %v2636_v29, %v2073_v52  ;;  %v2674_v58 = vadd.f32 %v2673_v15, %v2074_v54 }
 0x306   :  { %v1668_v59 = vpop.f32.mrf.mxu2  ;;  %v1837_v62 = vpop.f32.mrf.mxu3 }
 0x307   :  { %v1669_v61 = vadd.f32 %v1668_v59, %v8948_v6  ;;  %v1333_v63 = vpop.f32.mrf.mxu0  ;;  %v1838_v0 = vadd.f32 %v1837_v62, %v8950_v7  ;;  %v1502_v2 = vpop.f32.mrf.mxu1 }
 0x308   :  { %v1334_v1 = vadd.f32 %v1333_v63, %v8930_v42  ;;  %v1503_v3 = vadd.f32 %v1502_v2, %v8932_v50 }
 0x309   :  { %v2075_v44 = vmax.f32 %v1669_v61, 0.0  ;;  %v2076_v4 = vmax.f32 %v1838_v0, 0.0 }
 0x30a   :  { %v2081_v5 = vmax.f32 %v1334_v1, 0.0  ;;  %6195 = vmatmul.msk.bf16.gmra.mxu0 %vm491_vm1, %v8072_v8  ;;  %6227 = vmatmul.msk.bf16.gmra.mxu1 %vm491_vm1, %v8072_v8  ;;  %v2082_v10 = vmax.f32 %v1503_v3, 0.0 }
 0x30b   :  { %v2711_v9 = vadd.f32 %v2710_v53, %v2075_v44  ;;  %6259 = vmatmul.msk.bf16.gmra.mxu2 %vm491_vm1, %v8072_v8  ;;  %v2748_v11 = vadd.f32 %v2747_v55, %v2076_v4 }
 0x30c   :  { %v2638_v12 = vadd.f32 %v2637_v57, %v2081_v5  ;;  %6291 = vmatmul.msk.bf16.gmra.mxu3 %vm491_vm1, %v8072_v8  ;;  %v2675_v13 = vadd.f32 %v2674_v58, %v2082_v10 }
 0x30e   :  { %v1671_v60 = vpop.f32.mrf.mxu2  ;;  %v1840_v18 = vpop.f32.mrf.mxu3 }
 0x30f   :  { %v1672_v14 = vadd.f32 %v1671_v60, %v8948_v6  ;;  %v1335_v19 = vpop.f32.mrf.mxu0  ;;  %v1841_v20 = vadd.f32 %v1840_v18, %v8950_v7  ;;  %v1504_v22 = vpop.f32.mrf.mxu1 }
 0x310   :  { %v1336_v21 = vadd.f32 %v1335_v19, %v8930_v42  ;;  %v1505_v24 = vadd.f32 %v1504_v22, %v8932_v50 }
 0x311   :  { %v2083_v23 = vmax.f32 %v1672_v14, 0.0  ;;  %v2084_v25 = vmax.f32 %v1841_v20, 0.0 }
 0x312   :  { %v2089_v26 = vmax.f32 %v1336_v21, 0.0  ;;  %v2090_v27 = vmax.f32 %v1505_v24, 0.0  ;;  %v8074_v21 = vld [vmem:[%s11688_s0 + $0x88] sm:$0xff] }
 0x313   :  { %v2712_v29 = vadd.f32 %v2711_v9, %v2083_v23  ;;  %v2749_v30 = vadd.f32 %v2748_v11, %v2084_v25 }
 0x314   :  { %v2639_v31 = vadd.f32 %v2638_v12, %v2089_v26  ;;  %v2676_v15 = vadd.f32 %v2675_v13, %v2090_v27 }
 0x316   :  { %v1673_v32 = vpop.f32.mrf.mxu2  ;;  %v1842_v36 = vpop.f32.mrf.mxu3 }
 0x317   :  { %v1674_v35 = vadd.f32 %v1673_v32, %v8948_v6  ;;  %v1338_v28 = vpop.f32.mrf.mxu0  ;;  %v1843_v37 = vadd.f32 %v1842_v36, %v8950_v7  ;;  %v1507_v33 = vpop.f32.mrf.mxu1 }
 0x318   :  { %v1339_v38 = vadd.f32 %v1338_v28, %v8930_v42  ;;  %v1508_v40 = vadd.f32 %v1507_v33, %v8932_v50 }
 0x319   :  { %v2091_v39 = vmax.f32 %v1674_v35, 0.0  ;;  %v2092_v41 = vmax.f32 %v1843_v37, 0.0 }
 0x31a   :  { %v2097_v43 = vmax.f32 %v1339_v38, 0.0  ;;  %6196 = vmatmul.msk.bf16.gmra.mxu0 %vm491_vm1, %v8073_v48  ;;  %6228 = vmatmul.msk.bf16.gmra.mxu1 %vm491_vm1, %v8073_v48  ;;  %v2098_v49 = vmax.f32 %v1508_v40, 0.0 }
 0x31b   :  { %v2713_v34 = vadd.f32 %v2712_v29, %v2091_v39  ;;  %6260 = vmatmul.msk.bf16.gmra.mxu2 %vm491_vm1, %v8073_v48  ;;  %v2750_v51 = vadd.f32 %v2749_v30, %v2092_v41 }
 0x31c   :  { %v2640_v45 = vadd.f32 %v2639_v31, %v2097_v43  ;;  %6292 = vmatmul.msk.bf16.gmra.mxu3 %vm491_vm1, %v8073_v48  ;;  %v2677_v52 = vadd.f32 %v2676_v15, %v2098_v49  ;;  %v6646_v48 = vld [vmem:[%s11690_s3 + $0x2a0] sm:$0xf] }
 0x31e   :  { %v1676_v53 = vpop.f32.mrf.mxu2  ;;  %v1845_v55 = vpop.f32.mrf.mxu3 }
 0x31f   :  { %v1677_v54 = vadd.f32 %v1676_v53, %v8948_v6  ;;  %v1340_v57 = vpop.f32.mrf.mxu0  ;;  %v1846_v58 = vadd.f32 %v1845_v55, %v8950_v7  ;;  %v1509_v61 = vpop.f32.mrf.mxu1 }
 0x320   :  { %v1341_v59 = vadd.f32 %v1340_v57, %v8930_v42  ;;  %v1510_v63 = vadd.f32 %v1509_v61, %v8932_v50 }
 0x321   :  { %v2099_v62 = vmax.f32 %v1677_v54, 0.0  ;;  %v2100_v0 = vmax.f32 %v1846_v58, 0.0 }
 0x322   :  { %v2105_v1 = vmax.f32 %v1341_v59, 0.0  ;;  %v2106_v44 = vmax.f32 %v1510_v63, 0.0  ;;  %v8075_v63 = vld [vmem:[%s11688_s0 + $0x90] sm:$0xff] }
 0x323   :  { %v2714_v2 = vadd.f32 %v2713_v34, %v2099_v62  ;;  %v2751_v3 = vadd.f32 %v2750_v51, %v2100_v0  ;;  %v7802_v34 = vld [vmem:[%s11690_s3 + $0x2ac] sm:$0xf0] }
 0x324   :  { %v2641_v4 = vadd.f32 %v2640_v45, %v2105_v1  ;;  %v2678_v5 = vadd.f32 %v2677_v52, %v2106_v44  ;;  %v6647_v51 = vor.u32 %v7802_v34, %v6646_v48  ;;  %v8076_v34 = vld [vmem:[%s11688_s0 + $0x98] sm:$0xff] }
 0x326   :  { %v1678_v8 = vpop.f32.mrf.mxu2  ;;  %v1847_v10 = vpop.f32.mrf.mxu3  ;;  %4739 = vmatpush.bf16.msra.mxu2 %v6647_v51 }
 0x327   :  { %v1679_v9 = vadd.f32 %v1678_v8, %v8948_v6  ;;  %v1343_v11 = vpop.f32.mrf.mxu0  ;;  %v1848_v12 = vadd.f32 %v1847_v10, %v8950_v7  ;;  %v1512_v60 = vpop.f32.mrf.mxu1  ;;  %v7834_v10 = vld [vmem:[%s11690_s3 + $0x3ac] sm:$0xf0] }
 0x328   :  { %v1344_v13 = vadd.f32 %v1343_v11, %v8930_v42  ;;  %v1513_v18 = vadd.f32 %v1512_v60, %v8932_v50  ;;  %v6518_v11 = vld [vmem:[%s11690_s3 + $0x1a0] sm:$0xf] }
 0x329   :  { %v2107_v14 = vmax.f32 %v1679_v9, 0.0  ;;  %v2108_v19 = vmax.f32 %v1848_v12, 0.0  ;;  %v7770_v12 = vld [vmem:[%s11690_s3 + $0x1ac] sm:$0xf0] }
 0x32a   :  { %v2113_v20 = vmax.f32 %v1344_v13, 0.0  ;;  %6197 = vmatmul.msk.bf16.gmra.mxu0 %vm491_vm1, %v8074_v21  ;;  %6229 = vmatmul.msk.bf16.gmra.mxu1 %vm491_vm1, %v8074_v21  ;;  %v2114_v23 = vmax.f32 %v1513_v18, 0.0 }
 0x32b   :  { %v2715_v22 = vadd.f32 %v2714_v2, %v2107_v14  ;;  %6261 = vmatmul.msk.bf16.gmra.mxu2 %vm491_vm1, %v8074_v21  ;;  %v2752_v24 = vadd.f32 %v2751_v3, %v2108_v19  ;;  %v6390_v3 = vld [vmem:[%s11690_s3 + $0xa0] sm:$0xf]  ;;  %v6519_v14 = vor.u32 %v7770_v12, %v6518_v11 }
 0x32c   :  { %v2642_v25 = vadd.f32 %v2641_v4, %v2113_v20  ;;  %6293 = vmatmul.msk.bf16.gmra.mxu3 %vm491_vm1, %v8074_v21  ;;  %v2679_v26 = vadd.f32 %v2678_v5, %v2114_v23  ;;  %v7738_v4 = vld [vmem:[%s11690_s3 + $0xac] sm:$0xf0]  ;;  %v6774_v5 = vld [vmem:[%s11690_s3 + $0x3a0] sm:$0xf] }
 0x32d   :  { %v6391_v9 = vor.u32 %v7738_v4, %v6390_v3  ;;  %v6775_v60 = vor.u32 %v7834_v10, %v6774_v5  ;;  %4726 = vmatpush.bf16.msra.mxu1 %v6519_v14 }
 0x32e   :  { %v1681_v29 = vpop.f32.mrf.mxu2 }
 0x32f   :  { %v1682_v27 = vadd.f32 %v1681_v29, %v8948_v6  ;;  %v1850_v30 = vpop.f32.mrf.mxu3  ;;  %v1345_v31 = vpop.f32.mrf.mxu0  ;;  %4713 = vmatpush.bf16.msra.mxu0 %v6391_v9  ;;  %4752 = vmatpush.bf16.msra.mxu3 %v6775_v60 }
 0x330   :  { %v1851_v15 = vadd.f32 %v1850_v30, %v8950_v7  ;;  %v1346_v32 = vadd.f32 %v1345_v31, %v8930_v42  ;;  %v1514_v35 = vpop.f32.mrf.mxu1 }
 0x331   :  { %v2115_v36 = vmax.f32 %v1682_v27, 0.0  ;;  %v1515_v28 = vadd.f32 %v1514_v35, %v8932_v50 }
 0x332   :  { %v2116_v37 = vmax.f32 %v1851_v15, 0.0  ;;  %v2121_v38 = vmax.f32 %v1346_v32, 0.0 }
 0x333   :  { %v2716_v33 = vadd.f32 %v2715_v22, %v2115_v36  ;;  %v2122_v39 = vmax.f32 %v1515_v28, 0.0 }
 0x334   :  { %v2753_v40 = vadd.f32 %v2752_v24, %v2116_v37  ;;  %v2643_v41 = vadd.f32 %v2642_v25, %v2121_v38 }
 0x335   :  { %v2680_v43 = vadd.f32 %v2679_v26, %v2122_v39 }
 0x336   :  { %v1683_v49 = vpop.f32.mrf.mxu2 }
 0x337   :  { %v1684_v45 = vadd.f32 %v1683_v49, %v8948_v6  ;;  %v1852_v52 = vpop.f32.mrf.mxu3  ;;  %v1348_v53 = vpop.f32.mrf.mxu0 }
 0x338   :  { %v1853_v54 = vadd.f32 %v1852_v52, %v8950_v7  ;;  %v1349_v55 = vadd.f32 %v1348_v53, %v8930_v42  ;;  %v1517_v57 = vpop.f32.mrf.mxu1 }
 0x339   :  { %v2123_v58 = vmax.f32 %v1684_v45, 0.0  ;;  %v1518_v59 = vadd.f32 %v1517_v57, %v8932_v50 }
 0x33a   :  { %v2124_v61 = vmax.f32 %v1853_v54, 0.0  ;;  %v2129_v62 = vmax.f32 %v1349_v55, 0.0  ;;  %6198 = vmatmul.msk.bf16.gmra.mxu0 %vm491_vm1, %v8075_v63  ;;  %6230 = vmatmul.msk.bf16.gmra.mxu1 %vm491_vm1, %v8075_v63 }
 0x33b   :  { %v2717_v0 = vadd.f32 %v2716_v33, %v2123_v58  ;;  %v2130_v1 = vmax.f32 %v1518_v59, 0.0  ;;  %6262 = vmatmul.msk.bf16.gmra.mxu2 %vm491_vm1, %v8075_v63 }
 0x33c   :  { %v2754_v2 = vadd.f32 %v2753_v40, %v2124_v61  ;;  %v2644_v44 = vadd.f32 %v2643_v41, %v2129_v62  ;;  %6294 = vmatmul.msk.bf16.gmra.mxu3 %vm491_vm1, %v8075_v63 }
 0x33d   :  { %v2681_v8 = vadd.f32 %v2680_v43, %v2130_v1 }
 0x33e   :  { %v1686_v13 = vpop.f32.mrf.mxu2 }
 0x33f   :  { %v1687_v18 = vadd.f32 %v1686_v13, %v8948_v6  ;;  %v1855_v19 = vpop.f32.mrf.mxu3  ;;  %v1350_v20 = vpop.f32.mrf.mxu0 }
 0x340   :  { %v1856_v21 = vadd.f32 %v1855_v19, %v8950_v7  ;;  %v1351_v22 = vadd.f32 %v1350_v20, %v8930_v42  ;;  %v1519_v23 = vpop.f32.mrf.mxu1 }
 0x341   :  { %v2131_v24 = vmax.f32 %v1687_v18, 0.0  ;;  %v1520_v25 = vadd.f32 %v1519_v23, %v8932_v50 }
 0x342   :  { %v2132_v26 = vmax.f32 %v1856_v21, 0.0  ;;  %v2137_v29 = vmax.f32 %v1351_v22, 0.0  ;;  %v8077_v22 = vld [vmem:[%s11688_s0 + $0xa0] sm:$0xff] }
 0x343   :  { %v2718_v27 = vadd.f32 %v2717_v0, %v2131_v24  ;;  %v2138_v30 = vmax.f32 %v1520_v25, 0.0 }
 0x344   :  { %v2755_v31 = vadd.f32 %v2754_v2, %v2132_v26  ;;  %v2645_v15 = vadd.f32 %v2644_v44, %v2137_v29 }
 0x345   :  { %v2682_v32 = vadd.f32 %v2681_v8, %v2138_v30 }
 0x346   :  { %v1688_v35 = vpop.f32.mrf.mxu2 }
 0x347   :  { %v1689_v36 = vadd.f32 %v1688_v35, %v8948_v6  ;;  %v1857_v28 = vpop.f32.mrf.mxu3  ;;  %v1353_v37 = vpop.f32.mrf.mxu0 }
 0x348   :  { %v1858_v38 = vadd.f32 %v1857_v28, %v8950_v7  ;;  %v1354_v33 = vadd.f32 %v1353_v37, %v8930_v42  ;;  %v1522_v39 = vpop.f32.mrf.mxu1 }
 0x349   :  { %v2139_v40 = vmax.f32 %v1689_v36, 0.0  ;;  %v1523_v41 = vadd.f32 %v1522_v39, %v8932_v50 }
 0x34a   :  { %v2140_v43 = vmax.f32 %v1858_v38, 0.0  ;;  %v2145_v48 = vmax.f32 %v1354_v33, 0.0  ;;  %6199 = vmatmul.msk.bf16.gmra.mxu0 %vm491_vm1, %v8076_v34  ;;  %6231 = vmatmul.msk.bf16.gmra.mxu1 %vm491_vm1, %v8076_v34 }
 0x34b   :  { %v2719_v49 = vadd.f32 %v2718_v27, %v2139_v40  ;;  %v2146_v51 = vmax.f32 %v1523_v41, 0.0  ;;  %6263 = vmatmul.msk.bf16.gmra.mxu2 %vm491_vm1, %v8076_v34 }
 0x34c   :  { %v2756_v45 = vadd.f32 %v2755_v31, %v2140_v43  ;;  %v2646_v52 = vadd.f32 %v2645_v15, %v2145_v48  ;;  %6295 = vmatmul.msk.bf16.gmra.mxu3 %vm491_vm1, %v8076_v34 }
 0x34d   :  { %v2683_v53 = vadd.f32 %v2682_v32, %v2146_v51 }
 0x34e   :  { %v1691_v54 = vpop.f32.mrf.mxu2 }
 0x34f   :  { %v1692_v55 = vadd.f32 %v1691_v54, %v8948_v6  ;;  %v1860_v57 = vpop.f32.mrf.mxu3  ;;  %v1355_v58 = vpop.f32.mrf.mxu0 }
 0x350   :  { %v1861_v59 = vadd.f32 %v1860_v57, %v8950_v7  ;;  %v1356_v61 = vadd.f32 %v1355_v58, %v8930_v42  ;;  %v1524_v62 = vpop.f32.mrf.mxu1 }
 0x351   :  { %v2147_v63 = vmax.f32 %v1692_v55, 0.0  ;;  %v1525_v0 = vadd.f32 %v1524_v62, %v8932_v50 }
 0x352   :  { %v2148_v1 = vmax.f32 %v1861_v59, 0.0  ;;  %v2153_v2 = vmax.f32 %v1356_v61, 0.0  ;;  %v8078_v61 = vld [vmem:[%s11688_s0 + $0xa8] sm:$0xff] }
 0x353   :  { %v2720_v44 = vadd.f32 %v2719_v49, %v2147_v63  ;;  %v2154_v3 = vmax.f32 %v1525_v0, 0.0 }
 0x354   :  { %v2757_v4 = vadd.f32 %v2756_v45, %v2148_v1  ;;  %v2647_v5 = vadd.f32 %v2646_v52, %v2153_v2 }
 0x355   :  { %v2684_v8 = vadd.f32 %v2683_v53, %v2154_v3 }
 0x356   :  { %v1693_v9 = vpop.f32.mrf.mxu2 }
 0x357   :  { %v1694_v10 = vadd.f32 %v1693_v9, %v8948_v6  ;;  %v1862_v11 = vpop.f32.mrf.mxu3  ;;  %v1358_v12 = vpop.f32.mrf.mxu0 }
 0x358   :  { %v1863_v13 = vadd.f32 %v1862_v11, %v8950_v7  ;;  %v1359_v60 = vadd.f32 %v1358_v12, %v8930_v42  ;;  %v1527_v14 = vpop.f32.mrf.mxu1 }
 0x359   :  { %v2155_v18 = vmax.f32 %v1694_v10, 0.0  ;;  %v1528_v19 = vadd.f32 %v1527_v14, %v8932_v50 }
 0x35a   :  { %v2156_v20 = vmax.f32 %v1863_v13, 0.0  ;;  %v2161_v21 = vmax.f32 %v1359_v60, 0.0  ;;  %6200 = vmatmul.msk.bf16.gmra.mxu0 %vm491_vm1, %v8077_v22  ;;  %6232 = vmatmul.msk.bf16.gmra.mxu1 %vm491_vm1, %v8077_v22 }
 0x35b   :  { %v2721_v23 = vadd.f32 %v2720_v44, %v2155_v18  ;;  %v2162_v24 = vmax.f32 %v1528_v19, 0.0  ;;  %6264 = vmatmul.msk.bf16.gmra.mxu2 %vm491_vm1, %v8077_v22 }
 0x35c   :  { %v2758_v25 = vadd.f32 %v2757_v4, %v2156_v20  ;;  %v2648_v26 = vadd.f32 %v2647_v5, %v2161_v21  ;;  %6296 = vmatmul.msk.bf16.gmra.mxu3 %vm491_vm1, %v8077_v22 }
 0x35d   :  { %v2685_v29 = vadd.f32 %v2684_v8, %v2162_v24 }
 0x35e   :  { %v1696_v27 = vpop.f32.mrf.mxu2 }
 0x35f   :  { %v1697_v30 = vadd.f32 %v1696_v27, %v8948_v6  ;;  %v1865_v31 = vpop.f32.mrf.mxu3  ;;  %v1360_v15 = vpop.f32.mrf.mxu0 }
 0x360   :  { %v1866_v32 = vadd.f32 %v1865_v31, %v8950_v7  ;;  %v1361_v35 = vadd.f32 %v1360_v15, %v8930_v42  ;;  %v1529_v36 = vpop.f32.mrf.mxu1 }
 0x361   :  { %v2163_v28 = vmax.f32 %v1697_v30, 0.0  ;;  %v1530_v37 = vadd.f32 %v1529_v36, %v8932_v50 }
 0x362   :  { %v2164_v38 = vmax.f32 %v1866_v32, 0.0  ;;  %v2169_v33 = vmax.f32 %v1361_v35, 0.0  ;;  %v8079_v35 = vld [vmem:[%s11688_s0 + $0xb0] sm:$0xff] }
 0x363   :  { %v2722_v39 = vadd.f32 %v2721_v23, %v2163_v28  ;;  %v2170_v40 = vmax.f32 %v1530_v37, 0.0 }
 0x364   :  { %v2759_v41 = vadd.f32 %v2758_v25, %v2164_v38  ;;  %v2649_v43 = vadd.f32 %v2648_v26, %v2169_v33 }
 0x365   :  { %v2686_v48 = vadd.f32 %v2685_v29, %v2170_v40 }
 0x366   :  { %v1698_v34 = vpop.f32.mrf.mxu2 }
 0x367   :  { %v1699_v49 = vadd.f32 %v1698_v34, %v8948_v6  ;;  %v1867_v51 = vpop.f32.mrf.mxu3  ;;  %v1363_v45 = vpop.f32.mrf.mxu0 }
 0x368   :  { %v1868_v52 = vadd.f32 %v1867_v51, %v8950_v7  ;;  %v1364_v53 = vadd.f32 %v1363_v45, %v8930_v42  ;;  %v1532_v54 = vpop.f32.mrf.mxu1 }
 0x369   :  { %v2171_v55 = vmax.f32 %v1699_v49, 0.0  ;;  %v1533_v57 = vadd.f32 %v1532_v54, %v8932_v50 }
 0x36a   :  { %v2172_v58 = vmax.f32 %v1868_v52, 0.0  ;;  %v2177_v59 = vmax.f32 %v1364_v53, 0.0  ;;  %6201 = vmatmul.msk.bf16.gmra.mxu0 %vm491_vm1, %v8078_v61  ;;  %6233 = vmatmul.msk.bf16.gmra.mxu1 %vm491_vm1, %v8078_v61 }
 0x36b   :  { %v2723_v62 = vadd.f32 %v2722_v39, %v2171_v55  ;;  %v2178_v63 = vmax.f32 %v1533_v57, 0.0  ;;  %6265 = vmatmul.msk.bf16.gmra.mxu2 %vm491_vm1, %v8078_v61 }
 0x36c   :  { %v2760_v0 = vadd.f32 %v2759_v41, %v2172_v58  ;;  %v2650_v1 = vadd.f32 %v2649_v43, %v2177_v59  ;;  %6297 = vmatmul.msk.bf16.gmra.mxu3 %vm491_vm1, %v8078_v61 }
 0x36d   :  { %v2687_v2 = vadd.f32 %v2686_v48, %v2178_v63 }
 0x36e   :  { %v1701_v44 = vpop.f32.mrf.mxu2 }
 0x36f   :  { %v1702_v3 = vadd.f32 %v1701_v44, %v8948_v6  ;;  %v1870_v4 = vpop.f32.mrf.mxu3  ;;  %v1365_v5 = vpop.f32.mrf.mxu0 }
 0x370   :  { %v1871_v8 = vadd.f32 %v1870_v4, %v8950_v7  ;;  %v1366_v9 = vadd.f32 %v1365_v5, %v8930_v42  ;;  %v1534_v10 = vpop.f32.mrf.mxu1 }
 0x371   :  { %v2179_v11 = vmax.f32 %v1702_v3, 0.0  ;;  %v1535_v12 = vadd.f32 %v1534_v10, %v8932_v50 }
 0x372   :  { %v2180_v13 = vmax.f32 %v1871_v8, 0.0  ;;  %v2185_v60 = vmax.f32 %v1366_v9, 0.0 }
 0x373   :  { %v2724_v14 = vadd.f32 %v2723_v62, %v2179_v11  ;;  %v2186_v18 = vmax.f32 %v1535_v12, 0.0  ;;  %v8080_v12 = vld [vmem:[%s11688_s0 + $0xb8] sm:$0xff] }
 0x374   :  { %v2761_v19 = vadd.f32 %v2760_v0, %v2180_v13  ;;  %v2651_v20 = vadd.f32 %v2650_v1, %v2185_v60  ;;  %v6630_v1 = vld [vmem:[%s11690_s3 + $0x280] sm:$0xf] }
 0x375   :  { %v2688_v21 = vadd.f32 %v2687_v2, %v2186_v18  ;;  %v7798_v2 = vld [vmem:[%s11690_s3 + $0x28c] sm:$0xf0] }
 0x376   :  { %v1703_v22 = vpop.f32.mrf.mxu2  ;;  %v6631_v5 = vor.u32 %v7798_v2, %v6630_v1 }
 0x377   :  { %v1704_v23 = vadd.f32 %v1703_v22, %v8948_v6  ;;  %v1872_v24 = vpop.f32.mrf.mxu3  ;;  %v1368_v25 = vpop.f32.mrf.mxu0  ;;  %v7734_v22 = vld [vmem:[%s11690_s3 + $0x8c] sm:$0xf0] }
 0x378   :  { %v1873_v26 = vadd.f32 %v1872_v24, %v8950_v7  ;;  %v1369_v29 = vadd.f32 %v1368_v25, %v8930_v42  ;;  %v1537_v27 = vpop.f32.mrf.mxu1  ;;  %4740 = vmatpush.bf16.msra.mxu2 %v6631_v5 }
 0x379   :  { %v2187_v30 = vmax.f32 %v1704_v23, 0.0  ;;  %v1538_v31 = vadd.f32 %v1537_v27, %v8932_v50  ;;  %v6758_v23 = vld [vmem:[%s11690_s3 + $0x380] sm:$0xf]  ;;  %v7830_v27 = vld [vmem:[%s11690_s3 + $0x38c] sm:$0xf0] }
 0x37a   :  { %v2188_v15 = vmax.f32 %v1873_v26, 0.0  ;;  %v2193_v32 = vmax.f32 %v1369_v29, 0.0  ;;  %6202 = vmatmul.msk.bf16.gmra.mxu0 %vm491_vm1, %v8079_v35  ;;  %6234 = vmatmul.msk.bf16.gmra.mxu1 %vm491_vm1, %v8079_v35 }
 0x37b   :  { %v2725_v36 = vadd.f32 %v2724_v14, %v2187_v30  ;;  %v2194_v28 = vmax.f32 %v1538_v31, 0.0  ;;  %6266 = vmatmul.msk.bf16.gmra.mxu2 %vm491_vm1, %v8079_v35  ;;  %v6502_v30 = vld [vmem:[%s11690_s3 + $0x180] sm:$0xf]  ;;  %v7766_v31 = vld [vmem:[%s11690_s3 + $0x18c] sm:$0xf0] }
 0x37c   :  { %v2762_v37 = vadd.f32 %v2761_v19, %v2188_v15  ;;  %v2652_v38 = vadd.f32 %v2651_v20, %v2193_v32  ;;  %6298 = vmatmul.msk.bf16.gmra.mxu3 %vm491_vm1, %v8079_v35 }
 0x37d   :  { %v2689_v33 = vadd.f32 %v2688_v21, %v2194_v28  ;;  %v6374_v21 = vld [vmem:[%s11690_s3 + $0x80] sm:$0xf]  ;;  %v6503_v28 = vor.u32 %v7766_v31, %v6502_v30  ;;  %v8082_v31 = vld [vmem:[%s11688_s0 + $0xc8] sm:$0xff] }
 0x37e   :  { %v1706_v39 = vpop.f32.mrf.mxu2  ;;  %v6375_v29 = vor.u32 %v7734_v22, %v6374_v21 }
 0x37f   :  { %v1707_v40 = vadd.f32 %v1706_v39, %v8948_v6  ;;  %v1875_v41 = vpop.f32.mrf.mxu3  ;;  %v1370_v43 = vpop.f32.mrf.mxu0  ;;  %4727 = vmatpush.bf16.msra.mxu1 %v6503_v28 }
 0x380   :  { %v1876_v48 = vadd.f32 %v1875_v41, %v8950_v7  ;;  %v1371_v34 = vadd.f32 %v1370_v43, %v8930_v42  ;;  %v1539_v49 = vpop.f32.mrf.mxu1  ;;  %4714 = vmatpush.bf16.msra.mxu0 %v6375_v29 }
 0x381   :  { %v2195_v51 = vmax.f32 %v1707_v40, 0.0  ;;  %v1540_v45 = vadd.f32 %v1539_v49, %v8932_v50 }
 0x382   :  { %v2196_v52 = vmax.f32 %v1876_v48, 0.0  ;;  %v2201_v53 = vmax.f32 %v1371_v34, 0.0 }
 0x383   :  { %v2726_v54 = vadd.f32 %v2725_v36, %v2195_v51  ;;  %v2202_v55 = vmax.f32 %v1540_v45, 0.0  ;;  %v6759_v36 = vor.u32 %v7830_v27, %v6758_v23 }
 0x384   :  { %v2763_v57 = vadd.f32 %v2762_v37, %v2196_v52  ;;  %v2653_v58 = vadd.f32 %v2652_v38, %v2201_v53 }
 0x385   :  { %v2690_v59 = vadd.f32 %v2689_v33, %v2202_v55  ;;  %4753 = vmatpush.bf16.msra.mxu3 %v6759_v36 }
 0x386   :  { %v1708_v61 = vpop.f32.mrf.mxu2 }
 0x387   :  { %v1709_v62 = vadd.f32 %v1708_v61, %v8948_v6  ;;  %v1877_v63 = vpop.f32.mrf.mxu3  ;;  %v1373_v0 = vpop.f32.mrf.mxu0 }
 0x388   :  { %v1878_v44 = vadd.f32 %v1877_v63, %v8950_v7  ;;  %v1374_v3 = vadd.f32 %v1373_v0, %v8930_v42  ;;  %v1542_v4 = vpop.f32.mrf.mxu1 }
 0x389   :  { %v2203_v8 = vmax.f32 %v1709_v62, 0.0  ;;  %v1543_v9 = vadd.f32 %v1542_v4, %v8932_v50 }
 0x38a   :  { %v2204_v10 = vmax.f32 %v1878_v44, 0.0  ;;  %v2209_v11 = vmax.f32 %v1374_v3, 0.0  ;;  %6203 = vmatmul.msk.bf16.gmra.mxu0 %vm491_vm1, %v8080_v12  ;;  %6235 = vmatmul.msk.bf16.gmra.mxu1 %vm491_vm1, %v8080_v12 }
 0x38b   :  { %v2727_v13 = vadd.f32 %v2726_v54, %v2203_v8  ;;  %v2210_v60 = vmax.f32 %v1543_v9, 0.0  ;;  %6267 = vmatmul.msk.bf16.gmra.mxu2 %vm491_vm1, %v8080_v12 }
 0x38c   :  { %v2764_v14 = vadd.f32 %v2763_v57, %v2204_v10  ;;  %v2654_v18 = vadd.f32 %v2653_v58, %v2209_v11  ;;  %6299 = vmatmul.msk.bf16.gmra.mxu3 %vm491_vm1, %v8080_v12  ;;  %v8081_v58 = vld [vmem:[%s11688_s0 + $0xc0] sm:$0xff] }
 0x38d   :  { %v2691_v19 = vadd.f32 %v2690_v59, %v2210_v60 }
 0x38e   :  { %v1711_v20 = vpop.f32.mrf.mxu2 }
 0x38f   :  { %v1712_v24 = vadd.f32 %v1711_v20, %v8948_v6  ;;  %v1880_v25 = vpop.f32.mrf.mxu3  ;;  %v1375_v26 = vpop.f32.mrf.mxu0 }
 0x390   :  { %v1881_v15 = vadd.f32 %v1880_v25, %v8950_v7  ;;  %v1376_v32 = vadd.f32 %v1375_v26, %v8930_v42  ;;  %v1544_v35 = vpop.f32.mrf.mxu1 }
 0x391   :  { %v2211_v37 = vmax.f32 %v1712_v24, 0.0  ;;  %v1545_v38 = vadd.f32 %v1544_v35, %v8932_v50 }
 0x392   :  { %v2212_v33 = vmax.f32 %v1881_v15, 0.0  ;;  %v2217_v39 = vmax.f32 %v1376_v32, 0.0 }
 0x393   :  { %v2728_v40 = vadd.f32 %v2727_v13, %v2211_v37  ;;  %v2218_v41 = vmax.f32 %v1545_v38, 0.0 }
 0x394   :  { %v2765_v43 = vadd.f32 %v2764_v14, %v2212_v33  ;;  %v9297_v48 = vadd.f32 %v2654_v18, %v2217_v39 }
 0x395   :  { %v9299_v34 = vadd.f32 %v2691_v19, %v2218_v41 }
 0x396   :  { %v1713_v49 = vpop.f32.mrf.mxu2 }
 0x397   :  { %v1714_v51 = vadd.f32 %v1713_v49, %v8948_v6  ;;  %v1882_v45 = vpop.f32.mrf.mxu3  ;;  %v1378_v52 = vpop.f32.mrf.mxu0 }
 0x398   :  { %v1883_v53 = vadd.f32 %v1882_v45, %v8950_v7  ;;  %v1547_v54 = vpop.f32.mrf.mxu1  ;;  %v1379_v62 = vadd.f32 %v1378_v52, %v8930_v42 }
 0x399   :  { %v2219_v55 = vmax.f32 %v1714_v51, 0.0  ;;  %v1548_v63 = vadd.f32 %v1547_v54, %v8932_v50 }
 0x39a   :  { %v2220_v57 = vmax.f32 %v1883_v53, 0.0  ;;  %6204 = vmatmul.msk.bf16.gmra.mxu0 %vm491_vm1, %v8081_v58  ;;  %6236 = vmatmul.msk.bf16.gmra.mxu1 %vm491_vm1, %v8081_v58  ;;  %v2225_v44 = vmax.f32 %v1379_v62, 0.0  ;;  %v6614_v62 = vld [vmem:[%s11690_s3 + $0x260] sm:$0xf] }
 0x39b   :  { %v9308_v59 = vadd.f32 %v2728_v40, %v2219_v55  ;;  %6268 = vmatmul.msk.bf16.gmra.mxu2 %vm491_vm1, %v8081_v58  ;;  %v2226_v5 = vmax.f32 %v1548_v63, 0.0  ;;  %v7794_v63 = vld [vmem:[%s11690_s3 + $0x26c] sm:$0xf0] }
 0x39c   :  { %v9311_v61 = vadd.f32 %v2765_v43, %v2220_v57  ;;  %6300 = vmatmul.msk.bf16.gmra.mxu3 %vm491_vm1, %v8081_v58 }
 0x39e   :  { %v1716_v0 = vpop.f32.mrf.mxu2 }
 0x39f   :  { %v1885_v1 = vpop.f32.mrf.mxu3  ;;  %v1380_v2 = vpop.f32.mrf.mxu0  ;;  %v1717_v12 = vadd.f32 %v1716_v0, %v8948_v6 }
 0x3a0   :  { %v1381_v3 = vadd.f32 %v1380_v2, %v8930_v42  ;;  %v1549_v4 = vpop.f32.mrf.mxu1  ;;  %v1886_v60 = vadd.f32 %v1885_v1, %v8950_v7  ;;  %v6615_v1 = vor.u32 %v7794_v63, %v6614_v62 }
 0x3a1   :  { %v1550_v8 = vadd.f32 %v1549_v4, %v8932_v50  ;;  %v2227_v24 = vmax.f32 %v1717_v12, 0.0 }
 0x3a2   :  { %v2233_v9 = vmax.f32 %v1381_v3, 0.0  ;;  %v2228_v29 = vmax.f32 %v1886_v60, 0.0  ;;  %4741 = vmatpush.bf16.msra.mxu2 %v6615_v1 }
 0x3a3   :  { %v2234_v10 = vmax.f32 %v1550_v8, 0.0 }
 0x3a4   :  { %v2921_v11 = vadd.f32 %v2233_v9, %v2225_v44 }
 0x3a5   :  { %v2958_v13 = vadd.f32 %v2234_v10, %v2226_v5 }
 0x3a6   :  { %v1718_v14 = vpop.f32.mrf.mxu2 }
 0x3a7   :  { %v1719_v18 = vadd.f32 %v1718_v14, %v8948_v6  ;;  %v1887_v19 = vpop.f32.mrf.mxu3  ;;  %v1383_v20 = vpop.f32.mrf.mxu0 }
 0x3a8   :  { %v1888_v21 = vadd.f32 %v1887_v19, %v8950_v7  ;;  %v1384_v22 = vadd.f32 %v1383_v20, %v8930_v42  ;;  %v1552_v23 = vpop.f32.mrf.mxu1  ;;  %v6358_v20 = vld [vmem:[%s11690_s3 + $0x60] sm:$0xf] }
 0x3a9   :  { %v2235_v25 = vmax.f32 %v1719_v18, 0.0  ;;  %v1553_v26 = vadd.f32 %v1552_v23, %v8932_v50 }
 0x3aa   :  { %v2236_v27 = vmax.f32 %v1888_v21, 0.0  ;;  %v2241_v30 = vmax.f32 %v1384_v22, 0.0  ;;  %6205 = vmatmul.msk.bf16.gmra.mxu0 %vm491_vm1, %v8082_v31  ;;  %6237 = vmatmul.msk.bf16.gmra.mxu1 %vm491_vm1, %v8082_v31  ;;  %v7730_v21 = vld [vmem:[%s11690_s3 + $0x6c] sm:$0xf0]  ;;  %v6742_v22 = vld [vmem:[%s11690_s3 + $0x360] sm:$0xf] }
 0x3ab   :  { %v2995_v15 = vadd.f32 %v2235_v25, %v2227_v24  ;;  %v2242_v32 = vmax.f32 %v1553_v26, 0.0  ;;  %6269 = vmatmul.msk.bf16.gmra.mxu2 %vm491_vm1, %v8082_v31  ;;  %v6359_v24 = vor.u32 %v7730_v21, %v6358_v20  ;;  %v7826_v25 = vld [vmem:[%s11690_s3 + $0x36c] sm:$0xf0]  ;;  %v6486_v26 = vld [vmem:[%s11690_s3 + $0x160] sm:$0xf] }
 0x3ac   :  { %v3032_v35 = vadd.f32 %v2236_v27, %v2228_v29  ;;  %v2922_v36 = vadd.f32 %v2921_v11, %v2241_v30  ;;  %6301 = vmatmul.msk.bf16.gmra.mxu3 %vm491_vm1, %v8082_v31  ;;  %v7762_v29 = vld [vmem:[%s11690_s3 + $0x16c] sm:$0xf0]  ;;  %v6743_v30 = vor.u32 %v7826_v25, %v6742_v22 }
 0x3ad   :  { %v2959_v28 = vadd.f32 %v2958_v13, %v2242_v32  ;;  %v8083_v13 = vld [vmem:[%s11688_s0 + $0xd0] sm:$0xff]  ;;  %v6487_v31 = vor.u32 %v7762_v29, %v6486_v26  ;;  %4715 = vmatpush.bf16.msra.mxu0 %v6359_v24 }
 0x3ae   :  { %v1721_v37 = vpop.f32.mrf.mxu2  ;;  %4754 = vmatpush.bf16.msra.mxu3 %v6743_v30 }
 0x3af   :  { %v1722_v38 = vadd.f32 %v1721_v37, %v8948_v6  ;;  %v1890_v33 = vpop.f32.mrf.mxu3  ;;  %v1385_v39 = vpop.f32.mrf.mxu0  ;;  %4728 = vmatpush.bf16.msra.mxu1 %v6487_v31 }
 0x3b0   :  { %v1891_v40 = vadd.f32 %v1890_v33, %v8950_v7  ;;  %v1386_v41 = vadd.f32 %v1385_v39, %v8930_v42  ;;  %v1554_v43 = vpop.f32.mrf.mxu1 }
 0x3b1   :  { %v2243_v49 = vmax.f32 %v1722_v38, 0.0  ;;  %v1555_v51 = vadd.f32 %v1554_v43, %v8932_v50 }
 0x3b2   :  { %v2244_v45 = vmax.f32 %v1891_v40, 0.0  ;;  %v2249_v52 = vmax.f32 %v1386_v41, 0.0 }
 0x3b3   :  { %v2996_v53 = vadd.f32 %v2995_v15, %v2243_v49  ;;  %v2250_v54 = vmax.f32 %v1555_v51, 0.0 }
 0x3b4   :  { %v3033_v55 = vadd.f32 %v3032_v35, %v2244_v45  ;;  %v2923_v57 = vadd.f32 %v2922_v36, %v2249_v52 }
 0x3b5   :  { %v2960_v58 = vadd.f32 %v2959_v28, %v2250_v54 }
 0x3b6   :  { %v1723_v0 = vpop.f32.mrf.mxu2 }
 0x3b7   :  { %v1724_v2 = vadd.f32 %v1723_v0, %v8948_v6  ;;  %v1892_v44 = vpop.f32.mrf.mxu3  ;;  %v1388_v3 = vpop.f32.mrf.mxu0 }
 0x3b8   :  { %v1893_v4 = vadd.f32 %v1892_v44, %v8950_v7  ;;  %v1389_v5 = vadd.f32 %v1388_v3, %v8930_v42  ;;  %v1557_v8 = vpop.f32.mrf.mxu1  ;;  %v8084_v44 = vld [vmem:[%s11688_s0 + $0xd8] sm:$0xff] }
 0x3b9   :  { %v2251_v9 = vmax.f32 %v1724_v2, 0.0  ;;  %v1558_v10 = vadd.f32 %v1557_v8, %v8932_v50 }
 0x3ba   :  { %v2252_v11 = vmax.f32 %v1893_v4, 0.0  ;;  %v2257_v12 = vmax.f32 %v1389_v5, 0.0  ;;  %6206 = vmatmul.msk.bf16.gmra.mxu0 %vm491_vm1, %v8083_v13  ;;  %6238 = vmatmul.msk.bf16.gmra.mxu1 %vm491_vm1, %v8083_v13 }
 0x3bb   :  { %v2997_v60 = vadd.f32 %v2996_v53, %v2251_v9  ;;  %v2258_v14 = vmax.f32 %v1558_v10, 0.0  ;;  %6270 = vmatmul.msk.bf16.gmra.mxu2 %vm491_vm1, %v8083_v13 }
 0x3bc   :  { %v3034_v18 = vadd.f32 %v3033_v55, %v2252_v11  ;;  %v2924_v19 = vadd.f32 %v2923_v57, %v2257_v12  ;;  %6302 = vmatmul.msk.bf16.gmra.mxu3 %vm491_vm1, %v8083_v13 }
 0x3bd   :  { %v2961_v23 = vadd.f32 %v2960_v58, %v2258_v14 }
 0x3be   :  { %v1726_v27 = vpop.f32.mrf.mxu2 }
 0x3bf   :  { %v1727_v15 = vadd.f32 %v1726_v27, %v8948_v6  ;;  %v1895_v32 = vpop.f32.mrf.mxu3  ;;  %v1390_v35 = vpop.f32.mrf.mxu0 }
 0x3c0   :  { %v1896_v36 = vadd.f32 %v1895_v32, %v8950_v7  ;;  %v1391_v28 = vadd.f32 %v1390_v35, %v8930_v42  ;;  %v1559_v37 = vpop.f32.mrf.mxu1 }
 0x3c1   :  { %v2259_v38 = vmax.f32 %v1727_v15, 0.0  ;;  %v1560_v33 = vadd.f32 %v1559_v37, %v8932_v50 }
 0x3c2   :  { %v2260_v39 = vmax.f32 %v1896_v36, 0.0  ;;  %v2265_v40 = vmax.f32 %v1391_v28, 0.0 }
 0x3c3   :  { %v2998_v41 = vadd.f32 %v2997_v60, %v2259_v38  ;;  %v2266_v43 = vmax.f32 %v1560_v33, 0.0 }
 0x3c4   :  { %v3035_v49 = vadd.f32 %v3034_v18, %v2260_v39  ;;  %v2925_v51 = vadd.f32 %v2924_v19, %v2265_v40  ;;  %v8085_v39 = vld [vmem:[%s11688_s0 + $0xe0] sm:$0xff] }
 0x3c5   :  { %v2962_v45 = vadd.f32 %v2961_v23, %v2266_v43 }
 0x3c6   :  { %v1728_v52 = vpop.f32.mrf.mxu2 }
 0x3c7   :  { %v1729_v53 = vadd.f32 %v1728_v52, %v8948_v6  ;;  %v1897_v54 = vpop.f32.mrf.mxu3  ;;  %v1393_v55 = vpop.f32.mrf.mxu0 }
 0x3c8   :  { %v1898_v57 = vadd.f32 %v1897_v54, %v8950_v7  ;;  %v1394_v58 = vadd.f32 %v1393_v55, %v8930_v42  ;;  %v1562_v62 = vpop.f32.mrf.mxu1 }
 0x3c9   :  { %v2267_v63 = vmax.f32 %v1729_v53, 0.0  ;;  %v1563_v0 = vadd.f32 %v1562_v62, %v8932_v50 }
 0x3ca   :  { %v2268_v1 = vmax.f32 %v1898_v57, 0.0  ;;  %v2273_v2 = vmax.f32 %v1394_v58, 0.0  ;;  %6207 = vmatmul.msk.bf16.gmra.mxu0 %vm491_vm1, %v8084_v44  ;;  %6239 = vmatmul.msk.bf16.gmra.mxu1 %vm491_vm1, %v8084_v44 }
 0x3cb   :  { %v2999_v3 = vadd.f32 %v2998_v41, %v2267_v63  ;;  %v2274_v4 = vmax.f32 %v1563_v0, 0.0  ;;  %6271 = vmatmul.msk.bf16.gmra.mxu2 %vm491_vm1, %v8084_v44 }
 0x3cc   :  { %v3036_v5 = vadd.f32 %v3035_v49, %v2268_v1  ;;  %v2926_v8 = vadd.f32 %v2925_v51, %v2273_v2  ;;  %6303 = vmatmul.msk.bf16.gmra.mxu3 %vm491_vm1, %v8084_v44 }
 0x3cd   :  { %v2963_v9 = vadd.f32 %v2962_v45, %v2274_v4 }
 0x3ce   :  { %v1731_v10 = vpop.f32.mrf.mxu2 }
 0x3cf   :  { %v1732_v11 = vadd.f32 %v1731_v10, %v8948_v6  ;;  %v1900_v12 = vpop.f32.mrf.mxu3  ;;  %v1395_v13 = vpop.f32.mrf.mxu0 }
 0x3d0   :  { %v1901_v60 = vadd.f32 %v1900_v12, %v8950_v7  ;;  %v1396_v14 = vadd.f32 %v1395_v13, %v8930_v42  ;;  %v1564_v18 = vpop.f32.mrf.mxu1 }
 0x3d1   :  { %v2275_v19 = vmax.f32 %v1732_v11, 0.0  ;;  %v1565_v20 = vadd.f32 %v1564_v18, %v8932_v50 }
 0x3d2   :  { %v2276_v21 = vmax.f32 %v1901_v60, 0.0  ;;  %v2281_v22 = vmax.f32 %v1396_v14, 0.0 }
 0x3d3   :  { %v3000_v23 = vadd.f32 %v2999_v3, %v2275_v19  ;;  %v2282_v24 = vmax.f32 %v1565_v20, 0.0 }
 0x3d4   :  { %v3037_v25 = vadd.f32 %v3036_v5, %v2276_v21  ;;  %v2927_v26 = vadd.f32 %v2926_v8, %v2281_v22  ;;  %v8086_v21 = vld [vmem:[%s11688_s0 + $0xe8] sm:$0xff] }
 0x3d5   :  { %v2964_v29 = vadd.f32 %v2963_v9, %v2282_v24 }
 0x3d6   :  { %v1733_v27 = vpop.f32.mrf.mxu2 }
 0x3d7   :  { %v1734_v30 = vadd.f32 %v1733_v27, %v8948_v6  ;;  %v1902_v31 = vpop.f32.mrf.mxu3  ;;  %v1398_v15 = vpop.f32.mrf.mxu0  ;;  %v6342_v27 = vld [vmem:[%s11690_s3 + $0x40] sm:$0xf] }
 0x3d8   :  { %v1903_v32 = vadd.f32 %v1902_v31, %v8950_v7  ;;  %v1399_v35 = vadd.f32 %v1398_v15, %v8930_v42  ;;  %v1567_v36 = vpop.f32.mrf.mxu1  ;;  %v6470_v31 = vld [vmem:[%s11690_s3 + $0x140] sm:$0xf] }
 0x3d9   :  { %v2283_v28 = vmax.f32 %v1734_v30, 0.0  ;;  %v1568_v37 = vadd.f32 %v1567_v36, %v8932_v50  ;;  %v7726_v30 = vld [vmem:[%s11690_s3 + $0x4c] sm:$0xf0] }
 0x3da   :  { %v2284_v38 = vmax.f32 %v1903_v32, 0.0  ;;  %v2289_v33 = vmax.f32 %v1399_v35, 0.0  ;;  %6208 = vmatmul.msk.bf16.gmra.mxu0 %vm491_vm1, %v8085_v39  ;;  %6240 = vmatmul.msk.bf16.gmra.mxu1 %vm491_vm1, %v8085_v39  ;;  %v6343_v36 = vor.u32 %v7726_v30, %v6342_v27 }
 0x3db   :  { %v3001_v40 = vadd.f32 %v3000_v23, %v2283_v28  ;;  %v2290_v41 = vmax.f32 %v1568_v37, 0.0  ;;  %6272 = vmatmul.msk.bf16.gmra.mxu2 %vm491_vm1, %v8085_v39  ;;  %v7758_v28 = vld [vmem:[%s11690_s3 + $0x14c] sm:$0xf0]  ;;  %v6598_v37 = vld [vmem:[%s11690_s3 + $0x240] sm:$0xf] }
 0x3dc   :  { %v3038_v43 = vadd.f32 %v3037_v25, %v2284_v38  ;;  %v2928_v49 = vadd.f32 %v2927_v26, %v2289_v33  ;;  %6304 = vmatmul.msk.bf16.gmra.mxu3 %vm491_vm1, %v8085_v39  ;;  %v7790_v38 = vld [vmem:[%s11690_s3 + $0x24c] sm:$0xf0]  ;;  %4716 = vmatpush.bf16.msra.mxu0 %v6343_v36 }
 0x3dd   :  { %v2965_v51 = vadd.f32 %v2964_v29, %v2290_v41  ;;  %v6599_v41 = vor.u32 %v7790_v38, %v6598_v37 }
 0x3de   :  { %v1736_v45 = vpop.f32.mrf.mxu2 }
 0x3df   :  { %v1737_v52 = vadd.f32 %v1736_v45, %v8948_v6  ;;  %v1905_v53 = vpop.f32.mrf.mxu3  ;;  %v1400_v54 = vpop.f32.mrf.mxu0  ;;  %4742 = vmatpush.bf16.msra.mxu2 %v6599_v41 }
 0x3e0   :  { %v1906_v55 = vadd.f32 %v1905_v53, %v8950_v7  ;;  %v1401_v57 = vadd.f32 %v1400_v54, %v8930_v42  ;;  %v1569_v58 = vpop.f32.mrf.mxu1 }
 0x3e1   :  { %v2291_v62 = vmax.f32 %v1737_v52, 0.0  ;;  %v1570_v63 = vadd.f32 %v1569_v58, %v8932_v50 }
 0x3e2   :  { %v2292_v0 = vmax.f32 %v1906_v55, 0.0  ;;  %v2297_v1 = vmax.f32 %v1401_v57, 0.0  ;;  %v6326_v55 = vld [vmem:[%s11690_s3 + $0x20] sm:$0xf]  ;;  %v7722_v57 = vld [vmem:[%s11690_s3 + $0x2c] sm:$0xf0] }
 0x3e3   :  { %v3002_v2 = vadd.f32 %v3001_v40, %v2291_v62  ;;  %v2298_v44 = vmax.f32 %v1570_v63, 0.0  ;;  %v6471_v40 = vor.u32 %v7758_v28, %v6470_v31  ;;  %v6327_v62 = vor.u32 %v7722_v57, %v6326_v55  ;;  %v6454_v63 = vld [vmem:[%s11690_s3 + $0x120] sm:$0xf] }
 0x3e4   :  { %v3039_v3 = vadd.f32 %v3038_v43, %v2292_v0  ;;  %v2929_v4 = vadd.f32 %v2928_v49, %v2297_v1  ;;  %v6726_v43 = vld [vmem:[%s11690_s3 + $0x340] sm:$0xf]  ;;  %v7822_v49 = vld [vmem:[%s11690_s3 + $0x34c] sm:$0xf0] }
 0x3e5   :  { %v2966_v5 = vadd.f32 %v2965_v51, %v2298_v44  ;;  %v6727_v53 = vor.u32 %v7822_v49, %v6726_v43  ;;  %4729 = vmatpush.bf16.msra.mxu1 %v6471_v40  ;;  %v7754_v0 = vld [vmem:[%s11690_s3 + $0x12c] sm:$0xf0]  ;;  %v6582_v44 = vld [vmem:[%s11690_s3 + $0x220] sm:$0xf]  ;;  %4717 = vmatpush.bf16.msra.mxu0 %v6327_v62 }
 0x3e6   :  { %v1738_v8 = vpop.f32.mrf.mxu2  ;;  %v6694_v31 = vld [vmem:[%s11690_s3 + $0x300] sm:$0xf] }
 0x3e7   :  { %v1739_v9 = vadd.f32 %v1738_v8, %v8948_v6  ;;  %v1907_v10 = vpop.f32.mrf.mxu3  ;;  %v1403_v11 = vpop.f32.mrf.mxu0  ;;  %4755 = vmatpush.bf16.msra.mxu3 %v6727_v53 }
 0x3e8   :  { %v1908_v12 = vadd.f32 %v1907_v10, %v8950_v7  ;;  %v1404_v13 = vadd.f32 %v1403_v11, %v8930_v42  ;;  %v1572_v60 = vpop.f32.mrf.mxu1  ;;  %v7818_v10 = vld [vmem:[%s11690_s3 + $0x32c] sm:$0xf0] }
 0x3e9   :  { %v2299_v14 = vmax.f32 %v1739_v9, 0.0  ;;  %v1573_v18 = vadd.f32 %v1572_v60, %v8932_v50  ;;  %v7718_v60 = vld [vmem:[%s11690_s3 + $0xc] sm:$0xf0] }
 0x3ea   :  { %v2300_v19 = vmax.f32 %v1908_v12, 0.0  ;;  %v2305_v20 = vmax.f32 %v1404_v13, 0.0  ;;  %6209 = vmatmul.msk.bf16.gmra.mxu0 %vm491_vm1, %v8086_v21  ;;  %6241 = vmatmul.msk.bf16.gmra.mxu1 %vm491_vm1, %v8086_v21  ;;  %v6310_v13 = vld [vmem:[%s11690_s3] sm:$0xf] }
 0x3eb   :  { %v3003_v22 = vadd.f32 %v3002_v2, %v2299_v14  ;;  %v2306_v23 = vmax.f32 %v1573_v18, 0.0  ;;  %6273 = vmatmul.msk.bf16.gmra.mxu2 %vm491_vm1, %v8086_v21  ;;  %v6455_v2 = vor.u32 %v7754_v0, %v6454_v63  ;;  %v6438_v14 = vld [vmem:[%s11690_s3 + $0x100] sm:$0xf] }
 0x3ec   :  { %v3040_v24 = vadd.f32 %v3039_v3, %v2300_v19  ;;  %v9414_v25 = vadd.f32 %v2929_v4, %v2305_v20  ;;  %6305 = vmatmul.msk.bf16.gmra.mxu3 %vm491_vm1, %v8086_v21  ;;  %v7786_v3 = vld [vmem:[%s11690_s3 + $0x22c] sm:$0xf0]  ;;  %v6710_v4 = vld [vmem:[%s11690_s3 + $0x320] sm:$0xf]  ;;  %v6311_v20 = vor.u32 %v7718_v60, %v6310_v13 }
 0x3ed   :  { %v9417_v26 = vadd.f32 %v2966_v5, %v2306_v23  ;;  %v6583_v9 = vor.u32 %v7786_v3, %v6582_v44  ;;  %4730 = vmatpush.bf16.msra.mxu1 %v6455_v2  ;;  %v6711_v12 = vor.u32 %v7818_v10, %v6710_v4  ;;  %v7750_v21 = vld [vmem:[%s11690_s3 + $0x10c] sm:$0xf0] }
 0x3ee   :  { %v1741_v29 = vpop.f32.mrf.mxu2  ;;  %v7782_v23 = vld [vmem:[%s11690_s3 + $0x20c] sm:$0xf0]  ;;  %v6439_v27 = vor.u32 %v7750_v21, %v6438_v14  ;;  %4718 = vmatpush.bf16.msra.mxu0 %v6311_v20 }
 0x3ef   :  { %v1742_v15 = vadd.f32 %v1741_v29, %v8948_v6  ;;  %v1910_v32 = vpop.f32.mrf.mxu3  ;;  %v1405_v35 = vpop.f32.mrf.mxu0  ;;  %4743 = vmatpush.bf16.msra.mxu2 %v6583_v9  ;;  %4756 = vmatpush.bf16.msra.mxu3 %v6711_v12 }
 0x3f0   :  { %v1911_v33 = vadd.f32 %v1910_v32, %v8950_v7  ;;  %v1574_v39 = vpop.f32.mrf.mxu1  ;;  %v1406_v45 = vadd.f32 %v1405_v35, %v8930_v42 }
 0x3f1   :  { %v2307_v51 = vmax.f32 %v1742_v15, 0.0  ;;  %v1575_v52 = vadd.f32 %v1574_v39, %v8932_v50  ;;  %v7814_v15 = vld [vmem:[%s11690_s3 + $0x30c] sm:$0xf0]  ;;  %4731 = vmatpush.bf16.msra.mxu1 %v6439_v27 }
 0x3f2   :  { %v2308_v54 = vmax.f32 %v1911_v33, 0.0  ;;  %v2313_v5 = vmax.f32 %v1406_v45, 0.0  ;;  %v6695_v36 = vor.u32 %v7814_v15, %v6694_v31  ;;  %v8087_v33 = vld [vmem:[%s11688_s0 + $0xf0] sm:$0xff] }
 0x3f3   :  { %v3004_v58 = vadd.f32 %v3003_v22, %v2307_v51  ;;  %v2314_v8 = vmax.f32 %v1575_v52, 0.0  ;;  %v6566_v22 = vld [vmem:[%s11690_s3 + $0x200] sm:$0xf] }
 0x3f4   :  { %v3041_v1 = vadd.f32 %v3040_v24, %v2308_v54  ;;  %v6567_v30 = vor.u32 %v7782_v23, %v6566_v22  ;;  %v2931_v28 = vadd.f32 %v9414_v25, %v2313_v5  ;;  %4757 = vmatpush.bf16.msra.mxu3 %v6695_v36 }
 0x3f5   :  { %v2968_v39 = vadd.f32 %v9417_v26, %v2314_v8 }
 0x3f6   :  { %v1743_v11 = vpop.f32.mrf.mxu2  ;;  %4744 = vmatpush.bf16.msra.mxu2 %v6567_v30 }
 0x3f7   :  { %v1912_v18 = vpop.f32.mrf.mxu3  ;;  %v1408_v19 = vpop.f32.mrf.mxu0  ;;  %v1744_v32 = vadd.f32 %v1743_v11, %v8948_v6 }
 0x3f8   :  { %v1409_v24 = vadd.f32 %v1408_v19, %v8930_v42  ;;  %v1577_v29 = vpop.f32.mrf.mxu1  ;;  %v1913_v37 = vadd.f32 %v1912_v18, %v8950_v7  ;;  %v8088_v18 = vld [vmem:[%s11688_s0 + $0xf8] sm:$0xff] }
 0x3f9   :  { %v1578_v35 = vadd.f32 %v1577_v29, %v8932_v50  ;;  %v2315_v25 = vmax.f32 %v1744_v32, 0.0 }
 0x3fa   :  { %v2321_v38 = vmax.f32 %v1409_v24, 0.0  ;;  %6210 = vmatmul.msk.bf16.gmra.mxu0 %vm491_vm1, %v8087_v33  ;;  %6242 = vmatmul.msk.bf16.gmra.mxu1 %vm491_vm1, %v8087_v33  ;;  %v2316_v49 = vmax.f32 %v1913_v37, 0.0 }
 0x3fb   :  { %v2322_v40 = vmax.f32 %v1578_v35, 0.0  ;;  %6274 = vmatmul.msk.bf16.gmra.mxu2 %vm491_vm1, %v8087_v33  ;;  %v3005_v55 = vadd.f32 %v3004_v58, %v2315_v25 }
 0x3fc   :  { %v2932_v41 = vadd.f32 %v2931_v28, %v2321_v38  ;;  %6306 = vmatmul.msk.bf16.gmra.mxu3 %vm491_vm1, %v8087_v33  ;;  %v3042_v62 = vadd.f32 %v3041_v1, %v2316_v49 }
 0x3fd   :  { %v2969_v43 = vadd.f32 %v2968_v39, %v2322_v40 }
 0x3fe   :  { %v1746_v51 = vpop.f32.mrf.mxu2 }
 0x3ff   :  { %v1747_v45 = vadd.f32 %v1746_v51, %v8948_v6  ;;  %v1915_v52 = vpop.f32.mrf.mxu3  ;;  %v1410_v53 = vpop.f32.mrf.mxu0 }
 0x400   :  { %v1916_v54 = vadd.f32 %v1915_v52, %v8950_v7  ;;  %v1579_v26 = vpop.f32.mrf.mxu1  ;;  %v1411_v0 = vadd.f32 %v1410_v53, %v8930_v42  ;;  %v9530_v53 = vpack.c.b16 %v8965_v46, %v8965_v46  ;;  %v9547_v46 = vpack.c.b16 %v8988_v47, %v8988_v47 }
 0x401   :  { %v2323_v57 = vmax.f32 %v1747_v45, 0.0  ;;  %v1580_v44 = vadd.f32 %v1579_v26, %v8932_v50 }
 0x402   :  { %v2324_v63 = vmax.f32 %v1916_v54, 0.0  ;;  %v2329_v4 = vmax.f32 %v1411_v0, 0.0  ;;  %v9534_v54 = vpack.c.b16 %v8977_v56, %v8977_v56 }
 0x403   :  { %v3006_v2 = vadd.f32 %v3005_v55, %v2323_v57  ;;  %v2330_v8 = vmax.f32 %v1580_v44, 0.0  ;;  %v9540_v57 = vpack.c.b16 %v8983_v17, %v8983_v17 }
 0x404   :  { %v3043_v3 = vadd.f32 %v3042_v62, %v2324_v63  ;;  %v2933_v1 = vadd.f32 %v2932_v41, %v2329_v4 }
 0x405   :  { %v2970_v19 = vadd.f32 %v2969_v43, %v2330_v8 }
 0x406   :  { %v1748_v5 = vpop.f32.mrf.mxu2 }
 0x407   :  { %v1917_v9 = vpop.f32.mrf.mxu3  ;;  %v1413_v10 = vpop.f32.mrf.mxu0  ;;  %v1749_v13 = vadd.f32 %v1748_v5, %v8948_v6 }
 0x408   :  { %v1414_v11 = vadd.f32 %v1413_v10, %v8930_v42  ;;  %v1582_v12 = vpop.f32.mrf.mxu1  ;;  %v1918_v60 = vadd.f32 %v1917_v9, %v8950_v7 }
 0x409   :  { %v1583_v58 = vadd.f32 %v1582_v12, %v8932_v50  ;;  %v2331_v22 = vmax.f32 %v1749_v13, 0.0 }
 0x40a   :  { %v2337_v14 = vmax.f32 %v1414_v11, 0.0  ;;  %6211 = vmatmul.msk.bf16.gmra.mxu0 %vm491_vm1, %v8088_v18  ;;  %6243 = vmatmul.msk.bf16.gmra.mxu1 %vm491_vm1, %v8088_v18  ;;  %v2332_v24 = vmax.f32 %v1918_v60, 0.0 }
 0x40b   :  { %v2338_v20 = vmax.f32 %v1583_v58, 0.0  ;;  %6275 = vmatmul.msk.bf16.gmra.mxu2 %vm491_vm1, %v8088_v18  ;;  %v3007_v35 = vadd.f32 %v3006_v2, %v2331_v22 }
 0x40c   :  { %v2934_v21 = vadd.f32 %v2933_v1, %v2337_v14  ;;  %6307 = vmatmul.msk.bf16.gmra.mxu3 %vm491_vm1, %v8088_v18  ;;  %v3044_v28 = vadd.f32 %v3043_v3, %v2332_v24 }
 0x40d   :  { %v2971_v23 = vadd.f32 %v2970_v19, %v2338_v20 }
 0x40e   :  { %v1751_v29 = vpop.f32.mrf.mxu2 }
 0x40f   :  { %v1752_v27 = vadd.f32 %v1751_v29, %v8948_v6  ;;  %v1920_v30 = vpop.f32.mrf.mxu3  ;;  %v1415_v31 = vpop.f32.mrf.mxu0 }
 0x410   :  { %v1921_v15 = vadd.f32 %v1920_v30, %v8950_v7  ;;  %v1584_v32 = vpop.f32.mrf.mxu1  ;;  %v1416_v38 = vadd.f32 %v1415_v31, %v8930_v42 }
 0x411   :  { %v2339_v36 = vmax.f32 %v1752_v27, 0.0  ;;  %v1585_v39 = vadd.f32 %v1584_v32, %v8932_v50 }
 0x412   :  { %v2340_v37 = vmax.f32 %v1921_v15, 0.0  ;;  %v2345_v41 = vmax.f32 %v1416_v38, 0.0 }
 0x413   :  { %v3008_v33 = vadd.f32 %v3007_v35, %v2339_v36  ;;  %v2346_v43 = vmax.f32 %v1585_v39, 0.0 }
 0x414   :  { %v3045_v40 = vadd.f32 %v3044_v28, %v2340_v37  ;;  %v2935_v62 = vadd.f32 %v2934_v21, %v2345_v41 }
 0x415   :  { %v2972_v56 = vadd.f32 %v2971_v23, %v2346_v43 }
 0x416   :  { %v1753_v25 = vpop.f32.mrf.mxu2 }
 0x417   :  { %v1922_v49 = vpop.f32.mrf.mxu3  ;;  %v1418_v51 = vpop.f32.mrf.mxu0  ;;  %v1754_v26 = vadd.f32 %v1753_v25, %v8948_v6 }
 0x418   :  { %v1419_v45 = vadd.f32 %v1418_v51, %v8930_v42  ;;  %v1587_v52 = vpop.f32.mrf.mxu1  ;;  %v1923_v63 = vadd.f32 %v1922_v49, %v8950_v7 }
 0x419   :  { %v1588_v55 = vadd.f32 %v1587_v52, %v8932_v50  ;;  %v2347_v17 = vmax.f32 %v1754_v26, 0.0 }
 0x41a   :  { %v2353_v0 = vmax.f32 %v1419_v45, 0.0  ;;  %4719 = vmatmul.bf16.vlgmr.msra.gmra.mxu0 %v9530_v53  ;;  %4732 = vmatmul.bf16.vlgmr.msra.gmra.mxu1 %v9534_v54  ;;  %v2348_v4 = vmax.f32 %v1923_v63, 0.0 }
 0x41b   :  { %v2354_v2 = vmax.f32 %v1588_v55, 0.0  ;;  %4745 = vmatmul.bf16.vlgmr.msra.gmra.mxu2 %v9540_v57  ;;  %v3009_v47 = vadd.f32 %v3008_v33, %v2347_v17 }
 0x41c   :  { %v2936_v44 = vadd.f32 %v2935_v62, %v2353_v0  ;;  %4758 = vmatmul.bf16.vlgmr.msra.gmra.mxu3 %v9547_v46  ;;  %v3046_v58 = vadd.f32 %v3045_v40, %v2348_v4 }
 0x41d   :  { %v2973_v3 = vadd.f32 %v2972_v56, %v2354_v2 }
 0x41e   :  { %v1756_v5 = vpop.f32.mrf.mxu2 }
 0x41f   :  { %v1757_v8 = vadd.f32 %v1756_v5, %v8948_v6  ;;  %v1925_v9 = vpop.f32.mrf.mxu3  ;;  %v1420_v10 = vpop.f32.mrf.mxu0 }
 0x420   :  { %v1926_v11 = vadd.f32 %v1925_v9, %v8950_v7  ;;  %v1589_v12 = vpop.f32.mrf.mxu1  ;;  %v1421_v60 = vadd.f32 %v1420_v10, %v8930_v42 }
 0x421   :  { %v2355_v13 = vmax.f32 %v1757_v8, 0.0  ;;  %v1590_v18 = vadd.f32 %v1589_v12, %v8932_v50 }
 0x422   :  { %v2356_v1 = vmax.f32 %v1926_v11, 0.0  ;;  %v2361_v20 = vmax.f32 %v1421_v60, 0.0 }
 0x423   :  { %v3010_v14 = vadd.f32 %v3009_v47, %v2355_v13  ;;  %v2362_v22 = vmax.f32 %v1590_v18, 0.0 }
 0x424   :  { %v3047_v19 = vadd.f32 %v3046_v58, %v2356_v1  ;;  %v2937_v15 = vadd.f32 %v2936_v44, %v2361_v20 }
 0x425   :  { %v2974_v36 = vadd.f32 %v2973_v3, %v2362_v22 }
 0x426   :  { %v1758_v21 = vpop.f32.mrf.mxu2 }
 0x427   :  { %v1927_v23 = vpop.f32.mrf.mxu3  ;;  %v1423_v24 = vpop.f32.mrf.mxu0  ;;  %v1759_v30 = vadd.f32 %v1758_v21, %v8948_v6 }
 0x428   :  { %v1424_v29 = vadd.f32 %v1423_v24, %v8930_v42  ;;  %v1592_v27 = vpop.f32.mrf.mxu1  ;;  %v1928_v32 = vadd.f32 %v1927_v23, %v8950_v7 }
 0x429   :  { %v1593_v31 = vadd.f32 %v1592_v27, %v8932_v50  ;;  %v2363_v38 = vmax.f32 %v1759_v30, 0.0 }
 0x42a   :  { %v2369_v35 = vmax.f32 %v1424_v29, 0.0  ;;  %v2364_v39 = vmax.f32 %v1928_v32, 0.0 }
 0x42b   :  { %v2370_v28 = vmax.f32 %v1593_v31, 0.0  ;;  %v3011_v45 = vadd.f32 %v3010_v14, %v2363_v38 }
 0x42c   :  { %v2938_v37 = vadd.f32 %v2937_v15, %v2369_v35  ;;  %v3048_v26 = vadd.f32 %v3047_v19, %v2364_v39 }
 0x42d   :  { %v2975_v33 = vadd.f32 %v2974_v36, %v2370_v28 }
 0x42e   :  { %v1761_v40 = vpop.f32.mrf.mxu2 }
 0x42f   :  { %v1762_v41 = vadd.f32 %v1761_v40, %v8948_v6  ;;  %v1930_v25 = vpop.f32.mrf.mxu3  ;;  %v1425_v43 = vpop.f32.mrf.mxu0 }
 0x430   :  { %v1931_v49 = vadd.f32 %v1930_v25, %v8950_v7  ;;  %v1594_v51 = vpop.f32.mrf.mxu1  ;;  %v1426_v62 = vadd.f32 %v1425_v43, %v8930_v42  ;;  %v7874_v25 = vld [vmem:[%s11690_s3 + $0x4ec] sm:$0xf0]  ;;  %v7062_v43 = vld [vmem:[%s11690_s3 + $0x5e0] sm:$0xf] }
 0x431   :  { %v2371_v52 = vmax.f32 %v1762_v41, 0.0  ;;  %v1595_v0 = vadd.f32 %v1594_v51, %v8932_v50  ;;  %v6934_v41 = vld [vmem:[%s11690_s3 + $0x4e0] sm:$0xf]  ;;  %v7906_v51 = vld [vmem:[%s11690_s3 + $0x5ec] sm:$0xf0] }
 0x432   :  { %v2372_v55 = vmax.f32 %v1931_v49, 0.0  ;;  %v2377_v2 = vmax.f32 %v1426_v62, 0.0  ;;  %v6935_v49 = vor.u32 %v7874_v25, %v6934_v41  ;;  %v2656_v41 = vrot.slane %v9297_v48, 4 }
 0x433   :  { %v3012_v63 = vadd.f32 %v3011_v45, %v2371_v52  ;;  %v2378_v17 = vmax.f32 %v1595_v0, 0.0  ;;  %v7063_v45 = vor.u32 %v7906_v51, %v7062_v43  ;;  %v6918_v52 = vld [vmem:[%s11690_s3 + $0x4c0] sm:$0xf]  ;;  %v7894_v43 = vld [vmem:[%s11690_s3 + $0x58c] sm:$0xf0] }
 0x434   :  { %v3049_v56 = vadd.f32 %v3048_v26, %v2372_v55  ;;  %v2939_v11 = vadd.f32 %v2938_v37, %v2377_v2  ;;  %4763 = vmatpush.bf16.msrb.mxu0 %v6935_v49  ;;  %v7870_v26 = vld [vmem:[%s11690_s3 + $0x4cc] sm:$0xf0]  ;;  %v7046_v55 = vld [vmem:[%s11690_s3 + $0x5c0] sm:$0xf] }
 0x435   :  { %v2976_v13 = vadd.f32 %v2975_v33, %v2378_v17  ;;  %4776 = vmatpush.bf16.msrb.mxu1 %v7063_v45  ;;  %v6919_v62 = vor.u32 %v7870_v26, %v6918_v52  ;;  %v7190_v2 = vld [vmem:[%s11690_s3 + $0x6e0] sm:$0xf]  ;;  %v7930_v52 = vld [vmem:[%s11690_s3 + $0x6ac] sm:$0xf0] }
 0x436   :  { %v1763_v44 = vpop.f32.mrf.mxu2  ;;  %v7318_v17 = vld [vmem:[%s11690_s3 + $0x7e0] sm:$0xf] }
 0x437   :  { %v1932_v3 = vpop.f32.mrf.mxu3  ;;  %v1428_v4 = vpop.f32.mrf.mxu0  ;;  %v1764_v9 = vadd.f32 %v1763_v44, %v8948_v6  ;;  %v7938_v44 = vld [vmem:[%s11690_s3 + $0x6ec] sm:$0xf0]  ;;  %v7158_v45 = vld [vmem:[%s11690_s3 + $0x6a0] sm:$0xf] }
 0x438   :  { %v1429_v5 = vadd.f32 %v1428_v4, %v8930_v42  ;;  %v1597_v8 = vpop.f32.mrf.mxu1  ;;  %v1933_v12 = vadd.f32 %v1932_v3, %v8950_v7  ;;  %4764 = vmatpush.bf16.msrb.mxu0 %v6919_v62  ;;  %v7286_v26 = vld [vmem:[%s11690_s3 + $0x7a0] sm:$0xf] }
 0x439   :  { %v1598_v10 = vadd.f32 %v1597_v8, %v8932_v50  ;;  %v2379_v60 = vmax.f32 %v1764_v9, 0.0  ;;  %v7970_v8 = vld [vmem:[%s11690_s3 + $0x7ec] sm:$0xf0] }
 0x43a   :  { %v2385_v47 = vmax.f32 %v1429_v5, 0.0  ;;  %v2380_v18 = vmax.f32 %v1933_v12, 0.0  ;;  %v7191_v5 = vor.u32 %v7938_v44, %v7190_v2  ;;  %v7866_v12 = vld [vmem:[%s11690_s3 + $0x4ac] sm:$0xf0] }
 0x43b   :  { %v2386_v58 = vmax.f32 %v1598_v10, 0.0  ;;  %v3013_v29 = vadd.f32 %v3012_v63, %v2379_v60  ;;  %v7902_v63 = vld [vmem:[%s11690_s3 + $0x5cc] sm:$0xf0]  ;;  %v7319_v10 = vor.u32 %v7970_v8, %v7318_v17 }
 0x43c   :  { %v9567_v1 = vadd.f32 %v2939_v11, %v2385_v47  ;;  %v3050_v30 = vadd.f32 %v3049_v56, %v2380_v18  ;;  %v7047_v56 = vor.u32 %v7902_v63, %v7046_v55  ;;  %v6902_v11 = vld [vmem:[%s11690_s3 + $0x4a0] sm:$0xf]  ;;  %4789 = vmatpush.bf16.msrb.mxu2 %v7191_v5  ;;  %v2693_v55 = vrot.slane %v9299_v34, 4  ;;  %v7962_v2 = vld [vmem:[%s11690_s3 + $0x7ac] sm:$0xf0] }
 0x43d   :  { %v9569_v14 = vadd.f32 %v2976_v13, %v2386_v58  ;;  %v7030_v47 = vld [vmem:[%s11690_s3 + $0x5a0] sm:$0xf]  ;;  %v6903_v13 = vor.u32 %v7866_v12, %v6902_v11  ;;  %v7898_v58 = vld [vmem:[%s11690_s3 + $0x5ac] sm:$0xf0]  ;;  %4802 = vmatpush.bf16.msrb.mxu3 %v7319_v10  ;;  %v7287_v17 = vor.u32 %v7962_v2, %v7286_v26  ;;  %v2657_v11 = vadd.f32 %v2656_v41, %v9297_v48 }
 0x43e   :  { %v1766_v19 = vpop.f32.mrf.mxu2  ;;  %4777 = vmatpush.bf16.msrb.mxu1 %v7047_v56  ;;  %v7031_v60 = vor.u32 %v7898_v58, %v7030_v47  ;;  %v7174_v18 = vld [vmem:[%s11690_s3 + $0x6c0] sm:$0xf]  ;;  %v7159_v56 = vor.u32 %v7930_v52, %v7158_v45  ;;  %v7858_v8 = vld [vmem:[%s11690_s3 + $0x46c] sm:$0xf0] }
 0x43f   :  { %v1767_v20 = vadd.f32 %v1766_v19, %v8948_v6  ;;  %v1935_v21 = vpop.f32.mrf.mxu3  ;;  %v9572_v22 = vpop.f32.mrf.mxu0  ;;  %v7934_v19 = vld [vmem:[%s11690_s3 + $0x6cc] sm:$0xf0]  ;;  %4765 = vmatpush.bf16.msrb.mxu0 %v6903_v13  ;;  %v6870_v5 = vld [vmem:[%s11690_s3 + $0x460] sm:$0xf] }
 0x440   :  { %v1936_v23 = vadd.f32 %v1935_v21, %v8950_v7  ;;  %v9575_v24 = vpop.f32.mrf.mxu1  ;;  %v7302_v21 = vld [vmem:[%s11690_s3 + $0x7c0] sm:$0xf]  ;;  %v6871_v12 = vor.u32 %v7858_v8, %v6870_v5  ;;  %v7890_v47 = vld [vmem:[%s11690_s3 + $0x56c] sm:$0xf0]  ;;  %v9739_v41 = vadd.f32 %v9572_v22, %v8930_v42 }
 0x441   :  { %v2387_v27 = vmax.f32 %v1767_v20, 0.0  ;;  %v7175_v20 = vor.u32 %v7934_v19, %v7174_v18  ;;  %v6998_v10 = vld [vmem:[%s11690_s3 + $0x560] sm:$0xf]  ;;  %v2694_v18 = vadd.f32 %v2693_v55, %v9299_v34  ;;  %v7854_v34 = vld [vmem:[%s11690_s3 + $0x44c] sm:$0xf0]  ;;  %v9754_v22 = vadd.f32 %v9575_v24, %v8932_v50 }
 0x442   :  { %v2388_v31 = vmax.f32 %v1936_v23, 0.0  ;;  %v7966_v23 = vld [vmem:[%s11690_s3 + $0x7cc] sm:$0xf0]  ;;  %4778 = vmatpush.bf16.msrb.mxu1 %v7031_v60  ;;  %v6999_v13 = vor.u32 %v7890_v47, %v6998_v10  ;;  %v7142_v58 = vld [vmem:[%s11690_s3 + $0x680] sm:$0xf]  ;;  %v2730_v47 = vrot.slane %v9308_v59, 4 }
 0x443   :  { %v9577_v15 = vadd.f32 %v3013_v29, %v2387_v27  ;;  %v7303_v29 = vor.u32 %v7966_v23, %v7302_v21  ;;  %v6886_v27 = vld [vmem:[%s11690_s3 + $0x480] sm:$0xf]  ;;  %4790 = vmatpush.bf16.msrb.mxu2 %v7175_v20  ;;  %v7926_v60 = vld [vmem:[%s11690_s3 + $0x68c] sm:$0xf0]  ;;  %v2695_v26 = vrot.slane %v2694_v18, 2 }
 0x444   :  { %v9579_v32 = vadd.f32 %v3050_v30, %v2388_v31  ;;  %v7862_v30 = vld [vmem:[%s11690_s3 + $0x48c] sm:$0xf0]  ;;  %v7014_v31 = vld [vmem:[%s11690_s3 + $0x580] sm:$0xf]  ;;  %v7143_v48 = vor.u32 %v7926_v60, %v7142_v58  ;;  %v2767_v60 = vrot.slane %v9311_v61, 4 }
 0x445   :  { %v6887_v25 = vor.u32 %v7862_v30, %v6886_v27  ;;  %4803 = vmatpush.bf16.msrb.mxu3 %v7303_v29  ;;  %v7015_v51 = vor.u32 %v7894_v43, %v7014_v31  ;;  %v7270_v19 = vld [vmem:[%s11690_s3 + $0x780] sm:$0xf]  ;;  %v7958_v20 = vld [vmem:[%s11690_s3 + $0x78c] sm:$0xf0]  ;;  %v2658_v27 = vrot.slane %v2657_v11, 2 }
 0x446   :  { %v9581_v35 = vpop.f32.mrf.mxu2  ;;  %v7271_v21 = vor.u32 %v7958_v20, %v7270_v19  ;;  %v6854_v23 = vld [vmem:[%s11690_s3 + $0x440] sm:$0xf]  ;;  %v7886_v31 = vld [vmem:[%s11690_s3 + $0x54c] sm:$0xf0] }
 0x447   :  { %v9583_v36 = vpop.f32.mrf.mxu3  ;;  %v9585_v28 = vpop.f32.mrf.mxu0  ;;  %4766 = vmatpush.bf16.msrb.mxu0 %v6887_v25  ;;  %4779 = vmatpush.bf16.msrb.mxu1 %v7015_v51  ;;  %v6982_v29 = vld [vmem:[%s11690_s3 + $0x540] sm:$0xf]  ;;  %v6855_v30 = vor.u32 %v7854_v34, %v6854_v23  ;;  %v7922_v45 = vld [vmem:[%s11690_s3 + $0x66c] sm:$0xf0]  ;;  %v9758_v55 = vadd.f32 %v9581_v35, %v8948_v6  ;;  %v2394_v23 = vmax.f32 %v9754_v22, 0.0 }
 0x448   :  { %v9587_v37 = vpop.f32.mrf.mxu1  ;;  %4791 = vmatpush.bf16.msrb.mxu2 %v7159_v56  ;;  %v6983_v43 = vor.u32 %v7886_v31, %v6982_v29  ;;  %v7126_v51 = vld [vmem:[%s11690_s3 + $0x660] sm:$0xf]  ;;  %v7954_v5 = vld [vmem:[%s11690_s3 + $0x76c] sm:$0xf0] }
 0x449   :  { %4804 = vmatpush.bf16.msrb.mxu3 %v7287_v17  ;;  %v7254_v52 = vld [vmem:[%s11690_s3 + $0x760] sm:$0xf]  ;;  %v7127_v17 = vor.u32 %v7922_v45, %v7126_v51  ;;  %v7850_v35 = vld [vmem:[%s11690_s3 + $0x42c] sm:$0xf0]  ;;  %v2395_v34 = vmax.f32 %v9758_v55, 0.0  ;;  %v1938_v51 = vadd.f32 %v9583_v36, %v8950_v7 }
 0x44a   :  { %v7255_v10 = vor.u32 %v7954_v5, %v7254_v52  ;;  %v6838_v24 = vld [vmem:[%s11690_s3 + $0x420] sm:$0xf]  ;;  %v7882_v58 = vld [vmem:[%s11690_s3 + $0x52c] sm:$0xf0]  ;;  %v6424_v55 = vld [vmem:[%s11690_s3 + $0xf0] sm:$0xf0] }
 0x44b   :  { %4767 = vmatpush.bf16.msrb.mxu0 %v6871_v12  ;;  %4780 = vmatpush.bf16.msrb.mxu1 %v6999_v13  ;;  %v6966_v12 = vld [vmem:[%s11690_s3 + $0x520] sm:$0xf]  ;;  %v6839_v13 = vor.u32 %v7850_v35, %v6838_v24  ;;  %v7950_v31 = vld [vmem:[%s11690_s3 + $0x74c] sm:$0xf0]  ;;  %v6552_v24 = vld [vmem:[%s11690_s3 + $0x1f0] sm:$0xf0] }
 0x44c   :  { %4792 = vmatpush.bf16.msrb.mxu2 %v7143_v48  ;;  %v2393_v48 = vmax.f32 %v9739_v41, 0.0  ;;  %v6967_v19 = vor.u32 %v7882_v58, %v6966_v12  ;;  %v7110_v20 = vld [vmem:[%s11690_s3 + $0x640] sm:$0xf]  ;;  %v9798_v41 = vadd.f32 %v2658_v27, %v2657_v11  ;;  %v7846_v22 = vld [vmem:[%s11690_s3 + $0x40c] sm:$0xf0]  ;;  %v9837_v12 = vadd.f32 %v9587_v37, %v8932_v50 }
 0x44d   :  { %4805 = vmatpush.bf16.msrb.mxu3 %v7271_v21  ;;  %v7918_v21 = vld [vmem:[%s11690_s3 + $0x64c] sm:$0xf0]  ;;  %v6822_v52 = vld [vmem:[%s11690_s3 + $0x400] sm:$0xf] }
 0x44e   :  { %v9589_v38 = vpop.f32.mrf.mxu2  ;;  %v7111_v29 = vor.u32 %v7918_v21, %v7110_v20  ;;  %v6950_v11 = vld [vmem:[%s11690_s3 + $0x500] sm:$0xf]  ;;  %v6823_v27 = vor.u32 %v7846_v22, %v6822_v52  ;;  %v7878_v36 = vld [vmem:[%s11690_s3 + $0x50c] sm:$0xf0]  ;;  %v9861_v22 = vadd.f32 %v2730_v47, %v9308_v59  ;;  %v3015_v59 = vadd.f32 %v9577_v15, %v2395_v34  ;;  %v7772_v47 = vld [vmem:[%s11690_s3 + $0x1c4] sm:$0xf] }
 0x44f   :  { %v9591_v33 = vpop.f32.mrf.mxu3  ;;  %v9593_v39 = vpop.f32.mrf.mxu0  ;;  %4768 = vmatpush.bf16.msrb.mxu0 %v6855_v30  ;;  %4781 = vmatpush.bf16.msrb.mxu1 %v6983_v43  ;;  %v7238_v30 = vld [vmem:[%s11690_s3 + $0x740] sm:$0xf]  ;;  %v9800_v43 = vadd.f32 %v2695_v26, %v2694_v18  ;;  %v1434_v18 = vadd.f32 %v9585_v28, %v8930_v42  ;;  %v7744_v26 = vld [vmem:[%s11690_s3 + $0xe4] sm:$0xf]  ;;  %v6951_v5 = vor.u32 %v7878_v36, %v6950_v11  ;;  %v7914_v21 = vld [vmem:[%s11690_s3 + $0x62c] sm:$0xf0] }
 0x450   :  { %v9595_v40 = vpop.f32.mrf.mxu1  ;;  %4793 = vmatpush.bf16.msrb.mxu2 %v7127_v17  ;;  %v7239_v45 = vor.u32 %v7950_v31, %v7238_v30  ;;  %v7776_v28 = vld [vmem:[%s11690_s3 + $0x1e4] sm:$0xf]  ;;  %v7094_v35 = vld [vmem:[%s11690_s3 + $0x620] sm:$0xf]  ;;  %v7946_v37 = vld [vmem:[%s11690_s3 + $0x72c] sm:$0xf0]  ;;  %v9864_v11 = vadd.f32 %v2767_v60, %v9311_v61  ;;  %v9896_v34 = vadd.f32 %v9593_v39, %v8930_v42 }
 0x451   :  { %4806 = vmatpush.bf16.msrb.mxu3 %v7255_v10  ;;  %v6427_v10 = vor.u32 %v7744_v26, %v6424_v55  ;;  %v6555_v20 = vor.u32 %v7776_v28, %v6552_v24  ;;  %v2697_v30 = vrot.slane %v9800_v43, 1  ;;  %v2396_v31 = vmax.f32 %v1938_v51, 0.0  ;;  %v7740_v26 = vld [vmem:[%s11690_s3 + $0xc4] sm:$0xf]  ;;  %v6408_v51 = vld [vmem:[%s11690_s3 + $0xd0] sm:$0xf0] }
 0x452   :  { %v7095_v52 = vor.u32 %v7914_v21, %v7094_v35  ;;  %v2941_v55 = vadd.f32 %v9567_v1, %v2393_v48  ;;  %v6411_v61 = vor.u32 %v7740_v26, %v6408_v51  ;;  %v6536_v60 = vld [vmem:[%s11690_s3 + $0x1d0] sm:$0xf0]  ;;  %v9885_v1 = vadd.f32 %v9591_v33, %v8950_v7  ;;  %v7078_v15 = vld [vmem:[%s11690_s3 + $0x600] sm:$0xf]  ;;  %v7910_v48 = vld [vmem:[%s11690_s3 + $0x60c] sm:$0xf0] }
 0x453   :  { %4769 = vmatpush.bf16.msrb.mxu0 %v6839_v13  ;;  %4782 = vmatpush.bf16.msrb.mxu1 %v6967_v19  ;;  %v9841_v13 = vadd.f32 %v9589_v38, %v8948_v6  ;;  %v2660_v38 = vrot.slane %v9798_v41, 1  ;;  %v9900_v33 = vadd.f32 %v9595_v40, %v8932_v50  ;;  %v7079_v28 = vor.u32 %v7910_v48, %v7078_v15  ;;  %v7206_v24 = vld [vmem:[%s11690_s3 + $0x700] sm:$0xf]  ;;  %v7942_v35 = vld [vmem:[%s11690_s3 + $0x70c] sm:$0xf0] }
 0x454   :  { %4794 = vmatpush.bf16.msrb.mxu2 %v7111_v29  ;;  %v7222_v29 = vld [vmem:[%s11690_s3 + $0x720] sm:$0xf]  ;;  %v7840_v21 = vld [vmem:[%s11690_s3 + $0x3e4] sm:$0xf] }
 0x455   :  { %4807 = vmatpush.bf16.msrb.mxu3 %v7239_v45  ;;  %v7223_v36 = vor.u32 %v7946_v37, %v7222_v29  ;;  %v6808_v29 = vld [vmem:[%s11690_s3 + $0x3f0] sm:$0xf0] }
 0x456   :  { %v9621_v0 = vpop.f32.mrf.mxu2 }
 0x457   :  { %v9632_v3 = vpop.f32.mrf.mxu3  ;;  %v9634_v4 = vpop.f32.mrf.mxu0  ;;  %4770 = vmatpush.bf16.msrb.mxu0 %v6823_v27  ;;  %4783 = vmatpush.bf16.msrb.mxu1 %v6951_v5  ;;  %v2401_v27 = vmax.f32 %v1434_v18, 0.0  ;;  %v2978_v5 = vadd.f32 %v9569_v14, %v2394_v23  ;;  %v2402_v18 = vmax.f32 %v9837_v12, 0.0  ;;  %v6539_v14 = vor.u32 %v7772_v47, %v6536_v60  ;;  %v6520_v60 = vld [vmem:[%s11690_s3 + $0x1b0] sm:$0xf0] }
 0x458   :  { %v9639_v9 = vpop.f32.mrf.mxu1  ;;  %4795 = vmatpush.bf16.msrb.mxu2 %v7095_v52  ;;  %v3052_v23 = vadd.f32 %v9579_v32, %v2396_v31  ;;  %v7808_v32 = vld [vmem:[%s11690_s3 + $0x2e4] sm:$0xf]  ;;  %v9913_v12 = vadd.f32 %v9621_v0, %v8948_v6  ;;  %v9917_v40 = vadd.f32 %v9632_v3, %v8950_v7  ;;  %v9930_v0 = vadd.f32 %v9634_v4, %v8930_v42 }
 0x459   :  { %4808 = vmatpush.bf16.msrb.mxu3 %v7223_v36  ;;  %v2942_v39 = vadd.f32 %v2941_v55, %v2401_v27  ;;  %v9934_v3 = vadd.f32 %v9639_v9, %v8932_v50  ;;  %v6811_v52 = vor.u32 %v7840_v21, %v6808_v29  ;;  %v7736_v27 = vld [vmem:[%s11690_s3 + $0xa4] sm:$0xf]  ;;  %v6392_v36 = vld [vmem:[%s11690_s3 + $0xb0] sm:$0xf0]  ;;  %v2404_v9 = vmax.f32 %v9885_v1, 0.0 }
 0x45a   :  { %v7768_v4 = vld [vmem:[%s11690_s3 + $0x1a4] sm:$0xf]  ;;  %v6395_v47 = vor.u32 %v7736_v27, %v6392_v36  ;;  %v6648_v36 = vld [vmem:[%s11690_s3 + $0x2b0] sm:$0xf0] }
 0x45b   :  { %4815 = vmatpush.bf16.msra.mxu0 %v6427_v10  ;;  %4828 = vmatpush.bf16.msra.mxu1 %v6555_v20  ;;  %v2403_v10 = vmax.f32 %v9841_v13, 0.0  ;;  %v7207_v13 = vor.u32 %v7942_v35, %v7206_v24  ;;  %v6680_v20 = vld [vmem:[%s11690_s3 + $0x2f0] sm:$0xf0]  ;;  %v7804_v1 = vld [vmem:[%s11690_s3 + $0x2c4] sm:$0xf]  ;;  %v6523_v48 = vor.u32 %v7768_v4, %v6520_v60  ;;  %v3053_v21 = vadd.f32 %v3052_v23, %v2404_v9 }
 0x45c   :  { %4796 = vmatpush.bf16.msrb.mxu2 %v7079_v28  ;;  %v6683_v31 = vor.u32 %v7808_v32, %v6680_v20  ;;  %v6664_v28 = vld [vmem:[%s11690_s3 + $0x2d0] sm:$0xf0]  ;;  %v7836_v24 = vld [vmem:[%s11690_s3 + $0x3c4] sm:$0xf]  ;;  %v2418_v20 = vmax.f32 %v9934_v3, 0.0 }
 0x45d   :  { %4809 = vmatpush.bf16.msrb.mxu3 %v7207_v13  ;;  %v3016_v35 = vadd.f32 %v3015_v59, %v2403_v10  ;;  %v7732_v32 = vld [vmem:[%s11690_s3 + $0x84] sm:$0xf]  ;;  %v2417_v13 = vmax.f32 %v9930_v0, 0.0  ;;  %v6776_v9 = vld [vmem:[%s11690_s3 + $0x3b0] sm:$0xf0] }
 0x45e   :  { %v9678_v49 = vpop.f32.mrf.mxu2  ;;  %v7832_v4 = vld [vmem:[%s11690_s3 + $0x3a4] sm:$0xf]  ;;  %v6360_v60 = vld [vmem:[%s11690_s3 + $0x70] sm:$0xf0] }
 0x45f   :  { %v9690_v62 = vpop.f32.mrf.mxu3  ;;  %v9692_v63 = vpop.f32.mrf.mxu0  ;;  %4816 = vmatpush.bf16.msra.mxu0 %v6411_v61  ;;  %4829 = vmatpush.bf16.msra.mxu1 %v6539_v14  ;;  %v9950_v26 = vadd.f32 %v9678_v49, %v8948_v6  ;;  %v2979_v49 = vadd.f32 %v2978_v5, %v2402_v18  ;;  %v2409_v14 = vmax.f32 %v9896_v34, 0.0  ;;  %v2411_v5 = vmax.f32 %v9913_v12, 0.0  ;;  %v6376_v12 = vld [vmem:[%s11690_s3 + $0x90] sm:$0xf0] }
 0x460   :  { %v9697_v44 = vpop.f32.mrf.mxu1  ;;  %v9954_v51 = vadd.f32 %v9690_v62, %v8950_v7  ;;  %v2410_v62 = vmax.f32 %v9900_v33, 0.0  ;;  %4841 = vmatpush.bf16.msra.mxu2 %v6683_v31  ;;  %v2412_v18 = vmax.f32 %v9917_v40, 0.0  ;;  %v6667_v34 = vor.u32 %v7804_v1, %v6664_v28  ;;  %v6792_v33 = vld [vmem:[%s11690_s3 + $0x3d0] sm:$0xf0]  ;;  %v7764_v40 = vld [vmem:[%s11690_s3 + $0x184] sm:$0xf] }
 0x461   :  { %4854 = vmatpush.bf16.msra.mxu3 %v6811_v52  ;;  %v9988_v59 = vadd.f32 %v9692_v63, %v8930_v42  ;;  %v6795_v10 = vor.u32 %v7836_v24, %v6792_v33  ;;  %v2419_v29 = vmax.f32 %v9950_v26, 0.0  ;;  %v6379_v3 = vor.u32 %v7732_v32, %v6376_v12  ;;  %v6504_v63 = vld [vmem:[%s11690_s3 + $0x190] sm:$0xf0]  ;;  %v7800_v31 = vld [vmem:[%s11690_s3 + $0x2a4] sm:$0xf] }
 0x462   :  { %v2420_v0 = vmax.f32 %v9954_v51, 0.0  ;;  %v2943_v52 = vadd.f32 %v2942_v39, %v2409_v14  ;;  %v1610_v27 = vadd.f32 %v9697_v44, %v8932_v50  ;;  %v6507_v23 = vor.u32 %v7764_v40, %v6504_v63  ;;  %v7760_v1 = vld [vmem:[%s11690_s3 + $0x164] sm:$0xf]  ;;  %v6488_v28 = vld [vmem:[%s11690_s3 + $0x170] sm:$0xf0] }
 0x463   :  { %4817 = vmatpush.bf16.msra.mxu0 %v6395_v47  ;;  %4830 = vmatpush.bf16.msra.mxu1 %v6523_v48  ;;  %v2980_v26 = vadd.f32 %v2979_v49, %v2410_v62  ;;  %v6651_v44 = vor.u32 %v7800_v31, %v6648_v36  ;;  %v6779_v51 = vor.u32 %v7832_v4, %v6776_v9  ;;  %v7728_v47 = vld [vmem:[%s11690_s3 + $0x64] sm:$0xf]  ;;  %v2425_v62 = vmax.f32 %v9988_v59, 0.0  ;;  %v6632_v59 = vld [vmem:[%s11690_s3 + $0x290] sm:$0xf0] }
 0x464   :  { %4842 = vmatpush.bf16.msra.mxu2 %v6667_v34  ;;  %v3017_v14 = vadd.f32 %v3016_v35, %v2411_v5  ;;  %v3054_v49 = vadd.f32 %v3053_v21, %v2412_v18  ;;  %v6363_v48 = vor.u32 %v7728_v47, %v6360_v60  ;;  %v2944_v24 = vadd.f32 %v2943_v52, %v2417_v13  ;;  %v7796_v18 = vld [vmem:[%s11690_s3 + $0x284] sm:$0xf]  ;;  %v6760_v21 = vld [vmem:[%s11690_s3 + $0x390] sm:$0xf0] }
 0x465   :  { %4855 = vmatpush.bf16.msra.mxu3 %v6795_v10  ;;  %v6491_v5 = vor.u32 %v7760_v1, %v6488_v28  ;;  %v7828_v13 = vld [vmem:[%s11690_s3 + $0x384] sm:$0xf]  ;;  %v2426_v10 = vmax.f32 %v1610_v27, 0.0  ;;  %v6635_v40 = vor.u32 %v7796_v18, %v6632_v59  ;;  %v6472_v4 = vld [vmem:[%s11690_s3 + $0x150] sm:$0xf0] }
 0x466   :  { %v9741_v25 = vpop.f32.mrf.mxu2  ;;  %v3055_v63 = vadd.f32 %v3054_v49, %v2420_v0  ;;  %v6763_v52 = vor.u32 %v7828_v13, %v6760_v21  ;;  %v7756_v36 = vld [vmem:[%s11690_s3 + $0x144] sm:$0xf]  ;;  %v2945_v9 = vadd.f32 %v2944_v24, %v2425_v62  ;;  %v6328_v24 = vld [vmem:[%s11690_s3 + $0x30] sm:$0xf0] }
 0x467   :  { %v9760_v56 = vpop.f32.mrf.mxu3  ;;  %v9762_v2 = vpop.f32.mrf.mxu0  ;;  %v1779_v39 = vadd.f32 %v9741_v25, %v8948_v6  ;;  %4818 = vmatpush.bf16.msra.mxu0 %v6379_v3  ;;  %4831 = vmatpush.bf16.msra.mxu1 %v6507_v23  ;;  %v3018_v3 = vadd.f32 %v3017_v14, %v2419_v29  ;;  %v7824_v1 = vld [vmem:[%s11690_s3 + $0x364] sm:$0xf]  ;;  %v6744_v14 = vld [vmem:[%s11690_s3 + $0x370] sm:$0xf0] }
 0x468   :  { %v9767_v8 = vpop.f32.mrf.mxu1  ;;  %v1444_v34 = vadd.f32 %v9762_v2, %v8930_v42  ;;  %v2981_v2 = vadd.f32 %v2980_v26, %v2418_v20  ;;  %4843 = vmatpush.bf16.msra.mxu2 %v6651_v44  ;;  %v7724_v20 = vld [vmem:[%s11690_s3 + $0x44] sm:$0xf]  ;;  %v6456_v59 = vld [vmem:[%s11690_s3 + $0x130] sm:$0xf0] }
 0x469   :  { %v1613_v33 = vadd.f32 %v9767_v8, %v8932_v50  ;;  %v10049_v8 = vadd.f32 %v9760_v56, %v8950_v7  ;;  %4856 = vmatpush.bf16.msra.mxu3 %v6779_v51  ;;  %v2427_v31 = vmax.f32 %v1779_v39, 0.0  ;;  %v6344_v56 = vld [vmem:[%s11690_s3 + $0x50] sm:$0xf0]  ;;  %v6475_v39 = vor.u32 %v7756_v36, %v6472_v4  ;;  %v7720_v28 = vld [vmem:[%s11690_s3 + $0x24] sm:$0xf] }
 0x46a   :  { %v6347_v0 = vor.u32 %v7724_v20, %v6344_v56  ;;  %v2433_v26 = vmax.f32 %v1444_v34, 0.0  ;;  %v2982_v44 = vadd.f32 %v2981_v2, %v2426_v10  ;;  %v7752_v34 = vld [vmem:[%s11690_s3 + $0x124] sm:$0xf] }
 0x46b   :  { %4819 = vmatpush.bf16.msra.mxu0 %v6363_v48  ;;  %4832 = vmatpush.bf16.msra.mxu1 %v6491_v5  ;;  %v2428_v51 = vmax.f32 %v10049_v8, 0.0  ;;  %v3019_v49 = vadd.f32 %v3018_v3, %v2427_v31  ;;  %v6459_v21 = vor.u32 %v7752_v34, %v6456_v59  ;;  %v7788_v3 = vld [vmem:[%s11690_s3 + $0x244] sm:$0xf]  ;;  %v6600_v31 = vld [vmem:[%s11690_s3 + $0x250] sm:$0xf0] }
 0x46c   :  { %4844 = vmatpush.bf16.msra.mxu2 %v6635_v40  ;;  %v2946_v13 = vadd.f32 %v2945_v9, %v2433_v26 }
 0x46d   :  { %4857 = vmatpush.bf16.msra.mxu3 %v6763_v52  ;;  %v7820_v52 = vld [vmem:[%s11690_s3 + $0x344] sm:$0xf] }
 0x46e   :  { %v9824_v17 = vpop.f32.mrf.mxu2 }
 0x46f   :  { %v9843_v58 = vpop.f32.mrf.mxu3  ;;  %v9845_v19 = vpop.f32.mrf.mxu0  ;;  %v10062_v27 = vadd.f32 %v9824_v17, %v8948_v6  ;;  %v2434_v17 = vmax.f32 %v1613_v33, 0.0  ;;  %4820 = vmatpush.bf16.msra.mxu0 %v6347_v0  ;;  %4833 = vmatpush.bf16.msra.mxu1 %v6475_v39  ;;  %v3056_v0 = vadd.f32 %v3055_v63, %v2428_v51  ;;  %v7748_v63 = vld [vmem:[%s11690_s3 + $0x104] sm:$0xf] }
 0x470   :  { %v9858_v45 = vpop.f32.mrf.mxu1  ;;  %v1446_v23 = vadd.f32 %v9845_v19, %v8930_v42  ;;  %v7792_v19 = vld [vmem:[%s11690_s3 + $0x264] sm:$0xf]  ;;  %v10083_v47 = vadd.f32 %v9843_v58, %v8950_v7  ;;  %v6747_v58 = vor.u32 %v7824_v1, %v6744_v14  ;;  %v2732_v1 = vrot.slane %v9861_v22, 2 }
 0x471   :  { %v1615_v29 = vadd.f32 %v9858_v45, %v8932_v50  ;;  %v6616_v45 = vld [vmem:[%s11690_s3 + $0x270] sm:$0xf0]  ;;  %v2435_v33 = vmax.f32 %v10062_v27, 0.0  ;;  %v2983_v2 = vadd.f32 %v2982_v44, %v2434_v17 }
 0x472   :  { %v6619_v60 = vor.u32 %v7792_v19, %v6616_v45  ;;  %v2436_v20 = vmax.f32 %v10083_v47, 0.0  ;;  %4858 = vmatpush.bf16.msra.mxu3 %v6747_v58  ;;  %v6440_v45 = vld [vmem:[%s11690_s3 + $0x110] sm:$0xf0]  ;;  %v7784_v58 = vld [vmem:[%s11690_s3 + $0x224] sm:$0xf] }
 0x473   :  { %v2442_v5 = vmax.f32 %v1615_v29, 0.0  ;;  %v6728_v29 = vld [vmem:[%s11690_s3 + $0x350] sm:$0xf0]  ;;  %4834 = vmatpush.bf16.msra.mxu1 %v6459_v21 }
 0x474   :  { %4845 = vmatpush.bf16.msra.mxu2 %v6619_v60  ;;  %v6731_v9 = vor.u32 %v7820_v52, %v6728_v29  ;;  %v6443_v60 = vor.u32 %v7748_v63, %v6440_v45  ;;  %v7780_v52 = vld [vmem:[%s11690_s3 + $0x204] sm:$0xf]  ;;  %v6696_v29 = vld [vmem:[%s11690_s3 + $0x310] sm:$0xf0] }
 0x475   :  { %v2984_v17 = vadd.f32 %v2983_v2, %v2442_v5  ;;  %v6712_v5 = vld [vmem:[%s11690_s3 + $0x330] sm:$0xf0] }
 0x476   :  { %v9936_v37 = vpop.f32.mrf.mxu2  ;;  %4859 = vmatpush.bf16.msra.mxu3 %v6731_v9 }
 0x477   :  { %v9956_v55 = vpop.f32.mrf.mxu3  ;;  %v9958_v61 = vpop.f32.mrf.mxu0  ;;  %4835 = vmatpush.bf16.msra.mxu1 %v6443_v60 }
 0x478   :  { %v9968_v15 = vpop.f32.mrf.mxu1  ;;  %v1449_v62 = vadd.f32 %v9958_v61, %v8930_v42  ;;  %v2441_v61 = vmax.f32 %v1446_v23, 0.0  ;;  %v6603_v23 = vor.u32 %v7788_v3, %v6600_v31  ;;  %v1953_v44 = vadd.f32 %v9956_v55, %v8950_v7 }
 0x479   :  { %v1618_v48 = vadd.f32 %v9968_v15, %v8932_v50  ;;  %v6331_v15 = vor.u32 %v7720_v28, %v6328_v24  ;;  %v3020_v28 = vadd.f32 %v3019_v49, %v2435_v33  ;;  %v3057_v55 = vadd.f32 %v3056_v0, %v2436_v20 }
 0x47a   :  { %v2449_v36 = vmax.f32 %v1449_v62, 0.0  ;;  %v2947_v26 = vadd.f32 %v2946_v13, %v2441_v61  ;;  %4846 = vmatpush.bf16.msra.mxu2 %v6603_v23  ;;  %v6584_v61 = vld [vmem:[%s11690_s3 + $0x230] sm:$0xf0]  ;;  %v2444_v2 = vmax.f32 %v1953_v44, 0.0 }
 0x47b   :  { %v2450_v4 = vmax.f32 %v1618_v48, 0.0  ;;  %4821 = vmatpush.bf16.msra.mxu0 %v6331_v15  ;;  %v6587_v59 = vor.u32 %v7784_v58, %v6584_v61  ;;  %v2661_v58 = vadd.f32 %v2660_v38, %v9798_v41 }
 0x47c   :  { %v2948_v24 = vadd.f32 %v2947_v26, %v2449_v36  ;;  %v3058_v45 = vadd.f32 %v3057_v55, %v2444_v2  ;;  %v2733_v55 = vadd.f32 %v2732_v1, %v9861_v22 }
 0x47d   :  { %v2985_v34 = vadd.f32 %v2984_v17, %v2450_v4 }
 0x47e   :  { %v10027_v25 = vpop.f32.mrf.mxu2  ;;  %4847 = vmatpush.bf16.msra.mxu2 %v6587_v59 }
 0x47f   :  { %v10036_v32 = vpop.f32.mrf.mxu3  ;;  %v1450_v35 = vpop.f32.mrf.mxu0  ;;  %v1787_v62 = vadd.f32 %v10027_v25, %v8948_v6  ;;  %v7816_v25 = vld [vmem:[%s11690_s3 + $0x324] sm:$0xf] }
 0x480   :  { %v1619_v12 = vpop.f32.mrf.mxu1  ;;  %v1451_v10 = vadd.f32 %v1450_v35, %v8930_v42  ;;  %v10125_v35 = vadd.f32 %v9936_v37, %v8948_v6  ;;  %v7716_v37 = vld [vmem:[%s11690_s3 + $0x4] sm:$0xf]  ;;  %v1956_v15 = vadd.f32 %v10036_v32, %v8950_v7  ;;  %v6715_v13 = vor.u32 %v7816_v25, %v6712_v5  ;;  %v6568_v32 = vld [vmem:[%s11690_s3 + $0x210] sm:$0xf0] }
 0x481   :  { %v1620_v56 = vadd.f32 %v1619_v12, %v8932_v50  ;;  %v6312_v12 = vld [vmem:[%s11690_s3 + $0x10] sm:$0xf0]  ;;  %v2451_v20 = vmax.f32 %v1787_v62, 0.0 }
 0x482   :  { %v6315_v19 = vor.u32 %v7716_v37, %v6312_v12  ;;  %v2457_v51 = vmax.f32 %v1451_v10, 0.0  ;;  %v2443_v14 = vmax.f32 %v10125_v35, 0.0  ;;  %4860 = vmatpush.bf16.msra.mxu3 %v6715_v13  ;;  %v2452_v9 = vmax.f32 %v1956_v15, 0.0 }
 0x483   :  { %v2458_v48 = vmax.f32 %v1620_v56, 0.0 }
 0x484   :  { %4822 = vmatpush.bf16.msra.mxu0 %v6315_v19  ;;  %v2949_v10 = vadd.f32 %v2948_v24, %v2457_v51  ;;  %v3021_v17 = vadd.f32 %v3020_v28, %v2443_v14  ;;  %v3059_v24 = vadd.f32 %v3058_v45, %v2452_v9 }
 0x485   :  { %v2986_v35 = vadd.f32 %v2985_v34, %v2458_v48 }
 0x486   :  { %v10105_v18 = vpop.f32.mrf.mxu2  ;;  %v3022_v60 = vadd.f32 %v3021_v17, %v2451_v20  ;;  %v2734_v20 = vrot.slane %v2733_v55, 1 }
 0x487   :  { %v10111_v8 = vpop.f32.mrf.mxu3  ;;  %v1453_v40 = vpop.f32.mrf.mxu0 }
 0x488   :  { %v1622_v27 = vpop.f32.mrf.mxu1  ;;  %v1454_v39 = vadd.f32 %v1453_v40, %v8930_v42  ;;  %v1789_v40 = vadd.f32 %v10105_v18, %v8948_v6  ;;  %v1958_v56 = vadd.f32 %v10111_v8, %v8950_v7  ;;  %v7812_v18 = vld [vmem:[%s11690_s3 + $0x304] sm:$0xf]  ;;  %v3364_v8 = vld [vmem:[%s11691_s4] sm:$0xf] }
 0x489   :  { %v1623_v47 = vadd.f32 %v1622_v27, %v8932_v50  ;;  %v6699_v4 = vor.u32 %v7812_v18, %v6696_v29 }
 0x48a   :  { %v2465_v49 = vmax.f32 %v1454_v39, 0.0  ;;  %v2459_v39 = vmax.f32 %v1789_v40, 0.0  ;;  %v2460_v44 = vmax.f32 %v1958_v56, 0.0 }
 0x48b   :  { %v2466_v21 = vmax.f32 %v1623_v47, 0.0  ;;  %v3366_v47 = vperm.slane %v3364_v8, 0  ;;  %4861 = vmatpush.bf16.msra.mxu3 %v6699_v4 }
 0x48c   :  { %v2950_v37 = vadd.f32 %v2949_v10, %v2465_v49  ;;  %v3023_v61 = vadd.f32 %v3022_v60, %v2459_v39 }
 0x48d   :  { %v2987_v19 = vadd.f32 %v2986_v35, %v2466_v21 }
 0x48e   :  { %v1791_v33 = vpop.f32.mrf.mxu2 }
 0x48f   :  { %v1960_v3 = vpop.f32.mrf.mxu3  ;;  %v1455_v31 = vpop.f32.mrf.mxu0  ;;  %v1792_v0 = vadd.f32 %v1791_v33, %v8948_v6  ;;  %v3060_v33 = vadd.f32 %v3059_v24, %v2460_v44 }
 0x490   :  { %v1456_v27 = vadd.f32 %v1455_v31, %v8930_v42  ;;  %v1624_v23 = vpop.f32.mrf.mxu1  ;;  %v6571_v42 = vor.u32 %v7780_v52, %v6568_v32  ;;  %v1961_v12 = vadd.f32 %v1960_v3, %v8950_v7 }
 0x491   :  { %v1625_v36 = vadd.f32 %v1624_v23, %v8932_v50  ;;  %v2769_v50 = vrot.slane %v9864_v11, 2  ;;  %v2467_v62 = vmax.f32 %v1792_v0, 0.0 }
 0x492   :  { %v2473_v26 = vmax.f32 %v1456_v27, 0.0  ;;  %4848 = vmatpush.bf16.msra.mxu2 %v6571_v42  ;;  %v2468_v14 = vmax.f32 %v1961_v12, 0.0 }
 0x493   :  { %v2474_v63 = vmax.f32 %v1625_v36, 0.0  ;;  %v2770_v38 = vadd.f32 %v2769_v50, %v9864_v11  ;;  %v3024_v10 = vadd.f32 %v3023_v61, %v2467_v62  ;;  %v3080_v11 = vmul.f32 %v8920_v16, %v2661_v58 }
 0x494   :  { %v2951_v51 = vadd.f32 %v2950_v37, %v2473_v26  ;;  %v3061_v3 = vadd.f32 %v3060_v33, %v2468_v14  ;;  %v7064_v33 = vld [vmem:[%s11690_s3 + $0x5f0] sm:$0xf0] }
 0x495   :  { %v2988_v48 = vadd.f32 %v2987_v19, %v2474_v63  ;;  %v2771_v23 = vrot.slane %v2770_v38, 1  ;;  %v3096_v63 = vpack.c.bf16 %v3080_v11, %v3080_v11 }
 0x496   :  { %v2952_v28 = vrot.slane %v2951_v51, 4  ;;  %v1793_v34 = vpop.f32.mrf.mxu2 }
 0x497   :  { %v2989_v25 = vrot.slane %v2988_v48, 4  ;;  %v1794_v5 = vadd.f32 %v1793_v34, %v8948_v6  ;;  %v1962_v15 = vpop.f32.mrf.mxu3  ;;  %v4720_v49 = vpop.f32.mrf.mxu0  ;;  %v2698_v6 = vadd.f32 %v2697_v30, %v9800_v43  ;;  %v2735_v30 = vadd.f32 %v2734_v20, %v2733_v55  ;;  %v6936_v34 = vld [vmem:[%s11690_s3 + $0x4f0] sm:$0xf0] }
 0x498   :  { %v2953_v59 = vadd.f32 %v2952_v28, %v2951_v51  ;;  %v1963_v13 = vadd.f32 %v1962_v15, %v8950_v7  ;;  %v4721_v2 = vadd.f32 %v4720_v49, %v3366_v47  ;;  %v4733_v41 = vpop.f32.mrf.mxu1  ;;  %v2772_v45 = vadd.f32 %v2771_v23, %v2770_v38  ;;  %v7872_v28 = vld [vmem:[%s11690_s3 + $0x4e4] sm:$0xf] }
 0x499   :  { %v2990_v40 = vadd.f32 %v2989_v25, %v2988_v48  ;;  %v2475_v21 = vmax.f32 %v1794_v5, 0.0  ;;  %v3081_v36 = vmul.f32 %v8920_v16, %v2698_v6  ;;  %v3082_v62 = vmul.f32 %v8920_v16, %v2735_v30  ;;  %v7904_v49 = vld [vmem:[%s11690_s3 + $0x5e4] sm:$0xf] }
 0x49a   :  { %v2954_v31 = vrot.slane %v2953_v59, 2  ;;  %v2476_v22 = vmax.f32 %v1963_v13, 0.0  ;;  %v4734_v1 = vadd.f32 %v4733_v41, %v4721_v2  ;;  %v3394_v55 = vunpack.c.l.b16 %v3096_v63  ;;  %v7868_v6 = vld [vmem:[%s11690_s3 + $0x4c4] sm:$0xf] }
 0x49b   :  { %v2991_v52 = vrot.slane %v2990_v40, 2  ;;  %v3025_v32 = vadd.f32 %v3024_v10, %v2475_v21  ;;  %v3097_v47 = vpack.c.bf16 %v3081_v36, %v3081_v36  ;;  %v3083_v61 = vmul.f32 %v8920_v16, %v2772_v45 }
 0x49c   :  { %v2955_v35 = vadd.f32 %v2954_v31, %v2953_v59  ;;  %v3062_v7 = vadd.f32 %v3061_v3, %v2476_v22  ;;  %v3098_v38 = vpack.c.bf16 %v3082_v62, %v3082_v62  ;;  %v6939_v21 = vor.u32 %v7872_v28, %v6936_v34  ;;  %v7016_v28 = vld [vmem:[%s11690_s3 + $0x590] sm:$0xf0] }
 0x49d   :  { %v2992_v56 = vadd.f32 %v2991_v52, %v2990_v40  ;;  %v3026_v27 = vrot.slane %v3025_v32, 4  ;;  %v3395_v59 = vunpack.c.l.b16 %v3097_v47  ;;  %v6920_v52 = vld [vmem:[%s11690_s3 + $0x4d0] sm:$0xf0] }
 0x49e   :  { %v2956_v18 = vrot.slane %v2955_v35, 1  ;;  %v3063_v29 = vrot.slane %v3062_v7, 4  ;;  %v4746_v0 = vpop.f32.mrf.mxu2  ;;  %v6923_v23 = vor.u32 %v7868_v6, %v6920_v52  ;;  %v7176_v47 = vld [vmem:[%s11690_s3 + $0x6d0] sm:$0xf0]  ;;  %v7852_v52 = vld [vmem:[%s11690_s3 + $0x444] sm:$0xf] }
 0x49f   :  { %v2993_v8 = vrot.slane %v2992_v56, 1  ;;  %v3027_v42 = vadd.f32 %v3026_v27, %v3025_v32  ;;  %v4747_v4 = vadd.f32 %v4746_v0, %v4734_v1  ;;  %v4759_v9 = vpop.f32.mrf.mxu3  ;;  %v4722_v43 = vpop.f32.mrf.mxu0  ;;  %v7067_v1 = vor.u32 %v7904_v49, %v7064_v33  ;;  %v7960_v49 = vld [vmem:[%s11690_s3 + $0x7a4] sm:$0xf]  ;;  %v7288_v33 = vld [vmem:[%s11690_s3 + $0x7b0] sm:$0xf0] }
 0x4a0   :  { %v2957_v37 = vadd.f32 %v2956_v18, %v2955_v35  ;;  %v3064_v12 = vadd.f32 %v3063_v29, %v3062_v7  ;;  %v4735_v26 = vpop.f32.mrf.mxu1  ;;  %v3099_v32 = vpack.c.bf16 %v3083_v61, %v3083_v61  ;;  %v7900_v7 = vld [vmem:[%s11690_s3 + $0x5c4] sm:$0xf]  ;;  %v7192_v18 = vld [vmem:[%s11690_s3 + $0x6f0] sm:$0xf0]  ;;  %v3396_v0 = vunpack.c.l.b16 %v3098_v38 }
 0x4a1   :  { %v2994_v17 = vadd.f32 %v2993_v8, %v2992_v56  ;;  %v3028_v39 = vrot.slane %v3027_v42, 2  ;;  %v10203_v19 = vadd.f32 %v4759_v9, %v4747_v4  ;;  %v7048_v56 = vld [vmem:[%s11690_s3 + $0x5d0] sm:$0xf0]  ;;  %v7968_v29 = vld [vmem:[%s11690_s3 + $0x7e4] sm:$0xf] }
 0x4a2   :  { %v3088_v44 = vmul.f32 %v8920_v16, %v2957_v37  ;;  %v3065_v51 = vrot.slane %v3064_v12, 2  ;;  %v7051_v8 = vor.u32 %v7900_v7, %v7048_v56  ;;  %v7864_v4 = vld [vmem:[%s11690_s3 + $0x4a4] sm:$0xf]  ;;  %v6904_v9 = vld [vmem:[%s11690_s3 + $0x4b0] sm:$0xf0]  ;;  %v3397_v43 = vunpack.c.l.b16 %v3099_v32 }
 0x4a3   :  { %v3089_v50 = vmul.f32 %v8920_v16, %v2994_v17  ;;  %v3029_v60 = vadd.f32 %v3028_v39, %v3027_v42  ;;  %v7320_v42 = vld [vmem:[%s11690_s3 + $0x7f0] sm:$0xf0]  ;;  %v7896_v37 = vld [vmem:[%s11690_s3 + $0x5a4] sm:$0xf] }
 0x4a4   :  { %v3104_v48 = vpack.c.bf16 %v3088_v44, %v3088_v44  ;;  %v3066_v58 = vadd.f32 %v3065_v51, %v3064_v12  ;;  %v7032_v12 = vld [vmem:[%s11690_s3 + $0x5b0] sm:$0xf0]  ;;  %v7323_v45 = vor.u32 %v7968_v29, %v7320_v42  ;;  %v6907_v44 = vor.u32 %v7864_v4, %v6904_v9  ;;  %v7932_v51 = vld [vmem:[%s11690_s3 + $0x6c4] sm:$0xf] }
 0x4a5   :  { %v3105_v24 = vpack.c.bf16 %v3089_v50, %v3089_v50  ;;  %v3030_v14 = vrot.slane %v3029_v60, 1  ;;  %v7964_v50 = vld [vmem:[%s11690_s3 + $0x7c4] sm:$0xf]  ;;  %v7035_v62 = vor.u32 %v7896_v37, %v7032_v12  ;;  %v7179_v34 = vor.u32 %v7932_v51, %v7176_v47  ;;  %v7272_v6 = vld [vmem:[%s11690_s3 + $0x790] sm:$0xf0] }
 0x4a6   :  { %v3402_v25 = vunpack.c.l.b16 %v3104_v48  ;;  %v3067_v5 = vrot.slane %v3066_v58, 1  ;;  %v4748_v15 = vpop.f32.mrf.mxu2  ;;  %v7304_v48 = vld [vmem:[%s11690_s3 + $0x7d0] sm:$0xf0]  ;;  %v7952_v29 = vld [vmem:[%s11690_s3 + $0x764] sm:$0xf] }
 0x4a7   :  { %v3403_v13 = vunpack.c.l.b16 %v3105_v24  ;;  %v3031_v2 = vadd.f32 %v3030_v14, %v3029_v60  ;;  %v4761_v41 = vpop.f32.mrf.mxu3  ;;  %v6888_v24 = vld [vmem:[%s11690_s3 + $0x490] sm:$0xf0]  ;;  %v7892_v14 = vld [vmem:[%s11690_s3 + $0x584] sm:$0xf] }
 0x4a8   :  { %v3068_v10 = vadd.f32 %v3067_v5, %v3066_v58  ;;  %v3411_v40 = vsel %vm3406_vm3, %v3402_v25, %v3394_v55  ;;  %v7860_v58 = vld [vmem:[%s11690_s3 + $0x484] sm:$0xf]  ;;  %v7307_v55 = vor.u32 %v7964_v50, %v7304_v48  ;;  %v7160_v5 = vld [vmem:[%s11690_s3 + $0x6b0] sm:$0xf0]  ;;  %v7019_v15 = vor.u32 %v7892_v14, %v7016_v28  ;;  %v6430_v50 = vld [vmem:[%s11690_s3 + $0xe8] sm:$0xf] }
 0x4a9   :  { %v3090_v3 = vmul.f32 %v8920_v16, %v3031_v2  ;;  %v10223_v31 = vpack.c.b16 %v3411_v40, %v3411_v40  ;;  %v3412_v22 = vsel %vm3406_vm3, %v3403_v13, %v3395_v59  ;;  %v6891_v61 = vor.u32 %v7860_v58, %v6888_v24  ;;  %v7928_v25 = vld [vmem:[%s11690_s3 + $0x6a4] sm:$0xf]  ;;  %v6872_v13 = vld [vmem:[%s11690_s3 + $0x470] sm:$0xf0]  ;;  %v7747_v48 = vld [vmem:[%s11690_s3 + $0xf4] sm:$0xf0] }
 0x4aa   :  { %v3091_v20 = vmul.f32 %v8920_v16, %v3068_v10  ;;  %v10233_v35 = vpack.c.b16 %v3412_v22, %v3412_v22  ;;  %v7936_v16 = vld [vmem:[%s11690_s3 + $0x6e4] sm:$0xf]  ;;  %v7000_v41 = vld [vmem:[%s11690_s3 + $0x570] sm:$0xf0]  ;;  %v7163_v38 = vor.u32 %v7928_v25, %v7160_v5  ;;  %v7291_v10 = vor.u32 %v7960_v49, %v7288_v33  ;;  %v6558_v58 = vld [vmem:[%s11690_s3 + $0x1e8] sm:$0xf] }
 0x4ab   :  { %v3106_v27 = vpack.c.bf16 %v3090_v3, %v3090_v3  ;;  %4771 = vmatmul.bf16.vlgmr.msrb.gmra.mxu0 %v10223_v31  ;;  %v7195_v17 = vor.u32 %v7936_v16, %v7192_v18  ;;  %v7856_v59 = vld [vmem:[%s11690_s3 + $0x464] sm:$0xf]  ;;  %v6856_v32 = vld [vmem:[%s11690_s3 + $0x450] sm:$0xf0]  ;;  %v7779_v24 = vld [vmem:[%s11690_s3 + $0x1f4] sm:$0xf0] }
 0x4ac   :  { %v3107_v11 = vpack.c.bf16 %v3091_v20, %v3091_v20  ;;  %4784 = vmatmul.bf16.vlgmr.msrb.gmra.mxu1 %v10233_v35  ;;  %4867 = vmatpush.bf16.msrb.mxu0 %v6939_v21  ;;  %v7888_v2 = vld [vmem:[%s11690_s3 + $0x564] sm:$0xf]  ;;  %v7144_v21 = vld [vmem:[%s11690_s3 + $0x690] sm:$0xf0]  ;;  %v6875_v3 = vor.u32 %v7856_v59, %v6872_v13  ;;  %v6859_v16 = vor.u32 %v7852_v52, %v6856_v32  ;;  %v6414_v33 = vld [vmem:[%s11690_s3 + $0xc8] sm:$0xf] }
 0x4ad   :  { %v3404_v36 = vunpack.c.l.b16 %v3106_v27  ;;  %4880 = vmatpush.bf16.msrb.mxu1 %v7067_v1  ;;  %v7924_v40 = vld [vmem:[%s11690_s3 + $0x684] sm:$0xf]  ;;  %v7003_v22 = vor.u32 %v7888_v2, %v7000_v41  ;;  %v6984_v7 = vld [vmem:[%s11690_s3 + $0x550] sm:$0xf0]  ;;  %v6559_v49 = vor.u32 %v7779_v24, %v6558_v58  ;;  %v7743_v13 = vld [vmem:[%s11690_s3 + $0xd4] sm:$0xf0] }
 0x4ae   :  { %v3405_v30 = vunpack.c.l.b16 %v3107_v11  ;;  %v7956_v1 = vld [vmem:[%s11690_s3 + $0x784] sm:$0xf]  ;;  %v7147_v56 = vor.u32 %v7924_v40, %v7144_v21  ;;  %v6968_v4 = vld [vmem:[%s11690_s3 + $0x530] sm:$0xf0]  ;;  %v6542_v2 = vld [vmem:[%s11690_s3 + $0x1c8] sm:$0xf] }
 0x4af   :  { %v3413_v26 = vsel %vm3406_vm3, %v3404_v36, %v3396_v0  ;;  %v7884_v20 = vld [vmem:[%s11690_s3 + $0x544] sm:$0xf]  ;;  %v7275_v27 = vor.u32 %v7956_v1, %v7272_v6  ;;  %v7256_v0 = vld [vmem:[%s11690_s3 + $0x770] sm:$0xf0]  ;;  %v7775_v41 = vld [vmem:[%s11690_s3 + $0x1d4] sm:$0xf0]  ;;  %v6415_v6 = vor.u32 %v7743_v13, %v6414_v33 }
 0x4b0   :  { %4868 = vmatpush.bf16.msrb.mxu0 %v6923_v23  ;;  %v10268_v39 = vpack.c.b16 %v3413_v26, %v3413_v26  ;;  %v3414_v63 = vsel %vm3406_vm3, %v3405_v30, %v3397_v43  ;;  %v7920_v11 = vld [vmem:[%s11690_s3 + $0x664] sm:$0xf]  ;;  %v7128_v23 = vld [vmem:[%s11690_s3 + $0x670] sm:$0xf0]  ;;  %v6987_v18 = vor.u32 %v7884_v20, %v6984_v7  ;;  %v7259_v43 = vor.u32 %v7952_v29, %v7256_v0  ;;  %v7811_v1 = vld [vmem:[%s11690_s3 + $0x2f4] sm:$0xf0] }
 0x4b1   :  { %4881 = vmatpush.bf16.msrb.mxu1 %v7051_v8  ;;  %v10280_v60 = vpack.c.b16 %v3414_v63, %v3414_v63  ;;  %v7848_v36 = vld [vmem:[%s11690_s3 + $0x424] sm:$0xf]  ;;  %v6840_v8 = vld [vmem:[%s11690_s3 + $0x430] sm:$0xf0]  ;;  %v7131_v9 = vor.u32 %v7920_v11, %v7128_v23  ;;  %v6543_v52 = vor.u32 %v7775_v41, %v6542_v2  ;;  %v6814_v32 = vld [vmem:[%s11690_s3 + $0x3e8] sm:$0xf] }
 0x4b2   :  { %4797 = vmatmul.bf16.vlgmr.msrb.gmra.mxu2 %v10268_v39  ;;  %v7880_v42 = vld [vmem:[%s11690_s3 + $0x524] sm:$0xf]  ;;  %v7112_v37 = vld [vmem:[%s11690_s3 + $0x650] sm:$0xf0]  ;;  %v6843_v26 = vor.u32 %v7848_v36, %v6840_v8  ;;  %v7843_v20 = vld [vmem:[%s11690_s3 + $0x3f4] sm:$0xf0] }
 0x4b3   :  { %4810 = vmatmul.bf16.vlgmr.msrb.gmra.mxu3 %v10280_v60  ;;  %4893 = vmatpush.bf16.msrb.mxu2 %v7195_v17  ;;  %v7916_v30 = vld [vmem:[%s11690_s3 + $0x644] sm:$0xf]  ;;  %v6971_v17 = vor.u32 %v7880_v42, %v6968_v4  ;;  %v7240_v63 = vld [vmem:[%s11690_s3 + $0x750] sm:$0xf0]  ;;  %v6398_v7 = vld [vmem:[%s11690_s3 + $0xa8] sm:$0xf]  ;;  %v6815_v29 = vor.u32 %v7843_v20, %v6814_v32 }
 0x4b4   :  { %4906 = vmatpush.bf16.msrb.mxu3 %v7323_v45  ;;  %4869 = vmatpush.bf16.msrb.mxu0 %v6907_v44  ;;  %v7948_v12 = vld [vmem:[%s11690_s3 + $0x744] sm:$0xf]  ;;  %v6824_v44 = vld [vmem:[%s11690_s3 + $0x410] sm:$0xf0]  ;;  %v6526_v11 = vld [vmem:[%s11690_s3 + $0x1a8] sm:$0xf] }
 0x4b5   :  { %4882 = vmatpush.bf16.msrb.mxu1 %v7035_v62  ;;  %v7844_v45 = vld [vmem:[%s11690_s3 + $0x404] sm:$0xf]  ;;  %v6952_v47 = vld [vmem:[%s11690_s3 + $0x510] sm:$0xf0]  ;;  %v7115_v62 = vor.u32 %v7916_v30, %v7112_v37  ;;  %v7243_v14 = vor.u32 %v7948_v12, %v7240_v63  ;;  %v7771_v23 = vld [vmem:[%s11690_s3 + $0x1b4] sm:$0xf0] }
 0x4b6   :  { %v7876_v51 = vld [vmem:[%s11690_s3 + $0x504] sm:$0xf]  ;;  %v7224_v5 = vld [vmem:[%s11690_s3 + $0x730] sm:$0xf0]  ;;  %v6670_v0 = vld [vmem:[%s11690_s3 + $0x2c8] sm:$0xf]  ;;  %v6527_v42 = vor.u32 %v7771_v23, %v6526_v11 }
 0x4b7   :  { %4894 = vmatpush.bf16.msrb.mxu2 %v7179_v34  ;;  %v7912_v28 = vld [vmem:[%s11690_s3 + $0x624] sm:$0xf]  ;;  %v7096_v34 = vld [vmem:[%s11690_s3 + $0x630] sm:$0xf0]  ;;  %v7807_v36 = vld [vmem:[%s11690_s3 + $0x2d4] sm:$0xf0] }
 0x4b8   :  { %4907 = vmatpush.bf16.msrb.mxu3 %v7307_v55  ;;  %4870 = vmatpush.bf16.msrb.mxu0 %v6891_v61  ;;  %v6827_v55 = vor.u32 %v7844_v45, %v6824_v44  ;;  %v6955_v61 = vor.u32 %v7876_v51, %v6952_v47  ;;  %v7944_v25 = vld [vmem:[%s11690_s3 + $0x724] sm:$0xf]  ;;  %v7099_v59 = vor.u32 %v7912_v28, %v7096_v34  ;;  %v7080_v40 = vld [vmem:[%s11690_s3 + $0x610] sm:$0xf0]  ;;  %v6798_v4 = vld [vmem:[%s11690_s3 + $0x3c8] sm:$0xf] }
 0x4b9   :  { %4883 = vmatpush.bf16.msrb.mxu1 %v7019_v15  ;;  %v6431_v15 = vor.u32 %v7747_v48, %v6430_v50  ;;  %v7940_v21 = vld [vmem:[%s11690_s3 + $0x704] sm:$0xf]  ;;  %v7735_v30 = vld [vmem:[%s11690_s3 + $0x94] sm:$0xf0]  ;;  %v6510_v37 = vld [vmem:[%s11690_s3 + $0x188] sm:$0xf] }
 0x4ba   :  { %v7767_v12 = vld [vmem:[%s11690_s3 + $0x194] sm:$0xf0]  ;;  %v6654_v63 = vld [vmem:[%s11690_s3 + $0x2a8] sm:$0xf] }
 0x4bb   :  { %4895 = vmatpush.bf16.msrb.mxu2 %v7163_v38  ;;  %4823 = vmatmul.bf16.vlgmr.msra.gmra.mxu0 %v9530_v53  ;;  %v7227_v38 = vor.u32 %v7944_v25, %v7224_v5  ;;  %v7803_v45 = vld [vmem:[%s11690_s3 + $0x2b4] sm:$0xf0]  ;;  %v6511_v51 = vor.u32 %v7767_v12, %v6510_v37  ;;  %v6782_v47 = vld [vmem:[%s11690_s3 + $0x3a8] sm:$0xf] }
 0x4bc   :  { %4908 = vmatpush.bf16.msrb.mxu3 %v7291_v10  ;;  %4836 = vmatmul.bf16.vlgmr.msra.gmra.mxu1 %v9534_v54  ;;  %v7908_v10 = vld [vmem:[%s11690_s3 + $0x604] sm:$0xf]  ;;  %v7835_v50 = vld [vmem:[%s11690_s3 + $0x3b4] sm:$0xf0]  ;;  %v6494_v58 = vld [vmem:[%s11690_s3 + $0x168] sm:$0xf] }
 0x4bd   :  { %4871 = vmatpush.bf16.msrb.mxu0 %v6875_v3  ;;  %4884 = vmatpush.bf16.msrb.mxu1 %v7003_v22  ;;  %v7208_v3 = vld [vmem:[%s11690_s3 + $0x710] sm:$0xf0]  ;;  %v6686_v22 = vld [vmem:[%s11690_s3 + $0x2e8] sm:$0xf]  ;;  %v7731_v48 = vld [vmem:[%s11690_s3 + $0x74] sm:$0xf0]  ;;  %v6783_v28 = vor.u32 %v7835_v50, %v6782_v47 }
 0x4be   :  { %v7763_v24 = vld [vmem:[%s11690_s3 + $0x174] sm:$0xf0]  ;;  %v6638_v34 = vld [vmem:[%s11690_s3 + $0x288] sm:$0xf] }
 0x4bf   :  { %4896 = vmatpush.bf16.msrb.mxu2 %v7147_v56  ;;  %v7083_v56 = vor.u32 %v7908_v10, %v7080_v40  ;;  %v6495_v25 = vor.u32 %v7763_v24, %v6494_v58  ;;  %v6766_v5 = vld [vmem:[%s11690_s3 + $0x388] sm:$0xf]  ;;  %v7727_v33 = vld [vmem:[%s11690_s3 + $0x54] sm:$0xf0] }
 0x4c0   :  { %4909 = vmatpush.bf16.msrb.mxu3 %v7275_v27  ;;  %v7739_v27 = vld [vmem:[%s11690_s3 + $0xb4] sm:$0xf0]  ;;  %v6734_v11 = vld [vmem:[%s11690_s3 + $0x348] sm:$0xf] }
 0x4c1   :  { %4872 = vmatpush.bf16.msrb.mxu0 %v6859_v16  ;;  %4885 = vmatpush.bf16.msrb.mxu1 %v6987_v18  ;;  %v7211_v16 = vor.u32 %v7940_v21, %v7208_v3  ;;  %v6687_v18 = vor.u32 %v7811_v1, %v6686_v22  ;;  %v6399_v8 = vor.u32 %v7739_v27, %v6398_v7  ;;  %v7759_v13 = vld [vmem:[%s11690_s3 + $0x154] sm:$0xf0]  ;;  %v6750_v3 = vld [vmem:[%s11690_s3 + $0x368] sm:$0xf] }
 0x4c2   :  { %4849 = vmatmul.bf16.vlgmr.msra.gmra.mxu2 %v9540_v57  ;;  %v7795_v10 = vld [vmem:[%s11690_s3 + $0x274] sm:$0xf0]  ;;  %v6334_v1 = vld [vmem:[%s11690_s3 + $0x28] sm:$0xf] }
 0x4c3   :  { %4862 = vmatmul.bf16.vlgmr.msra.gmra.mxu3 %v9547_v46  ;;  %4897 = vmatpush.bf16.msrb.mxu2 %v7131_v9  ;;  %v7839_v9 = vld [vmem:[%s11690_s3 + $0x3d4] sm:$0xf0]  ;;  %v6590_v12 = vld [vmem:[%s11690_s3 + $0x228] sm:$0xf] }
 0x4c4   :  { %4910 = vmatpush.bf16.msrb.mxu3 %v7259_v43  ;;  %v6382_v43 = vld [vmem:[%s11690_s3 + $0x88] sm:$0xf]  ;;  %v7827_v22 = vld [vmem:[%s11690_s3 + $0x374] sm:$0xf0] }
 0x4c5   :  { %4873 = vmatpush.bf16.msrb.mxu0 %v6843_v26  ;;  %4886 = vmatpush.bf16.msrb.mxu1 %v6971_v17  ;;  %v6671_v26 = vor.u32 %v7807_v36, %v6670_v0  ;;  %v6799_v17 = vor.u32 %v7839_v9, %v6798_v4  ;;  %v6383_v44 = vor.u32 %v7735_v30, %v6382_v43  ;;  %v7755_v32 = vld [vmem:[%s11690_s3 + $0x134] sm:$0xf0]  ;;  %v6446_v36 = vld [vmem:[%s11690_s3 + $0x108] sm:$0xf] }
 0x4c6   :  { %v6751_v7 = vor.u32 %v7827_v22, %v6750_v3  ;;  %v7791_v27 = vld [vmem:[%s11690_s3 + $0x254] sm:$0xf0]  ;;  %v7070_v43 = vld [vmem:[%s11690_s3 + $0x5e8] sm:$0xf] }
 0x4c7   :  { %4898 = vmatpush.bf16.msrb.mxu2 %v7115_v62  ;;  %v6366_v62 = vld [vmem:[%s11690_s3 + $0x68] sm:$0xf]  ;;  %v7719_v0 = vld [vmem:[%s11690_s3 + $0x14] sm:$0xf0] }
 0x4c8   :  { %4911 = vmatpush.bf16.msrb.mxu3 %v7243_v14  ;;  %v6655_v14 = vor.u32 %v7803_v45, %v6654_v63  ;;  %v7875_v9 = vld [vmem:[%s11690_s3 + $0x4f4] sm:$0xf0]  ;;  %v6718_v45 = vld [vmem:[%s11690_s3 + $0x328] sm:$0xf] }
 0x4c9   :  { %4874 = vmatpush.bf16.msrb.mxu0 %v6827_v55  ;;  %4887 = vmatpush.bf16.msrb.mxu1 %v6955_v61  ;;  %v7799_v55 = vld [vmem:[%s11690_s3 + $0x294] sm:$0xf0]  ;;  %v6367_v61 = vor.u32 %v7731_v48, %v6366_v62  ;;  %v6926_v50 = vld [vmem:[%s11690_s3 + $0x4c8] sm:$0xf] }
 0x4ca   :  { %v6639_v2 = vor.u32 %v7799_v55, %v6638_v34  ;;  %v7907_v30 = vld [vmem:[%s11690_s3 + $0x5f4] sm:$0xf0]  ;;  %v7054_v58 = vld [vmem:[%s11690_s3 + $0x5c8] sm:$0xf] }
 0x4cb   :  { %4899 = vmatpush.bf16.msrb.mxu2 %v7099_v59  ;;  %v6478_v59 = vld [vmem:[%s11690_s3 + $0x148] sm:$0xf]  ;;  %v7071_v47 = vor.u32 %v7907_v30, %v7070_v43  ;;  %v7871_v48 = vld [vmem:[%s11690_s3 + $0x4d4] sm:$0xf0] }
 0x4cc   :  { %4912 = vmatpush.bf16.msrb.mxu3 %v7227_v38  ;;  %4875 = vmatmul.bf16.vlgmr.msrb.gmra.mxu0 %v10223_v31  ;;  %v6622_v38 = vld [vmem:[%s11690_s3 + $0x268] sm:$0xf]  ;;  %v6479_v21 = vor.u32 %v7759_v13, %v6478_v59  ;;  %v7903_v24 = vld [vmem:[%s11690_s3 + $0x5d4] sm:$0xf0] }
 0x4cd   :  { %4919 = vmatpush.bf16.msra.mxu0 %v6431_v15  ;;  %4932 = vmatpush.bf16.msra.mxu1 %v6559_v49  ;;  %v7831_v15 = vld [vmem:[%s11690_s3 + $0x394] sm:$0xf0]  ;;  %v6350_v49 = vld [vmem:[%s11690_s3 + $0x48] sm:$0xf]  ;;  %v6623_v20 = vor.u32 %v7795_v10, %v6622_v38 }
 0x4ce   :  { %4888 = vmatmul.bf16.vlgmr.msrb.gmra.mxu1 %v10233_v35  ;;  %v6767_v41 = vor.u32 %v7831_v15, %v6766_v5  ;;  %v6351_v40 = vor.u32 %v7727_v33, %v6350_v49  ;;  %v7783_v34 = vld [vmem:[%s11690_s3 + $0x214] sm:$0xf0]  ;;  %v6702_v55 = vld [vmem:[%s11690_s3 + $0x308] sm:$0xf]  ;;  %v6927_v15 = vor.u32 %v7871_v48, %v6926_v50  ;;  %v7055_v49 = vor.u32 %v7903_v24, %v7054_v58 }
 0x4cf   :  { %4900 = vmatpush.bf16.msrb.mxu2 %v7083_v56  ;;  %v6606_v56 = vld [vmem:[%s11690_s3 + $0x248] sm:$0xf]  ;;  %v7939_v5 = vld [vmem:[%s11690_s3 + $0x6f4] sm:$0xf0] }
 0x4d0   :  { %4913 = vmatpush.bf16.msrb.mxu3 %v7211_v16  ;;  %v6607_v4 = vor.u32 %v7791_v27, %v6606_v56  ;;  %v7326_v33 = vld [vmem:[%s11690_s3 + $0x7e8] sm:$0xf]  ;;  %v7971_v59 = vld [vmem:[%s11690_s3 + $0x7f4] sm:$0xf0] }
 0x4d1   :  { %4920 = vmatpush.bf16.msra.mxu0 %v6415_v6  ;;  %4933 = vmatpush.bf16.msra.mxu1 %v6543_v52  ;;  %v7723_v6 = vld [vmem:[%s11690_s3 + $0x34] sm:$0xf0]  ;;  %v6462_v52 = vld [vmem:[%s11690_s3 + $0x128] sm:$0xf]  ;;  %v7327_v3 = vor.u32 %v7971_v59, %v7326_v33 }
 0x4d2   :  { %4901 = vmatmul.bf16.vlgmr.msrb.gmra.mxu2 %v10268_v39  ;;  %v6335_v23 = vor.u32 %v7723_v6, %v6334_v1  ;;  %v6463_v16 = vor.u32 %v7755_v32, %v6462_v52  ;;  %v7182_v22 = vld [vmem:[%s11690_s3 + $0x6c8] sm:$0xf]  ;;  %v7935_v1 = vld [vmem:[%s11690_s3 + $0x6d4] sm:$0xf0] }
 0x4d3   :  { %4945 = vmatpush.bf16.msra.mxu2 %v6687_v18  ;;  %4914 = vmatmul.bf16.vlgmr.msrb.gmra.mxu3 %v10280_v60  ;;  %v7823_v18 = vld [vmem:[%s11690_s3 + $0x354] sm:$0xf0]  ;;  %v7310_v52 = vld [vmem:[%s11690_s3 + $0x7c8] sm:$0xf]  ;;  %v7183_v27 = vor.u32 %v7935_v1, %v7182_v22 }
 0x4d4   :  { %4958 = vmatpush.bf16.msra.mxu3 %v6815_v29  ;;  %v6318_v29 = vld [vmem:[%s11690_s3 + $0x8] sm:$0xf]  ;;  %v6735_v37 = vor.u32 %v7823_v18, %v6734_v11  ;;  %v7967_v32 = vld [vmem:[%s11690_s3 + $0x7d4] sm:$0xf0] }
 0x4d5   :  { %4921 = vmatpush.bf16.msra.mxu0 %v6399_v8  ;;  %4934 = vmatpush.bf16.msra.mxu1 %v6527_v42  ;;  %v7751_v8 = vld [vmem:[%s11690_s3 + $0x114] sm:$0xf0]  ;;  %v6942_v42 = vld [vmem:[%s11690_s3 + $0x4e8] sm:$0xf] }
 0x4d6   :  { %v6447_v63 = vor.u32 %v7751_v8, %v6446_v36  ;;  %v7863_v56 = vld [vmem:[%s11690_s3 + $0x494] sm:$0xf0]  ;;  %v7022_v11 = vld [vmem:[%s11690_s3 + $0x588] sm:$0xf] }
 0x4d7   :  { %4946 = vmatpush.bf16.msra.mxu2 %v6671_v26  ;;  %v7787_v26 = vld [vmem:[%s11690_s3 + $0x234] sm:$0xf0]  ;;  %v7166_v18 = vld [vmem:[%s11690_s3 + $0x6a8] sm:$0xf] }
 0x4d8   :  { %4959 = vmatpush.bf16.msra.mxu3 %v6799_v17  ;;  %v6319_v17 = vor.u32 %v7719_v0, %v6318_v29  ;;  %v6591_v62 = vor.u32 %v7787_v26, %v6590_v12  ;;  %v7931_v29 = vld [vmem:[%s11690_s3 + $0x6b4] sm:$0xf0]  ;;  %v7294_v36 = vld [vmem:[%s11690_s3 + $0x7a8] sm:$0xf] }
 0x4d9   :  { %4922 = vmatpush.bf16.msra.mxu0 %v6383_v44  ;;  %4935 = vmatpush.bf16.msra.mxu1 %v6511_v51  ;;  %v7819_v44 = vld [vmem:[%s11690_s3 + $0x334] sm:$0xf0]  ;;  %v6943_v51 = vor.u32 %v7875_v9, %v6942_v42  ;;  %v7167_v43 = vor.u32 %v7931_v29, %v7166_v18  ;;  %v7006_v30 = vld [vmem:[%s11690_s3 + $0x568] sm:$0xf] }
 0x4da   :  { %v7963_v8 = vld [vmem:[%s11690_s3 + $0x7b4] sm:$0xf0]  ;;  %v7150_v26 = vld [vmem:[%s11690_s3 + $0x688] sm:$0xf] }
 0x4db   :  { %4947 = vmatpush.bf16.msra.mxu2 %v6655_v14  ;;  %v6719_v14 = vor.u32 %v7819_v44, %v6718_v45  ;;  %v7859_v9 = vld [vmem:[%s11690_s3 + $0x474] sm:$0xf0]  ;;  %v7295_v12 = vor.u32 %v7963_v8, %v7294_v36  ;;  %v7278_v45 = vld [vmem:[%s11690_s3 + $0x788] sm:$0xf]  ;;  %v7741_v8 = vld [vmem:[%s11690_s3 + $0xcc] sm:$0xf] }
 0x4dc   :  { %4960 = vmatpush.bf16.msra.mxu3 %v6783_v28  ;;  %v6574_v28 = vld [vmem:[%s11690_s3 + $0x208] sm:$0xf]  ;;  %v7959_v44 = vld [vmem:[%s11690_s3 + $0x794] sm:$0xf0] }
 0x4dd   :  { %4923 = vmatpush.bf16.msra.mxu0 %v6367_v61  ;;  %4936 = vmatpush.bf16.msra.mxu1 %v6495_v25  ;;  %v7815_v61 = vld [vmem:[%s11690_s3 + $0x314] sm:$0xf0]  ;;  %v7198_v25 = vld [vmem:[%s11690_s3 + $0x6e8] sm:$0xf]  ;;  %v6575_v13 = vor.u32 %v7783_v34, %v6574_v28  ;;  %v7279_v24 = vor.u32 %v7959_v44, %v7278_v45  ;;  %v7809_v45 = vld [vmem:[%s11690_s3 + $0x2ec] sm:$0xf] }
 0x4de   :  { %v6703_v38 = vor.u32 %v7815_v61, %v6702_v55  ;;  %v7199_v10 = vor.u32 %v7939_v5, %v7198_v25  ;;  %v7855_v50 = vld [vmem:[%s11690_s3 + $0x454] sm:$0xf0]  ;;  %v6990_v48 = vld [vmem:[%s11690_s3 + $0x548] sm:$0xf]  ;;  %v6688_v44 = vld [vmem:[%s11690_s3 + $0x2f8] sm:$0xf0] }
 0x4df   :  { %4948 = vmatpush.bf16.msra.mxu2 %v6639_v2  ;;  %v6910_v2 = vld [vmem:[%s11690_s3 + $0x4a8] sm:$0xf]  ;;  %v7887_v58 = vld [vmem:[%s11690_s3 + $0x554] sm:$0xf0] }
 0x4e0   :  { %4961 = vmatpush.bf16.msra.mxu3 %v6767_v41  ;;  %v7867_v41 = vld [vmem:[%s11690_s3 + $0x4b4] sm:$0xf0]  ;;  %v7262_v55 = vld [vmem:[%s11690_s3 + $0x768] sm:$0xf]  ;;  %v6991_v25 = vor.u32 %v7887_v58, %v6990_v48  ;;  %v7737_v58 = vld [vmem:[%s11690_s3 + $0xac] sm:$0xf] }
 0x4e1   :  { %4924 = vmatpush.bf16.msra.mxu0 %v6351_v40  ;;  %4937 = vmatpush.bf16.msra.mxu1 %v6479_v21  ;;  %v7038_v40 = vld [vmem:[%s11690_s3 + $0x5a8] sm:$0xf]  ;;  %v7899_v21 = vld [vmem:[%s11690_s3 + $0x5b4] sm:$0xf0]  ;;  %v6911_v6 = vor.u32 %v7867_v41, %v6910_v2 }
 0x4e2   :  { %v7923_v28 = vld [vmem:[%s11690_s3 + $0x674] sm:$0xf0]  ;;  %v6846_v5 = vld [vmem:[%s11690_s3 + $0x428] sm:$0xf] }
 0x4e3   :  { %4949 = vmatpush.bf16.msra.mxu2 %v6623_v20  ;;  %v7039_v20 = vor.u32 %v7899_v21, %v7038_v40  ;;  %v7955_v61 = vld [vmem:[%s11690_s3 + $0x774] sm:$0xf0]  ;;  %v6974_v33 = vld [vmem:[%s11690_s3 + $0x528] sm:$0xf] }
 0x4e4   :  { %4962 = vmatpush.bf16.msra.mxu3 %v6751_v7  ;;  %v6894_v7 = vld [vmem:[%s11690_s3 + $0x488] sm:$0xf]  ;;  %v7883_v59 = vld [vmem:[%s11690_s3 + $0x534] sm:$0xf0] }
 0x4e5   :  { %4925 = vmatpush.bf16.msra.mxu0 %v6335_v23  ;;  %4938 = vmatpush.bf16.msra.mxu1 %v6463_v16  ;;  %v7895_v23 = vld [vmem:[%s11690_s3 + $0x594] sm:$0xf0]  ;;  %v7311_v16 = vor.u32 %v7967_v32, %v7310_v52  ;;  %v6895_v0 = vor.u32 %v7863_v56, %v6894_v7  ;;  %v7118_v2 = vld [vmem:[%s11690_s3 + $0x648] sm:$0xf]  ;;  %v7745_v32 = vld [vmem:[%s11690_s3 + $0xec] sm:$0xf] }
 0x4e6   :  { %v7023_v42 = vor.u32 %v7895_v23, %v7022_v11  ;;  %v7919_v41 = vld [vmem:[%s11690_s3 + $0x654] sm:$0xf0]  ;;  %v6830_v21 = vld [vmem:[%s11690_s3 + $0x408] sm:$0xf]  ;;  %v7777_v7 = vld [vmem:[%s11690_s3 + $0x1ec] sm:$0xf] }
 0x4e7   :  { %4950 = vmatpush.bf16.msra.mxu2 %v6607_v4  ;;  %v6878_v4 = vld [vmem:[%s11690_s3 + $0x468] sm:$0xf]  ;;  %v7951_v40 = vld [vmem:[%s11690_s3 + $0x754] sm:$0xf0]  ;;  %v7119_v52 = vor.u32 %v7919_v41, %v7118_v2  ;;  %v6384_v2 = vld [vmem:[%s11690_s3 + $0x98] sm:$0xf0] }
 0x4e8   :  { %4963 = vmatpush.bf16.msra.mxu3 %v6735_v37  ;;  %v7891_v37 = vld [vmem:[%s11690_s3 + $0x574] sm:$0xf0]  ;;  %v6958_v1 = vld [vmem:[%s11690_s3 + $0x508] sm:$0xf] }
 0x4e9   :  { %4926 = vmatpush.bf16.msra.mxu0 %v6319_v17  ;;  %4939 = vmatpush.bf16.msra.mxu1 %v6447_v63  ;;  %v7927_v17 = vld [vmem:[%s11690_s3 + $0x694] sm:$0xf0]  ;;  %v6879_v63 = vor.u32 %v7859_v9, %v6878_v4  ;;  %v7102_v11 = vld [vmem:[%s11690_s3 + $0x628] sm:$0xf]  ;;  %v6416_v9 = vld [vmem:[%s11690_s3 + $0xd8] sm:$0xf0] }
 0x4ea   :  { %v7847_v22 = vld [vmem:[%s11690_s3 + $0x414] sm:$0xf0]  ;;  %v7230_v18 = vld [vmem:[%s11690_s3 + $0x728] sm:$0xf] }
 0x4eb   :  { %4951 = vmatpush.bf16.msra.mxu2 %v6591_v62  ;;  %v7151_v62 = vor.u32 %v7927_v17, %v7150_v26  ;;  %v7915_v23 = vld [vmem:[%s11690_s3 + $0x634] sm:$0xf0]  ;;  %v7214_v17 = vld [vmem:[%s11690_s3 + $0x708] sm:$0xf] }
 0x4ec   :  { %4964 = vmatpush.bf16.msra.mxu3 %v6719_v14  ;;  %4927 = vmatmul.bf16.vlgmr.msra.gmra.mxu0 %v9530_v53  ;;  %v7134_v14 = vld [vmem:[%s11690_s3 + $0x668] sm:$0xf]  ;;  %v7947_v29 = vld [vmem:[%s11690_s3 + $0x734] sm:$0xf0]  ;;  %v7103_v4 = vor.u32 %v7915_v23, %v7102_v11  ;;  %v7797_v23 = vld [vmem:[%s11690_s3 + $0x28c] sm:$0xf] }
 0x4ed   :  { %4971 = vmatpush.bf16.msrb.mxu0 %v6943_v51  ;;  %4984 = vmatpush.bf16.msrb.mxu1 %v7071_v47  ;;  %v7007_v51 = vor.u32 %v7891_v37, %v7006_v30  ;;  %v6862_v47 = vld [vmem:[%s11690_s3 + $0x448] sm:$0xf]  ;;  %v6544_v30 = vld [vmem:[%s11690_s3 + $0x1d8] sm:$0xf0]  ;;  %v7231_v37 = vor.u32 %v7947_v29, %v7230_v18  ;;  %v7911_v26 = vld [vmem:[%s11690_s3 + $0x614] sm:$0xf0] }
 0x4ee   :  { %4940 = vmatmul.bf16.vlgmr.msra.gmra.mxu1 %v9534_v54  ;;  %v6863_v34 = vor.u32 %v7855_v50, %v6862_v47  ;;  %v7841_v47 = vld [vmem:[%s11690_s3 + $0x3ec] sm:$0xf]  ;;  %v6816_v50 = vld [vmem:[%s11690_s3 + $0x3f8] sm:$0xf0] }
 0x4ef   :  { %4952 = vmatpush.bf16.msra.mxu2 %v6575_v13  ;;  %v7263_v13 = vor.u32 %v7955_v61, %v7262_v55  ;;  %v6528_v55 = vld [vmem:[%s11690_s3 + $0x1b8] sm:$0xf0]  ;;  %v6819_v61 = vor.u32 %v7841_v47, %v6816_v50  ;;  %v7829_v29 = vld [vmem:[%s11690_s3 + $0x38c] sm:$0xf] }
 0x4f0   :  { %4965 = vmatpush.bf16.msra.mxu3 %v6703_v38  ;;  %v7753_v50 = vld [vmem:[%s11690_s3 + $0x12c] sm:$0xf] }
 0x4f1   :  { %4972 = vmatpush.bf16.msrb.mxu0 %v6927_v15  ;;  %4985 = vmatpush.bf16.msrb.mxu1 %v7055_v49  ;;  %v7851_v15 = vld [vmem:[%s11690_s3 + $0x434] sm:$0xf0]  ;;  %v7135_v49 = vor.u32 %v7923_v28, %v7134_v14  ;;  %v6691_v28 = vor.u32 %v7809_v45, %v6688_v44  ;;  %v7721_v44 = vld [vmem:[%s11690_s3 + $0x2c] sm:$0xf] }
 0x4f2   :  { %4953 = vmatmul.bf16.vlgmr.msra.gmra.mxu2 %v9540_v57  ;;  %v6847_v38 = vor.u32 %v7851_v15, %v6846_v5  ;;  %v6672_v5 = vld [vmem:[%s11690_s3 + $0x2d8] sm:$0xf0] }
 0x4f3   :  { %4997 = vmatpush.bf16.msrb.mxu2 %v7199_v10  ;;  %4966 = vmatmul.bf16.vlgmr.msra.gmra.mxu3 %v9547_v46  ;;  %v7246_v10 = vld [vmem:[%s11690_s3 + $0x748] sm:$0xf] }
 0x4f4   :  { %5010 = vmatpush.bf16.msrb.mxu3 %v7327_v3  ;;  %v6975_v3 = vor.u32 %v7883_v59, %v6974_v33  ;;  %v7247_v56 = vor.u32 %v7951_v40, %v7246_v10  ;;  %v6800_v33 = vld [vmem:[%s11690_s3 + $0x3d8] sm:$0xf0] }
 0x4f5   :  { %4973 = vmatpush.bf16.msrb.mxu0 %v6911_v6  ;;  %4986 = vmatpush.bf16.msrb.mxu1 %v7039_v20  ;;  %v7879_v6 = vld [vmem:[%s11690_s3 + $0x514] sm:$0xf0]  ;;  %v6432_v20 = vld [vmem:[%s11690_s3 + $0xf8] sm:$0xf0] }
 0x4f6   :  { %v6435_v36 = vor.u32 %v7745_v32, %v6432_v20  ;;  %v6512_v10 = vld [vmem:[%s11690_s3 + $0x198] sm:$0xf0]  ;;  %v7729_v32 = vld [vmem:[%s11690_s3 + $0x6c] sm:$0xf] }
 0x4f7   :  { %4998 = vmatpush.bf16.msrb.mxu2 %v7183_v27  ;;  %v6560_v27 = vld [vmem:[%s11690_s3 + $0x1f8] sm:$0xf0] }
 0x4f8   :  { %5011 = vmatpush.bf16.msrb.mxu3 %v7311_v16  ;;  %v6831_v16 = vor.u32 %v7847_v22, %v6830_v21  ;;  %v7801_v21 = vld [vmem:[%s11690_s3 + $0x2ac] sm:$0xf]  ;;  %v6368_v20 = vld [vmem:[%s11690_s3 + $0x78] sm:$0xf0] }
 0x4f9   :  { %4974 = vmatpush.bf16.msrb.mxu0 %v6895_v0  ;;  %4987 = vmatpush.bf16.msrb.mxu1 %v7023_v42  ;;  %v6959_v0 = vor.u32 %v7879_v6, %v6958_v1  ;;  %v6563_v42 = vor.u32 %v7777_v7, %v6560_v27  ;;  %v7833_v1 = vld [vmem:[%s11690_s3 + $0x3ac] sm:$0xf]  ;;  %v6784_v6 = vld [vmem:[%s11690_s3 + $0x3b8] sm:$0xf0]  ;;  %v6371_v18 = vor.u32 %v7729_v32, %v6368_v20 }
 0x4fa   :  { %v6496_v27 = vld [vmem:[%s11690_s3 + $0x178] sm:$0xf0]  ;;  %v6787_v11 = vor.u32 %v7833_v1, %v6784_v6  ;;  %v7869_v6 = vld [vmem:[%s11690_s3 + $0x4cc] sm:$0xf] }
 0x4fb   :  { %4999 = vmatpush.bf16.msrb.mxu2 %v7167_v43  ;;  %v7773_v43 = vld [vmem:[%s11690_s3 + $0x1cc] sm:$0xf]  ;;  %v6928_v20 = vld [vmem:[%s11690_s3 + $0x4d8] sm:$0xf0] }
 0x4fc   :  { %5012 = vmatpush.bf16.msrb.mxu3 %v7295_v12  ;;  %v7086_v12 = vld [vmem:[%s11690_s3 + $0x608] sm:$0xf] }
 0x4fd   :  { %4975 = vmatpush.bf16.msrb.mxu0 %v6879_v63  ;;  %4988 = vmatpush.bf16.msrb.mxu1 %v7007_v51  ;;  %v7943_v63 = vld [vmem:[%s11690_s3 + $0x714] sm:$0xf0]  ;;  %v6419_v51 = vor.u32 %v7741_v8, %v6416_v9  ;;  %v7087_v48 = vor.u32 %v7911_v26, %v7086_v12  ;;  %v7725_v8 = vld [vmem:[%s11690_s3 + $0x4c] sm:$0xf]  ;;  %v6624_v12 = vld [vmem:[%s11690_s3 + $0x278] sm:$0xf0] }
 0x4fe   :  { %v7215_v14 = vor.u32 %v7943_v63, %v7214_v17  ;;  %v7757_v9 = vld [vmem:[%s11690_s3 + $0x14c] sm:$0xf]  ;;  %v6752_v63 = vld [vmem:[%s11690_s3 + $0x378] sm:$0xf0] }
 0x4ff   :  { %5000 = vmatpush.bf16.msrb.mxu2 %v7151_v62  ;;  %v6547_v62 = vor.u32 %v7773_v43, %v6544_v30  ;;  %v6480_v43 = vld [vmem:[%s11690_s3 + $0x158] sm:$0xf0]  ;;  %v7825_v17 = vld [vmem:[%s11690_s3 + $0x36c] sm:$0xf] }
 0x500   :  { %5013 = vmatpush.bf16.msrb.mxu3 %v7279_v24  ;;  %v6400_v24 = vld [vmem:[%s11690_s3 + $0xb8] sm:$0xf0]  ;;  %v6483_v45 = vor.u32 %v7757_v9, %v6480_v43  ;;  %v7865_v43 = vld [vmem:[%s11690_s3 + $0x4ac] sm:$0xf] }
 0x501   :  { %4976 = vmatpush.bf16.msrb.mxu0 %v6863_v34  ;;  %4989 = vmatpush.bf16.msrb.mxu1 %v6991_v25  ;;  %v7769_v34 = vld [vmem:[%s11690_s3 + $0x1ac] sm:$0xf]  ;;  %v6403_v15 = vor.u32 %v7737_v58, %v6400_v24  ;;  %v6608_v24 = vld [vmem:[%s11690_s3 + $0x258] sm:$0xf0] }
 0x502   :  { %v7805_v25 = vld [vmem:[%s11690_s3 + $0x2cc] sm:$0xf]  ;;  %v6531_v59 = vor.u32 %v7769_v34, %v6528_v55  ;;  %v6736_v34 = vld [vmem:[%s11690_s3 + $0x358] sm:$0xf0] }
 0x503   :  { %5001 = vmatpush.bf16.msrb.mxu2 %v7135_v49  ;;  %v7837_v49 = vld [vmem:[%s11690_s3 + $0x3cc] sm:$0xf]  ;;  %v6675_v41 = vor.u32 %v7805_v25, %v6672_v5  ;;  %v6320_v25 = vld [vmem:[%s11690_s3 + $0x18] sm:$0xf0] }
 0x504   :  { %5014 = vmatpush.bf16.msrb.mxu3 %v7263_v13  ;;  %v7733_v13 = vld [vmem:[%s11690_s3 + $0x8c] sm:$0xf]  ;;  %v6803_v40 = vor.u32 %v7837_v49, %v6800_v33 }
 0x505   :  { %4977 = vmatpush.bf16.msrb.mxu0 %v6847_v38  ;;  %4990 = vmatpush.bf16.msrb.mxu1 %v6975_v3  ;;  %v7765_v38 = vld [vmem:[%s11690_s3 + $0x18c] sm:$0xf]  ;;  %v6656_v3 = vld [vmem:[%s11690_s3 + $0x2b8] sm:$0xf0]  ;;  %v6387_v22 = vor.u32 %v7733_v13, %v6384_v2 }
 0x506   :  { %v6659_v7 = vor.u32 %v7801_v21, %v6656_v3  ;;  %v7789_v58 = vld [vmem:[%s11690_s3 + $0x24c] sm:$0xf]  ;;  %v6720_v3 = vld [vmem:[%s11690_s3 + $0x338] sm:$0xf0] }
 0x507   :  { %5002 = vmatpush.bf16.msrb.mxu2 %v7119_v52  ;;  %v6515_v52 = vor.u32 %v7765_v38, %v6512_v10  ;;  %v7717_v55 = vld [vmem:[%s11690_s3 + $0xc] sm:$0xf]  ;;  %v6611_v49 = vor.u32 %v7789_v58, %v6608_v24  ;;  %v6592_v10 = vld [vmem:[%s11690_s3 + $0x238] sm:$0xf0] }
 0x508   :  { %5015 = vmatpush.bf16.msrb.mxu3 %v7247_v56  ;;  %v7761_v56 = vld [vmem:[%s11690_s3 + $0x16c] sm:$0xf]  ;;  %v7024_v24 = vld [vmem:[%s11690_s3 + $0x598] sm:$0xf0] }
 0x509   :  { %4978 = vmatpush.bf16.msrb.mxu0 %v6831_v16  ;;  %4991 = vmatpush.bf16.msrb.mxu1 %v6959_v0  ;;  %v6640_v16 = vld [vmem:[%s11690_s3 + $0x298] sm:$0xf0]  ;;  %v7749_v5 = vld [vmem:[%s11690_s3 + $0x10c] sm:$0xf] }
 0x50a   :  { %v6768_v0 = vld [vmem:[%s11690_s3 + $0x398] sm:$0xf0]  ;;  %v7873_v33 = vld [vmem:[%s11690_s3 + $0x4ec] sm:$0xf] }
 0x50b   :  { %5003 = vmatpush.bf16.msrb.mxu2 %v7103_v4  ;;  %v6643_v4 = vor.u32 %v7797_v23, %v6640_v16  ;;  %v6771_v30 = vor.u32 %v7829_v29, %v6768_v0  ;;  %v7905_v13 = vld [vmem:[%s11690_s3 + $0x5ec] sm:$0xf]  ;;  %v6576_v23 = vld [vmem:[%s11690_s3 + $0x218] sm:$0xf0] }
 0x50c   :  { %5016 = vmatpush.bf16.msrb.mxu3 %v7231_v37  ;;  %4979 = vmatmul.bf16.vlgmr.msrb.gmra.mxu0 %v10223_v31  ;;  %v7793_v37 = vld [vmem:[%s11690_s3 + $0x26c] sm:$0xf]  ;;  %v7200_v0 = vld [vmem:[%s11690_s3 + $0x6f8] sm:$0xf0] }
 0x50d   :  { %5023 = vmatpush.bf16.msra.mxu0 %v6435_v36  ;;  %5036 = vmatpush.bf16.msra.mxu1 %v6563_v42  ;;  %v6499_v36 = vor.u32 %v7761_v56, %v6496_v27  ;;  %v6352_v42 = vld [vmem:[%s11690_s3 + $0x58] sm:$0xf0]  ;;  %v6627_v47 = vor.u32 %v7793_v37, %v6624_v12  ;;  %v7785_v38 = vld [vmem:[%s11690_s3 + $0x22c] sm:$0xf] }
 0x50e   :  { %4992 = vmatmul.bf16.vlgmr.msrb.gmra.mxu1 %v10233_v35  ;;  %v6355_v26 = vor.u32 %v7725_v8, %v6352_v42  ;;  %v7817_v21 = vld [vmem:[%s11690_s3 + $0x32c] sm:$0xf]  ;;  %v6595_v32 = vor.u32 %v7785_v38, %v6592_v10  ;;  %v7056_v56 = vld [vmem:[%s11690_s3 + $0x5d8] sm:$0xf0] }
 0x50f   :  { %5004 = vmatpush.bf16.msrb.mxu2 %v7087_v48  ;;  %v6755_v48 = vor.u32 %v7825_v17, %v6752_v63  ;;  %v6723_v27 = vor.u32 %v7817_v21, %v6720_v3  ;;  %v7813_v16 = vld [vmem:[%s11690_s3 + $0x30c] sm:$0xf]  ;;  %v7328_v42 = vld [vmem:[%s11690_s3 + $0x7f8] sm:$0xf0] }
 0x510   :  { %5017 = vmatpush.bf16.msrb.mxu3 %v7215_v14  ;;  %v7937_v29 = vld [vmem:[%s11690_s3 + $0x6ec] sm:$0xf]  ;;  %v7040_v17 = vld [vmem:[%s11690_s3 + $0x5b8] sm:$0xf0] }
 0x511   :  { %5024 = vmatpush.bf16.msra.mxu0 %v6419_v51  ;;  %5037 = vmatpush.bf16.msra.mxu1 %v6547_v62  ;;  %v6336_v51 = vld [vmem:[%s11690_s3 + $0x38] sm:$0xf0]  ;;  %v7969_v8 = vld [vmem:[%s11690_s3 + $0x7ec] sm:$0xf]  ;;  %v7203_v12 = vor.u32 %v7937_v29, %v7200_v0 }
 0x512   :  { %5005 = vmatmul.bf16.vlgmr.msrb.gmra.mxu2 %v10268_v39  ;;  %v6464_v62 = vld [vmem:[%s11690_s3 + $0x138] sm:$0xf0]  ;;  %v6339_v14 = vor.u32 %v7721_v44, %v6336_v51  ;;  %v7331_v63 = vor.u32 %v7969_v8, %v7328_v42  ;;  %v7965_v51 = vld [vmem:[%s11690_s3 + $0x7cc] sm:$0xf] }
 0x513   :  { %5049 = vmatpush.bf16.msra.mxu2 %v6691_v28  ;;  %5018 = vmatmul.bf16.vlgmr.msrb.gmra.mxu3 %v10280_v60  ;;  %v7821_v28 = vld [vmem:[%s11690_s3 + $0x34c] sm:$0xf]  ;;  %v7152_v38 = vld [vmem:[%s11690_s3 + $0x698] sm:$0xf0] }
 0x514   :  { %5062 = vmatpush.bf16.msra.mxu3 %v6819_v61  ;;  %v6467_v61 = vor.u32 %v7753_v50, %v6464_v62  ;;  %v6739_v2 = vor.u32 %v7821_v28, %v6736_v34  ;;  %v7861_v50 = vld [vmem:[%s11690_s3 + $0x48c] sm:$0xf]  ;;  %v6896_v62 = vld [vmem:[%s11690_s3 + $0x498] sm:$0xf0] }
 0x515   :  { %5025 = vmatpush.bf16.msra.mxu0 %v6403_v15  ;;  %5038 = vmatpush.bf16.msra.mxu1 %v6531_v59  ;;  %v6448_v15 = vld [vmem:[%s11690_s3 + $0x118] sm:$0xf0]  ;;  %v7893_v58 = vld [vmem:[%s11690_s3 + $0x58c] sm:$0xf] }
 0x516   :  { %v6944_v59 = vld [vmem:[%s11690_s3 + $0x4f8] sm:$0xf0]  ;;  %v7929_v34 = vld [vmem:[%s11690_s3 + $0x6ac] sm:$0xf] }
 0x517   :  { %5050 = vmatpush.bf16.msra.mxu2 %v6675_v41  ;;  %v7072_v41 = vld [vmem:[%s11690_s3 + $0x5f8] sm:$0xf0]  ;;  %v6947_v1 = vor.u32 %v7873_v33, %v6944_v59  ;;  %v7849_v0 = vld [vmem:[%s11690_s3 + $0x42c] sm:$0xf] }
 0x518   :  { %5063 = vmatpush.bf16.msra.mxu3 %v6803_v40  ;;  %v6323_v40 = vor.u32 %v7717_v55, %v6320_v25  ;;  %v7168_v55 = vld [vmem:[%s11690_s3 + $0x6b8] sm:$0xf0]  ;;  %v6899_v25 = vor.u32 %v7861_v50, %v6896_v62  ;;  %v7881_v42 = vld [vmem:[%s11690_s3 + $0x52c] sm:$0xf]  ;;  %v7390_v50 = vld [vmem:[%s11692_s5 + $0x70] sm:$0xf] }
 0x519   :  { %5026 = vmatpush.bf16.msra.mxu0 %v6387_v22  ;;  %5039 = vmatpush.bf16.msra.mxu1 %v6515_v52  ;;  %v6451_v22 = vor.u32 %v7749_v5, %v6448_v15  ;;  %v7075_v52 = vor.u32 %v7905_v13, %v7072_v41  ;;  %v7961_v5 = vld [vmem:[%s11690_s3 + $0x7ac] sm:$0xf]  ;;  %v7296_v15 = vld [vmem:[%s11690_s3 + $0x7b8] sm:$0xf0]  ;;  %v7171_v59 = vor.u32 %v7929_v34, %v7168_v55  ;;  %v7987_v62 = vld [vmem:[%s11692_s5 + $0x74] sm:$0xf0] }
 0x51a   :  { %v6880_v33 = vld [vmem:[%s11690_s3 + $0x478] sm:$0xf0]  ;;  %v7889_v13 = vld [vmem:[%s11690_s3 + $0x56c] sm:$0xf] }
 0x51b   :  { %5051 = vmatpush.bf16.msra.mxu2 %v6659_v7  ;;  %v7901_v7 = vld [vmem:[%s11690_s3 + $0x5cc] sm:$0xf]  ;;  %v7280_v21 = vld [vmem:[%s11690_s3 + $0x798] sm:$0xf0] }
 0x51c   :  { %5064 = vmatpush.bf16.msra.mxu3 %v6787_v11  ;;  %v7781_v11 = vld [vmem:[%s11690_s3 + $0x20c] sm:$0xf]  ;;  %v7104_v55 = vld [vmem:[%s11690_s3 + $0x638] sm:$0xf0] }
 0x51d   :  { %5027 = vmatpush.bf16.msra.mxu0 %v6371_v18  ;;  %5040 = vmatpush.bf16.msra.mxu1 %v6499_v36  ;;  %v6704_v18 = vld [vmem:[%s11690_s3 + $0x318] sm:$0xf0]  ;;  %v6931_v36 = vor.u32 %v7869_v6, %v6928_v20  ;;  %v6579_v9 = vor.u32 %v7781_v11, %v6576_v23  ;;  %v7925_v41 = vld [vmem:[%s11690_s3 + $0x68c] sm:$0xf] }
 0x51e   :  { %v6707_v37 = vor.u32 %v7813_v16, %v6704_v18  ;;  %v7155_v6 = vor.u32 %v7925_v41, %v7152_v38  ;;  %v7953_v16 = vld [vmem:[%s11690_s3 + $0x76c] sm:$0xf]  ;;  %v7264_v18 = vld [vmem:[%s11690_s3 + $0x778] sm:$0xf0]  ;;  %v7446_v41 = vld [vmem:[%s11692_s5 + $0xe0] sm:$0xf] }
 0x51f   :  { %5052 = vmatpush.bf16.msra.mxu2 %v6643_v4  ;;  %v7059_v4 = vor.u32 %v7901_v7, %v7056_v56  ;;  %v7921_v56 = vld [vmem:[%s11690_s3 + $0x66c] sm:$0xf] }
 0x520   :  { %5065 = vmatpush.bf16.msra.mxu3 %v6771_v30  ;;  %v6912_v30 = vld [vmem:[%s11690_s3 + $0x4b8] sm:$0xf0]  ;;  %v7913_v34 = vld [vmem:[%s11690_s3 + $0x62c] sm:$0xf] }
 0x521   :  { %5028 = vmatpush.bf16.msra.mxu0 %v6355_v26  ;;  %5041 = vmatpush.bf16.msra.mxu1 %v6483_v45  ;;  %v7897_v26 = vld [vmem:[%s11690_s3 + $0x5ac] sm:$0xf]  ;;  %v6915_v44 = vor.u32 %v7865_v43, %v6912_v30  ;;  %v7120_v30 = vld [vmem:[%s11690_s3 + $0x658] sm:$0xf0] }
 0x522   :  { %v7933_v45 = vld [vmem:[%s11690_s3 + $0x6cc] sm:$0xf] }
 0x523   :  { %5053 = vmatpush.bf16.msra.mxu2 %v6627_v47  ;;  %v7312_v47 = vld [vmem:[%s11690_s3 + $0x7d8] sm:$0xf0]  ;;  %v7917_v43 = vld [vmem:[%s11690_s3 + $0x64c] sm:$0xf] }
 0x524   :  { %5066 = vmatpush.bf16.msra.mxu3 %v6755_v48  ;;  %v7315_v28 = vor.u32 %v7965_v51, %v7312_v47  ;;  %v7877_v51 = vld [vmem:[%s11690_s3 + $0x50c] sm:$0xf]  ;;  %v6960_v47 = vld [vmem:[%s11690_s3 + $0x518] sm:$0xf0] }
 0x525   :  { %5029 = vmatpush.bf16.msra.mxu0 %v6339_v14  ;;  %5042 = vmatpush.bf16.msra.mxu1 %v6467_v61 }
 0x527   :  { %5054 = vmatpush.bf16.msra.mxu2 %v6611_v49  ;;  %v7027_v49 = vor.u32 %v7893_v58, %v7024_v24 }
 0x528   :  { %5067 = vmatpush.bf16.msra.mxu3 %v6739_v2  ;;  %v11085_v14 = vpop.f32.mrf.mxu0  ;;  %v7299_v2 = vor.u32 %v7961_v5, %v7296_v15  ;;  %v7945_v15 = vld [vmem:[%s11690_s3 + $0x72c] sm:$0xf] }
 0x529   :  { %5030 = vmatpush.bf16.msra.mxu0 %v6323_v40  ;;  %5043 = vmatpush.bf16.msra.mxu1 %v6451_v22  ;;  %v11094_v61 = vpop.f32.mrf.mxu1  ;;  %v7957_v40 = vld [vmem:[%s11690_s3 + $0x78c] sm:$0xf] }
 0x52a   :  { %v7853_v22 = vld [vmem:[%s11690_s3 + $0x44c] sm:$0xf]  ;;  %v7283_v7 = vor.u32 %v7957_v40, %v7280_v21  ;;  %v7088_v21 = vld [vmem:[%s11690_s3 + $0x618] sm:$0xf0] }
 0x52b   :  { %5055 = vmatpush.bf16.msra.mxu2 %v6595_v32  ;;  %v6992_v32 = vld [vmem:[%s11690_s3 + $0x558] sm:$0xf0]  ;;  %v7909_v40 = vld [vmem:[%s11690_s3 + $0x60c] sm:$0xf] }
 0x52c   :  { %5068 = vmatpush.bf16.msra.mxu3 %v6723_v27  ;;  %5031 = vmatmul.bf16.vlgmr.msra.gmra.mxu0 %v9530_v53  ;;  %v7184_v53 = vld [vmem:[%s11690_s3 + $0x6d8] sm:$0xf0] }
 0x52d   :  { %5075 = vmatpush.bf16.msrb.mxu0 %v6947_v1  ;;  %5088 = vmatpush.bf16.msrb.mxu1 %v7075_v52  ;;  %v7187_v48 = vor.u32 %v7933_v45, %v7184_v53  ;;  %v6864_v1 = vld [vmem:[%s11690_s3 + $0x458] sm:$0xf0]  ;;  %v7885_v52 = vld [vmem:[%s11690_s3 + $0x54c] sm:$0xf] }
 0x52e   :  { %5044 = vmatmul.bf16.vlgmr.msra.gmra.mxu1 %v9534_v54  ;;  %v7043_v54 = vor.u32 %v7897_v26, %v7040_v17  ;;  %v7136_v27 = vld [vmem:[%s11690_s3 + $0x678] sm:$0xf0]  ;;  %v6867_v23 = vor.u32 %v7853_v22, %v6864_v1  ;;  %v6995_v29 = vor.u32 %v7885_v52, %v6992_v32  ;;  %v7949_v26 = vld [vmem:[%s11690_s3 + $0x74c] sm:$0xf]  ;;  %v11242_v32 = vld [vmem:[%s11691_s4] sm:$0xf] }
 0x52f   :  { %5056 = vmatpush.bf16.msra.mxu2 %v6579_v9  ;;  %v7139_v8 = vor.u32 %v7921_v56, %v7136_v27  ;;  %v7267_v9 = vor.u32 %v7953_v16, %v7264_v18  ;;  %v7248_v17 = vld [vmem:[%s11690_s3 + $0x758] sm:$0xf0]  ;;  %v7941_v22 = vld [vmem:[%s11690_s3 + $0x70c] sm:$0xf]  ;;  %v7091_v56 = vor.u32 %v7909_v40, %v7088_v21  ;;  %v7374_v27 = vld [vmem:[%s11692_s5 + $0x50] sm:$0xf] }
 0x530   :  { %5069 = vmatpush.bf16.msra.mxu3 %v6707_v37  ;;  %v4774_v20 = vpop.f32.mrf.mxu0  ;;  %v7251_v24 = vor.u32 %v7949_v26, %v7248_v17  ;;  %v7216_v1 = vld [vmem:[%s11690_s3 + $0x718] sm:$0xf0]  ;;  %v7438_v18 = vld [vmem:[%s11692_s5 + $0xd0] sm:$0xf] }
 0x531   :  { %5076 = vmatpush.bf16.msrb.mxu0 %v6931_v36  ;;  %5089 = vmatpush.bf16.msrb.mxu1 %v7059_v4  ;;  %v4787_v11 = vpop.f32.mrf.mxu1  ;;  %v6848_v36 = vld [vmem:[%s11690_s3 + $0x438] sm:$0xf0]  ;;  %v3367_v20 = vperm.slane %v11242_v32, 1  ;;  %v7219_v16 = vor.u32 %v7941_v22, %v7216_v1  ;;  %v7502_v22 = vld [vmem:[%s11692_s5 + $0x150] sm:$0xf] }
 0x532   :  { %5057 = vmatmul.bf16.vlgmr.msra.gmra.mxu2 %v9540_v57  ;;  %v7857_v57 = vld [vmem:[%s11690_s3 + $0x46c] sm:$0xf]  ;;  %v6976_v4 = vld [vmem:[%s11690_s3 + $0x538] sm:$0xf0]  ;;  %v7983_v11 = vld [vmem:[%s11692_s5 + $0x54] sm:$0xf0] }
 0x533   :  { %5101 = vmatpush.bf16.msrb.mxu2 %v7203_v12  ;;  %5070 = vmatmul.bf16.vlgmr.msra.gmra.mxu3 %v9547_v46  ;;  %v7008_v46 = vld [vmem:[%s11690_s3 + $0x578] sm:$0xf0]  ;;  %v6883_v10 = vor.u32 %v7857_v57, %v6880_v33  ;;  %v6851_v12 = vor.u32 %v7849_v0, %v6848_v36  ;;  %v6979_v53 = vor.u32 %v7881_v42, %v6976_v4  ;;  %v7981_v4 = vld [vmem:[%s11692_s5 + $0x44] sm:$0xf0]  ;;  %v8015_v1 = vld [vmem:[%s11692_s5 + $0x154] sm:$0xf0] }
 0x534   :  { %5114 = vmatpush.bf16.msrb.mxu3 %v7331_v63  ;;  %v7011_v3 = vor.u32 %v7889_v13, %v7008_v46  ;;  %v7845_v63 = vld [vmem:[%s11690_s3 + $0x40c] sm:$0xf]  ;;  %v6963_v57 = vor.u32 %v7877_v51, %v6960_v47  ;;  %v7391_v33 = vor.u32 %v7987_v62, %v7390_v50  ;;  %v7107_v13 = vor.u32 %v7913_v34, %v7104_v55  ;;  %v7382_v46 = vld [vmem:[%s11692_s5 + $0x60] sm:$0xf]  ;;  %v7518_v62 = vld [vmem:[%s11692_s5 + $0x170] sm:$0xf] }
 0x535   :  { %5077 = vmatpush.bf16.msrb.mxu0 %v6915_v44  ;;  %5090 = vmatpush.bf16.msrb.mxu1 %v7043_v54  ;;  %v11169_v37 = vpop.f32.mrf.mxu2  ;;  %v6832_v44 = vld [vmem:[%s11690_s3 + $0x418] sm:$0xf0]  ;;  %v7123_v54 = vor.u32 %v7917_v43, %v7120_v30  ;;  %v7375_v36 = vor.u32 %v7983_v11, %v7374_v27  ;;  %v7414_v34 = vld [vmem:[%s11692_s5 + $0xa0] sm:$0xf]  ;;  %v7993_v55 = vld [vmem:[%s11692_s5 + $0xa4] sm:$0xf0] }
 0x536   :  { %v11180_v45 = vpop.f32.mrf.mxu3  ;;  %v6835_v5 = vor.u32 %v7845_v63, %v6832_v44  ;;  %v7358_v63 = vld [vmem:[%s11692_s5 + $0x30] sm:$0xf]  ;;  %v4773_v44 = vadd.f32 %v11085_v14, %v10203_v19  ;;  %v8019_v19 = vld [vmem:[%s11692_s5 + $0x174] sm:$0xf0]  ;;  %v7986_v27 = vld [vmem:[%s11692_s5 + $0x74] sm:$0xf] }
 0x537   :  { %5102 = vmatpush.bf16.msrb.mxu2 %v7187_v48  ;;  %v7454_v48 = vld [vmem:[%s11692_s5 + $0xf0] sm:$0xf]  ;;  %v7392_v11 = vld [vmem:[%s11692_s5 + $0x78] sm:$0xf0] }
 0x538   :  { %5115 = vmatpush.bf16.msrb.mxu3 %v7315_v28  ;;  %v4824_v58 = vpop.f32.mrf.mxu0  ;;  %v8003_v28 = vld [vmem:[%s11692_s5 + $0xf4] sm:$0xf0] }
 0x539   :  { %5078 = vmatpush.bf16.msrb.mxu0 %v6899_v25  ;;  %5091 = vmatpush.bf16.msrb.mxu1 %v7027_v49  ;;  %v4837_v25 = vpop.f32.mrf.mxu1  ;;  %v7232_v49 = vld [vmem:[%s11690_s3 + $0x738] sm:$0xf0] }
 0x53a   :  { %v7235_v38 = vor.u32 %v7945_v15, %v7232_v49 }
 0x53b   :  { %5103 = vmatpush.bf16.msrb.mxu2 %v7171_v59  ;;  %v7455_v59 = vor.u32 %v8003_v28, %v7454_v48  ;;  %v7350_v48 = vld [vmem:[%s11692_s5 + $0x20] sm:$0xf]  ;;  %v4786_v28 = vadd.f32 %v11094_v61, %v4773_v44  ;;  %v7486_v44 = vld [vmem:[%s11692_s5 + $0x130] sm:$0xf] }
 0x53c   :  { %5116 = vmatpush.bf16.msrb.mxu3 %v7299_v2  ;;  %v7985_v2 = vld [vmem:[%s11692_s5 + $0x64] sm:$0xf0]  ;;  %v7510_v61 = vld [vmem:[%s11692_s5 + $0x160] sm:$0xf] }
 0x53d   :  { %5079 = vmatpush.bf16.msrb.mxu0 %v6883_v10  ;;  %5092 = vmatpush.bf16.msrb.mxu1 %v7011_v3  ;;  %v8001_v10 = vld [vmem:[%s11692_s5 + $0xe4] sm:$0xf0]  ;;  %v4800_v3 = vpop.f32.mrf.mxu2  ;;  %v7383_v52 = vor.u32 %v7985_v2, %v7382_v46  ;;  %v4799_v15 = vadd.f32 %v11169_v37, %v4786_v28  ;;  %v7975_v37 = vld [vmem:[%s11692_s5 + $0x14] sm:$0xf0]  ;;  %v7406_v2 = vld [vmem:[%s11692_s5 + $0x90] sm:$0xf] }
 0x53e   :  { %v7440_v28 = vld [vmem:[%s11692_s5 + $0xd8] sm:$0xf0] }
 0x53f   :  { %5104 = vmatpush.bf16.msrb.mxu2 %v7155_v6  ;;  %v4813_v6 = vpop.f32.mrf.mxu3  ;;  %v4812_v40 = vadd.f32 %v11180_v45, %v4799_v15  ;;  %v7973_v45 = vld [vmem:[%s11692_s5 + $0x4] sm:$0xf0] }
 0x540   :  { %5117 = vmatpush.bf16.msrb.mxu3 %v7283_v7  ;;  %v7447_v7 = vor.u32 %v8001_v10, %v7446_v41  ;;  %v7991_v41 = vld [vmem:[%s11692_s5 + $0x94] sm:$0xf0] }
 0x541   :  { %5080 = vmatpush.bf16.msrb.mxu0 %v6867_v23  ;;  %5093 = vmatpush.bf16.msrb.mxu1 %v6995_v29  ;;  %v4826_v23 = vpop.f32.mrf.mxu0  ;;  %v7999_v29 = vld [vmem:[%s11692_s5 + $0xd4] sm:$0xf0]  ;;  %v4839_v0 = vpop.f32.mrf.mxu1  ;;  %v7407_v6 = vor.u32 %v7991_v41, %v7406_v2  ;;  %v7978_v41 = vld [vmem:[%s11692_s5 + $0x34] sm:$0xf] }
 0x542   :  { %v7439_v42 = vor.u32 %v7999_v29, %v7438_v18  ;;  %v7456_v18 = vld [vmem:[%s11692_s5 + $0xf8] sm:$0xf0]  ;;  %v5127_v29 = vmax.f32 %v4812_v40, 0.0 }
 0x543   :  { %5105 = vmatpush.bf16.msrb.mxu2 %v7139_v8  ;;  %v4825_v8 = vadd.f32 %v4824_v58, %v3367_v20  ;;  %v7977_v58 = vld [vmem:[%s11692_s5 + $0x24] sm:$0xf0]  ;;  %v7398_v20 = vld [vmem:[%s11692_s5 + $0x80] sm:$0xf]  ;;  %v7424_v40 = vld [vmem:[%s11692_s5 + $0xb8] sm:$0xf0] }
 0x544   :  { %5118 = vmatpush.bf16.msrb.mxu3 %v7267_v9  ;;  %v7997_v9 = vld [vmem:[%s11692_s5 + $0xc4] sm:$0xf0] }
 0x545   :  { %5081 = vmatpush.bf16.msrb.mxu0 %v6851_v12  ;;  %5094 = vmatpush.bf16.msrb.mxu1 %v6979_v53  ;;  %v4850_v43 = vpop.f32.mrf.mxu2  ;;  %v4838_v26 = vadd.f32 %v4837_v25, %v4825_v8  ;;  %v7979_v53 = vld [vmem:[%s11692_s5 + $0x34] sm:$0xf0] }
 0x546   :  { %v7359_v50 = vor.u32 %v7979_v53, %v7358_v63  ;;  %v8000_v63 = vld [vmem:[%s11692_s5 + $0xe4] sm:$0xf]  ;;  %v7448_v53 = vld [vmem:[%s11692_s5 + $0xe8] sm:$0xf0] }
 0x547   :  { %5106 = vmatpush.bf16.msrb.mxu2 %v7123_v54  ;;  %v4863_v30 = vpop.f32.mrf.mxu3  ;;  %v4851_v51 = vadd.f32 %v4850_v43, %v4838_v26  ;;  %v7384_v26 = vld [vmem:[%s11692_s5 + $0x68] sm:$0xf0] }
 0x548   :  { %5119 = vmatpush.bf16.msrb.mxu3 %v7251_v24  ;;  %v7519_v24 = vor.u32 %v8019_v19, %v7518_v62  ;;  %v8009_v62 = vld [vmem:[%s11692_s5 + $0x124] sm:$0xf0]  ;;  %v7451_v19 = vor.u32 %v8000_v63, %v7448_v53  ;;  %v7972_v63 = vld [vmem:[%s11692_s5 + $0x4] sm:$0xf]  ;;  %v7336_v53 = vld [vmem:[%s11692_s5 + $0x8] sm:$0xf0] }
 0x549   :  { %5082 = vmatpush.bf16.msrb.mxu0 %v6835_v5  ;;  %5095 = vmatpush.bf16.msrb.mxu1 %v6963_v57  ;;  %v4876_v47 = vpop.f32.mrf.mxu0  ;;  %v4864_v25 = vadd.f32 %v4863_v30, %v4851_v51  ;;  %v7351_v57 = vor.u32 %v7977_v58, %v7350_v48  ;;  %v7376_v48 = vld [vmem:[%s11692_s5 + $0x58] sm:$0xf0] }
 0x54b   :  { %5107 = vmatpush.bf16.msrb.mxu2 %v7107_v13  ;;  %v4889_v54 = vpop.f32.mrf.mxu1  ;;  %v7342_v13 = vld [vmem:[%s11692_s5 + $0x10] sm:$0xf] }
 0x54c   :  { %5120 = vmatpush.bf16.msrb.mxu3 %v7235_v38  ;;  %5083 = vmatmul.bf16.vlgmr.msrb.gmra.mxu0 %v10223_v31  ;;  %v7366_v31 = vld [vmem:[%s11692_s5 + $0x40] sm:$0xf]  ;;  %v4877_v38 = vadd.f32 %v4876_v47, %v4864_v25  ;;  %v7343_v3 = vor.u32 %v7975_v37, %v7342_v13  ;;  %v8007_v13 = vld [vmem:[%s11692_s5 + $0x114] sm:$0xf0] }
 0x54d   :  { %5525 = vmatpush.bf16.msra.mxu0 %v7391_v33  ;;  %5538 = vmatpush.bf16.msra.mxu1 %v7455_v59  ;;  %v7367_v12 = vor.u32 %v7981_v4, %v7366_v31  ;;  %v4852_v5 = vpop.f32.mrf.mxu2  ;;  %v8017_v33 = vld [vmem:[%s11692_s5 + $0x164] sm:$0xf0]  ;;  %v7415_v59 = vor.u32 %v7993_v55, %v7414_v34 }
 0x54e   :  { %5096 = vmatmul.bf16.vlgmr.msrb.gmra.mxu1 %v10233_v35  ;;  %v7430_v35 = vld [vmem:[%s11692_s5 + $0xc0] sm:$0xf]  ;;  %v7511_v46 = vor.u32 %v8017_v33, %v7510_v61  ;;  %v4890_v23 = vadd.f32 %v4889_v54, %v4877_v38  ;;  %v8013_v31 = vld [vmem:[%s11692_s5 + $0x144] sm:$0xf0]  ;;  %v7996_v61 = vld [vmem:[%s11692_s5 + $0xc4] sm:$0xf] }
 0x54f   :  { %5108 = vmatpush.bf16.msrb.mxu2 %v7091_v56  ;;  %v7431_v17 = vor.u32 %v7997_v9, %v7430_v35  ;;  %v4865_v49 = vpop.f32.mrf.mxu3  ;;  %v7989_v56 = vld [vmem:[%s11692_s5 + $0x84] sm:$0xf0]  ;;  %v7395_v9 = vor.u32 %v7986_v27, %v7392_v11  ;;  %v7432_v33 = vld [vmem:[%s11692_s5 + $0xc8] sm:$0xf0]  ;;  %v7360_v38 = vld [vmem:[%s11692_s5 + $0x38] sm:$0xf0] }
 0x550   :  { %5121 = vmatpush.bf16.msrb.mxu3 %v7219_v16  ;;  %v8002_v16 = vld [vmem:[%s11692_s5 + $0xf4] sm:$0xf]  ;;  %v7399_v35 = vor.u32 %v7989_v56, %v7398_v20  ;;  %v7980_v49 = vld [vmem:[%s11692_s5 + $0x44] sm:$0xf]  ;;  %v7435_v2 = vor.u32 %v7996_v61, %v7432_v33  ;;  %v7520_v20 = vld [vmem:[%s11692_s5 + $0x178] sm:$0xf0] }
 0x551   :  { %5526 = vmatpush.bf16.msra.mxu0 %v7383_v52  ;;  %5539 = vmatpush.bf16.msra.mxu1 %v7447_v7  ;;  %v4878_v10 = vpop.f32.mrf.mxu0  ;;  %v7334_v52 = vld [vmem:[%s11692_s5] sm:$0xf]  ;;  %v7503_v7 = vor.u32 %v8015_v1, %v7502_v22  ;;  %v7459_v30 = vor.u32 %v8002_v16, %v7456_v18  ;;  %v8005_v22 = vld [vmem:[%s11692_s5 + $0x104] sm:$0xf0]  ;;  %v8018_v1 = vld [vmem:[%s11692_s5 + $0x174] sm:$0xf] }
 0x552   :  { %5109 = vmatmul.bf16.vlgmr.msrb.gmra.mxu2 %v10268_v39  ;;  %v7422_v39 = vld [vmem:[%s11692_s5 + $0xb0] sm:$0xf]  ;;  %v7335_v8 = vor.u32 %v7973_v45, %v7334_v52  ;;  %v7994_v10 = vld [vmem:[%s11692_s5 + $0xb4] sm:$0xf]  ;;  %v7363_v52 = vor.u32 %v7978_v41, %v7360_v38  ;;  %v7976_v56 = vld [vmem:[%s11692_s5 + $0x24] sm:$0xf]  ;;  %v7523_v11 = vor.u32 %v8018_v1, %v7520_v20 }
 0x553   :  { %5122 = vmatmul.bf16.vlgmr.msrb.gmra.mxu3 %v10280_v60  ;;  %v7995_v60 = vld [vmem:[%s11692_s5 + $0xb4] sm:$0xf0]  ;;  %5551 = vmatpush.bf16.msra.mxu2 %v7519_v24  ;;  %v4891_v21 = vpop.f32.mrf.mxu1  ;;  %v7998_v24 = vld [vmem:[%s11692_s5 + $0xd4] sm:$0xf]  ;;  %v7352_v27 = vld [vmem:[%s11692_s5 + $0x28] sm:$0xf0] }
 0x554   :  { %v7423_v14 = vor.u32 %v7995_v60, %v7422_v39  ;;  %v8011_v39 = vld [vmem:[%s11692_s5 + $0x134] sm:$0xf0]  ;;  %v11380_v60 = vpack.c.bf16 %v5127_v29, %v5127_v29  ;;  %v7443_v15 = vor.u32 %v7998_v24, %v7440_v28  ;;  %v7416_v16 = vld [vmem:[%s11692_s5 + $0xa8] sm:$0xf0]  ;;  %v7355_v18 = vor.u32 %v7976_v56, %v7352_v27  ;;  %v8016_v29 = vld [vmem:[%s11692_s5 + $0x164] sm:$0xf] }
 0x555   :  { %5527 = vmatpush.bf16.msra.mxu0 %v7375_v36  ;;  %5540 = vmatpush.bf16.msra.mxu1 %v7439_v42  ;;  %v4902_v0 = vpop.f32.mrf.mxu2  ;;  %v7494_v42 = vld [vmem:[%s11692_s5 + $0x140] sm:$0xf]  ;;  %v7487_v54 = vor.u32 %v8011_v39, %v7486_v44  ;;  %v7988_v39 = vld [vmem:[%s11692_s5 + $0x84] sm:$0xf]  ;;  %v8010_v24 = vld [vmem:[%s11692_s5 + $0x134] sm:$0xf] }
 0x556   :  { %v4903_v4 = vadd.f32 %v4902_v0, %v4890_v23  ;;  %v7495_v43 = vor.u32 %v8013_v31, %v7494_v42  ;;  %v7992_v23 = vld [vmem:[%s11692_s5 + $0xa4] sm:$0xf]  ;;  %v7512_v0 = vld [vmem:[%s11692_s5 + $0x168] sm:$0xf0]  ;;  %v7344_v42 = vld [vmem:[%s11692_s5 + $0x18] sm:$0xf0] }
 0x557   :  { %5552 = vmatpush.bf16.msra.mxu2 %v7511_v46  ;;  %v4915_v36 = vpop.f32.mrf.mxu3  ;;  %v7515_v31 = vor.u32 %v8016_v29, %v7512_v0  ;;  %v7488_v28 = vld [vmem:[%s11692_s5 + $0x138] sm:$0xf0]  ;;  %v8006_v33 = vld [vmem:[%s11692_s5 + $0x114] sm:$0xf]  ;;  %v8033_v1 = vld [vmem:[%s11692_s5 + $0x1e4] sm:$0xf0] }
 0x558   :  { %v8031_v56 = vld [vmem:[%s11692_s5 + $0x1d4] sm:$0xf0] }
 0x559   :  { %5528 = vmatpush.bf16.msra.mxu0 %v7367_v12  ;;  %5541 = vmatpush.bf16.msra.mxu1 %v7431_v17  ;;  %v7984_v12 = vld [vmem:[%s11692_s5 + $0x64] sm:$0xf]  ;;  %v4916_v17 = vadd.f32 %v4915_v36, %v4903_v4  ;;  %v7419_v36 = vor.u32 %v7992_v23, %v7416_v16  ;;  %v7990_v4 = vld [vmem:[%s11692_s5 + $0x94] sm:$0xf]  ;;  %v7558_v16 = vld [vmem:[%s11692_s5 + $0x1c0] sm:$0xf] }
 0x55a   :  { %v7387_v47 = vor.u32 %v7984_v12, %v7384_v26  ;;  %v8014_v12 = vld [vmem:[%s11692_s5 + $0x154] sm:$0xf]  ;;  %v7504_v26 = vld [vmem:[%s11692_s5 + $0x158] sm:$0xf0] }
 0x55b   :  { %5553 = vmatpush.bf16.msra.mxu2 %v7503_v7  ;;  %v5128_v51 = vmax.f32 %v4916_v17, 0.0  ;;  %v7427_v7 = vor.u32 %v7994_v10, %v7424_v40  ;;  %v7507_v44 = vor.u32 %v8014_v12, %v7504_v26  ;;  %v8035_v40 = vld [vmem:[%s11692_s5 + $0x1f4] sm:$0xf0] }
 0x55d   :  { %5529 = vmatpush.bf16.msra.mxu0 %v7359_v50  ;;  %5542 = vmatpush.bf16.msra.mxu1 %v7423_v14  ;;  %v7478_v50 = vld [vmem:[%s11692_s5 + $0x120] sm:$0xf]  ;;  %v7982_v14 = vld [vmem:[%s11692_s5 + $0x54] sm:$0xf]  ;;  %v11394_v58 = vpack.c.bf16 %v5128_v51, %v5128_v51  ;;  %v4904_v55 = vpop.f32.mrf.mxu2  ;;  %v7400_v51 = vld [vmem:[%s11692_s5 + $0x88] sm:$0xf0] }
 0x55e   :  { %v7479_v34 = vor.u32 %v8009_v62, %v7478_v50  ;;  %v7379_v5 = vor.u32 %v7982_v14, %v7376_v48  ;;  %v7339_v50 = vor.u32 %v7972_v63, %v7336_v53  ;;  %v8012_v62 = vld [vmem:[%s11692_s5 + $0x144] sm:$0xf]  ;;  %v7403_v14 = vor.u32 %v7988_v39, %v7400_v51  ;;  %v7534_v63 = vld [vmem:[%s11692_s5 + $0x190] sm:$0xf]  ;;  %v8023_v53 = vld [vmem:[%s11692_s5 + $0x194] sm:$0xf0] }
 0x55f   :  { %5554 = vmatpush.bf16.msra.mxu2 %v7495_v43  ;;  %v4917_v25 = vpop.f32.mrf.mxu3  ;;  %v8008_v55 = vld [vmem:[%s11692_s5 + $0x124] sm:$0xf]  ;;  %v7526_v51 = vld [vmem:[%s11692_s5 + $0x180] sm:$0xf] }
 0x560   :  { %v7480_v25 = vld [vmem:[%s11692_s5 + $0x128] sm:$0xf0] }
 0x561   :  { %5530 = vmatpush.bf16.msra.mxu0 %v7351_v57  ;;  %5543 = vmatpush.bf16.msra.mxu1 %v7415_v59  ;;  %v7368_v57 = vld [vmem:[%s11692_s5 + $0x48] sm:$0xf0]  ;;  %v7470_v59 = vld [vmem:[%s11692_s5 + $0x110] sm:$0xf] }
 0x562   :  { %v7371_v37 = vor.u32 %v7980_v49, %v7368_v57  ;;  %v7471_v46 = vor.u32 %v8007_v13, %v7470_v59  ;;  %v7483_v49 = vor.u32 %v8008_v55, %v7480_v25  ;;  %v7472_v59 = vld [vmem:[%s11692_s5 + $0x118] sm:$0xf0]  ;;  %v8030_v25 = vld [vmem:[%s11692_s5 + $0x1d4] sm:$0xf] }
 0x563   :  { %5555 = vmatpush.bf16.msra.mxu2 %v7487_v54  ;;  %v7475_v13 = vor.u32 %v8006_v33, %v7472_v59  ;;  %v7560_v33 = vld [vmem:[%s11692_s5 + $0x1c8] sm:$0xf0] }
 0x565   :  { %5531 = vmatpush.bf16.msra.mxu0 %v7343_v3  ;;  %5544 = vmatpush.bf16.msra.mxu1 %v7407_v6  ;;  %v7462_v3 = vld [vmem:[%s11692_s5 + $0x100] sm:$0xf] }
 0x566   :  { %v7463_v45 = vor.u32 %v8005_v22, %v7462_v3  ;;  %v7574_v22 = vld [vmem:[%s11692_s5 + $0x1e0] sm:$0xf] }
 0x567   :  { %5556 = vmatpush.bf16.msra.mxu2 %v7479_v34  ;;  %v7491_v34 = vor.u32 %v8010_v24, %v7488_v28  ;;  %v7576_v24 = vld [vmem:[%s11692_s5 + $0x1e8] sm:$0xf0] }
 0x569   :  { %5532 = vmatpush.bf16.msra.mxu0 %v7335_v8  ;;  %5545 = vmatpush.bf16.msra.mxu1 %v7399_v35  ;;  %v11434_v21 = vpop.f32.mrf.mxu0  ;;  %v7974_v8 = vld [vmem:[%s11692_s5 + $0x14] sm:$0xf]  ;;  %v7408_v35 = vld [vmem:[%s11692_s5 + $0x98] sm:$0xf0] }
 0x56a   :  { %v7411_v17 = vor.u32 %v7990_v4, %v7408_v35  ;;  %v8027_v4 = vld [vmem:[%s11692_s5 + $0x1b4] sm:$0xf0] }
 0x56b   :  { %5557 = vmatpush.bf16.msra.mxu2 %v7471_v46  ;;  %v11445_v6 = vpop.f32.mrf.mxu1  ;;  %v7464_v46 = vld [vmem:[%s11692_s5 + $0x108] sm:$0xf0] }
 0x56c   :  { %5533 = vmatmul.bf16.vlgmr.msra.gmra.mxu0 %v11380_v60  ;;  %5546 = vmatmul.bf16.vlgmr.msra.gmra.mxu1 %v11394_v58 }
 0x56d   :  { %5577 = vmatpush.bf16.msrb.mxu0 %v7395_v9  ;;  %5590 = vmatpush.bf16.msrb.mxu1 %v7459_v30  ;;  %v7347_v30 = vor.u32 %v7974_v8, %v7344_v42 }
 0x56f   :  { %5558 = vmatpush.bf16.msra.mxu2 %v7463_v45 }
 0x571   :  { %5578 = vmatpush.bf16.msrb.mxu0 %v7387_v47  ;;  %5591 = vmatpush.bf16.msrb.mxu1 %v7451_v19  ;;  %v4930_v9 = vpop.f32.mrf.mxu0  ;;  %v7496_v19 = vld [vmem:[%s11692_s5 + $0x148] sm:$0xf0] }
 0x572   :  { %v7499_v48 = vor.u32 %v8012_v62, %v7496_v19  ;;  %v7542_v9 = vld [vmem:[%s11692_s5 + $0x1a0] sm:$0xf]  ;;  %v7584_v19 = vld [vmem:[%s11692_s5 + $0x1f8] sm:$0xf0] }
 0x573   :  { %5603 = vmatpush.bf16.msrb.mxu2 %v7523_v11  ;;  %v4943_v43 = vpop.f32.mrf.mxu1 }
 0x574   :  { %v8025_v43 = vld [vmem:[%s11692_s5 + $0x1a4] sm:$0xf0] }
 0x575   :  { %5579 = vmatpush.bf16.msrb.mxu0 %v7379_v5  ;;  %5592 = vmatpush.bf16.msrb.mxu1 %v7443_v15  ;;  %v4954_v47 = vpop.f32.mrf.mxu2  ;;  %v3368_v5 = vperm.slane %v11242_v32, 2  ;;  %v7543_v26 = vor.u32 %v8025_v43, %v7542_v9 }
 0x576   :  { %v4967_v54 = vpop.f32.mrf.mxu3 }
 0x577   :  { %5604 = vmatpush.bf16.msrb.mxu2 %v7515_v31  ;;  %v4929_v61 = vadd.f32 %v11434_v21, %v3368_v5  ;;  %v7550_v31 = vld [vmem:[%s11692_s5 + $0x1b0] sm:$0xf]  ;;  %v7568_v5 = vld [vmem:[%s11692_s5 + $0x1d8] sm:$0xf0] }
 0x578   :  { %v7551_v35 = vor.u32 %v8027_v4, %v7550_v31 }
 0x579   :  { %5580 = vmatpush.bf16.msrb.mxu0 %v7371_v37  ;;  %5593 = vmatpush.bf16.msrb.mxu1 %v7435_v2  ;;  %v4942_v37 = vadd.f32 %v11445_v6, %v4929_v61  ;;  %v7582_v2 = vld [vmem:[%s11692_s5 + $0x1f0] sm:$0xf]  ;;  %v7575_v6 = vor.u32 %v8033_v1, %v7574_v22  ;;  %v8028_v61 = vld [vmem:[%s11692_s5 + $0x1c4] sm:$0xf] }
 0x57a   :  { %v7583_v21 = vor.u32 %v8035_v40, %v7582_v2  ;;  %v7563_v59 = vor.u32 %v8028_v61, %v7560_v33  ;;  %v3369_v2 = vperm.slane %v11242_v32, 3  ;;  %v8020_v32 = vld [vmem:[%s11692_s5 + $0x184] sm:$0xf]  ;;  %v8049_v61 = vld [vmem:[%s11695_s7 + $0x68] sm:$0xff] }
 0x57b   :  { %5605 = vmatpush.bf16.msrb.mxu2 %v7507_v44  ;;  %v4955_v41 = vadd.f32 %v4954_v47, %v4942_v37  ;;  %v7535_v44 = vor.u32 %v8023_v53, %v7534_v63  ;;  %v8021_v47 = vld [vmem:[%s11692_s5 + $0x184] sm:$0xf0]  ;;  %v7552_v37 = vld [vmem:[%s11692_s5 + $0x1b8] sm:$0xf0]  ;;  %v8036_v33 = vld [vmem:[%s11695_s7] sm:$0xff] }
 0x57c   :  { %5564 = vmatpush.bf16.msra.mxu3 %v7583_v21  ;;  %v7527_v62 = vor.u32 %v8021_v47, %v7526_v51  ;;  %v8022_v21 = vld [vmem:[%s11692_s5 + $0x194] sm:$0xf] }
 0x57d   :  { %5581 = vmatpush.bf16.msrb.mxu0 %v7363_v52  ;;  %5594 = vmatpush.bf16.msrb.mxu1 %v7427_v7  ;;  %v4956_v15 = vpop.f32.mrf.mxu2  ;;  %v4968_v3 = vadd.f32 %v4967_v54, %v4955_v41  ;;  %v7566_v7 = vld [vmem:[%s11692_s5 + $0x1d0] sm:$0xf]  ;;  %v8034_v54 = vld [vmem:[%s11692_s5 + $0x1f4] sm:$0xf] }
 0x57e   :  { %v4969_v57 = vpop.f32.mrf.mxu3  ;;  %v7567_v27 = vor.u32 %v8031_v56, %v7566_v7  ;;  %v7571_v15 = vor.u32 %v8030_v25, %v7568_v5  ;;  %v8038_v5 = vld [vmem:[%s11695_s7 + $0x10] sm:$0xff] }
 0x57f   :  { %5606 = vmatpush.bf16.msrb.mxu2 %v7499_v48  ;;  %v8032_v48 = vld [vmem:[%s11692_s5 + $0x1e4] sm:$0xf] }
 0x580   :  { %5565 = vmatpush.bf16.msra.mxu3 %v7575_v6  ;;  %v7579_v28 = vor.u32 %v8032_v48, %v7576_v24  ;;  %v8050_v48 = vld [vmem:[%s11695_s7 + $0x70] sm:$0xff]  ;;  %v8041_v24 = vld [vmem:[%s11695_s7 + $0x28] sm:$0xff] }
 0x581   :  { %5582 = vmatpush.bf16.msrb.mxu0 %v7355_v18  ;;  %5595 = vmatpush.bf16.msrb.mxu1 %v7419_v36  ;;  %v8029_v18 = vld [vmem:[%s11692_s5 + $0x1c4] sm:$0xf0] }
 0x582   :  { %v7559_v36 = vor.u32 %v8029_v18, %v7558_v16 }
 0x583   :  { %5607 = vmatpush.bf16.msrb.mxu2 %v7491_v34 }
 0x584   :  { %5566 = vmatpush.bf16.msra.mxu3 %v7567_v27 }
 0x585   :  { %5583 = vmatpush.bf16.msrb.mxu0 %v7347_v30  ;;  %5596 = vmatpush.bf16.msrb.mxu1 %v7411_v17 }
 0x587   :  { %5608 = vmatpush.bf16.msrb.mxu2 %v7483_v49 }
 0x588   :  { %5567 = vmatpush.bf16.msra.mxu3 %v7559_v36 }
 0x589   :  { %5584 = vmatpush.bf16.msrb.mxu0 %v7339_v50  ;;  %5597 = vmatpush.bf16.msrb.mxu1 %v7403_v14  ;;  %v7587_v14 = vor.u32 %v8034_v54, %v7584_v19  ;;  %v8051_v19 = vld [vmem:[%s11695_s7 + $0x78] sm:$0xff] }
 0x58b   :  { %5609 = vmatpush.bf16.msrb.mxu2 %v7475_v13  ;;  %v4993_v38 = vpop.f32.mrf.mxu1  ;;  %v8026_v13 = vld [vmem:[%s11692_s5 + $0x1b4] sm:$0xf] }
 0x58c   :  { %5585 = vmatmul.bf16.vlgmr.msrb.gmra.mxu0 %v11380_v60  ;;  %5598 = vmatmul.bf16.vlgmr.msrb.gmra.mxu1 %v11394_v58  ;;  %v4980_v60 = vpop.f32.mrf.mxu0  ;;  %v8004_v58 = vld [vmem:[%s11692_s5 + $0x104] sm:$0xf] }
 0x58d   :  { %v7467_v10 = vor.u32 %v8004_v58, %v7464_v46  ;;  %v4981_v52 = vadd.f32 %v4980_v60, %v4968_v3  ;;  %5568 = vmatpush.bf16.msra.mxu3 %v7551_v35  ;;  %v7555_v60 = vor.u32 %v8026_v13, %v7552_v37  ;;  %v8024_v58 = vld [vmem:[%s11692_s5 + $0x1a4] sm:$0xf]  ;;  %v7544_v46 = vld [vmem:[%s11692_s5 + $0x1a8] sm:$0xf0]  ;;  %v7536_v3 = vld [vmem:[%s11692_s5 + $0x198] sm:$0xf0]  ;;  %5778 = vmatpush.bf16.msra.mxu1 %v8051_v19 }
 0x58e   :  { %v7539_v22 = vor.u32 %v8022_v21, %v7536_v3  ;;  %v5199_v35 = vld [vmem:[%s11693_s6] sm:$0x3]  ;;  %v8047_v13 = vld [vmem:[%s11695_s7 + $0x58] sm:$0xff]  ;;  %v8046_v37 = vld [vmem:[%s11695_s7 + $0x50] sm:$0xff] }
 0x58f   :  { %5610 = vmatpush.bf16.msrb.mxu2 %v7467_v10  ;;  %v4994_v11 = vadd.f32 %v4993_v38, %v4981_v52  ;;  %v7547_v38 = vor.u32 %v8024_v58, %v7544_v46  ;;  %v7528_v52 = vld [vmem:[%s11692_s5 + $0x188] sm:$0xf0]  ;;  %v5201_v9 = vperm.slane %v5199_v35, 0  ;;  %v5202_v53 = vperm.slane %v5199_v35, 1  ;;  %v8044_v58 = vld [vmem:[%s11695_s7 + $0x40] sm:$0xff] }
 0x590   :  { %v7531_v7 = vor.u32 %v8020_v32, %v7528_v52 }
 0x591   :  { %5569 = vmatpush.bf16.msra.mxu3 %v7543_v26  ;;  %5779 = vmatpush.bf16.msra.mxu1 %v8050_v48 }
 0x593   :  { %v4995_v20 = vpop.f32.mrf.mxu1 }
 0x594   :  { %v4982_v45 = vpop.f32.mrf.mxu0 }
 0x595   :  { %v5006_v23 = vpop.f32.mrf.mxu2  ;;  %5570 = vmatpush.bf16.msra.mxu3 %v7535_v44  ;;  %5780 = vmatpush.bf16.msra.mxu1 %v8049_v61 }
 0x596   :  { %v5007_v29 = vadd.f32 %v5006_v23, %v4994_v11  ;;  %v5019_v0 = vpop.f32.mrf.mxu3 }
 0x598   :  { %v5020_v8 = vadd.f32 %v5019_v0, %v5007_v29 }
 0x599   :  { %5571 = vmatpush.bf16.msra.mxu3 %v7527_v62  ;;  %v8043_v62 = vld [vmem:[%s11695_s7 + $0x38] sm:$0xff] }
 0x59a   :  { %v5129_v42 = vmax.f32 %v5020_v8, 0.0  ;;  %5765 = vmatpush.bf16.msra.mxu0 %v8043_v62 }
 0x59c   :  { %v5133_v30 = vpack.c.bf16 %v5129_v42, %v5129_v42 }
 0x59d   :  { %v5008_v12 = vpop.f32.mrf.mxu2  ;;  %5616 = vmatpush.bf16.msrb.mxu3 %v7587_v14  ;;  %v8042_v14 = vld [vmem:[%s11695_s7 + $0x30] sm:$0xff] }
 0x59e   :  { %v5021_v17 = vpop.f32.mrf.mxu3  ;;  %5559 = vmatmul.bf16.vlgmr.msra.gmra.mxu2 %v5133_v30  ;;  %5766 = vmatpush.bf16.msra.mxu0 %v8042_v14 }
 0x5a1   :  { %5617 = vmatpush.bf16.msrb.mxu3 %v7579_v28 }
 0x5a2   :  { %5767 = vmatpush.bf16.msra.mxu0 %v8041_v24 }
 0x5a5   :  { %5618 = vmatpush.bf16.msrb.mxu3 %v7571_v15 }
 0x5a9   :  { %v5032_v39 = vpop.f32.mrf.mxu0  ;;  %5619 = vmatpush.bf16.msrb.mxu3 %v7563_v59  ;;  %v8048_v59 = vld [vmem:[%s11695_s7 + $0x60] sm:$0xff] }
 0x5aa   :  { %v5033_v40 = vadd.f32 %v5032_v39, %v3369_v2  ;;  %5781 = vmatpush.bf16.msra.mxu1 %v8048_v59 }
 0x5ab   :  { %v5045_v50 = vpop.f32.mrf.mxu1 }
 0x5ac   :  { %v5046_v1 = vadd.f32 %v5045_v50, %v5033_v40 }
 0x5ad   :  { %5620 = vmatpush.bf16.msrb.mxu3 %v7555_v60  ;;  %v8045_v60 = vld [vmem:[%s11695_s7 + $0x48] sm:$0xff] }
 0x5ae   :  { %5611 = vmatmul.bf16.vlgmr.msrb.gmra.mxu2 %v5133_v30  ;;  %5782 = vmatpush.bf16.msra.mxu1 %v8047_v13 }
 0x5b1   :  { %v5034_v34 = vpop.f32.mrf.mxu0  ;;  %5621 = vmatpush.bf16.msrb.mxu3 %v7547_v38 }
 0x5b2   :  { %v8040_v34 = vld [vmem:[%s11695_s7 + $0x20] sm:$0xff]  ;;  %5783 = vmatpush.bf16.msra.mxu1 %v8046_v37 }
 0x5b3   :  { %v5047_v55 = vpop.f32.mrf.mxu1  ;;  %5768 = vmatpush.bf16.msra.mxu0 %v8040_v34 }
 0x5b4   :  { %v8039_v55 = vld [vmem:[%s11695_s7 + $0x18] sm:$0xff] }
 0x5b5   :  { %v5058_v49 = vpop.f32.mrf.mxu2  ;;  %5622 = vmatpush.bf16.msrb.mxu3 %v7539_v22 }
 0x5b6   :  { %v5071_v57 = vpop.f32.mrf.mxu3  ;;  %v5059_v45 = vadd.f32 %v5058_v49, %v5046_v1  ;;  %5784 = vmatpush.bf16.msra.mxu1 %v8045_v60 }
 0x5b7   :  { %5769 = vmatpush.bf16.msra.mxu0 %v8039_v55 }
 0x5b8   :  { %v5072_v56 = vadd.f32 %v5071_v57, %v5059_v45  ;;  %v8037_v57 = vld [vmem:[%s11695_s7 + $0x8] sm:$0xff] }
 0x5b9   :  { %5623 = vmatpush.bf16.msrb.mxu3 %v7531_v7 }
 0x5ba   :  { %5785 = vmatpush.bf16.msra.mxu1 %v8044_v58 }
 0x5bb   :  { %5770 = vmatpush.bf16.msra.mxu0 %v8038_v5 }
 0x5bd   :  { %v5060_v41 = vpop.f32.mrf.mxu2 }
 0x5be   :  { %v5073_v10 = vpop.f32.mrf.mxu3 }
 0x5bf   :  { %5771 = vmatpush.bf16.msra.mxu0 %v8037_v57 }
 0x5c3   :  { %5772 = vmatpush.bf16.msra.mxu0 %v8036_v33 }
 0x5c9   :  { %v5084_v6 = vpop.f32.mrf.mxu0 }
 0x5ca   :  { %v5085_v27 = vadd.f32 %v5084_v6, %v5072_v56 }
 0x5cb   :  { %v5097_v20 = vpop.f32.mrf.mxu1 }
 0x5cc   :  { %v5098_v16 = vadd.f32 %v5097_v20, %v5085_v27  ;;  %v8053_v20 = vld [vmem:[%s11694_s8] ss:$0 sm:$0xff] }
 0x5d1   :  { %v5086_v11 = vpop.f32.mrf.mxu0 }
 0x5d3   :  { %v5099_v23 = vpop.f32.mrf.mxu1 }
 0x5d5   :  { %v5110_v18 = vpop.f32.mrf.mxu2 }
 0x5d6   :  { %v5111_v29 = vadd.f32 %v5110_v18, %v5098_v16  ;;  %v5123_v0 = vpop.f32.mrf.mxu3 }
 0x5d8   :  { %v5124_v36 = vadd.f32 %v5123_v0, %v5111_v29 }
 0x5da   :  { %v5130_v8 = vmax.f32 %v5124_v36, 0.0 }
 0x5dc   :  { %v5134_v42 = vpack.c.bf16 %v5130_v8, %v5130_v8 }
 0x5dd   :  { %v5112_v31 = vpop.f32.mrf.mxu2 }
 0x5de   :  { %v5125_v4 = vpop.f32.mrf.mxu3  ;;  %5572 = vmatmul.bf16.vlgmr.msra.gmra.mxu3 %v5134_v42 }
 0x5e9   :  { %v5534_v43 = vpop.f32.mrf.mxu0  ;;  %v5547_v12 = vpop.f32.mrf.mxu1 }
 0x5ea   :  { %v5535_v30 = vadd.f32 %v5534_v43, %v5201_v9 }
 0x5ec   :  { %v5548_v26 = vadd.f32 %v5547_v12, %v5535_v30 }
 0x5ee   :  { %5624 = vmatmul.bf16.vlgmr.msrb.gmra.mxu3 %v5134_v42 }
 0x5f1   :  { %v5536_v17 = vpop.f32.mrf.mxu0  ;;  %v5549_v63 = vpop.f32.mrf.mxu1 }
 0x609   :  { %v5586_v44 = vpop.f32.mrf.mxu0  ;;  %v5599_v51 = vpop.f32.mrf.mxu1 }
 0x60a   :  { %v5587_v39 = vadd.f32 %v5586_v44, %v5202_v53 }
 0x60c   :  { %v5600_v47 = vadd.f32 %v5599_v51, %v5587_v39 }
 0x611   :  { %v5588_v54 = vpop.f32.mrf.mxu0  ;;  %v5601_v50 = vpop.f32.mrf.mxu1 }
 0x621   :  { %v5560_v28 = vpop.f32.mrf.mxu2 }
 0x622   :  { %v5561_v46 = vadd.f32 %v5560_v28, %v5548_v26 }
 0x629   :  { %v5562_v25 = vpop.f32.mrf.mxu2 }
 0x631   :  { %v5612_v15 = vpop.f32.mrf.mxu2 }
 0x632   :  { %v5613_v21 = vadd.f32 %v5612_v15, %v5600_v47 }
 0x639   :  { %v5614_v49 = vpop.f32.mrf.mxu2 }
 0x661   :  { %v5573_v2 = vpop.f32.mrf.mxu3 }
 0x662   :  { %v5574_v41 = vadd.f32 %v5573_v2, %v5561_v46 }
 0x664   :  { %v5629_v38 = vmax.f32 %v5574_v41, 0.0 }
 0x666   :  { %v5631_v10 = vpack.c.bf16 %v5629_v38, %v5629_v38 }
 0x668   :  { %5773 = vmatmul.bf16.vlgmr.msra.gmra.mxu0 %v5631_v10 }
 0x669   :  { %v5575_v40 = vpop.f32.mrf.mxu3 }
 0x671   :  { %v5625_v3 = vpop.f32.mrf.mxu3 }
 0x672   :  { %v5626_v22 = vadd.f32 %v5625_v3, %v5613_v21 }
 0x674   :  { %v5630_v1 = vmax.f32 %v5626_v22, 0.0 }
 0x676   :  { %v5632_v6 = vpack.c.bf16 %v5630_v1, %v5630_v1 }
 0x678   :  { %5786 = vmatmul.bf16.vlgmr.msra.gmra.mxu1 %v5632_v6 }
 0x679   :  { %v5627_v32 = vpop.f32.mrf.mxu3 }
 0x6e5   :  { %v5774_v52 = vpop.f32.mrf.mxu0 }
 0x6e6   :  { %v5775_v7 = vadd.f32 %v8053_v20, %v5774_v52 }
 0x6ed   :  { %v5776_v45 = vpop.f32.mrf.mxu0 }
 0x6f5   :  { %v5787_v56 = vpop.f32.mrf.mxu1 }
 0x6f6   :  { %v5788_v27 = vadd.f32 %v5787_v56, %v5775_v7 }
 0x6f8   :  { %5791 = vst [vmem:[%s11696_s9] sm:$0x3] %v5788_v27 }
 0x6fd   :  { %v5789_v11 = vpop.f32.mrf.mxu1 }

</bundles_post_ra>
